<compile_context>
chip_gen: v7x
topology: tpu7x:2x2x1
jax: 0.10.0
libtpu: 0.0.40
codegen_flags: <defaults>
</compile_context>

<pallas_src>
import jax
import jax.numpy as jnp
from jax.experimental import pallas as pl
from jax.experimental.pallas import tpu as pltpu

H, W = 108, 28              # input spatial size implied by fc1 (32*53*13)
C_OUT = 32
HC, WC = H - 2, W - 2       # 106, 26  (valid 3x3 conv)
HP, WP = HC // 2, WC // 2   # 53, 13   (2x2 max pool)
FLAT = C_OUT * HP * WP      # 22048 (torch flatten size)
HID = 128
NCLS = 2

LANES = C_OUT * WC          # 832 : conv lane layout, column index = c*26 + j
POOL_C = C_OUT * WP         # 416 : pooled lane layout, column index = c*13 + p
POOL_CP = 512               # 416 padded up to a multiple of 128 (lane-dense stores)
K_PAD = HP * POOL_CP        # 27136 = 212*128 : flat fc1 input length per batch element
HID_SPLIT = 2               # hidden halves -> "parallel" grid axis (both v7x cores)
HID_H = HID // HID_SPLIT    # 64
NK = 2                      # K-tiles per hidden half
TK = K_PAD // NK            # 13568 (multiple of 128)


# ----------------------- kernel 1: conv(3x3) + bias + ReLU + maxpool 2x2 -----------------------
def conv_pool_kernel(x_ref, bmat_ref, brow_ref, r_ref, s_ref, o_ref):
    # x_ref:    (1, 108, 28) f32
    # bmat_ref: (3, 28, 832) f32   bmat[di, jj, c*26+j] = w_conv[c, 0, di, jj-j] (0<=jj-j<=2)
    # brow_ref: (1, 832)     f32   brow[c*26+j] = b_conv[c]
    # r_ref:    (53, 105)    f32   R[p, 2p] = 1        (even-row selection)
    # s_ref:    (831, 512)   bf16  S[c*26+2q, c*13+q]=1 (even-col selection + channel regroup)
    # o_ref:    (1, 53, 512) bf16  pooled, layout [r, c*13+p]; cols 416..511 are zero
    x = x_ref[0]                                                       # (108, 28)
    g0 = jnp.dot(x, bmat_ref[0], preferred_element_type=jnp.float32)   # (108, 832)
    g1 = jnp.dot(x, bmat_ref[1], preferred_element_type=jnp.float32)
    g2 = jnp.dot(x, bmat_ref[2], preferred_element_type=jnp.float32)
    conv = g0[0:HC, :] + g1[1:HC + 1, :] + g2[2:HC + 2, :]             # (106, 832) valid conv
    conv = jnp.maximum(conv + brow_ref[...], 0.0)                      # bias + ReLU
    rm = jnp.maximum(conv[0:HC - 1, :], conv[1:HC, :])                 # (105, 832) row-pair max
    rsel = jnp.dot(r_ref[...], rm, preferred_element_type=jnp.float32)  # (53, 832) even rows
    cm = jnp.maximum(rsel[:, 0:LANES - 1], rsel[:, 1:LANES])           # (53, 831) col-pair max
    pooled = jnp.dot(cm.astype(jnp.bfloat16), s_ref[...],
                     preferred_element_type=jnp.float32)               # (53, 512) even cols
    o_ref[0] = pooled.astype(jnp.bfloat16)


def conv_relu_pool(x_bhw, bmat, brow, R, S):
    B = x_bhw.shape[0]
    return pl.pallas_call(
        conv_pool_kernel,
        out_shape=jax.ShapeDtypeStruct((B, HP, POOL_CP), jnp.bfloat16),
        grid=(B,),
        in_specs=[
            pl.BlockSpec((1, H, W), lambda b: (b, 0, 0)),
            pl.BlockSpec((3, W, LANES), lambda b: (0, 0, 0)),
            pl.BlockSpec((1, LANES), lambda b: (0, 0)),
            pl.BlockSpec((HP, HC - 1), lambda b: (0, 0)),
            pl.BlockSpec((LANES - 1, POOL_CP), lambda b: (0, 0)),
        ],
        out_specs=pl.BlockSpec((1, HP, POOL_CP), lambda b: (b, 0, 0)),
        compiler_params=pltpu.CompilerParams(dimension_semantics=("parallel",)),
    )(x_bhw, bmat, brow, R, S)


# ------------------------------- kernel 2: fc1 -> ReLU -> fc2 ----------------------------------
def fc_kernel(x_ref, w1_ref, b1_ref, w2_ref, o_ref, acc_ref):
    # x_ref: (B, TK) bf16; w1_ref: (1, TK, 64) bf16; b1_ref: (1, 1, 64) f32
    # w2_ref: (1, 64, NCLS) f32; o_ref: (1, B, NCLS) f32 partial logits for this hidden half
    k = pl.program_id(1)

    @pl.when(k == 0)
    def _init():
        acc_ref[...] = jnp.zeros_like(acc_ref)

    acc_ref[...] += jnp.dot(x_ref[...], w1_ref[0], preferred_element_type=jnp.float32)

    @pl.when(k == pl.num_programs(1) - 1)
    def _finalize():
        h = jnp.maximum(acc_ref[...] + b1_ref[0], 0.0)                    # (B, 64)
        o_ref[0] = jnp.dot(h, w2_ref[0], preferred_element_type=jnp.float32)


def fc_forward(flat_bf16, w1s, b1s, w2s):
    B = flat_bf16.shape[0]
    return pl.pallas_call(
        fc_kernel,
        out_shape=jax.ShapeDtypeStruct((HID_SPLIT, B, NCLS), jnp.float32),
        grid=(HID_SPLIT, NK),
        in_specs=[
            pl.BlockSpec((B, TK), lambda h, k: (0, k)),
            pl.BlockSpec((1, TK, HID_H), lambda h, k: (h, k, 0)),
            pl.BlockSpec((1, 1, HID_H), lambda h, k: (h, 0, 0)),
            pl.BlockSpec((1, HID_H, NCLS), lambda h, k: (h, 0, 0)),
        ],
        out_specs=pl.BlockSpec((1, B, NCLS), lambda h, k: (h, 0, 0)),
        scratch_shapes=[pltpu.VMEM((B, HID_H), jnp.float32)],
        compiler_params=pltpu.CompilerParams(
            dimension_semantics=("parallel", "arbitrary")),
    )(flat_bf16, w1s, b1s, w2s)


# -------------------------- one-time parameter transforms (offline) ----------------------------
def prepare_params(w_conv, b_conv, w1, b1, w2):
    # Fold conv weights into 3 matmul operands: bmat[di, jj, c*26+j] = w_conv[c,0,di,jj-j].
    w = w_conv[:, 0]                                         # (32, 3, 3)  [c, di, dj]
    jj = jnp.arange(W)[:, None]                              # (28, 1)
    j = jnp.arange(WC)[None, :]                              # (1, 26)
    d = jj - j
    valid = ((d >= 0) & (d <= 2)).astype(jnp.float32)        # (28, 26)
    wt = w[:, :, jnp.clip(d, 0, 2)] * valid[None, None]      # (32, 3, 28, 26)
    bmat = jnp.transpose(wt, (1, 2, 0, 3)).reshape(3, W, LANES)
    brow = jnp.repeat(b_conv, WC)[None, :]                   # (1, 832): brow[c*26+j] = b[c]

    # 0/1 selection matrices for the stride-2 pooling, batched over all 32 channels.
    R = jnp.zeros((HP, HC - 1), jnp.float32).at[
        jnp.arange(HP), 2 * jnp.arange(HP)].set(1.0)          # (53, 105)
    cg, qg = jnp.meshgrid(jnp.arange(C_OUT), jnp.arange(WP), indexing="ij")
    S = jnp.zeros((LANES - 1, POOL_CP), jnp.bfloat16).at[
        (cg * WC + 2 * qg).ravel(), (cg * WP + qg).ravel()].set(1.0)   # (831, 512)

    # fc1 weights: permute rows from torch flatten order (c*689 + r*13 + p) to the kernel's
    # lane-dense order (r*512 + c*13 + p), zero-pad, split hidden dim for the parallel axis.
    w1p = w1.reshape(C_OUT, HP, WP, HID).transpose(1, 0, 2, 3).reshape(HP, POOL_C, HID)
    w1p = jnp.pad(w1p, ((0, 0), (0, POOL_CP - POOL_C), (0, 0))).reshape(K_PAD, HID)
    w1s = w1p.reshape(K_PAD, HID_SPLIT, HID_H).transpose(1, 0, 2).astype(jnp.bfloat16)
    b1s = b1.reshape(HID_SPLIT, 1, HID_H)
    w2s = w2.reshape(HID_SPLIT, HID_H, NCLS)
    return bmat, brow, R, S, w1s, b1s, w2s


@jax.jit
def forward(x_nchw, bmat, brow, R, S, w1s, b1s, w2s, b2):
    B = x_nchw.shape[0]
    pooled = conv_relu_pool(x_nchw[:, 0], bmat, brow, R, S)   # (B, 53, 512) bf16, lane-dense
    flat = pooled.reshape(B, K_PAD)                           # plain reshape; pad cols already 0
    part = fc_forward(flat, w1s, b1s, w2s)                    # (2, B, 2) partial logits
    return part.sum(axis=0) + b2[None, :]


# ---------------------------------------- pure-JAX reference -----------------------------------
def reference(x_nchw, w_conv, b_conv, w1, b1, w2, b2):
    conv = jax.lax.conv_general_dilated(
        x_nchw, w_conv, window_strides=(1, 1), padding="VALID",
        dimension_numbers=("NCHW", "OIHW", "NCHW"))
    conv = jnp.maximum(conv + b_conv[None, :, None, None], 0.0)
    pooled = jax.lax.reduce_window(conv, -jnp.inf, jax.lax.max,
                                   (1, 1, 2, 2), (1, 1, 2, 2), "VALID")
    flat = pooled.reshape(x_nchw.shape[0], -1)
    h = jnp.maximum(flat @ w1 + b1, 0.0)
    return h @ w2 + b2


if __name__ == "__main__":
    B = 2
    key = jax.random.PRNGKey(0)
    k_x, k_wc, k_bc, k_w1, k_b1, k_w2, k_b2 = jax.random.split(key, 7)

    # deterministic parameter init (PyTorch-style uniform bounds)
    x = jax.random.normal(k_x, (B, 1, H, W), jnp.float32)
    bc = 1.0 / 3.0                                    # 1/sqrt(fan_in=9)
    w_conv = jax.random.uniform(k_wc, (C_OUT, 1, 3, 3), jnp.float32, -bc, bc)
    b_conv = jax.random.uniform(k_bc, (C_OUT,), jnp.float32, -bc, bc)
    b1f = 1.0 / (FLAT ** 0.5)
    w1 = jax.random.uniform(k_w1, (FLAT, HID), jnp.float32, -b1f, b1f)
    b1 = jax.random.uniform(k_b1, (HID,), jnp.float32, -b1f, b1f)
    b2f = 1.0 / (HID ** 0.5)
    w2 = jax.random.uniform(k_w2, (HID, NCLS), jnp.float32, -b2f, b2f)
    b2 = jax.random.uniform(k_b2, (NCLS,), jnp.float32, -b2f, b2f)

    # --- forward pass ---
    bmat, brow, R, S, w1s, b1s, w2s = prepare_params(w_conv, b_conv, w1, b1, w2)
    logits = forward(x, bmat, brow, R, S, w1s, b1s, w2s, b2)
    logits = jax.block_until_ready(logits)

    ref = reference(x, w_conv, b_conv, w1, b1, w2, b2)
    assert logits.shape == (B, NCLS)
    err = float(jnp.max(jnp.abs(logits - ref)))
    assert err < 5e-2, f"mismatch vs reference: {err}"
    print("KERNEL_OK")
</pallas_src>

<mosaic_0001>
module attributes {stable_mosaic.version = 11 : i64} {
  func.func @conv_pool_kernel(%arg0: i32, %arg1: memref<1x108x28xf32, #tpu.memory_space<vmem>>, %arg2: memref<3x28x832xf32, #tpu.memory_space<vmem>>, %arg3: memref<1x832xf32, #tpu.memory_space<vmem>>, %arg4: memref<53x105xf32, #tpu.memory_space<vmem>>, %arg5: memref<831x512xbf16, #tpu.memory_space<vmem>>, %arg6: memref<1x53x512xbf16, #tpu.memory_space<vmem>>) attributes {dimension_semantics = [#tpu.dimension_semantics<parallel>], iteration_bounds = array<i64: 2>, scalar_prefetch = 0 : i64, scratch_operands = 0 : i64, tpu.core_type = #tpu.core_type<tc>, window_params = [{transform_indices = @transform_0, window_bounds = array<i64: 1, 108, 28>}, {pipeline_mode = #tpu.pipeline_mode<synchronous>, transform_indices = @transform_1, window_bounds = array<i64: 3, 28, 832>}, {pipeline_mode = #tpu.pipeline_mode<synchronous>, transform_indices = @transform_2, window_bounds = array<i64: 1, 832>}, {pipeline_mode = #tpu.pipeline_mode<synchronous>, transform_indices = @transform_3, window_bounds = array<i64: 53, 105>}, {pipeline_mode = #tpu.pipeline_mode<synchronous>, transform_indices = @transform_4, window_bounds = array<i64: 831, 512>}, {transform_indices = @transform_5, window_bounds = array<i64: 1, 53, 512>}]} {
    %c0 = arith.constant 0 : index
    %c0_0 = arith.constant 0 : index
    %c0_1 = arith.constant 0 : index
    %0 = vector.load %arg1[%c0, %c0_0, %c0_1] : memref<1x108x28xf32, #tpu.memory_space<vmem>>, vector<1x108x28xf32>
    %1 = vector.shape_cast %0 : vector<1x108x28xf32> to vector<108x28xf32>
    %c0_2 = arith.constant 0 : index
    %c0_3 = arith.constant 0 : index
    %c0_4 = arith.constant 0 : index
    %2 = vector.load %arg2[%c0_2, %c0_3, %c0_4] : memref<3x28x832xf32, #tpu.memory_space<vmem>>, vector<1x28x832xf32>
    %3 = vector.shape_cast %2 : vector<1x28x832xf32> to vector<28x832xf32>
    %cst = arith.constant dense<0.000000e+00> : vector<108x832xf32>
    %4 = tpu.matmul %1, %3, %cst {dimension_numbers = #tpu.dot_dimension_numbers<[1], [0], [0], [1], [0, 0, 1, 1], [], []>} : vector<108x28xf32>, vector<28x832xf32>, vector<108x832xf32> -> vector<108x832xf32>
    %c1 = arith.constant 1 : index
    %c0_5 = arith.constant 0 : index
    %c0_6 = arith.constant 0 : index
    %5 = vector.load %arg2[%c1, %c0_5, %c0_6] : memref<3x28x832xf32, #tpu.memory_space<vmem>>, vector<1x28x832xf32>
    %6 = vector.shape_cast %5 : vector<1x28x832xf32> to vector<28x832xf32>
    %cst_7 = arith.constant dense<0.000000e+00> : vector<108x832xf32>
    %7 = tpu.matmul %1, %6, %cst_7 {dimension_numbers = #tpu.dot_dimension_numbers<[1], [0], [0], [1], [0, 0, 1, 1], [], []>} : vector<108x28xf32>, vector<28x832xf32>, vector<108x832xf32> -> vector<108x832xf32>
    %c2 = arith.constant 2 : index
    %c0_8 = arith.constant 0 : index
    %c0_9 = arith.constant 0 : index
    %8 = vector.load %arg2[%c2, %c0_8, %c0_9] : memref<3x28x832xf32, #tpu.memory_space<vmem>>, vector<1x28x832xf32>
    %9 = vector.shape_cast %8 : vector<1x28x832xf32> to vector<28x832xf32>
    %cst_10 = arith.constant dense<0.000000e+00> : vector<108x832xf32>
    %10 = tpu.matmul %1, %9, %cst_10 {dimension_numbers = #tpu.dot_dimension_numbers<[1], [0], [0], [1], [0, 0, 1, 1], [], []>} : vector<108x28xf32>, vector<28x832xf32>, vector<108x832xf32> -> vector<108x832xf32>
    %11 = vector.extract_strided_slice %4 {offsets = [0, 0], sizes = [106, 832], strides = [1, 1]} : vector<108x832xf32> to vector<106x832xf32>
    %12 = vector.extract_strided_slice %7 {offsets = [1, 0], sizes = [106, 832], strides = [1, 1]} : vector<108x832xf32> to vector<106x832xf32>
    %13 = arith.addf %11, %12 : vector<106x832xf32>
    %14 = vector.extract_strided_slice %10 {offsets = [2, 0], sizes = [106, 832], strides = [1, 1]} : vector<108x832xf32> to vector<106x832xf32>
    %15 = arith.addf %13, %14 : vector<106x832xf32>
    %c0_11 = arith.constant 0 : index
    %c0_12 = arith.constant 0 : index
    %16 = vector.load %arg3[%c0_11, %c0_12] : memref<1x832xf32, #tpu.memory_space<vmem>>, vector<1x832xf32>
    %17 = vector.broadcast %16 : vector<1x832xf32> to vector<106x832xf32>
    %18 = arith.addf %15, %17 : vector<106x832xf32>
    %cst_13 = arith.constant 0.000000e+00 : f32
    %19 = vector.broadcast %cst_13 : f32 to vector<106x832xf32>
    %20 = arith.maximumf %18, %19 : vector<106x832xf32>
    %21 = vector.extract_strided_slice %20 {offsets = [0, 0], sizes = [105, 832], strides = [1, 1]} : vector<106x832xf32> to vector<105x832xf32>
    %22 = vector.extract_strided_slice %20 {offsets = [1, 0], sizes = [105, 832], strides = [1, 1]} : vector<106x832xf32> to vector<105x832xf32>
    %23 = arith.maximumf %21, %22 : vector<105x832xf32>
    %c0_14 = arith.constant 0 : index
    %c0_15 = arith.constant 0 : index
    %24 = vector.load %arg4[%c0_14, %c0_15] : memref<53x105xf32, #tpu.memory_space<vmem>>, vector<53x105xf32>
    %cst_16 = arith.constant dense<0.000000e+00> : vector<53x832xf32>
    %25 = tpu.matmul %24, %23, %cst_16 {dimension_numbers = #tpu.dot_dimension_numbers<[1], [0], [0], [1], [0, 0, 1, 1], [], []>} : vector<53x105xf32>, vector<105x832xf32>, vector<53x832xf32> -> vector<53x832xf32>
    %26 = vector.extract_strided_slice %25 {offsets = [0, 0], sizes = [53, 831], strides = [1, 1]} : vector<53x832xf32> to vector<53x831xf32>
    %27 = vector.extract_strided_slice %25 {offsets = [0, 1], sizes = [53, 831], strides = [1, 1]} : vector<53x832xf32> to vector<53x831xf32>
    %28 = arith.maximumf %26, %27 : vector<53x831xf32>
    %29 = arith.truncf %28 : vector<53x831xf32> to vector<53x831xbf16>
    %c0_17 = arith.constant 0 : index
    %c0_18 = arith.constant 0 : index
    %30 = vector.load %arg5[%c0_17, %c0_18] : memref<831x512xbf16, #tpu.memory_space<vmem>>, vector<831x512xbf16>
    %cst_19 = arith.constant dense<0.000000e+00> : vector<53x512xf32>
    %31 = tpu.matmul %29, %30, %cst_19 {dimension_numbers = #tpu.dot_dimension_numbers<[1], [0], [0], [1], [0, 0, 1, 1], [], []>} : vector<53x831xbf16>, vector<831x512xbf16>, vector<53x512xf32> -> vector<53x512xf32>
    %32 = arith.truncf %31 : vector<53x512xf32> to vector<53x512xbf16>
    %c0_20 = arith.constant 0 : index
    %c0_21 = arith.constant 0 : index
    %c0_22 = arith.constant 0 : index
    %33 = vector.load %arg6[%c0_20, %c0_21, %c0_22] : memref<1x53x512xbf16, #tpu.memory_space<vmem>>, vector<1x53x512xbf16>
    %34 = vector.shape_cast %33 : vector<1x53x512xbf16> to vector<53x512xbf16>
    %35 = vector.shape_cast %32 : vector<53x512xbf16> to vector<1x53x512xbf16>
    tpu.vector_store %arg6[%c0_20, %c0_21, %c0_22], %35 {strides = array<i32>} : memref<1x53x512xbf16, #tpu.memory_space<vmem>>, vector<1x53x512xbf16>,
    return
  }
  func.func @transform_0(%arg0: i32) -> (i32, i32, i32) {
    %c0_i32 = arith.constant 0 : i32
    %c0_i32_0 = arith.constant 0 : i32
    %c0_i32_1 = arith.constant 0 : i32
    return %arg0, %c0_i32, %c0_i32_0 : i32, i32, i32
  }
  func.func @transform_1(%arg0: i32) -> (i32, i32, i32) {
    %c0_i32 = arith.constant 0 : i32
    %c0_i32_0 = arith.constant 0 : i32
    %c0_i32_1 = arith.constant 0 : i32
    %c0_i32_2 = arith.constant 0 : i32
    return %c0_i32, %c0_i32_0, %c0_i32_1 : i32, i32, i32
  }
  func.func @transform_2(%arg0: i32) -> (i32, i32) {
    %c0_i32 = arith.constant 0 : i32
    %c0_i32_0 = arith.constant 0 : i32
    %c0_i32_1 = arith.constant 0 : i32
    return %c0_i32, %c0_i32_0 : i32, i32
  }
  func.func @transform_3(%arg0: i32) -> (i32, i32) {
    %c0_i32 = arith.constant 0 : i32
    %c0_i32_0 = arith.constant 0 : i32
    %c0_i32_1 = arith.constant 0 : i32
    return %c0_i32, %c0_i32_0 : i32, i32
  }
  func.func @transform_4(%arg0: i32) -> (i32, i32) {
    %c0_i32 = arith.constant 0 : i32
    %c0_i32_0 = arith.constant 0 : i32
    %c0_i32_1 = arith.constant 0 : i32
    return %c0_i32, %c0_i32_0 : i32, i32
  }
  func.func @transform_5(%arg0: i32) -> (i32, i32, i32) {
    %c0_i32 = arith.constant 0 : i32
    %c0_i32_0 = arith.constant 0 : i32
    %c0_i32_1 = arith.constant 0 : i32
    return %arg0, %c0_i32, %c0_i32_0 : i32, i32, i32
  }
}

module attributes {stable_mosaic.version = 11 : i64} {
  func.func @fc_kernel(%arg0: i32, %arg1: i32, %arg2: memref<2x13568xbf16, #tpu.memory_space<vmem>>, %arg3: memref<1x13568x64xbf16, #tpu.memory_space<vmem>>, %arg4: memref<1x1x64xf32, #tpu.memory_space<vmem>>, %arg5: memref<1x64x2xf32, #tpu.memory_space<vmem>>, %arg6: memref<1x2x2xf32, #tpu.memory_space<vmem>>, %arg7: memref<2x64xf32, #tpu.memory_space<vmem>>) attributes {dimension_semantics = [#tpu.dimension_semantics<parallel>, #tpu.dimension_semantics<arbitrary>], iteration_bounds = array<i64: 2, 2>, scalar_prefetch = 0 : i64, scratch_operands = 1 : i64, tpu.core_type = #tpu.core_type<tc>, window_params = [{transform_indices = @transform_0, window_bounds = array<i64: 2, 13568>}, {transform_indices = @transform_1, window_bounds = array<i64: 1, 13568, 64>}, {transform_indices = @transform_2, window_bounds = array<i64: 1, 1, 64>}, {transform_indices = @transform_3, window_bounds = array<i64: 1, 64, 2>}, {transform_indices = @transform_4, window_bounds = array<i64: 1, 2, 2>}]} {
    %c0_i32 = arith.constant 0 : i32
    %0 = arith.cmpi eq, %arg1, %c0_i32 : i32
    %1 = arith.extui %0 : i1 to i32
    %c0_i32_0 = arith.constant 0 : i32
    %2 = arith.cmpi ne, %1, %c0_i32_0 : i32
    scf.if %2 {
      %cst_10 = arith.constant 0.000000e+00 : f32
      %13 = vector.broadcast %cst_10 : f32 to vector<2x64xf32>
      %c0_11 = arith.constant 0 : index
      %c0_12 = arith.constant 0 : index
      %14 = vector.load %arg7[%c0_11, %c0_12] : memref<2x64xf32, #tpu.memory_space<vmem>>, vector<2x64xf32>
      tpu.vector_store %arg7[%c0_11, %c0_12], %13 {strides = array<i32>} : memref<2x64xf32, #tpu.memory_space<vmem>>, vector<2x64xf32>,
    } else {
    }
    %c0 = arith.constant 0 : index
    %c0_1 = arith.constant 0 : index
    %3 = vector.load %arg7[%c0, %c0_1] : memref<2x64xf32, #tpu.memory_space<vmem>>, vector<2x64xf32>
    %c0_2 = arith.constant 0 : index
    %c0_3 = arith.constant 0 : index
    %4 = vector.load %arg2[%c0_2, %c0_3] : memref<2x13568xbf16, #tpu.memory_space<vmem>>, vector<2x13568xbf16>
    %c0_4 = arith.constant 0 : index
    %c0_5 = arith.constant 0 : index
    %c0_6 = arith.constant 0 : index
    %5 = vector.load %arg3[%c0_4, %c0_5, %c0_6] : memref<1x13568x64xbf16, #tpu.memory_space<vmem>>, vector<1x13568x64xbf16>
    %6 = vector.shape_cast %5 : vector<1x13568x64xbf16> to vector<13568x64xbf16>
    %cst = arith.constant dense<0.000000e+00> : vector<2x64xf32>
    %7 = tpu.matmul %4, %6, %cst {dimension_numbers = #tpu.dot_dimension_numbers<[1], [0], [0], [1], [0, 0, 1, 1], [], []>} : vector<2x13568xbf16>, vector<13568x64xbf16>, vector<2x64xf32> -> vector<2x64xf32>
    %8 = arith.addf %3, %7 : vector<2x64xf32>
    %c0_7 = arith.constant 0 : index
    %c0_8 = arith.constant 0 : index
    %9 = vector.load %arg7[%c0_7, %c0_8] : memref<2x64xf32, #tpu.memory_space<vmem>>, vector<2x64xf32>
    tpu.vector_store %arg7[%c0_7, %c0_8], %8 {strides = array<i32>} : memref<2x64xf32, #tpu.memory_space<vmem>>, vector<2x64xf32>,
    %c1_i32 = arith.constant 1 : i32
    %10 = arith.cmpi eq, %arg1, %c1_i32 : i32
    %11 = arith.extui %10 : i1 to i32
    %c0_i32_9 = arith.constant 0 : i32
    %12 = arith.cmpi ne, %11, %c0_i32_9 : i32
    scf.if %12 {
      %c0_10 = arith.constant 0 : index
      %c0_11 = arith.constant 0 : index
      %13 = vector.load %arg7[%c0_10, %c0_11] : memref<2x64xf32, #tpu.memory_space<vmem>>, vector<2x64xf32>
      %c0_12 = arith.constant 0 : index
      %c0_13 = arith.constant 0 : index
      %c0_14 = arith.constant 0 : index
      %14 = vector.load %arg4[%c0_12, %c0_13, %c0_14] : memref<1x1x64xf32, #tpu.memory_space<vmem>>, vector<1x1x64xf32>
      %15 = vector.shape_cast %14 : vector<1x1x64xf32> to vector<1x64xf32>
      %16 = vector.broadcast %15 : vector<1x64xf32> to vector<2x64xf32>
      %17 = arith.addf %13, %16 : vector<2x64xf32>
      %cst_15 = arith.constant 0.000000e+00 : f32
      %18 = vector.broadcast %cst_15 : f32 to vector<2x64xf32>
      %19 = arith.maximumf %17, %18 : vector<2x64xf32>
      %c0_16 = arith.constant 0 : index
      %c0_17 = arith.constant 0 : index
      %c0_18 = arith.constant 0 : index
      %20 = vector.load %arg5[%c0_16, %c0_17, %c0_18] : memref<1x64x2xf32, #tpu.memory_space<vmem>>, vector<1x64x2xf32>
      %21 = vector.shape_cast %20 : vector<1x64x2xf32> to vector<64x2xf32>
      %cst_19 = arith.constant dense<0.000000e+00> : vector<2x2xf32>
      %22 = tpu.matmul %19, %21, %cst_19 {dimension_numbers = #tpu.dot_dimension_numbers<[1], [0], [0], [1], [0, 0, 1, 1], [], []>} : vector<2x64xf32>, vector<64x2xf32>, vector<2x2xf32> -> vector<2x2xf32>
      %c0_20 = arith.constant 0 : index
      %c0_21 = arith.constant 0 : index
      %c0_22 = arith.constant 0 : index
      %23 = vector.load %arg6[%c0_20, %c0_21, %c0_22] : memref<1x2x2xf32, #tpu.memory_space<vmem>>, vector<1x2x2xf32>
      %24 = vector.shape_cast %23 : vector<1x2x2xf32> to vector<2x2xf32>
      %25 = vector.shape_cast %22 : vector<2x2xf32> to vector<1x2x2xf32>
      tpu.vector_store %arg6[%c0_20, %c0_21, %c0_22], %25 {strides = array<i32>} : memref<1x2x2xf32, #tpu.memory_space<vmem>>, vector<1x2x2xf32>,
    } else {
    }
    return
  }
  func.func @transform_0(%arg0: i32, %arg1: i32) -> (i32, i32) {
    %c0_i32 = arith.constant 0 : i32
    %c0_i32_0 = arith.constant 0 : i32
    return %c0_i32, %arg1 : i32, i32
  }
  func.func @transform_1(%arg0: i32, %arg1: i32) -> (i32, i32, i32) {
    %c0_i32 = arith.constant 0 : i32
    %c0_i32_0 = arith.constant 0 : i32
    return %arg0, %arg1, %c0_i32 : i32, i32, i32
  }
  func.func @transform_2(%arg0: i32, %arg1: i32) -> (i32, i32, i32) {
    %c0_i32 = arith.constant 0 : i32
    %c0_i32_0 = arith.constant 0 : i32
    %c0_i32_1 = arith.constant 0 : i32
    return %arg0, %c0_i32, %c0_i32_0 : i32, i32, i32
  }
  func.func @transform_3(%arg0: i32, %arg1: i32) -> (i32, i32, i32) {
    %c0_i32 = arith.constant 0 : i32
    %c0_i32_0 = arith.constant 0 : i32
    %c0_i32_1 = arith.constant 0 : i32
    return %arg0, %c0_i32, %c0_i32_0 : i32, i32, i32
  }
  func.func @transform_4(%arg0: i32, %arg1: i32) -> (i32, i32, i32) {
    %c0_i32 = arith.constant 0 : i32
    %c0_i32_0 = arith.constant 0 : i32
    %c0_i32_1 = arith.constant 0 : i32
    return %arg0, %c0_i32, %c0_i32_0 : i32, i32, i32
  }
}

</mosaic_0001>

<bundles_post_ra>
// kernel: forward.2
= control target key start
LH: loop header
LB: loop body
LE: loop exit
PB: predicated region body
PF: predicated region fallthrough
CT: control target
= control target key end

     0   :  { %10 = vsyncpa [#allocation3], 0  ;;  %s12010_s0 = inlined_call_operand.vmem [shape: f32[2,108,28], index: 0, kind: input, shape index: {}]   ;;  %s12011_s1 = inlined_call_operand.hbm [shape: f32[3,28,832], index: 1, kind: input, shape index: {}]   ;;  %s12012_s2 = inlined_call_operand.hbm [shape: f32[1,832], index: 2, kind: input, shape index: {}]   ;;  %s12013_s3 = inlined_call_operand.hbm [shape: f32[53,105], index: 3, kind: input, shape index: {}]   ;;  %s12014_s4 = inlined_call_operand.hbm [shape: bf16[831,512], index: 4, kind: input, shape index: {}]   ;;  %s12015_s5 = inlined_call_operand.vmem [shape: bf16[2,53,512], index: 5, kind: output, shape index: {}]  }
   0x1   :  { %11 = vsyncpa [#allocation5], 0 }
   0x2   :  { %12 = vsyncpa [#allocation8], 0  ;;  %s8474_s18 = smov 0  }
   0x3 LB: > { %s8427_s19 = smov [#allocation4]   ;;  %s8480_s21 = sadd.s32 4294967295, %s8425_s18   ;;  %s8425_s18 = sphi %s8474_s18, %s18_s18  }
   0x4   : > { %s185_s20 = sshll.u32 %s8427_s19, 4  ;;  %p6759_p0 = scmp.ge.s32.totalorder %s8425_s18, 1  ;;  %s186_s20 = int_to_ptr.vmem [resolvable:$true] %s185_s20 }
   0x5   : > { %p159_p1 = scmp.lt.s32.totalorder %s8425_s18, 3  ;;  %p12016_p2 = scmp.eq.s32.totalorder %s8480_s21, 0 }
   0x6   : > { %s8428_s23 = smov [#allocation2]   ;;  %s8429_s26 = smov [#allocation6]  }
   0x7   : > { %p8485_p3 = pnand %p6759_p0, %p159_p1  ;;  %s171_s24 = sshll.u32 %s8428_s23, 4  ;;  %s8491_s24 = int_to_ptr.vmem [resolvable:$true] %s171_s24 }
   0x8   : > { %s195_s27 = sshll.u32 %s8429_s26, 4  ;;  %s8295_s30 = scalar_lea.hbm %s12012_s2, 112  ;;  %s8499_s27 = int_to_ptr.vmem [resolvable:$true] %s195_s27 }
   0x9   : > { %s12134_s22 = scalar_select %p8485_p3, 1, 0 }
   0xa   : > { %p7802_p4 = pneg %p8485_p3  ;;  %p8296_p6 = scmp.ne.s32.totalorder %s12012_s2, %s8295_s30 }
   0xb   : > { %p8302_p10 = scmp.lt.u32.totalorder %s8295_s30, %s12012_s2 }
   0xc   : > { %p8495_p5 = pnand %p12016_p2, %p7802_p4 }
   0xe   : > { %p8509_p7 = pneg %p8495_p5 }
  0x10   : > { %p8298_p8 = pnand %p8509_p7, %p8296_p6 }
  0x12   : > { %p8299_p9 = pneg %p8298_p8 }
  0x14   : > { %p8304_p11 = pnand %p8302_p10, %p8299_p9 }
  0x16   : > { %8307 = shalt.err (!%p8304_p11)
}
  0x17   : > { %s8308_s11 = scalar_lea.vmem %s186_s20, 112  ;;  %s8315_s12 = scalar_lea.vmem %s186_s20, 128 }
  0x18   : > { %p8309_p12 = scmp.ne.s32.totalorder %s186_s20, %s8308_s11  ;;  %p8316_p1 = scmp.lt.s32.totalorder %s186_s20, %s186_s20 }
  0x19   : > { %p8317_p4 = scmp.lt.s32.totalorder %s8315_s12, %s8308_s11 }
  0x1a   : > { %p8311_p13 = pnand %p8309_p12, %p8509_p7 }
  0x1b   : > { %p8318_p2 = por %p8317_p4, %p8316_p1 }
  0x1c   : > { %p8312_p0 = pneg %p8311_p13 }
  0x1e   : > { %p8319_p3 = pnand %p8318_p2, %p8312_p0 }
  0x20   : > { %8322 = shalt.err (!%p8319_p3)
}
  0x21   : > { %7808 = dma.hbm_to_vmem [thread:$0]  (!%p8495_p5), %s12012_s2, 112, %s186_s20, [#allocation5]  }
  0x22   : > { %s8323_s17 = scalar_lea.hbm %s12011_s1, 10752 }
  0x23   : > { %p8324_p6 = scmp.ne.s32.totalorder %s12011_s1, %s8323_s17  ;;  %p8330_p2 = scmp.lt.u32.totalorder %s8323_s17, %s12011_s1 }
  0x25   : > { %p8326_p8 = pnand %p8324_p6, %p8509_p7 }
  0x27   : > { %p8327_p9 = pneg %p8326_p8 }
  0x29   : > { %p8332_p3 = pnand %p8330_p2, %p8327_p9 }
  0x2b   : > { %8335 = shalt.err (!%p8332_p3)
}
  0x2c   : > { %s8336_s20 = scalar_lea.vmem %s8491_s24, 10752  ;;  %p8344_p13 = scmp.lt.s32.totalorder %s8491_s24, %s8491_s24 }
  0x2d   : > { %p8337_p10 = scmp.ne.s32.totalorder %s8491_s24, %s8336_s20  ;;  %p8345_p0 = scmp.lt.s32.totalorder %s8336_s20, %s8336_s20 }
  0x2f   : > { %p8339_p11 = pnand %p8337_p10, %p8509_p7  ;;  %p8346_p1 = por %p8345_p0, %p8344_p13 }
  0x31   : > { %p8340_p12 = pneg %p8339_p11 }
  0x33   : > { %p8347_p4 = pnand %p8346_p1, %p8340_p12 }
  0x35   : > { %8350 = shalt.err (!%p8347_p4)
}
  0x36   : > { %s8430_s29 = smov 896   ;;  %s8431_s30 = smov 56  }
  0x37   : > { %7805 = dma.hbm_to_vmem [thread:$0]  (!%p8495_p5), %s12011_s1, 10752, %s8491_s24, [#allocation3], %s8430_s29, %s8430_s29, %s8431_s30  }
  0x38   : > { %s8351_s11 = scalar_lea.hbm %s12013_s3, 896 }
  0x39   : > { %p8352_p6 = scmp.ne.s32.totalorder %s12013_s3, %s8351_s11  ;;  %p8358_p2 = scmp.lt.u32.totalorder %s8351_s11, %s12013_s3 }
  0x3b   : > { %p8354_p8 = pnand %p8352_p6, %p8509_p7 }
  0x3d   : > { %p8355_p9 = pneg %p8354_p8 }
  0x3f   : > { %p8360_p3 = pnand %p8358_p2, %p8355_p9 }
  0x41   : > { %8363 = shalt.err (!%p8360_p3)
}
  0x42   : > { %s8364_s24 = scalar_lea.vmem %s8499_s27, 896  ;;  %p8372_p13 = scmp.lt.s32.totalorder %s8499_s27, %s8499_s27 }
  0x43   : > { %p8365_p10 = scmp.ne.s32.totalorder %s8499_s27, %s8364_s24  ;;  %p8373_p0 = scmp.lt.s32.totalorder %s8364_s24, %s8364_s24 }
  0x45   : > { %p8367_p11 = pnand %p8365_p10, %p8509_p7  ;;  %p8374_p1 = por %p8373_p0, %p8372_p13 }
  0x47   : > { %p8368_p12 = pneg %p8367_p11 }
  0x49   : > { %p8375_p4 = pnand %p8374_p1, %p8368_p12 }
  0x4b   : > { %8378 = shalt.err (!%p8375_p4)
}
  0x4c   : > { %s8432_s16 = smov 128   ;;  %s8433_s17 = smov 8  }
  0x4d   : > { %7811 = dma.hbm_to_vmem [thread:$0]  (!%p8495_p5), %s12013_s3, 896, %s8499_s27, [#allocation5], %s8432_s16, %s8432_s16, %s8433_s17  }
  0x4e   : > { %s8434_s26 = smov [#allocation7]   ;;  %s8379_s30 = scalar_lea.hbm %s12014_s4, 26624 }
  0x4f   : > { %s208_s28 = sshll.u32 %s8434_s26, 4  ;;  %p8380_p6 = scmp.ne.s32.totalorder %s12014_s4, %s8379_s30  ;;  %s209_s28 = int_to_ptr.vmem [resolvable:$true] %s208_s28 }
  0x50   : > { %p8386_p2 = scmp.lt.u32.totalorder %s8379_s30, %s12014_s4 }
  0x51   : > { %p8382_p8 = pnand %p8380_p6, %p8509_p7 }
  0x53   : > { %p8383_p9 = pneg %p8382_p8 }
  0x55   : > { %p8388_p3 = pnand %p8386_p2, %p8383_p9 }
  0x57   : > { %8391 = shalt.err (!%p8388_p3)
}
  0x58   : > { %s8392_s27 = scalar_lea.vmem %s209_s28, 26624  ;;  %p8400_p13 = scmp.lt.s32.totalorder %s209_s28, %s209_s28 }
  0x59   : > { %p8393_p10 = scmp.ne.s32.totalorder %s209_s28, %s8392_s27  ;;  %p8401_p0 = scmp.lt.s32.totalorder %s8392_s27, %s8392_s27 }
  0x5b   : > { %p8395_p11 = pnand %p8393_p10, %p8509_p7  ;;  %p8402_p1 = por %p8401_p0, %p8400_p13 }
  0x5d   : > { %p8396_p12 = pneg %p8395_p11 }
  0x5f   : > { %p8403_p4 = pnand %p8402_p1, %p8396_p12 }
  0x61   : > { %8406 = shalt.err (!%p8403_p4)
}
  0x62   : > { %s8435_s11 = smov 256   ;;  %s8436_s12 = smov 16  }
  0x63   : > { %7814 = dma.hbm_to_vmem [thread:$0]  (!%p8495_p5), %s12014_s4, 26624, %s209_s28, [#allocation8], %s8435_s11, %s8435_s11, %s8436_s12  }
  0x64   : > { %p12137_p6 = scmp.ne.s32.totalorder %s12134_s22, 0 }
  0x66   : > { %232 = sbr.rel (%p12137_p6) target bundleno = 1475 (0x5c3), region = 40 }
  0x6d   : > { %p12138_p8 = scmp.eq.s32.totalorder %s8480_s21, 0 }
  0x6f   : > { %8412 = dma.done.wait (%p12138_p8), [#allocation3], 10752   ;;  %p12139_p7 = pmov %p12138_p8 }
  0x71   : > { %8414 = vsyncadd (%p12139_p7), [#allocation3], 4294956544  ;;  %p12140_p9 = pmov %p12139_p7 }
  0x72   : > { %p12141_p2 = pmov %p12139_p7 }
  0x73   : > { %8416 = dma.done.wait (%p12140_p9), [#allocation5], 1008  }
  0x74   : > { %8418 = vsyncadd (%p12141_p2), [#allocation5], 4294966288  ;;  %p12142_p3 = pmov %p12141_p2 }
  0x75   : > { %p12143_p5 = pmov %p12141_p2 }
  0x76   : > { %8420 = dma.done.wait (%p12142_p3), [#allocation8], 26624  }
  0x77   : > { %8422 = vsyncadd (%p12143_p5), [#allocation8], 4294940672  ;;  %p272_p10 = scmp.lt.s32.totalorder %s8480_s21, 1  ;;  %v12018_v0 = vmov 0.0   ;;  %vm368_vm0 = vcmask 1043456   ;;  %v298_v1 = vld [vmem:[#allocation2 + $0x8] sm:$0xff] }
  0x78   : > { %454 = vmatprep.mubr.f32.mxu0 %v12018_v0  ;;  %520 = vmatprep.mubr.f32.mxu1 %v12018_v0  ;;  %v305_v2 = vld [vmem:[#allocation2 + $0x40] sm:$0xff]  ;;  %v304_v5 = vld [vmem:[#allocation2 + $0x38] sm:$0xff]  ;;  %v319_v7 = vld [vmem:[#allocation2 + $0xb0] sm:$0xf]  ;;  %vm8438_vm1 = vmmov 1   ;;  %vm325_vm3 = vcmask 228352  }
  0x79   : > { %s12695_s21 = smov (!%p272_p10, %s8480_s21), 1  ;;  %v297_v3 = vld [vmem:[#allocation2] sm:$0xff]  ;;  %v7453_v4 = vpack.c.bf16 %v305_v2, %v298_v1  ;;  %v312_v6 = vld [vmem:[#allocation2 + $0x78] sm:$0xff]  ;;  %vm8611_vm2 = vmpackc.low %vm368_vm0, %vm8438_vm1  ;;  %vm2334_vm4 = vcmask 1046528   ;;  %vm2818_vm5 = vcmask 1045504   ;;  %vm3949_vm6 = vcmask 1040384  }
  0x7a   : > { %s7785_s22 = smul.u32 112, %s12695_s21  ;;  %v7455_v8 = vpack.c.bf16 %v304_v5, %v297_v3  ;;  %v7457_v9 = vpack.c.bf16 %v319_v7, %v312_v6  ;;  %v311_v11 = vld [vmem:[#allocation2 + $0x70] sm:$0xff]  ;;  %v318_v12 = vld [vmem:[#allocation2 + $0xa8] sm:$0xf]  ;;  %v300_v14 = vld [vmem:[#allocation2 + $0x18] sm:$0xff]  ;;  %vm3927_vm8 = vcmask 859136  }
  0x7b   : > { %7454 = vmatprep.subr.bf16.mxu0 %v7453_v4  ;;  %7685 = vmatprep.subr.bf16.mxu1 %v7453_v4  ;;  %v7460_v13 = vpack.c.bf16 %v318_v12, %v311_v11  ;;  %v307_v15 = vld [vmem:[#allocation2 + $0x50] sm:$0xff]  ;;  %v306_v18 = vld [vmem:[#allocation2 + $0x48] sm:$0xff]  ;;  %v321_v20 = vld [vmem:[#allocation2 + $0xc0] sm:$0xf]  ;;  %vm8440_vm9 = vmmov 0   ;;  %s8441_s24 = smov 127  }
  0x7c   : > { %7456 = vmatpush1.bf16.msra.mxu0 %v7455_v8  ;;  %7687 = vmatpush1.bf16.msra.mxu1 %v7455_v8  ;;  %s8624_s15 = scalar_lea.vmem %s12010_s0, %s7785_s22  ;;  %v7463_v16 = vpack.c.bf16 %v307_v15, %v300_v14  ;;  %v299_v17 = vld [vmem:[#allocation2 + $0x10] sm:$0xff]  ;;  %v314_v19 = vld [vmem:[#allocation2 + $0x88] sm:$0xff]  ;;  %v313_v24 = vld [vmem:[#allocation2 + $0x80] sm:$0xff]  ;;  %vm4539_vm10 = vcmask 1039360   ;;  %vm5965_vm11 = vcmask 1047552   ;;  %vm5952_vm12 = vcmask 515072   ;;  %s11977_s19 = scalar_lea.vmem %s12015_s5, %s7785_s22 }
  0x7d   : > { %7459 = vmatprep.subr.msk.bf16.mxu0 %vm8611_vm2, %v7457_v9  ;;  %7686 = vmatprep.subr.msk.bf16.mxu1 %vm8611_vm2, %v7457_v9  ;;  %v8631_v21 = vld [vmem:[%s8624_s15] sm:$0xff]  ;;  %v8634_v22 = vld [vmem:[%s8624_s15 + $0x58] sm:$0xff]  ;;  %v7465_v23 = vpack.c.bf16 %v306_v18, %v299_v17  ;;  %v302_v25 = vld [vmem:[#allocation2 + $0x28] sm:$0xff]  ;;  %v7467_v28 = vpack.c.bf16 %v321_v20, %v314_v19  ;;  %vm6648_vm13 = vcmask 1042432   ;;  %vm6649_vm14 = vsmask.f32 2304 }
  0x7e   : > { %v8637_v26 = vld [vmem:[%s8624_s15 + $0x8] sm:$0xff]  ;;  %v8640_v27 = vld [vmem:[%s8624_s15 + $0x60] sm:$0xff]  ;;  %v320_v29 = vld [vmem:[#allocation2 + $0xb8] sm:$0xf]  ;;  %vm6651_vm15 = vcmask 1046532  }
  0x7f   : > { %v309_v30 = vld [vmem:[#allocation2 + $0x60] sm:$0xff]  ;;  %v303_v32 = vld [vmem:[#allocation2 + $0x30] sm:$0xff]  ;;  %v310_v33 = vld [vmem:[#allocation2 + $0x68] sm:$0xff]  ;;  %v7470_v40 = vpack.c.bf16 %v320_v29, %v313_v24  ;;  %vm6652_vm0 = vsmask.f32 6400 }
  0x80   : > { %7462 = vmatpush1.bf16.msk.msra.mxu0 %vm8611_vm2, %v7460_v13  ;;  %7688 = vmatpush1.bf16.msk.msra.mxu1 %vm8611_vm2, %v7460_v13  ;;  %v301_v31 = vld [vmem:[#allocation2 + $0x20] sm:$0xff]  ;;  %v7473_v34 = vpack.c.bf16 %v309_v30, %v302_v25  ;;  %v308_v35 = vld [vmem:[#allocation2 + $0x58] sm:$0xff]  ;;  %v323_v38 = vld [vmem:[#allocation2 + $0xd0] sm:$0xf]  ;;  %v7483_v43 = vpack.c.bf16 %v310_v33, %v303_v32 }
  0x81   : > { %7464 = vmatprep.subr.bf16.mxu1 %v7463_v16  ;;  %v7475_v36 = vpack.c.bf16 %v308_v35, %v301_v31  ;;  %v316_v37 = vld [vmem:[#allocation2 + $0x98] sm:$0xff]  ;;  %v315_v39 = vld [vmem:[#allocation2 + $0x90] sm:$0xff]  ;;  %v322_v42 = vld [vmem:[#allocation2 + $0xc8] sm:$0xf] }
  0x82   : > { %7474 = vmatprep.subr.bf16.mxu0 %v7473_v34  ;;  %v7477_v41 = vpack.c.bf16 %v323_v38, %v316_v37  ;;  %v7480_v44 = vpack.c.bf16 %v322_v42, %v315_v39  ;;  %v976_v45 = vld [vmem:[#allocation2 + $0xf8] sm:$0xff]  ;;  %v983_v46 = vld [vmem:[#allocation2 + $0x130] sm:$0xff]  ;;  %v8660_v48 = vld [vmem:[%s8624_s15 + $0x68] sm:$0xf] }
  0x83   : > { %6774 = vmatmul.mubr.msk.f32.vlgmr.msra.gmra.mrb[0].mxu0 %vm325_vm3, %v8631_v21  ;;  %6785 = vmatmul.mubr.msk.f32.vlgmr.msra.gmra.mrb[0].mxu1 %vm325_vm3, %v8634_v22  ;;  %v8657_v47 = vld [vmem:[%s8624_s15 + $0x10] sm:$0xff]  ;;  %v7503_v49 = vpack.c.bf16 %v983_v46, %v976_v45  ;;  %v317_v50 = vld [vmem:[#allocation2 + $0xa0] sm:$0xff]  ;;  %v324_v51 = vld [vmem:[#allocation2 + $0xd8] sm:$0xf] }
  0x84   : > { %460 = vmatprep.mubr.f32.mxu0 %v12018_v0  ;;  %526 = vmatprep.mubr.f32.mxu1 %v12018_v0  ;;  %v8675_v52 = vld [vmem:[%s8624_s15 + $0x18] sm:$0xff]  ;;  %v8678_v53 = vld [vmem:[%s8624_s15 + $0x20] sm:$0xff]  ;;  %v7487_v54 = vpack.c.bf16 %v324_v51, %v317_v50  ;;  %v974_v55 = vld [vmem:[#allocation2 + $0xe8] sm:$0xff] }
  0x85   : > { %7466 = vmatpush1.bf16.msra.mxu1 %v7465_v23  ;;  %7476 = vmatpush1.bf16.msra.mxu0 %v7475_v36  ;;  %v981_v56 = vld [vmem:[#allocation2 + $0x120] sm:$0xff]  ;;  %v8687_v57 = vld [vmem:[%s8624_s15 + $0x28] sm:$0xff]  ;;  %v8706_v59 = vld [vmem:[%s8624_s15 + $0x30] sm:$0xff] }
  0x86   : > { %7469 = vmatprep.subr.msk.bf16.mxu1 %vm8611_vm2, %v7467_v28  ;;  %7479 = vmatprep.subr.msk.bf16.mxu0 %vm8611_vm2, %v7477_v41  ;;  %v7493_v58 = vpack.c.bf16 %v981_v56, %v974_v55  ;;  %v8709_v60 = vld [vmem:[%s8624_s15 + $0x38] sm:$0xff]  ;;  %v8718_v61 = vld [vmem:[%s8624_s15 + $0x40] sm:$0xff]  ;;  %v8733_v62 = vld [vmem:[%s8624_s15 + $0x48] sm:$0xff] }
  0x87   : > { %6775 = vmatmul.mubr.msk.f32.gmra.mrb[2].mxu0 %vm325_vm3, %v8637_v26  ;;  %6786 = vmatmul.mubr.msk.f32.gmra.mrb[2].mxu1 %vm325_vm3, %v8640_v27  ;;  %v8736_v63 = vld [vmem:[%s8624_s15 + $0x50] sm:$0xff]  ;;  %v982_v2 = vld [vmem:[#allocation2 + $0x128] sm:$0xff]  ;;  %v997_v4 = vld [vmem:[#allocation2 + $0x1a0] sm:$0xf] }
  0x88   : > { %466 = vmatprep.mubr.f32.mxu0 %v12018_v0  ;;  %532 = vmatprep.mubr.f32.mxu1 %v12018_v0  ;;  %v975_v1 = vld [vmem:[#allocation2 + $0xf0] sm:$0xff]  ;;  %v990_v3 = vld [vmem:[#allocation2 + $0x168] sm:$0xff]  ;;  %v989_v5 = vld [vmem:[#allocation2 + $0x160] sm:$0xff] }
  0x89   : > { %7472 = vmatpush1.bf16.msk.msra.mxu1 %vm8611_vm2, %v7470_v40  ;;  %7482 = vmatpush1.bf16.msk.msra.mxu0 %vm8611_vm2, %v7480_v44  ;;  %v996_v6 = vld [vmem:[#allocation2 + $0x198] sm:$0xf]  ;;  %v7505_v7 = vpack.c.bf16 %v982_v2, %v975_v1  ;;  %v979_v8 = vld [vmem:[#allocation2 + $0x110] sm:$0xff]  ;;  %v986_v9 = vld [vmem:[#allocation2 + $0x148] sm:$0xff]  ;;  %v7507_v11 = vpack.c.bf16 %v997_v4, %v990_v3 }
  0x8a   : > { %7484 = vmatprep.subr.bf16.mxu1 %v7483_v43  ;;  %7504 = vmatprep.subr.bf16.mxu0 %v7503_v49  ;;  %v7510_v12 = vpack.c.bf16 %v996_v6, %v989_v5  ;;  %v8758_v13 = vpack.c.bf16 %v986_v9, %v979_v8  ;;  %v973_v14 = vld [vmem:[#allocation2 + $0xe0] sm:$0xff]  ;;  %v980_v15 = vld [vmem:[#allocation2 + $0x118] sm:$0xff]  ;;  %v995_v17 = vld [vmem:[#allocation2 + $0x190] sm:$0xf] }
  0x8b   : > { %6776 = vmatmul.mubr.msk.f32.gmra.mrb[4].mxu0 %vm325_vm3, %v8657_v47  ;;  %6787 = vmatmul.mubr.msk.f32.gmra.mrb[4].mxu1 %vm325_vm3, %v8660_v48  ;;  %v988_v16 = vld [vmem:[#allocation2 + $0x158] sm:$0xff]  ;;  %v987_v18 = vld [vmem:[#allocation2 + $0x150] sm:$0xff]  ;;  %v994_v19 = vld [vmem:[#allocation2 + $0x188] sm:$0xf]  ;;  %v7495_v20 = vpack.c.bf16 %v980_v15, %v973_v14 }
  0x8c   : > { %472 = vmatprep.mubr.f32.mxu0 %v12018_v0  ;;  %603 = vmatprep.mubr.f32.mxu1 %v12018_v0  ;;  %v978_v23 = vld [vmem:[#allocation2 + $0x108] sm:$0xff]  ;;  %v985_v24 = vld [vmem:[#allocation2 + $0x140] sm:$0xff]  ;;  %v7497_v25 = vpack.c.bf16 %v995_v17, %v988_v16  ;;  %v7500_v28 = vpack.c.bf16 %v994_v19, %v987_v18  ;;  %v984_v31 = vld [vmem:[#allocation2 + $0x138] sm:$0xff] }
  0x8d   : > { %v7513_v29 = vpack.c.bf16 %v985_v24, %v978_v23  ;;  %v977_v30 = vld [vmem:[#allocation2 + $0x100] sm:$0xff]  ;;  %v992_v32 = vld [vmem:[#allocation2 + $0x178] sm:$0xff]  ;;  %v999_v33 = vld [vmem:[#allocation2 + $0x1b0] sm:$0xf] }
  0x8e   : > { %v7515_v34 = vpack.c.bf16 %v984_v31, %v977_v30  ;;  %v7517_v35 = vpack.c.bf16 %v999_v33, %v992_v32  ;;  %v991_v36 = vld [vmem:[#allocation2 + $0x170] sm:$0xff]  ;;  %v998_v37 = vld [vmem:[#allocation2 + $0x1a8] sm:$0xf]  ;;  %v993_v38 = vld [vmem:[#allocation2 + $0x180] sm:$0xff] }
  0x8f   : > { %6777 = vmatmul.mubr.msk.f32.gmra.mrb[6].mxu0 %vm325_vm3, %v8675_v52  ;;  %6790 = vmatmul.mubr.msk.f32.vlgmr.msra.gmra.mrb[6].mxu1 %vm325_vm3, %v8631_v21  ;;  %v1000_v39 = vld [vmem:[#allocation2 + $0x1b8] sm:$0xf]  ;;  %v1615_v41 = vld [vmem:[#allocation2 + $0x210] sm:$0xff]  ;;  %v7520_v42 = vpack.c.bf16 %v998_v37, %v991_v36  ;;  %v1606_v45 = vld [vmem:[#allocation2 + $0x1c8] sm:$0xff] }
  0x90   : > { %478 = vmatprep.mubr.f32.mxu0 %v12018_v0  ;;  %609 = vmatprep.mubr.f32.mxu1 %v12018_v0  ;;  %v1608_v40 = vld [vmem:[#allocation2 + $0x1d8] sm:$0xff]  ;;  %v1613_v46 = vld [vmem:[#allocation2 + $0x200] sm:$0xff]  ;;  %v1607_v50 = vld [vmem:[#allocation2 + $0x1d0] sm:$0xff] }
  0x91   : > { %7486 = vmatpush3.bf16.msra.mxu1 %v7483_v43  ;;  %v7527_v43 = vpack.c.bf16 %v1000_v39, %v993_v38  ;;  %v7543_v44 = vpack.c.bf16 %v1615_v41, %v1608_v40  ;;  %v7533_v49 = vpack.c.bf16 %v1613_v46, %v1606_v45  ;;  %v1614_v51 = vld [vmem:[#allocation2 + $0x208] sm:$0xff]  ;;  %v1629_v55 = vld [vmem:[#allocation2 + $0x280] sm:$0xf]  ;;  %v1620_v1 = vld [vmem:[#allocation2 + $0x238] sm:$0xff] }
  0x92   : > { %7489 = vmatprep.subr.msk.bf16.mxu1 %vm8611_vm2, %v7487_v54  ;;  %v7545_v56 = vpack.c.bf16 %v1614_v51, %v1607_v50  ;;  %v1621_v3 = vld [vmem:[#allocation2 + $0x240] sm:$0xff]  ;;  %v1628_v4 = vld [vmem:[#allocation2 + $0x278] sm:$0xf]  ;;  %v1611_v5 = vld [vmem:[#allocation2 + $0x1f0] sm:$0xff] }
  0x93   : > { %6778 = vmatmul.mubr.msk.f32.gmra.mrb[8].mxu0 %vm325_vm3, %v8678_v53  ;;  %6791 = vmatmul.mubr.msk.f32.gmra.mrb[8].mxu1 %vm325_vm3, %v8637_v26  ;;  %v1618_v6 = vld [vmem:[#allocation2 + $0x228] sm:$0xff]  ;;  %v7550_v8 = vpack.c.bf16 %v1628_v4, %v1621_v3  ;;  %v1617_v15 = vld [vmem:[#allocation2 + $0x220] sm:$0xff]  ;;  %v1624_v17 = vld [vmem:[#allocation2 + $0x258] sm:$0xff] }
  0x94   : > { %484 = vmatprep.mubr.f32.mxu0 %v12018_v0  ;;  %615 = vmatprep.mubr.f32.mxu1 %v12018_v0  ;;  %v1610_v14 = vld [vmem:[#allocation2 + $0x1e8] sm:$0xff]  ;;  %v1631_v18 = vld [vmem:[#allocation2 + $0x290] sm:$0xf]  ;;  %v9045_v30 = vld [vmem:[%s8624_s15 + $0x18] sm:$0xff] }
  0x95   : > { %7492 = vmatpush3.bf16.msk.msra.mxu1 %vm8611_vm2, %v7487_v54  ;;  %v1622_v54 = vld [vmem:[#allocation2 + $0x248] sm:$0xff]  ;;  %v7553_v16 = vpack.c.bf16 %v1617_v15, %v1610_v14  ;;  %v1623_v23 = vld [vmem:[#allocation2 + $0x250] sm:$0xff]  ;;  %v9054_v31 = vld [vmem:[%s8624_s15 + $0x20] sm:$0xff] }
  0x96   : > { %7494 = vmatprep.subr.bf16.mxu1 %v7493_v58  ;;  %v1612_v58 = vld [vmem:[#allocation2 + $0x1f8] sm:$0xff]  ;;  %v7547_v2 = vpack.c.bf16 %v1629_v55, %v1622_v54  ;;  %v1630_v24 = vld [vmem:[#allocation2 + $0x288] sm:$0xf]  ;;  %v1625_v33 = vld [vmem:[#allocation2 + $0x260] sm:$0xff] }
  0x97   : > { %6779 = vmatmul.mubr.msk.f32.gmra.mrb[10].mxu0 %vm325_vm3, %v8687_v57  ;;  %6792 = vmatmul.mubr.msk.f32.gmra.mrb[10].mxu1 %vm325_vm3, %v8657_v47  ;;  %v9061_v32 = vld [vmem:[%s8624_s15 + $0x68] sm:$0xf]  ;;  %vm10722_vm7 = vmpackc.low %vm3949_vm6, %vm8438_vm1 }
  0x98   : > { %490 = vmatprep.mubr.f32.mxu0 %v12018_v0  ;;  %621 = vmatprep.mubr.f32.mxu1 %v12018_v0  ;;  %v9145_v54 = vld [vmem:[%s8624_s15 + $0x28] sm:$0xff]  ;;  %vm11989_vm1 = vmand %vm6648_vm13, %vm6649_vm14 }
  0x9b   : > { %6780 = vmatmul.mubr.msk.f32.gmra.mrb[12].mxu0 %vm325_vm3, %v8706_v59  ;;  %6793 = vmatmul.mubr.msk.f32.gmra.mrb[12].mxu1 %vm325_vm3, %v8675_v52 }
  0x9c   : > { %496 = vmatprep.mubr.f32.mxu0 %v12018_v0  ;;  %627 = vmatprep.mubr.f32.mxu1 %v12018_v0 }
  0x9f   : > { %6781 = vmatmul.mubr.msk.f32.gmra.mrb[14].mxu0 %vm325_vm3, %v8709_v60  ;;  %6794 = vmatmul.mubr.msk.f32.gmra.mrb[14].mxu1 %vm325_vm3, %v8678_v53 }
  0xa0   : > { %502 = vmatprep.mubr.f32.mxu0 %v12018_v0  ;;  %633 = vmatprep.mubr.f32.mxu1 %v12018_v0 }
  0xa3   : > { %6782 = vmatmul.mubr.msk.f32.gmra.mrb[16].mxu0 %vm325_vm3, %v8718_v61  ;;  %6795 = vmatmul.mubr.msk.f32.gmra.mrb[16].mxu1 %vm325_vm3, %v8687_v57 }
  0xa4   : > { %508 = vmatprep.mubr.f32.mxu0 %v12018_v0  ;;  %639 = vmatprep.mubr.f32.mxu1 %v12018_v0 }
  0xa7   : > { %6783 = vmatmul.mubr.msk.f32.gmra.mrb[18].mxu0 %vm325_vm3, %v8733_v62  ;;  %6796 = vmatmul.mubr.msk.f32.gmra.mrb[18].mxu1 %vm325_vm3, %v8706_v59 }
  0xa8   : > { %514 = vmatprep.mubr.f32.mxu0 %v12018_v0  ;;  %645 = vmatprep.mubr.f32.mxu1 %v12018_v0 }
  0xab   : > { %6784 = vmatmul.mubr.msk.f32.gmra.mrb[20].mxu0 %vm325_vm3, %v8736_v63  ;;  %6797 = vmatmul.mubr.msk.f32.gmra.mrb[20].mxu1 %vm325_vm3, %v8709_v60 }
  0xac   : > { %651 = vmatprep.mubr.f32.mxu1 %v12018_v0  ;;  %752 = vmatprep.mubr.f32.mxu0 %v12018_v0 }
  0xaf   : > { %6798 = vmatmul.mubr.msk.f32.gmra.mrb[22].mxu1 %vm325_vm3, %v8718_v61  ;;  %6806 = vmatmul.mubr.msk.f32.vlgmr.msra.gmra.mrb[22].mxu0 %vm325_vm3, %v8631_v21 }
  0xb0   : > { %657 = vmatprep.mubr.f32.mxu1 %v12018_v0  ;;  %758 = vmatprep.mubr.f32.mxu0 %v12018_v0 }
  0xb1   : > { %7506 = vmatpush1.bf16.msra.mxu0 %v7505_v7 }
  0xb2   : > { %7509 = vmatprep.subr.msk.bf16.mxu0 %vm8611_vm2, %v7507_v11  ;;  %v1619_v11 = vld [vmem:[#allocation2 + $0x230] sm:$0xff] }
  0xb3   : > { %6799 = vmatmul.mubr.msk.f32.gmra.mrb[24].mxu1 %vm325_vm3, %v8733_v62  ;;  %6807 = vmatmul.mubr.msk.f32.gmra.mrb[24].mxu0 %vm325_vm3, %v8637_v26 }
  0xb4   : > { %663 = vmatprep.mubr.f32.mxu1 %v12018_v0  ;;  %764 = vmatprep.mubr.f32.mxu0 %v12018_v0 }
  0xb5   : > { %7512 = vmatpush1.bf16.msk.msra.mxu0 %vm8611_vm2, %v7510_v12  ;;  %v1626_v12 = vld [vmem:[#allocation2 + $0x268] sm:$0xf] }
  0xb6   : > { %7524 = vmatprep.subr.bf16.mxu0 %v8758_v13 }
  0xb7   : > { %6800 = vmatmul.mubr.msk.f32.gmra.mrb[26].mxu1 %vm325_vm3, %v8736_v63  ;;  %6808 = vmatmul.mubr.msk.f32.gmra.mrb[26].mxu0 %vm325_vm3, %v8657_v47 }
  0xb8   : > { %669 = vmatprep.mubr.f32.mxu1 %v12018_v0  ;;  %770 = vmatprep.mubr.f32.mxu0 %v12018_v0 }
  0xbb   : > { %6801 = vmatmul.mubr.msk.f32.gmra.mrb[28].mxu1 %vm325_vm3, %v8634_v22  ;;  %6809 = vmatmul.mubr.msk.f32.gmra.mrb[28].mxu0 %vm325_vm3, %v8675_v52 }
  0xbc   : > { %675 = vmatprep.mubr.f32.mxu1 %v12018_v0  ;;  %776 = vmatprep.mubr.f32.mxu0 %v12018_v0 }
  0xbf   : > { %6802 = vmatmul.mubr.msk.f32.gmra.mrb[30].mxu1 %vm325_vm3, %v8640_v27  ;;  %6810 = vmatmul.mubr.msk.f32.gmra.mrb[30].mxu0 %vm325_vm3, %v8678_v53 }
  0xc0   : > { %681 = vmatprep.mubr.f32.mxu1 %v12018_v0  ;;  %782 = vmatprep.mubr.f32.mxu0 %v12018_v0 }
  0xc3   : > { %6803 = vmatmul.mubr.msk.f32.gmra.mrb[32].mxu1 %vm325_vm3, %v8660_v48  ;;  %6811 = vmatmul.mubr.msk.f32.gmra.mrb[32].mxu0 %vm325_vm3, %v8687_v57 }
  0xc4   : > { %788 = vmatprep.mubr.f32.mxu0 %v12018_v0  ;;  %7325 = vmatprep.mubr.msk.f32.mxu1 %vm325_vm3, %v8631_v21 }
  0xc7   : > { %6812 = vmatmul.mubr.msk.f32.gmra.mrb[34].mxu0 %vm325_vm3, %v8706_v59  ;;  %7326 = vmatmul.mubr.msk.f32.vlgmr.msra.gmra.mrb[34].mxu1 %vm325_vm3, %v8637_v26 }
  0xc8   : > { %794 = vmatprep.mubr.f32.mxu0 %v12018_v0  ;;  %7328 = vmatprep.mubr.msk.f32.mxu1 %vm325_vm3, %v8657_v47 }
  0xc9   : > { %7496 = vmatpush1.bf16.msra.mxu1 %v7495_v20  ;;  %v7557_v20 = vpack.c.bf16 %v1631_v18, %v1624_v17 }
  0xca   : > { %7499 = vmatprep.subr.msk.bf16.mxu1 %vm8611_vm2, %v7497_v25  ;;  %v9014_v25 = vld [vmem:[%s8624_s15] sm:$0xff] }
  0xcb   : > { %6813 = vmatmul.mubr.msk.f32.gmra.mrb[36].mxu0 %vm325_vm3, %v8709_v60  ;;  %7329 = vmatmul.mubr.msk.f32.gmra.mrb[36].mxu1 %vm325_vm3, %v8675_v52 }
  0xcc   : > { %800 = vmatprep.mubr.f32.mxu0 %v12018_v0  ;;  %7331 = vmatprep.mubr.msk.f32.mxu1 %vm325_vm3, %v8678_v53 }
  0xcd   : > { %7502 = vmatpush1.bf16.msk.msra.mxu1 %vm8611_vm2, %v7500_v28  ;;  %v9025_v28 = vld [vmem:[%s8624_s15 + $0x8] sm:$0xff] }
  0xce   : > { %7514 = vmatprep.subr.bf16.mxu1 %v7513_v29  ;;  %v9036_v29 = vld [vmem:[%s8624_s15 + $0x10] sm:$0xff] }
  0xcf   : > { %6814 = vmatmul.mubr.msk.f32.gmra.mrb[38].mxu0 %vm325_vm3, %v8718_v61  ;;  %7332 = vmatmul.mubr.msk.f32.gmra.mrb[38].mxu1 %vm325_vm3, %v8687_v57 }
  0xd0   : > { %806 = vmatprep.mubr.f32.mxu0 %v12018_v0  ;;  %7334 = vmatprep.mubr.msk.f32.mxu1 %vm325_vm3, %v8706_v59 }
  0xd3   : > { %6815 = vmatmul.mubr.msk.f32.gmra.mrb[40].mxu0 %vm325_vm3, %v8733_v62  ;;  %7335 = vmatmul.mubr.msk.f32.gmra.mrb[40].mxu1 %vm325_vm3, %v8709_v60 }
  0xd4   : > { %812 = vmatprep.mubr.f32.mxu0 %v12018_v0  ;;  %7337 = vmatprep.mubr.msk.f32.mxu1 %vm325_vm3, %v8718_v61 }
  0xd7   : > { %6816 = vmatmul.mubr.msk.f32.gmra.mrb[42].mxu0 %vm325_vm3, %v8736_v63  ;;  %7338 = vmatmul.mubr.msk.f32.gmra.mrb[42].mxu1 %vm325_vm3, %v8733_v62 }
  0xd8   : > { %818 = vmatprep.mubr.f32.mxu0 %v12018_v0  ;;  %7340 = vmatprep.mubr.msk.f32.mxu1 %vm325_vm3, %v8736_v63 }
  0xdb   : > { %6817 = vmatmul.mubr.msk.f32.gmra.mrb[44].mxu0 %vm325_vm3, %v8634_v22  ;;  %7341 = vmatmul.mubr.msk.f32.gmra.mrb[44].mxu1 %vm325_vm3, %v8634_v22 }
  0xdc   : > { %824 = vmatprep.mubr.f32.mxu0 %v12018_v0  ;;  %7343 = vmatprep.mubr.msk.f32.mxu1 %vm325_vm3, %v8640_v27 }
  0xdf   : > { %6818 = vmatmul.mubr.msk.f32.gmra.mrb[46].mxu0 %vm325_vm3, %v8640_v27  ;;  %7344 = vmatmul.mubr.msk.f32.gmra.mrb[46].mxu1 %vm325_vm3, %v8660_v48 }
  0xe0   : > { %830 = vmatprep.mubr.f32.mxu0 %v12018_v0  ;;  %1086 = vmatprep.mubr.f32.mxu1 %v12018_v0 }
  0xe3   : > { %6819 = vmatmul.mubr.msk.f32.gmra.mrb[48].mxu0 %vm325_vm3, %v8660_v48  ;;  %6837 = vmatmul.mubr.msk.f32.vlgmr.msra.gmra.mrb[48].mxu1 %vm325_vm3, %v8631_v21 }
  0xe4   : > { %1092 = vmatprep.mubr.f32.mxu1 %v12018_v0  ;;  %1235 = vmatprep.mubr.f32.mxu0 %v12018_v0 }
  0xe5   : > { %7516 = vmatpush1.bf16.msra.mxu1 %v7515_v34  ;;  %v1632_v34 = vld [vmem:[#allocation2 + $0x298] sm:$0xf] }
  0xe6   : > { %7519 = vmatprep.subr.msk.bf16.mxu1 %vm8611_vm2, %v7517_v35  ;;  %v7567_v35 = vpack.c.bf16 %v1632_v34, %v1625_v33 }
  0xe7   : > { %6838 = vmatmul.mubr.msk.f32.gmra.mrb[50].mxu1 %vm325_vm3, %v8637_v26  ;;  %6853 = vmatmul.mubr.msk.f32.vlgmr.msra.gmra.mrb[50].mxu0 %vm325_vm3, %v8631_v21 }
  0xe8   : > { %1098 = vmatprep.mubr.f32.mxu1 %v12018_v0  ;;  %1241 = vmatprep.mubr.f32.mxu0 %v12018_v0 }
  0xe9   : > { %7526 = vmatpush3.bf16.msra.mxu0 %v8758_v13  ;;  %7522 = vmatpush1.bf16.msk.msra.mxu1 %vm8611_vm2, %v7520_v42  ;;  %v8948_v13 = vpack.c.bf16 %v1618_v6, %v1611_v5  ;;  %v9179_v5 = vld [vmem:[%s8624_s15 + $0x38] sm:$0xff] }
  0xea   : > { %7529 = vmatprep.subr.msk.bf16.mxu0 %vm8611_vm2, %v7527_v43  ;;  %7544 = vmatprep.subr.bf16.mxu1 %v7543_v44 }
  0xeb   : > { %6839 = vmatmul.mubr.msk.f32.gmra.mrb[52].mxu1 %vm325_vm3, %v8657_v47  ;;  %6854 = vmatmul.mubr.msk.f32.gmra.mrb[52].mxu0 %vm325_vm3, %v8637_v26 }
  0xec   : > { %1104 = vmatprep.mubr.f32.mxu1 %v12018_v0  ;;  %1247 = vmatprep.mubr.f32.mxu0 %v12018_v0 }
  0xed   : > { %7532 = vmatpush3.bf16.msk.msra.mxu0 %vm8611_vm2, %v7527_v43 }
  0xee   : > { %7534 = vmatprep.subr.bf16.mxu0 %v7533_v49 }
  0xef   : > { %6840 = vmatmul.mubr.msk.f32.gmra.mrb[54].mxu1 %vm325_vm3, %v8675_v52  ;;  %6855 = vmatmul.mubr.msk.f32.gmra.mrb[54].mxu0 %vm325_vm3, %v8657_v47 }
  0xf0   : > { %1110 = vmatprep.mubr.f32.mxu1 %v12018_v0  ;;  %1253 = vmatprep.mubr.f32.mxu0 %v12018_v0 }
  0xf3   : > { %6841 = vmatmul.mubr.msk.f32.gmra.mrb[56].mxu1 %vm325_vm3, %v8678_v53  ;;  %6856 = vmatmul.mubr.msk.f32.gmra.mrb[56].mxu0 %vm325_vm3, %v8675_v52 }
  0xf4   : > { %1116 = vmatprep.mubr.f32.mxu1 %v12018_v0  ;;  %1259 = vmatprep.mubr.f32.mxu0 %v12018_v0 }
  0xf7   : > { %6842 = vmatmul.mubr.msk.f32.gmra.mrb[58].mxu1 %vm325_vm3, %v8687_v57  ;;  %6857 = vmatmul.mubr.msk.f32.gmra.mrb[58].mxu0 %vm325_vm3, %v8678_v53 }
  0xf8   : > { %1122 = vmatprep.mubr.f32.mxu1 %v12018_v0  ;;  %1265 = vmatprep.mubr.f32.mxu0 %v12018_v0 }
  0xfb   : > { %6843 = vmatmul.mubr.msk.f32.gmra.mrb[60].mxu1 %vm325_vm3, %v8706_v59  ;;  %6858 = vmatmul.mubr.msk.f32.gmra.mrb[60].mxu0 %vm325_vm3, %v8687_v57 }
  0xfc   : > { %1128 = vmatprep.mubr.f32.mxu1 %v12018_v0  ;;  %1271 = vmatprep.mubr.f32.mxu0 %v12018_v0 }
  0xff   : > { %6844 = vmatmul.mubr.msk.f32.gmra.mrb[62].mxu1 %vm325_vm3, %v8709_v60  ;;  %6859 = vmatmul.mubr.msk.f32.gmra.mrb[62].mxu0 %vm325_vm3, %v8706_v59 }
 0x100   : > { %1134 = vmatprep.mubr.f32.mxu1 %v12018_v0  ;;  %1277 = vmatprep.mubr.f32.mxu0 %v12018_v0 }
 0x103   : > { %6845 = vmatmul.mubr.msk.f32.gmra.mrb[64].mxu1 %vm325_vm3, %v8718_v61  ;;  %6860 = vmatmul.mubr.msk.f32.gmra.mrb[64].mxu0 %vm325_vm3, %v8709_v60 }
 0x104   : > { %1140 = vmatprep.mubr.f32.mxu1 %v12018_v0  ;;  %1283 = vmatprep.mubr.f32.mxu0 %v12018_v0 }
 0x107   : > { %6846 = vmatmul.mubr.msk.f32.gmra.mrb[66].mxu1 %vm325_vm3, %v8733_v62  ;;  %6861 = vmatmul.mubr.msk.f32.gmra.mrb[66].mxu0 %vm325_vm3, %v8718_v61 }
 0x108   : > { %1146 = vmatprep.mubr.f32.mxu1 %v12018_v0  ;;  %1289 = vmatprep.mubr.f32.mxu0 %v12018_v0 }
 0x10b   : > { %6847 = vmatmul.mubr.msk.f32.gmra.mrb[68].mxu1 %vm325_vm3, %v8736_v63  ;;  %6862 = vmatmul.mubr.msk.f32.gmra.mrb[68].mxu0 %vm325_vm3, %v8733_v62 }
 0x10c   : > { %1152 = vmatprep.mubr.f32.mxu1 %v12018_v0  ;;  %1295 = vmatprep.mubr.f32.mxu0 %v12018_v0 }
 0x10f   : > { %6848 = vmatmul.mubr.msk.f32.gmra.mrb[70].mxu1 %vm325_vm3, %v8634_v22  ;;  %6863 = vmatmul.mubr.msk.f32.gmra.mrb[70].mxu0 %vm325_vm3, %v8736_v63 }
 0x110   : > { %1158 = vmatprep.mubr.f32.mxu1 %v12018_v0  ;;  %1301 = vmatprep.mubr.f32.mxu0 %v12018_v0 }
 0x113   : > { %6849 = vmatmul.mubr.msk.f32.gmra.mrb[72].mxu1 %vm325_vm3, %v8640_v27  ;;  %6864 = vmatmul.mubr.msk.f32.gmra.mrb[72].mxu0 %vm325_vm3, %v8634_v22  ;;  %v1605_v22 = vld [vmem:[#allocation2 + $0x1c0] sm:$0xff] }
 0x114   : > { %1164 = vmatprep.mubr.f32.mxu1 %v12018_v0  ;;  %1307 = vmatprep.mubr.f32.mxu0 %v12018_v0  ;;  %v7535_v7 = vpack.c.bf16 %v1612_v58, %v1605_v22 }
 0x117   : > { %6850 = vmatmul.mubr.msk.f32.gmra.mrb[74].mxu1 %vm325_vm3, %v8660_v48  ;;  %6865 = vmatmul.mubr.msk.f32.gmra.mrb[74].mxu0 %vm325_vm3, %v8640_v27  ;;  %v1627_v27 = vld [vmem:[#allocation2 + $0x270] sm:$0xf] }
 0x118   : > { %1313 = vmatprep.mubr.f32.mxu0 %v12018_v0  ;;  %1384 = vmatprep.mubr.f32.mxu1 %v12018_v0  ;;  %v7537_v9 = vpack.c.bf16 %v1627_v27, %v1620_v1  ;;  %v9162_v1 = vld [vmem:[%s8624_s15 + $0x30] sm:$0xff] }
 0x11b   : > { %6866 = vmatmul.mubr.msk.f32.gmra.mrb[76].mxu0 %vm325_vm3, %v8660_v48  ;;  %6869 = vmatmul.mubr.msk.f32.vlgmr.msra.gmra.mrb[76].mxu1 %vm325_vm3, %v8631_v21 }
 0x11c   : > { %1390 = vmatprep.mubr.f32.mxu1 %v12018_v0  ;;  %7354 = vmatprep.mubr.msk.f32.mxu0 %vm325_vm3, %v8631_v21  ;;  %v7540_v21 = vpack.c.bf16 %v1626_v12, %v1619_v11  ;;  %v9194_v11 = vld [vmem:[%s8624_s15 + $0x40] sm:$0xff] }
 0x11d   : > { %7546 = vmatpush1.bf16.msra.mxu1 %v7545_v56 }
 0x11e   : > { %7549 = vmatprep.subr.msk.bf16.mxu1 %vm8611_vm2, %v7547_v2 }
 0x11f   : > { %6870 = vmatmul.mubr.msk.f32.gmra.mrb[78].mxu1 %vm325_vm3, %v8637_v26  ;;  %7355 = vmatmul.mubr.msk.f32.vlgmr.msra.gmra.mrb[78].mxu0 %vm325_vm3, %v8637_v26  ;;  %v8995_v26 = vld [vmem:[%s8624_s15 + $0x58] sm:$0xff] }
 0x120   : > { %1396 = vmatprep.mubr.f32.mxu1 %v12018_v0  ;;  %7357 = vmatprep.mubr.msk.f32.mxu0 %vm325_vm3, %v8657_v47 }
 0x121   : > { %7536 = vmatpush1.bf16.msra.mxu0 %v7535_v7  ;;  %7552 = vmatpush1.bf16.msk.msra.mxu1 %vm8611_vm2, %v7550_v8 }
 0x122   : > { %7539 = vmatprep.subr.msk.bf16.mxu0 %vm8611_vm2, %v7537_v9  ;;  %7564 = vmatprep.subr.bf16.mxu1 %v8948_v13 }
 0x123   : > { %6871 = vmatmul.mubr.msk.f32.gmra.mrb[80].mxu1 %vm325_vm3, %v8657_v47  ;;  %7358 = vmatmul.mubr.msk.f32.gmra.mrb[80].mxu0 %vm325_vm3, %v8675_v52  ;;  %v9001_v47 = vld [vmem:[%s8624_s15 + $0x60] sm:$0xff] }
 0x124   : > { %1402 = vmatprep.mubr.f32.mxu1 %v12018_v0  ;;  %7360 = vmatprep.mubr.msk.f32.mxu0 %vm325_vm3, %v8678_v53 }
 0x125   : > { %7542 = vmatpush1.bf16.msk.msra.mxu0 %vm8611_vm2, %v7540_v21 }
 0x126   : > { %7554 = vmatprep.subr.bf16.mxu0 %v7553_v16 }
 0x127   : > { %6872 = vmatmul.mubr.msk.f32.gmra.mrb[82].mxu1 %vm325_vm3, %v8675_v52  ;;  %7361 = vmatmul.mubr.msk.f32.gmra.mrb[82].mxu0 %vm325_vm3, %v8687_v57  ;;  %v1609_v52 = vld [vmem:[#allocation2 + $0x1e0] sm:$0xff] }
 0x128   : > { %1408 = vmatprep.mubr.f32.mxu1 %v12018_v0  ;;  %7363 = vmatprep.mubr.msk.f32.mxu0 %vm325_vm3, %v8706_v59 }
 0x12b   : > { %6873 = vmatmul.mubr.msk.f32.gmra.mrb[84].mxu1 %vm325_vm3, %v8678_v53  ;;  %7364 = vmatmul.mubr.msk.f32.gmra.mrb[84].mxu0 %vm325_vm3, %v8709_v60  ;;  %v1616_v53 = vld [vmem:[#allocation2 + $0x218] sm:$0xff] }
 0x12c   : > { %1414 = vmatprep.mubr.f32.mxu1 %v12018_v0  ;;  %7366 = vmatprep.mubr.msk.f32.mxu0 %vm325_vm3, %v8718_v61  ;;  %v7555_v19 = vpack.c.bf16 %v1616_v53, %v1609_v52 }
 0x12f   : > { %6874 = vmatmul.mubr.msk.f32.gmra.mrb[86].mxu1 %vm325_vm3, %v8687_v57  ;;  %7367 = vmatmul.mubr.msk.f32.gmra.mrb[86].mxu0 %vm325_vm3, %v8733_v62 }
 0x130   : > { %1420 = vmatprep.mubr.f32.mxu1 %v12018_v0  ;;  %7369 = vmatprep.mubr.msk.f32.mxu0 %vm325_vm3, %v8736_v63 }
 0x133   : > { %6875 = vmatmul.mubr.msk.f32.gmra.mrb[88].mxu1 %vm325_vm3, %v8706_v59  ;;  %7370 = vmatmul.mubr.msk.f32.gmra.mrb[88].mxu0 %vm325_vm3, %v8995_v26 }
 0x134   : > { %1426 = vmatprep.mubr.f32.mxu1 %v12018_v0  ;;  %7372 = vmatprep.mubr.msk.f32.mxu0 %vm325_vm3, %v9001_v47 }
 0x137   : > { %6876 = vmatmul.mubr.msk.f32.gmra.mrb[90].mxu1 %vm325_vm3, %v8709_v60  ;;  %7373 = vmatmul.mubr.msk.f32.gmra.mrb[90].mxu0 %vm325_vm3, %v8660_v48  ;;  %v7560_v48 = vpack.c.bf16 %v1630_v24, %v1623_v23 }
 0x138   : > { %1432 = vmatprep.mubr.f32.mxu1 %v12018_v0  ;;  %1718 = vmatprep.mubr.f32.mxu0 %v12018_v0 }
 0x13b   : > { %6877 = vmatmul.mubr.msk.f32.gmra.mrb[92].mxu1 %vm325_vm3, %v8718_v61  ;;  %6900 = vmatmul.mubr.msk.f32.vlgmr.msra.gmra.mrb[92].mxu0 %vm325_vm3, %v9014_v25 }
 0x13c   : > { %1438 = vmatprep.mubr.f32.mxu1 %v12018_v0  ;;  %1724 = vmatprep.mubr.f32.mxu0 %v12018_v0 }
 0x13d   : > { %7556 = vmatpush1.bf16.msra.mxu0 %v7555_v19 }
 0x13e   : > { %7559 = vmatprep.subr.msk.bf16.mxu0 %vm8611_vm2, %v7557_v20 }
 0x13f   : > { %6878 = vmatmul.mubr.msk.f32.gmra.mrb[94].mxu1 %vm325_vm3, %v8733_v62  ;;  %6901 = vmatmul.mubr.msk.f32.gmra.mrb[94].mxu0 %vm325_vm3, %v9025_v28 }
 0x140   : > { %1444 = vmatprep.mubr.f32.mxu1 %v12018_v0  ;;  %1730 = vmatprep.mubr.f32.mxu0 %v12018_v0 }
 0x141   : > { %7562 = vmatpush1.bf16.msk.msra.mxu0 %vm8611_vm2, %v7560_v48 }
 0x143   : > { %6879 = vmatmul.mubr.msk.f32.gmra.mrb[96].mxu1 %vm325_vm3, %v8736_v63  ;;  %6902 = vmatmul.mubr.msk.f32.gmra.mrb[96].mxu0 %vm325_vm3, %v9036_v29 }
 0x144   : > { %1450 = vmatprep.mubr.f32.mxu1 %v12018_v0  ;;  %1736 = vmatprep.mubr.f32.mxu0 %v12018_v0 }
 0x147   : > { %6880 = vmatmul.mubr.msk.f32.gmra.mrb[98].mxu1 %vm325_vm3, %v8995_v26  ;;  %6903 = vmatmul.mubr.msk.f32.gmra.mrb[98].mxu0 %vm325_vm3, %v9045_v30 }
 0x148   : > { %1456 = vmatprep.mubr.f32.mxu1 %v12018_v0  ;;  %1742 = vmatprep.mubr.f32.mxu0 %v12018_v0 }
 0x14b   : > { %6881 = vmatmul.mubr.msk.f32.gmra.mrb[100].mxu1 %vm325_vm3, %v9001_v47  ;;  %6904 = vmatmul.mubr.msk.f32.gmra.mrb[100].mxu0 %vm325_vm3, %v9054_v31 }
 0x14c   : > { %1462 = vmatprep.mubr.f32.mxu1 %v12018_v0  ;;  %1748 = vmatprep.mubr.f32.mxu0 %v12018_v0 }
 0x14f   : > { %6882 = vmatmul.mubr.msk.f32.gmra.mrb[102].mxu1 %vm325_vm3, %v9061_v32  ;;  %6905 = vmatmul.mubr.msk.f32.gmra.mrb[102].mxu0 %vm325_vm3, %v8687_v57 }
 0x150   : > { %1754 = vmatprep.mubr.f32.mxu0 %v12018_v0  ;;  %1867 = vmatprep.mubr.f32.mxu1 %v12018_v0 }
 0x153   : > { %6906 = vmatmul.mubr.msk.f32.gmra.mrb[104].mxu0 %vm325_vm3, %v8706_v59  ;;  %6916 = vmatmul.mubr.msk.f32.vlgmr.msra.gmra.mrb[104].mxu1 %vm325_vm3, %v9014_v25 }
 0x154   : > { %1760 = vmatprep.mubr.f32.mxu0 %v12018_v0  ;;  %1873 = vmatprep.mubr.f32.mxu1 %v12018_v0 }
 0x155   : > { %7566 = vmatpush3.bf16.msra.mxu1 %v8948_v13 }
 0x156   : > { %v9076_v57 = vpop.f32.mrb[0].mxu1  ;;  %v9078_v36 = vpop.f32.mrb[0].mxu0  ;;  %7569 = vmatprep.subr.msk.bf16.mxu1 %vm8611_vm2, %v7567_v35 }
 0x157   : > { %v9082_v37 = vpop.f32.mrb[1].mxu1  ;;  %6907 = vmatmul.mubr.msk.f32.gmra.mrb[106].mxu0 %vm325_vm3, %v8709_v60  ;;  %6917 = vmatmul.mubr.msk.f32.gmra.mrb[106].mxu1 %vm325_vm3, %v9025_v28  ;;  %v9088_v59 = vpop.f32.mrb[1].mxu0 }
 0x158   : > { %12146 = vst [vmem:[#allocation12_spill] sm:$0xff] %v9082_v37  ;;  %1766 = vmatprep.mubr.f32.mxu0 %v12018_v0  ;;  %1879 = vmatprep.mubr.f32.mxu1 %v12018_v0 }
 0x159   : > { %7572 = vmatpush3.bf16.msk.msra.mxu1 %vm8611_vm2, %v7567_v35  ;;  %vm11994_vm2 = vmand %vm6651_vm15, %vm6652_vm0 }
 0x15a   : > { %v9094_v38 = vpop.f32.mrb[2].mxu1  ;;  %v9096_v39 = vpop.f32.mrb[2].mxu0 }
 0x15b   : > { %12147 = vst [vmem:[#allocation13_spill] sm:$0xff] %v9094_v38  ;;  %v9098_v40 = vpop.f32.mrb[3].mxu1  ;;  %6908 = vmatmul.mubr.msk.f32.gmra.mrb[108].mxu0 %vm325_vm3, %v8718_v61  ;;  %6918 = vmatmul.mubr.msk.f32.gmra.mrb[108].mxu1 %vm325_vm3, %v9036_v29  ;;  %v9104_v60 = vpop.f32.mrb[3].mxu0 }
 0x15c   : > { %12148 = vst [vmem:[#allocation14_spill] sm:$0xff] %v9098_v40  ;;  %1772 = vmatprep.mubr.f32.mxu0 %v12018_v0  ;;  %1885 = vmatprep.mubr.f32.mxu1 %v12018_v0 }
 0x15e   : > { %v9108_v10 = vpop.f32.mrb[4].mxu1  ;;  %v9110_v41 = vpop.f32.mrb[4].mxu0 }
 0x15f   : > { %12149 = vst [vmem:[#allocation15_spill] sm:$0xff] %v9108_v10  ;;  %v9112_v42 = vpop.f32.mrb[5].mxu1  ;;  %6909 = vmatmul.mubr.msk.f32.gmra.mrb[110].mxu0 %vm325_vm3, %v8733_v62  ;;  %6919 = vmatmul.mubr.msk.f32.gmra.mrb[110].mxu1 %vm325_vm3, %v9045_v30  ;;  %v9118_v61 = vpop.f32.mrb[5].mxu0 }
 0x160   : > { %12150 = vst [vmem:[#allocation16_spill] sm:$0xff] %v9112_v42  ;;  %1778 = vmatprep.mubr.f32.mxu0 %v12018_v0  ;;  %1891 = vmatprep.mubr.f32.mxu1 %v12018_v0 }
 0x162   : > { %v9122_v43 = vpop.f32.mrb[6].mxu1  ;;  %v9124_v44 = vpop.f32.mrb[6].mxu0 }
 0x163   : > { %v9126_v45 = vpop.f32.mrb[7].mxu1  ;;  %6910 = vmatmul.mubr.msk.f32.gmra.mrb[112].mxu0 %vm325_vm3, %v8736_v63  ;;  %6920 = vmatmul.mubr.msk.f32.gmra.mrb[112].mxu1 %vm325_vm3, %v9054_v31  ;;  %v9132_v46 = vpop.f32.mrb[7].mxu0 }
 0x164   : > { %1784 = vmatprep.mubr.f32.mxu0 %v12018_v0  ;;  %1897 = vmatprep.mubr.f32.mxu1 %v12018_v0 }
 0x166   : > { %v9136_v49 = vpop.f32.mrb[8].mxu1  ;;  %v9138_v50 = vpop.f32.mrb[8].mxu0 }
 0x167   : > { %v9140_v51 = vpop.f32.mrb[9].mxu1  ;;  %6911 = vmatmul.mubr.msk.f32.gmra.mrb[114].mxu0 %vm325_vm3, %v8995_v26  ;;  %6921 = vmatmul.mubr.msk.f32.gmra.mrb[114].mxu1 %vm325_vm3, %v9145_v54  ;;  %v9149_v55 = vpop.f32.mrb[9].mxu0 }
 0x168   : > { %1790 = vmatprep.mubr.f32.mxu0 %v12018_v0  ;;  %1903 = vmatprep.mubr.f32.mxu1 %v12018_v0 }
 0x16a   : > { %v9153_v56 = vpop.f32.mrb[10].mxu1  ;;  %v9155_v22 = vpop.f32.mrb[10].mxu0 }
 0x16b   : > { %v9157_v58 = vpop.f32.mrb[11].mxu1  ;;  %6912 = vmatmul.mubr.msk.f32.gmra.mrb[116].mxu0 %vm325_vm3, %v9001_v47  ;;  %6922 = vmatmul.mubr.msk.f32.gmra.mrb[116].mxu1 %vm325_vm3, %v9162_v1  ;;  %v9166_v2 = vpop.f32.mrb[11].mxu0 }
 0x16c   : > { %1796 = vmatprep.mubr.f32.mxu0 %v12018_v0  ;;  %1909 = vmatprep.mubr.f32.mxu1 %v12018_v0 }
 0x16e   : > { %v9170_v3 = vpop.f32.mrb[12].mxu1  ;;  %v9172_v4 = vpop.f32.mrb[12].mxu0 }
 0x16f   : > { %v9174_v27 = vpop.f32.mrb[13].mxu1  ;;  %6913 = vmatmul.mubr.msk.f32.gmra.mrb[118].mxu0 %vm325_vm3, %v9061_v32  ;;  %6923 = vmatmul.mubr.msk.f32.gmra.mrb[118].mxu1 %vm325_vm3, %v9179_v5  ;;  %v9183_v6 = vpop.f32.mrb[13].mxu0 }
 0x170   : > { %1915 = vmatprep.mubr.f32.mxu1 %v12018_v0  ;;  %2016 = vmatprep.mubr.f32.mxu0 %v12018_v0 }
 0x172   : > { %v9187_v7 = vpop.f32.mrb[14].mxu1  ;;  %v9189_v8 = vpop.f32.mrb[14].mxu0 }
 0x173   : > { %v9191_v9 = vpop.f32.mrb[15].mxu1  ;;  %6924 = vmatmul.mubr.msk.f32.gmra.mrb[120].mxu1 %vm325_vm3, %v9194_v11  ;;  %6932 = vmatmul.mubr.msk.f32.vlgmr.msra.gmra.mrb[120].mxu0 %vm325_vm3, %v9014_v25  ;;  %v9200_v12 = vpop.f32.mrb[15].mxu0 }
 0x174   : > { %1921 = vmatprep.mubr.f32.mxu1 %v12018_v0  ;;  %2022 = vmatprep.mubr.f32.mxu0 %v12018_v0 }
 0x176   : > { %v9204_v13 = vpop.f32.mrb[16].mxu1  ;;  %v9206_v14 = vpop.f32.mrb[16].mxu0 }
 0x177   : > { %v9208_v15 = vpop.f32.mrb[17].mxu1  ;;  %6925 = vmatmul.mubr.msk.f32.gmra.mrb[122].mxu1 %vm325_vm3, %v8733_v62  ;;  %6933 = vmatmul.mubr.msk.f32.gmra.mrb[122].mxu0 %vm325_vm3, %v9025_v28  ;;  %v9214_v21 = vpop.f32.mrb[17].mxu0 }
 0x178   : > { %1927 = vmatprep.mubr.f32.mxu1 %v12018_v0  ;;  %2028 = vmatprep.mubr.f32.mxu0 %v12018_v0 }
 0x17a   : > { %v9218_v16 = vpop.f32.mrb[18].mxu1  ;;  %v9220_v52 = vpop.f32.mrb[18].mxu0 }
 0x17b   : > { %v9222_v53 = vpop.f32.mrb[19].mxu1  ;;  %6926 = vmatmul.mubr.msk.f32.gmra.mrb[124].mxu1 %vm325_vm3, %v8736_v63  ;;  %6934 = vmatmul.mubr.msk.f32.gmra.mrb[124].mxu0 %vm325_vm3, %v9036_v29  ;;  %v9228_v62 = vpop.f32.mrb[19].mxu0 }
 0x17c   : > { %1933 = vmatprep.mubr.f32.mxu1 %v12018_v0  ;;  %2034 = vmatprep.mubr.f32.mxu0 %v12018_v0 }
 0x17e   : > { %v9232_v17 = vpop.f32.mrb[20].mxu1  ;;  %v9234_v18 = vpop.f32.mrb[20].mxu0 }
 0x17f   : > { %v9236_v19 = vpop.f32.mrb[21].mxu1  ;;  %6927 = vmatmul.mubr.msk.f32.gmra.mrb[126].mxu1 %vm325_vm3, %v8995_v26  ;;  %6935 = vmatmul.mubr.msk.f32.gmra.mrb[126].mxu0 %vm325_vm3, %v9045_v30  ;;  %v9242_v63 = vpop.f32.mrb[21].mxu0 }
 0x180   : > { %1939 = vmatprep.mubr.f32.mxu1 %v12018_v0  ;;  %2040 = vmatprep.mubr.f32.mxu0 %v12018_v0 }
 0x182   : > { %v9246_v20 = vpop.f32.mrb[22].mxu1  ;;  %v9248_v23 = vpop.f32.mrb[22].mxu0 }
 0x183   : > { %12151 = vst [vmem:[#allocation17_spill] sm:$0xff] %v9248_v23  ;;  %v9250_v24 = vpop.f32.mrb[23].mxu1  ;;  %6928 = vmatmul.mubr.msk.f32.gmra.mrb[128].mxu1 %vm325_vm3, %v9001_v47  ;;  %6936 = vmatmul.mubr.msk.f32.gmra.mrb[128].mxu0 %vm325_vm3, %v9054_v31  ;;  %v9256_v48 = vpop.f32.mrb[23].mxu0 }
 0x184   : > { %12152 = vst [vmem:[#allocation18_spill] sm:$0xff] %v9256_v48  ;;  %1945 = vmatprep.mubr.f32.mxu1 %v12018_v0  ;;  %2046 = vmatprep.mubr.f32.mxu0 %v12018_v0 }
 0x186   : > { %v9260_v33 = vpop.f32.mrb[24].mxu1  ;;  %v9262_v34 = vpop.f32.mrb[24].mxu0 }
 0x187   : > { %12153 = vst [vmem:[#allocation19_spill] sm:$0xff] %v9262_v34  ;;  %v9264_v35 = vpop.f32.mrb[25].mxu1  ;;  %6929 = vmatmul.mubr.msk.f32.gmra.mrb[130].mxu1 %vm325_vm3, %v9061_v32  ;;  %6937 = vmatmul.mubr.msk.f32.gmra.mrb[130].mxu0 %vm325_vm3, %v9145_v54  ;;  %v9270_v23 = vpop.f32.mrb[25].mxu0 }
 0x188   : > { %12154 = vst [vmem:[#allocation20_spill] sm:$0xff] %v9270_v23  ;;  %2052 = vmatprep.mubr.f32.mxu0 %v12018_v0  ;;  %7383 = vmatprep.mubr.msk.f32.mxu1 %vm325_vm3, %v9014_v25 }
 0x18a   : > { %v9275_v48 = vpop.f32.mrb[26].mxu1  ;;  %v9277_v40 = vpop.f32.mrb[26].mxu0 }
 0x18b   : > { %12155 = vst [vmem:[#allocation21_spill] sm:$0xff] %v9277_v40  ;;  %v9279_v34 = vpop.f32.mrb[27].mxu1  ;;  %6938 = vmatmul.mubr.msk.f32.gmra.mrb[132].mxu0 %vm325_vm3, %v9162_v1  ;;  %7384 = vmatmul.mubr.msk.f32.vlgmr.msra.gmra.mrb[132].mxu1 %vm325_vm3, %v9025_v28  ;;  %v9285_v42 = vpop.f32.mrb[27].mxu0 }
 0x18c   : > { %12156 = vst [vmem:[#allocation22_spill] sm:$0xff] %v9279_v34  ;;  %12157 = vst [vmem:[#allocation23_spill] sm:$0xff] %v9285_v42  ;;  %2058 = vmatprep.mubr.f32.mxu0 %v12018_v0  ;;  %7386 = vmatprep.mubr.msk.f32.mxu1 %vm325_vm3, %v9036_v29 }
 0x18e   : > { %v9290_v25 = vpop.f32.mrb[28].mxu1  ;;  %v9292_v23 = vpop.f32.mrb[28].mxu0 }
 0x18f   : > { %12158 = vst [vmem:[#allocation24_spill] sm:$0xff] %v9290_v25  ;;  %12159 = vst [vmem:[#allocation25_spill] sm:$0xff] %v9292_v23  ;;  %v9294_v40 = vpop.f32.mrb[29].mxu1  ;;  %6939 = vmatmul.mubr.msk.f32.gmra.mrb[134].mxu0 %vm325_vm3, %v9179_v5  ;;  %7387 = vmatmul.mubr.msk.f32.gmra.mrb[134].mxu1 %vm325_vm3, %v9045_v30  ;;  %v9300_v28 = vpop.f32.mrb[29].mxu0 }
 0x190   : > { %12160 = vst [vmem:[#allocation26_spill] sm:$0xff] %v9294_v40  ;;  %12161 = vst [vmem:[#allocation27_spill] sm:$0xff] %v9300_v28  ;;  %2064 = vmatprep.mubr.f32.mxu0 %v12018_v0  ;;  %7389 = vmatprep.mubr.msk.f32.mxu1 %vm325_vm3, %v9054_v31 }
 0x192   : > { %v9305_v29 = vpop.f32.mrb[30].mxu1  ;;  %v9307_v42 = vpop.f32.mrb[30].mxu0 }
 0x193   : > { %12162 = vst [vmem:[#allocation28_spill] sm:$0xff] %v9305_v29  ;;  %12163 = vst [vmem:[#allocation29_spill] sm:$0xff] %v9307_v42  ;;  %v9309_v23 = vpop.f32.mrb[31].mxu1  ;;  %6940 = vmatmul.mubr.msk.f32.gmra.mrb[136].mxu0 %vm325_vm3, %v9194_v11  ;;  %7390 = vmatmul.mubr.msk.f32.gmra.mrb[136].mxu1 %vm325_vm3, %v9145_v54  ;;  %v9315_v30 = vpop.f32.mrb[31].mxu0 }
 0x194   : > { %12164 = vst [vmem:[#allocation30_spill] sm:$0xff] %v9309_v23  ;;  %12165 = vst [vmem:[#allocation31_spill] sm:$0xff] %v9315_v30  ;;  %2070 = vmatprep.mubr.f32.mxu0 %v12018_v0  ;;  %7392 = vmatprep.mubr.msk.f32.mxu1 %vm325_vm3, %v9162_v1  ;;  %v8292_v23 = vld [vmem:[%s8624_s15 + $0x48] sm:$0xff] }
 0x196   : > { %v9320_v31 = vpop.f32.mrb[32].mxu1  ;;  %v9322_v28 = vpop.f32.mrb[32].mxu0 }
 0x197   : > { %12166 = vst [vmem:[#allocation32_spill] sm:$0xff] %v9320_v31  ;;  %12167 = vst [vmem:[#allocation33_spill] sm:$0xff] %v9322_v28  ;;  %v9324_v42 = vpop.f32.mrb[33].mxu1  ;;  %6941 = vmatmul.mubr.msk.f32.gmra.mrb[138].mxu0 %vm325_vm3, %v8292_v23  ;;  %7393 = vmatmul.mubr.msk.f32.gmra.mrb[138].mxu1 %vm325_vm3, %v9179_v5  ;;  %v9330_v54 = vpop.f32.mrb[33].mxu0 }
 0x198   : > { %12168 = vst [vmem:[#allocation34_spill] sm:$0xff] %v9324_v42  ;;  %12169 = vst [vmem:[#allocation35_spill] sm:$0xff] %v9330_v54  ;;  %2076 = vmatprep.mubr.f32.mxu0 %v12018_v0  ;;  %7395 = vmatprep.mubr.msk.f32.mxu1 %vm325_vm3, %v9194_v11  ;;  %v8293_v42 = vld [vmem:[%s8624_s15 + $0x50] sm:$0xff] }
 0x19a   : > { %v9335_v1 = vpop.f32.mrb[34].mxu1  ;;  %v9337_v30 = vpop.f32.mrb[34].mxu0 }
 0x19b   : > { %12170 = vst [vmem:[#allocation36_spill] sm:$0xff] %v9335_v1  ;;  %12171 = vst [vmem:[#allocation37_spill] sm:$0xff] %v9337_v30  ;;  %v9339_v28 = vpop.f32.mrb[35].mxu1  ;;  %6942 = vmatmul.mubr.msk.f32.gmra.mrb[140].mxu0 %vm325_vm3, %v8293_v42  ;;  %7396 = vmatmul.mubr.msk.f32.gmra.mrb[140].mxu1 %vm325_vm3, %v8292_v23  ;;  %v9344_v29 = vpop.f32.mrb[35].mxu0 }
 0x19c   : > { %12172 = vst [vmem:[#allocation38_spill] sm:$0xff] %v9339_v28  ;;  %12173 = vst [vmem:[#allocation39_spill] sm:$0xff] %v9344_v29  ;;  %2082 = vmatprep.mubr.f32.mxu0 %v12018_v0  ;;  %7398 = vmatprep.mubr.msk.f32.mxu1 %vm325_vm3, %v8293_v42 }
 0x19e   : > { %v9348_v5 = vpop.f32.mrb[36].mxu1  ;;  %v9350_v11 = vpop.f32.mrb[36].mxu0 }
 0x19f   : > { %12174 = vst [vmem:[#allocation40_spill] sm:$0xff] %v9348_v5  ;;  %12175 = vst [vmem:[#allocation41_spill] sm:$0xff] %v9350_v11  ;;  %v9352_v54 = vpop.f32.mrb[37].mxu1  ;;  %6943 = vmatmul.mubr.msk.f32.gmra.mrb[142].mxu0 %vm325_vm3, %v8995_v26  ;;  %7399 = vmatmul.mubr.msk.f32.gmra.mrb[142].mxu1 %vm325_vm3, %v8995_v26  ;;  %v9358_v30 = vpop.f32.mrb[37].mxu0 }
 0x1a0   : > { %12176 = vst [vmem:[#allocation42_spill] sm:$0xff] %v9352_v54  ;;  %12177 = vst [vmem:[#allocation43_spill] sm:$0xff] %v9358_v30  ;;  %2088 = vmatprep.mubr.f32.mxu0 %v12018_v0  ;;  %7401 = vmatprep.mubr.msk.f32.mxu1 %vm325_vm3, %v9001_v47 }
 0x1a2   : > { %v9363_v42 = vpop.f32.mrb[38].mxu1  ;;  %v9365_v23 = vpop.f32.mrb[38].mxu0 }
 0x1a3   : > { %12178 = vst [vmem:[#allocation44_spill] sm:$0xff] %v9363_v42  ;;  %12179 = vst [vmem:[#allocation45_spill] sm:$0xff] %v9365_v23  ;;  %v9367_v11 = vpop.f32.mrb[39].mxu1  ;;  %6944 = vmatmul.mubr.msk.f32.gmra.mrb[144].mxu0 %vm325_vm3, %v9001_v47  ;;  %7402 = vmatmul.mubr.msk.f32.gmra.mrb[144].mxu1 %vm325_vm3, %v9061_v32  ;;  %v9373_v26 = vpop.f32.mrb[39].mxu0 }
 0x1a4   : > { %12180 = vst [vmem:[#allocation46_spill] sm:$0xff] %v9367_v11  ;;  %12181 = vst [vmem:[#allocation47_spill] sm:$0xff] %v9373_v26  ;;  %2094 = vmatprep.mubr.f32.mxu0 %v12018_v0  ;;  %4035 = vmatprep.mubr.f32.mxu1 %v12018_v0 }
 0x1a6   : > { %v9377_v30 = vpop.f32.mrb[40].mxu1  ;;  %v9379_v29 = vpop.f32.mrb[40].mxu0 }
 0x1a7   : > { %12182 = vst [vmem:[#allocation48_spill] sm:$0xff] %v9377_v30  ;;  %12183 = vst [vmem:[#allocation49_spill] sm:$0xff] %v9379_v29  ;;  %v9381_v42 = vpop.f32.mrb[41].mxu1  ;;  %6945 = vmatmul.mubr.msk.f32.gmra.mrb[146].mxu0 %vm325_vm3, %v9061_v32  ;;  %v9385_v23 = vpop.f32.mrb[41].mxu0 }
 0x1a8   : > { %12184 = vst [vmem:[#allocation50_spill] sm:$0xff] %v9381_v42  ;;  %12185 = vst [vmem:[#allocation51_spill] sm:$0xff] %v9385_v23  ;;  %4142 = vmatprep.mubr.f32.mxu0 %v12018_v0 }
 0x1a9   : > { %vm6654_vm3 = vmor %vm11994_vm2, %vm11989_vm1 }
 0x1aa   : > { %v9388_v47 = vpop.f32.mrb[42].mxu1  ;;  %v9390_v26 = vpop.f32.mrb[42].mxu0 }
 0x1ab   : > { %12186 = vst [vmem:[#allocation52_spill] sm:$0xff] %v9388_v47  ;;  %12187 = vst [vmem:[#allocation53_spill] sm:$0xff] %v9390_v26  ;;  %v9392_v11 = vpop.f32.mrb[43].mxu1  ;;  %v9394_v5 = vpop.f32.mrb[43].mxu0 }
 0x1ac   : > { %12188 = vst [vmem:[#allocation54_spill] sm:$0xff] %v9392_v11  ;;  %12189 = vst [vmem:[#allocation55_spill] sm:$0xff] %v9394_v5 }
 0x1ae   : > { %v9396_v30 = vpop.f32.mrb[44].mxu1  ;;  %v9398_v29 = vpop.f32.mrb[44].mxu0 }
 0x1af   : > { %12190 = vst [vmem:[#allocation56_spill] sm:$0xff] %v9396_v30  ;;  %12191 = vst [vmem:[#allocation57_spill] sm:$0xff] %v9398_v29  ;;  %v9400_v42 = vpop.f32.mrb[45].mxu1  ;;  %v9402_v54 = vpop.f32.mrb[45].mxu0 }
 0x1b0   : > { %12192 = vst [vmem:[#allocation58_spill] sm:$0xff] %v9400_v42  ;;  %12193 = vst [vmem:[#allocation59_spill] sm:$0xff] %v9402_v54 }
 0x1b2   : > { %v9404_v32 = vpop.f32.mrb[46].mxu1  ;;  %v9406_v23 = vpop.f32.mrb[46].mxu0 }
 0x1b3   : > { %12194 = vst [vmem:[#allocation60_spill] sm:$0xff] %v9404_v32  ;;  %12195 = vst [vmem:[#allocation61_spill] sm:$0xff] %v9406_v23  ;;  %v9408_v0 = vpop.f32.mrb[47].mxu1  ;;  %v9410_v47 = vpop.f32.mrb[47].mxu0 }
 0x1b4   : > { %12196 = vst [vmem:[#allocation62_spill] sm:$0xff] %v9408_v0  ;;  %12197 = vst [vmem:[#allocation63_spill] sm:$0xff] %v9410_v47 }
 0x1b6   : > { %v1088_v26 = vpop.f32.mrb[48].mxu1  ;;  %v9412_v11 = vpop.f32.mrb[48].mxu0 }
 0x1b7   : > { %12198 = vst [vmem:[#allocation64_spill] sm:$0xff] %v9412_v11  ;;  %v1090_v5 = vpop.f32.mrb[49].mxu1  ;;  %v9414_v1 = vpop.f32.mrb[49].mxu0  ;;  %v2335_v42 = vrot.slane %v1088_v26, 1 }
 0x1b8   : > { %12199 = vst [vmem:[#allocation65_spill] sm:$0xff] %v9414_v1  ;;  %v2338_v32 = vrot.slane %v1090_v5, 1 }
 0x1ba   : > { %v1094_v30 = vpop.f32.mrb[50].mxu1  ;;  %v1237_v29 = vpop.f32.mrb[50].mxu0 }
 0x1bb   : > { %v2336_v28 = vrot.slane %v1094_v30, 1  ;;  %v1096_v54 = vpop.f32.mrb[51].mxu1  ;;  %v1239_v31 = vpop.f32.mrb[51].mxu0  ;;  %v2341_v0 = vrot.slane %v1237_v29, 1 }
 0x1bc   : > { %v2339_v40 = vrot.slane %v1096_v54, 1  ;;  %v2344_v25 = vrot.slane %v1239_v31, 1 }
 0x1bd   : > { %v2337_v23 = vsel %vm2334_vm4, %v2335_v42, %v2336_v28 }
 0x1be   : > { %v9418_v47 = vadd.f32 %v2337_v23, %v9078_v36  ;;  %v2340_v11 = vsel %vm2334_vm4, %v2338_v32, %v2339_v40  ;;  %v1100_v38 = vpop.f32.mrb[52].mxu1  ;;  %v1243_v1 = vpop.f32.mrb[52].mxu0 }
 0x1bf   : > { %v9422_v10 = vadd.f32 %v2340_v11, %v9088_v59  ;;  %v2356_v26 = vrot.slane %v1100_v38, 1  ;;  %v2342_v30 = vrot.slane %v1243_v1, 1  ;;  %v1102_v34 = vpop.f32.mrb[53].mxu1  ;;  %v1245_v37 = vpop.f32.mrb[53].mxu0 }
 0x1c0   : > { %v2358_v5 = vrot.slane %v1102_v34, 1  ;;  %v2345_v54 = vrot.slane %v1245_v37, 1 }
 0x1c1   : > { %v2357_v42 = vsel %vm2334_vm4, %v2336_v28, %v2356_v26  ;;  %v2343_v29 = vsel %vm2334_vm4, %v2341_v0, %v2342_v30 }
 0x1c2   : > { %v9427_v36 = vadd.f32 %v2357_v42, %v9096_v39  ;;  %v9430_v31 = vadd.f32 %v2343_v29, %v9122_v43  ;;  %v2359_v23 = vsel %vm2334_vm4, %v2339_v40, %v2358_v5  ;;  %v2346_v59 = vsel %vm2334_vm4, %v2344_v25, %v2345_v54  ;;  %v1106_v38 = vpop.f32.mrb[54].mxu1  ;;  %v1249_v1 = vpop.f32.mrb[54].mxu0 }
 0x1c3   : > { %v9435_v11 = vadd.f32 %v2359_v23, %v9104_v60  ;;  %v9438_v37 = vadd.f32 %v2346_v59, %v9126_v45  ;;  %v2370_v34 = vrot.slane %v1106_v38, 1  ;;  %v2360_v0 = vrot.slane %v1249_v1, 1  ;;  %v1108_v28 = vpop.f32.mrb[55].mxu1  ;;  %v1251_v39 = vpop.f32.mrb[55].mxu0 }
 0x1c4   : > { %v2372_v32 = vrot.slane %v1108_v28, 1  ;;  %v2362_v42 = vrot.slane %v1251_v39, 1 }
 0x1c5   : > { %v2371_v43 = vsel %vm2334_vm4, %v2356_v26, %v2370_v34  ;;  %v2361_v40 = vsel %vm2334_vm4, %v2342_v30, %v2360_v0 }
 0x1c6   : > { %v9443_v25 = vadd.f32 %v2371_v43, %v9110_v41  ;;  %v9446_v29 = vadd.f32 %v2361_v40, %v9136_v49  ;;  %v2373_v60 = vsel %vm2334_vm4, %v2358_v5, %v2372_v32  ;;  %v2363_v45 = vsel %vm2334_vm4, %v2345_v54, %v2362_v42  ;;  %v1112_v23 = vpop.f32.mrb[56].mxu1  ;;  %v1255_v59 = vpop.f32.mrb[56].mxu0 }
 0x1c7   : > { %v9451_v38 = vadd.f32 %v2373_v60, %v9118_v61  ;;  %v9454_v1 = vadd.f32 %v2363_v45, %v9140_v51  ;;  %v2384_v26 = vrot.slane %v1112_v23, 1  ;;  %v2374_v30 = vrot.slane %v1255_v59, 1  ;;  %v1114_v28 = vpop.f32.mrb[57].mxu1  ;;  %v1257_v41 = vpop.f32.mrb[57].mxu0 }
 0x1c8   : > { %v2386_v39 = vrot.slane %v1114_v28, 1  ;;  %v2376_v43 = vrot.slane %v1257_v41, 1 }
 0x1c9   : > { %v2385_v49 = vsel %vm2334_vm4, %v2370_v34, %v2384_v26  ;;  %v2375_v5 = vsel %vm2334_vm4, %v2360_v0, %v2374_v30 }
 0x1ca   : > { %v9459_v54 = vadd.f32 %v2385_v49, %v9124_v44  ;;  %v9462_v40 = vadd.f32 %v2375_v5, %v9153_v56  ;;  %v2387_v61 = vsel %vm2334_vm4, %v2372_v32, %v2386_v39  ;;  %v2377_v51 = vsel %vm2334_vm4, %v2362_v42, %v2376_v43  ;;  %v1118_v60 = vpop.f32.mrb[58].mxu1  ;;  %v1261_v45 = vpop.f32.mrb[58].mxu0 }
 0x1cb   : > { %v9467_v23 = vadd.f32 %v2387_v61, %v9132_v46  ;;  %v9470_v59 = vadd.f32 %v2377_v51, %v9157_v58  ;;  %v2398_v34 = vrot.slane %v1118_v60, 1  ;;  %v2388_v0 = vrot.slane %v1261_v45, 1  ;;  %v1120_v28 = vpop.f32.mrb[59].mxu1  ;;  %v1263_v44 = vpop.f32.mrb[59].mxu0 }
 0x1cc   : > { %v2400_v41 = vrot.slane %v1120_v28, 1  ;;  %v2390_v49 = vrot.slane %v1263_v44, 1 }
 0x1cd   : > { %v2399_v56 = vsel %vm2334_vm4, %v2384_v26, %v2398_v34  ;;  %v2389_v32 = vsel %vm2334_vm4, %v2374_v30, %v2388_v0 }
 0x1ce   : > { %v9475_v42 = vadd.f32 %v2399_v56, %v9138_v50  ;;  %v9478_v5 = vadd.f32 %v2389_v32, %v9170_v3  ;;  %v2401_v46 = vsel %vm2334_vm4, %v2386_v39, %v2400_v41  ;;  %v2391_v58 = vsel %vm2334_vm4, %v2376_v43, %v2390_v49  ;;  %v1124_v61 = vpop.f32.mrb[60].mxu1  ;;  %v1267_v51 = vpop.f32.mrb[60].mxu0 }
 0x1cf   : > { %v9483_v60 = vadd.f32 %v2401_v46, %v9149_v55  ;;  %v9486_v45 = vadd.f32 %v2391_v58, %v9174_v27  ;;  %v2412_v26 = vrot.slane %v1124_v61, 1  ;;  %v2402_v30 = vrot.slane %v1267_v51, 1  ;;  %v1126_v28 = vpop.f32.mrb[61].mxu1  ;;  %v1269_v50 = vpop.f32.mrb[61].mxu0 }
 0x1d0   : > { %v2414_v44 = vrot.slane %v1126_v28, 1  ;;  %v2404_v56 = vrot.slane %v1269_v50, 1 }
 0x1d1   : > { %v2413_v3 = vsel %vm2334_vm4, %v2398_v34, %v2412_v26  ;;  %v2403_v39 = vsel %vm2334_vm4, %v2388_v0, %v2402_v30 }
 0x1d2   : > { %v9491_v43 = vadd.f32 %v2413_v3, %v9155_v22  ;;  %v9494_v32 = vadd.f32 %v2403_v39, %v9187_v7  ;;  %v2415_v55 = vsel %vm2334_vm4, %v2400_v41, %v2414_v44  ;;  %v2405_v27 = vsel %vm2334_vm4, %v2390_v49, %v2404_v56  ;;  %v1130_v46 = vpop.f32.mrb[62].mxu1  ;;  %v1273_v58 = vpop.f32.mrb[62].mxu0 }
 0x1d3   : > { %v9499_v61 = vadd.f32 %v2415_v55, %v9166_v2  ;;  %v9502_v51 = vadd.f32 %v2405_v27, %v9191_v9  ;;  %v2426_v34 = vrot.slane %v1130_v46, 1  ;;  %v2416_v0 = vrot.slane %v1273_v58, 1  ;;  %v1132_v28 = vpop.f32.mrb[63].mxu1  ;;  %v1275_v22 = vpop.f32.mrb[63].mxu0 }
 0x1d4   : > { %v2428_v50 = vrot.slane %v1132_v28, 1  ;;  %v2418_v3 = vrot.slane %v1275_v22, 1 }
 0x1d5   : > { %12200 = vst [vmem:[#allocation66_spill] sm:$0xff] %v9502_v51  ;;  %v2427_v7 = vsel %vm2334_vm4, %v2412_v26, %v2426_v34  ;;  %v2417_v41 = vsel %vm2334_vm4, %v2402_v30, %v2416_v0 }
 0x1d6   : > { %v9507_v49 = vadd.f32 %v2427_v7, %v9172_v4  ;;  %v9510_v39 = vadd.f32 %v2417_v41, %v9204_v13  ;;  %v2429_v2 = vsel %vm2334_vm4, %v2414_v44, %v2428_v50  ;;  %v2419_v9 = vsel %vm2334_vm4, %v2404_v56, %v2418_v3  ;;  %v1136_v55 = vpop.f32.mrb[64].mxu1  ;;  %v1279_v27 = vpop.f32.mrb[64].mxu0 }
 0x1d7   : > { %v9515_v46 = vadd.f32 %v2429_v2, %v9183_v6  ;;  %v9518_v58 = vadd.f32 %v2419_v9, %v9208_v15  ;;  %v2440_v26 = vrot.slane %v1136_v55, 1  ;;  %v2430_v30 = vrot.slane %v1279_v27, 1  ;;  %v1138_v28 = vpop.f32.mrb[65].mxu1  ;;  %v1281_v4 = vpop.f32.mrb[65].mxu0 }
 0x1d8   : > { %12201 = vst [vmem:[#allocation67_spill] sm:$0xff] %v9510_v39  ;;  %v2442_v22 = vrot.slane %v1138_v28, 1  ;;  %v2432_v7 = vrot.slane %v1281_v4, 1 }
 0x1d9   : > { %12202 = vst [vmem:[#allocation68_spill] sm:$0xff] %v9518_v58  ;;  %v2441_v13 = vsel %vm2334_vm4, %v2426_v34, %v2440_v26  ;;  %v2431_v44 = vsel %vm2334_vm4, %v2416_v0, %v2430_v30 }
 0x1da   : > { %v9523_v56 = vadd.f32 %v2441_v13, %v9189_v8  ;;  %v9526_v41 = vadd.f32 %v2431_v44, %v9218_v16  ;;  %v2443_v6 = vsel %vm2334_vm4, %v2428_v50, %v2442_v22  ;;  %v2433_v15 = vsel %vm2334_vm4, %v2418_v3, %v2432_v7  ;;  %v1142_v2 = vpop.f32.mrb[66].mxu1  ;;  %v1285_v9 = vpop.f32.mrb[66].mxu0 }
 0x1db   : > { %v9531_v55 = vadd.f32 %v2443_v6, %v9200_v12  ;;  %v9534_v27 = vadd.f32 %v2433_v15, %v9222_v53  ;;  %v2454_v34 = vrot.slane %v1142_v2, 1  ;;  %v2444_v0 = vrot.slane %v1285_v9, 1  ;;  %v1144_v28 = vpop.f32.mrb[67].mxu1  ;;  %v1287_v8 = vpop.f32.mrb[67].mxu0 }
 0x1dc   : > { %12203 = vst [vmem:[#allocation69_spill] sm:$0xff] %v9526_v41  ;;  %v2456_v4 = vrot.slane %v1144_v28, 1  ;;  %v2446_v13 = vrot.slane %v1287_v8, 1 }
 0x1dd   : > { %12204 = vst [vmem:[#allocation70_spill] sm:$0xff] %v9534_v27  ;;  %v2455_v16 = vsel %vm2334_vm4, %v2440_v26, %v2454_v34  ;;  %v2445_v50 = vsel %vm2334_vm4, %v2430_v30, %v2444_v0 }
 0x1de   : > { %v9539_v3 = vadd.f32 %v2455_v16, %v9206_v14  ;;  %v9542_v44 = vadd.f32 %v2445_v50, %v9232_v17  ;;  %v2457_v12 = vsel %vm2334_vm4, %v2442_v22, %v2456_v4  ;;  %v2447_v53 = vsel %vm2334_vm4, %v2432_v7, %v2446_v13  ;;  %v1148_v6 = vpop.f32.mrb[68].mxu1  ;;  %v1291_v15 = vpop.f32.mrb[68].mxu0 }
 0x1df   : > { %v9547_v2 = vadd.f32 %v2457_v12, %v9214_v21  ;;  %v9550_v9 = vadd.f32 %v2447_v53, %v9236_v19  ;;  %v2468_v26 = vrot.slane %v1148_v6, 1  ;;  %v2458_v30 = vrot.slane %v1291_v15, 1  ;;  %v1150_v28 = vpop.f32.mrb[69].mxu1  ;;  %v1293_v14 = vpop.f32.mrb[69].mxu0 }
 0x1e0   : > { %12205 = vst [vmem:[#allocation71_spill] sm:$0xff] %v9542_v44  ;;  %v2470_v8 = vrot.slane %v1150_v28, 1  ;;  %v2460_v16 = vrot.slane %v1293_v14, 1  ;;  %v12236_v44 = vld [vmem:[#allocation30_spill] sm:$0xff] }
 0x1e1   : > { %12206 = vst [vmem:[#allocation72_spill] sm:$0xff] %v9550_v9  ;;  %v2469_v17 = vsel %vm2334_vm4, %v2454_v34, %v2468_v26  ;;  %v2459_v22 = vsel %vm2334_vm4, %v2444_v0, %v2458_v30 }
 0x1e2   : > { %v9555_v7 = vadd.f32 %v2469_v17, %v9220_v52  ;;  %v9558_v50 = vadd.f32 %v2459_v22, %v9246_v20  ;;  %v2471_v21 = vsel %vm2334_vm4, %v2456_v4, %v2470_v8  ;;  %v2461_v19 = vsel %vm2334_vm4, %v2446_v13, %v2460_v16  ;;  %v1154_v12 = vpop.f32.mrb[70].mxu1  ;;  %v1297_v53 = vpop.f32.mrb[70].mxu0 }
 0x1e3   : > { %v9563_v6 = vadd.f32 %v2471_v21, %v9228_v62  ;;  %v9566_v15 = vadd.f32 %v2461_v19, %v9250_v24  ;;  %v2482_v34 = vrot.slane %v1154_v12, 1  ;;  %v2472_v0 = vrot.slane %v1297_v53, 1  ;;  %v1156_v28 = vpop.f32.mrb[71].mxu1  ;;  %v1299_v52 = vpop.f32.mrb[71].mxu0 }
 0x1e4   : > { %12207 = vst [vmem:[#allocation73_spill] sm:$0xff] %v9558_v50  ;;  %v2484_v14 = vrot.slane %v1156_v28, 1  ;;  %v2474_v17 = vrot.slane %v1299_v52, 1 }
 0x1e5   : > { %12208 = vst [vmem:[#allocation74_spill] sm:$0xff] %v9566_v15  ;;  %v2483_v20 = vsel %vm2334_vm4, %v2468_v26, %v2482_v34  ;;  %v2473_v4 = vsel %vm2334_vm4, %v2458_v30, %v2472_v0 }
 0x1e6   : > { %v9571_v13 = vadd.f32 %v2483_v20, %v9234_v18  ;;  %v9574_v22 = vadd.f32 %v2473_v4, %v9260_v33  ;;  %v2485_v62 = vsel %vm2334_vm4, %v2470_v8, %v2484_v14  ;;  %v2475_v24 = vsel %vm2334_vm4, %v2460_v16, %v2474_v17  ;;  %v1160_v21 = vpop.f32.mrb[72].mxu1  ;;  %v1303_v19 = vpop.f32.mrb[72].mxu0 }
 0x1e7   : > { %v9579_v12 = vadd.f32 %v2485_v62, %v9242_v63  ;;  %v9582_v53 = vadd.f32 %v2475_v24, %v9264_v35  ;;  %v2496_v26 = vrot.slane %v1160_v21, 1  ;;  %v2486_v30 = vrot.slane %v1303_v19, 1  ;;  %v1162_v28 = vpop.f32.mrb[73].mxu1  ;;  %v1305_v18 = vpop.f32.mrb[73].mxu0  ;;  %v12214_v21 = vld [vmem:[#allocation12_spill] sm:$0xff] }
 0x1e8   : > { %12209 = vst [vmem:[#allocation75_spill] sm:$0xff] %v9574_v22  ;;  %v2498_v52 = vrot.slane %v1162_v28, 1  ;;  %v2488_v20 = vrot.slane %v1305_v18, 1  ;;  %v12216_v28 = vld [vmem:[#allocation22_spill] sm:$0xff] }
 0x1e9   : > { %12210 = vst [vmem:[#allocation76_spill] sm:$0xff] %v9579_v12  ;;  %12211 = vst [vmem:[#allocation77_spill] sm:$0xff] %v9582_v53  ;;  %v2497_v33 = vsel %vm2334_vm4, %v2482_v34, %v2496_v26  ;;  %v2487_v8 = vsel %vm2334_vm4, %v2472_v0, %v2486_v30 }
 0x1ea   : > { %v9587_v16 = vadd.f32 %v2497_v33, %v9076_v57  ;;  %v9590_v4 = vadd.f32 %v2487_v8, %v9275_v48  ;;  %v2499_v63 = vsel %vm2334_vm4, %v2484_v14, %v2498_v52  ;;  %v2489_v35 = vsel %vm2334_vm4, %v2474_v17, %v2488_v20  ;;  %v1166_v62 = vpop.f32.mrb[74].mxu1  ;;  %v1309_v24 = vpop.f32.mrb[74].mxu0  ;;  %v12218_v8 = vld [vmem:[#allocation15_spill] sm:$0xff] }
 0x1eb   : > { %v9595_v19 = vadd.f32 %v2499_v63, %v12214_v21  ;;  %v9598_v18 = vadd.f32 %v2489_v35, %v12216_v28  ;;  %v2510_v34 = vrot.slane %v1166_v62, 1  ;;  %v2500_v0 = vrot.slane %v1309_v24, 1  ;;  %v1168_v53 = vpop.f32.mrb[75].mxu1  ;;  %v1311_v57 = vpop.f32.mrb[75].mxu0  ;;  %v12222_v63 = vld [vmem:[#allocation24_spill] sm:$0xff] }
 0x1ec   : > { %12212 = vst [vmem:[#allocation78_spill] sm:$0xff] %v9587_v16  ;;  %12213 = vst [vmem:[#allocation79_spill] sm:$0xff] %v9590_v4  ;;  %v2512_v33 = vrot.slane %v1168_v53, 1  ;;  %v2502_v22 = vrot.slane %v1311_v57, 1  ;;  %v12220_v4 = vld [vmem:[#allocation13_spill] sm:$0xff]  ;;  %v12224_v62 = vld [vmem:[#allocation16_spill] sm:$0xff] }
 0x1ed   : > { %12215 = vst [vmem:[#allocation12_spill] sm:$0xff] %v9595_v19  ;;  %12217 = vst [vmem:[#allocation22_spill] sm:$0xff] %v9598_v18  ;;  %v2511_v48 = vsel %vm2334_vm4, %v2496_v26, %v2510_v34  ;;  %v9602_v14 = vadd.f32 %v2510_v34, %v12218_v8  ;;  %v2501_v17 = vsel %vm2334_vm4, %v2486_v30, %v2500_v0  ;;  %v12226_v57 = vld [vmem:[#allocation14_spill] sm:$0xff] }
 0x1ee   : > { %v9606_v15 = vadd.f32 %v2511_v48, %v12220_v4  ;;  %v9609_v21 = vadd.f32 %v2501_v17, %v12222_v63  ;;  %v2513_v35 = vsel %vm2334_vm4, %v2498_v52, %v2512_v33  ;;  %v9613_v24 = vadd.f32 %v2512_v33, %v12224_v62  ;;  %v1315_v53 = vpop.f32.mrb[76].mxu0  ;;  %v1386_v28 = vpop.f32.mrb[76].mxu1  ;;  %v12228_v4 = vld [vmem:[#allocation26_spill] sm:$0xff]  ;;  %v12230_v52 = vld [vmem:[#allocation32_spill] sm:$0xff] }
 0x1ef   : > { %12219 = vst [vmem:[#allocation15_spill] sm:$0xff] %v9602_v14  ;;  %v9616_v26 = vadd.f32 %v2513_v35, %v12226_v57  ;;  %v2503_v34 = vsel %vm2334_vm4, %v2488_v20, %v2502_v22  ;;  %v2514_v8 = vrot.slane %v1315_v53, 1  ;;  %v1317_v30 = vpop.f32.mrb[77].mxu0  ;;  %v1388_v18 = vpop.f32.mrb[77].mxu1  ;;  %v12232_v33 = vld [vmem:[#allocation28_spill] sm:$0xff]  ;;  %v12234_v57 = vld [vmem:[#allocation34_spill] sm:$0xff] }
 0x1f0   : > { %12221 = vst [vmem:[#allocation13_spill] sm:$0xff] %v9606_v15  ;;  %12223 = vst [vmem:[#allocation24_spill] sm:$0xff] %v9609_v21  ;;  %v9620_v48 = vadd.f32 %v2503_v34, %v12228_v4  ;;  %v2516_v17 = vrot.slane %v1317_v30, 1  ;;  %v2347_v9 = vrot.slane %v1386_v28, 1 }
 0x1f1   : > { %12225 = vst [vmem:[#allocation16_spill] sm:$0xff] %v9613_v24  ;;  %12227 = vst [vmem:[#allocation14_spill] sm:$0xff] %v9616_v26  ;;  %v2515_v63 = vsel %vm2334_vm4, %v2500_v0, %v2514_v8  ;;  %v9624_v21 = vadd.f32 %v2514_v8, %v12230_v52  ;;  %v2350_v8 = vrot.slane %v1388_v18, 1 }
 0x1f2   : > { %12229 = vst [vmem:[#allocation26_spill] sm:$0xff] %v9620_v48  ;;  %v9627_v62 = vadd.f32 %v2515_v63, %v12232_v33  ;;  %v2517_v35 = vsel %vm2334_vm4, %v2502_v22, %v2516_v17  ;;  %v9631_v50 = vadd.f32 %v2516_v17, %v12234_v57  ;;  %v1392_v20 = vpop.f32.mrb[78].mxu1  ;;  %v7356_v53 = vpop.f32.mrb[78].mxu0  ;;  %v12238_v33 = vld [vmem:[#allocation17_spill] sm:$0xff] }
 0x1f3   : > { %12231 = vst [vmem:[#allocation32_spill] sm:$0xff] %v9624_v21  ;;  %v9634_v34 = vadd.f32 %v2517_v35, %v12236_v44  ;;  %v2348_v30 = vrot.slane %v1392_v20, 1  ;;  %v2354_v4 = vrot.slane %v7356_v53, 1  ;;  %v1394_v0 = vpop.f32.mrb[79].mxu1  ;;  %v1535_v48 = vpop.f32.mrb[79].mxu0  ;;  %v12240_v44 = vld [vmem:[#allocation18_spill] sm:$0xff] }
 0x1f4   : > { %12233 = vst [vmem:[#allocation28_spill] sm:$0xff] %v9627_v62  ;;  %12235 = vst [vmem:[#allocation34_spill] sm:$0xff] %v9631_v50  ;;  %v2351_v52 = vrot.slane %v1394_v0, 1  ;;  %v2353_v21 = vrot.slane %v1535_v48, 1  ;;  %v12242_v20 = vld [vmem:[#allocation38_spill] sm:$0xff] }
 0x1f5   : > { %12237 = vst [vmem:[#allocation30_spill] sm:$0xff] %v9634_v34  ;;  %v2349_v63 = vsel %vm2334_vm4, %v2347_v9, %v2348_v30 }
 0x1f6   : > { %v9638_v22 = vadd.f32 %v2349_v63, %v12238_v33  ;;  %v2352_v17 = vsel %vm2334_vm4, %v2350_v8, %v2351_v52  ;;  %v2355_v57 = vsel %vm2334_vm4, %v2353_v21, %v2354_v4  ;;  %v1398_v28 = vpop.f32.mrb[80].mxu1  ;;  %v7359_v50 = vpop.f32.mrb[80].mxu0  ;;  %v12244_v33 = vld [vmem:[#allocation19_spill] sm:$0xff] }
 0x1f7   : > { %v9643_v35 = vadd.f32 %v2352_v17, %v12240_v44  ;;  %v9646_v53 = vadd.f32 %v2355_v57, %v12242_v20  ;;  %v2364_v18 = vrot.slane %v1398_v28, 1  ;;  %v2382_v0 = vrot.slane %v7359_v50, 1  ;;  %v1400_v48 = vpop.f32.mrb[81].mxu1  ;;  %v1545_v34 = vpop.f32.mrb[81].mxu0  ;;  %v12246_v20 = vld [vmem:[#allocation20_spill] sm:$0xff] }
 0x1f8   : > { %12239 = vst [vmem:[#allocation17_spill] sm:$0xff] %v9638_v22  ;;  %v2366_v9 = vrot.slane %v1400_v48, 1  ;;  %v2368_v62 = vrot.slane %v1545_v34, 1  ;;  %v12248_v50 = vld [vmem:[#allocation36_spill] sm:$0xff]  ;;  %v12250_v34 = vld [vmem:[#allocation42_spill] sm:$0xff] }
 0x1f9   : > { %12241 = vst [vmem:[#allocation18_spill] sm:$0xff] %v9643_v35  ;;  %12243 = vst [vmem:[#allocation38_spill] sm:$0xff] %v9646_v53  ;;  %v2365_v63 = vsel %vm2334_vm4, %v2348_v30, %v2364_v18 }
 0x1fa   : > { %v9650_v8 = vadd.f32 %v2365_v63, %v12244_v33  ;;  %v2367_v21 = vsel %vm2334_vm4, %v2351_v52, %v2366_v9  ;;  %v2369_v22 = vsel %vm2334_vm4, %v2354_v4, %v2368_v62  ;;  %v2383_v17 = vsel %vm2334_vm4, %v2368_v62, %v2382_v0  ;;  %v1404_v44 = vpop.f32.mrb[82].mxu1  ;;  %v7362_v57 = vpop.f32.mrb[82].mxu0  ;;  %v12252_v62 = vld [vmem:[#allocation21_spill] sm:$0xff] }
 0x1fb   : > { %v9656_v28 = vadd.f32 %v2367_v21, %v12246_v20  ;;  %v9659_v53 = vadd.f32 %v12248_v50, %v2369_v22  ;;  %v9662_v48 = vadd.f32 %v2383_v17, %v12250_v34  ;;  %v2378_v30 = vrot.slane %v1404_v44, 1  ;;  %v1406_v63 = vpop.f32.mrb[83].mxu1  ;;  %v1555_v33 = vpop.f32.mrb[83].mxu0  ;;  %v12254_v34 = vld [vmem:[#allocation23_spill] sm:$0xff] }
 0x1fc   : > { %12245 = vst [vmem:[#allocation19_spill] sm:$0xff] %v9650_v8  ;;  %v2410_v8 = vrot.slane %v7362_v57, 1  ;;  %v2380_v52 = vrot.slane %v1406_v63, 1  ;;  %v2396_v35 = vrot.slane %v1555_v33, 1  ;;  %v12258_v63 = vld [vmem:[#allocation46_spill] sm:$0xff] }
 0x1fd   : > { %12247 = vst [vmem:[#allocation20_spill] sm:$0xff] %v9656_v28  ;;  %12249 = vst [vmem:[#allocation36_spill] sm:$0xff] %v9659_v53  ;;  %v2379_v4 = vsel %vm2334_vm4, %v2364_v18, %v2378_v30 }
 0x1fe   : > { %12251 = vst [vmem:[#allocation42_spill] sm:$0xff] %v9662_v48  ;;  %v9666_v27 = vadd.f32 %v2379_v4, %v12252_v62  ;;  %v2381_v21 = vsel %vm2334_vm4, %v2366_v9, %v2380_v52  ;;  %v2397_v20 = vsel %vm2334_vm4, %v2382_v0, %v2396_v35  ;;  %v2411_v22 = vsel %vm2334_vm4, %v2396_v35, %v2410_v8  ;;  %v1410_v50 = vpop.f32.mrb[84].mxu1  ;;  %v7365_v17 = vpop.f32.mrb[84].mxu0  ;;  %v12256_v48 = vld [vmem:[#allocation40_spill] sm:$0xff]  ;;  %v12260_v35 = vld [vmem:[#allocation25_spill] sm:$0xff] }
 0x1ff   : > { %v9672_v44 = vadd.f32 %v2381_v21, %v12254_v34  ;;  %v9675_v57 = vadd.f32 %v12256_v48, %v2397_v20  ;;  %v9678_v33 = vadd.f32 %v2411_v22, %v12258_v63  ;;  %v2392_v18 = vrot.slane %v1410_v50, 1  ;;  %v1412_v4 = vpop.f32.mrb[85].mxu1  ;;  %v1565_v62 = vpop.f32.mrb[85].mxu0  ;;  %v12262_v63 = vld [vmem:[#allocation27_spill] sm:$0xff] }
 0x200   : > { %12253 = vst [vmem:[#allocation21_spill] sm:$0xff] %v9666_v27  ;;  %v2438_v53 = vrot.slane %v7365_v17, 1  ;;  %v2394_v9 = vrot.slane %v1412_v4, 1  ;;  %v2424_v27 = vrot.slane %v1565_v62, 1  ;;  %v12266_v4 = vld [vmem:[#allocation50_spill] sm:$0xff] }
 0x201   : > { %12255 = vst [vmem:[#allocation23_spill] sm:$0xff] %v9672_v44  ;;  %12257 = vst [vmem:[#allocation40_spill] sm:$0xff] %v9675_v57  ;;  %v2393_v0 = vsel %vm2334_vm4, %v2378_v30, %v2392_v18  ;;  %v12268_v44 = vld [vmem:[#allocation29_spill] sm:$0xff] }
 0x202   : > { %12259 = vst [vmem:[#allocation46_spill] sm:$0xff] %v9678_v33  ;;  %v9682_v28 = vadd.f32 %v2393_v0, %v12260_v35  ;;  %v2395_v21 = vsel %vm2334_vm4, %v2380_v52, %v2394_v9  ;;  %v2425_v34 = vsel %vm2334_vm4, %v2410_v8, %v2424_v27  ;;  %v2439_v48 = vsel %vm2334_vm4, %v2424_v27, %v2438_v53  ;;  %v1416_v20 = vpop.f32.mrb[86].mxu1  ;;  %v7368_v22 = vpop.f32.mrb[86].mxu0  ;;  %v12264_v33 = vld [vmem:[#allocation44_spill] sm:$0xff] }
 0x203   : > { %v9688_v50 = vadd.f32 %v2395_v21, %v12262_v63  ;;  %v9691_v17 = vadd.f32 %v12264_v33, %v2425_v34  ;;  %v9694_v62 = vadd.f32 %v2439_v48, %v12266_v4  ;;  %v2406_v30 = vrot.slane %v1416_v20, 1  ;;  %v1418_v0 = vpop.f32.mrb[87].mxu1  ;;  %v1575_v35 = vpop.f32.mrb[87].mxu0  ;;  %v12270_v20 = vld [vmem:[#allocation31_spill] sm:$0xff] }
 0x204   : > { %12261 = vst [vmem:[#allocation25_spill] sm:$0xff] %v9682_v28  ;;  %v2466_v57 = vrot.slane %v7368_v22, 1  ;;  %v2408_v52 = vrot.slane %v1418_v0, 1  ;;  %v2452_v28 = vrot.slane %v1575_v35, 1  ;;  %v3206_v27 = vlaneseq  ;;  %v12272_v22 = vld [vmem:[#allocation48_spill] sm:$0xff]  ;;  %v12274_v35 = vld [vmem:[#allocation54_spill] sm:$0xff] }
 0x205   : > { %12263 = vst [vmem:[#allocation27_spill] sm:$0xff] %v9688_v50  ;;  %12265 = vst [vmem:[#allocation44_spill] sm:$0xff] %v9691_v17  ;;  %v2407_v8 = vsel %vm2334_vm4, %v2392_v18, %v2406_v30  ;;  %v12277_v50 = vld [vmem:[#allocation33_spill] sm:$0xff] }
 0x206   : > { %12267 = vst [vmem:[#allocation50_spill] sm:$0xff] %v9694_v62  ;;  %v9698_v26 = vadd.f32 %v2407_v8, %v12268_v44  ;;  %v2409_v21 = vsel %vm2334_vm4, %v2394_v9, %v2408_v52  ;;  %v2453_v33 = vsel %vm2334_vm4, %v2438_v53, %v2452_v28  ;;  %v2467_v34 = vsel %vm2334_vm4, %v2452_v28, %v2466_v57  ;;  %v1422_v48 = vpop.f32.mrb[88].mxu1  ;;  %v7371_v63 = vpop.f32.mrb[88].mxu0 }
 0x207   : > { %v9704_v4 = vadd.f32 %v2409_v21, %v12270_v20  ;;  %v9707_v0 = vadd.f32 %v12272_v22, %v2453_v33  ;;  %v9710_v18 = vadd.f32 %v2467_v34, %v12274_v35  ;;  %v2420_v62 = vrot.slane %v1422_v48, 1  ;;  %v1424_v44 = vpop.f32.mrb[89].mxu1  ;;  %v1585_v8 = vpop.f32.mrb[89].mxu0  ;;  %v12279_v22 = vld [vmem:[#allocation35_spill] sm:$0xff] }
 0x208   : > { %12269 = vst [vmem:[#allocation29_spill] sm:$0xff] %v9698_v26  ;;  %v2494_v17 = vrot.slane %v7371_v63, 1  ;;  %v2422_v9 = vrot.slane %v1424_v44, 1  ;;  %v2480_v26 = vrot.slane %v1585_v8, 1  ;;  %v9713_v28 = vshrl.u32 %v3206_v27, 7  ;;  %v12281_v63 = vld [vmem:[#allocation52_spill] sm:$0xff] }
 0x209   : > { %12271 = vst [vmem:[#allocation31_spill] sm:$0xff] %v9704_v4  ;;  %12273 = vst [vmem:[#allocation48_spill] sm:$0xff] %v9707_v0  ;;  %v2421_v53 = vsel %vm2334_vm4, %v2406_v30, %v2420_v62  ;;  %v12283_v30 = vld [vmem:[#allocation58_spill] sm:$0xff] }
 0x20a   : > { %12275 = vst [vmem:[#allocation54_spill] sm:$0xff] %v9710_v18  ;;  %12276 = vst [vmem:[#allocation80_spill] sm:$0xff] %v9713_v28  ;;  %v9716_v24 = vadd.f32 %v2421_v53, %v12277_v50  ;;  %v2423_v21 = vsel %vm2334_vm4, %v2408_v52, %v2422_v9  ;;  %v2481_v33 = vsel %vm2334_vm4, %v2466_v57, %v2480_v26  ;;  %v1428_v20 = vpop.f32.mrb[90].mxu1  ;;  %v7374_v48 = vpop.f32.mrb[90].mxu0 }
 0x20b   : > { %v2495_v34 = vsel %vm2334_vm4, %v2480_v26, %v2494_v17  ;;  %v9722_v35 = vadd.f32 %v2423_v21, %v12279_v22  ;;  %v9725_v44 = vadd.f32 %v12281_v63, %v2481_v33  ;;  %v2434_v8 = vrot.slane %v1428_v20, 1  ;;  %v1430_v50 = vpop.f32.mrb[91].mxu1  ;;  %v1595_v53 = vpop.f32.mrb[91].mxu0  ;;  %v12287_v21 = vld [vmem:[#allocation60_spill] sm:$0xff] }
 0x20c   : > { %12278 = vst [vmem:[#allocation33_spill] sm:$0xff] %v9716_v24  ;;  %v9728_v27 = vadd.f32 %v2495_v34, %v12283_v30  ;;  %v2522_v18 = vrot.slane %v7374_v48, 1  ;;  %v2436_v52 = vrot.slane %v1430_v50, 1  ;;  %v2508_v0 = vrot.slane %v1595_v53, 1  ;;  %v12285_v24 = vld [vmem:[#allocation37_spill] sm:$0xff]  ;;  %v12289_v30 = vld [vmem:[#allocation39_spill] sm:$0xff] }
 0x20d   : > { %12280 = vst [vmem:[#allocation35_spill] sm:$0xff] %v9722_v35  ;;  %12282 = vst [vmem:[#allocation52_spill] sm:$0xff] %v9725_v44  ;;  %v2435_v57 = vsel %vm2334_vm4, %v2420_v62, %v2434_v8  ;;  %v3208_v26 = vsub.s32 0, %v9713_v28  ;;  %v12291_v62 = vld [vmem:[#allocation56_spill] sm:$0xff]  ;;  %v12293_v44 = vld [vmem:[#allocation62_spill] sm:$0xff] }
 0x20e   : > { %12284 = vst [vmem:[#allocation58_spill] sm:$0xff] %v9728_v27  ;;  %v9733_v4 = vadd.f32 %v2435_v57, %v12285_v24  ;;  %v9736_v22 = vadd.f32 %v12287_v21, %v2522_v18  ;;  %v2437_v33 = vsel %vm2334_vm4, %v2422_v9, %v2436_v52  ;;  %v2509_v34 = vsel %vm2334_vm4, %v2494_v17, %v2508_v0  ;;  %v1434_v20 = vpop.f32.mrb[92].mxu1  ;;  %v1720_v63 = vpop.f32.mrb[92].mxu0  ;;  %v3204_v9 = vld [vmem:[#allocation4] sm:$0x7f] }
 0x20f   : > { %v9741_v48 = vadd.f32 %v2437_v33, %v12289_v30  ;;  %v2523_v50 = vsel %vm2334_vm4, %v2508_v0, %v2522_v18  ;;  %v9745_v53 = vadd.f32 %v12291_v62, %v2509_v34  ;;  %v2448_v27 = vrot.slane %v1434_v20, 1  ;;  %v1436_v24 = vpop.f32.mrb[93].mxu1  ;;  %v1722_v57 = vpop.f32.mrb[93].mxu0  ;;  %v12295_v18 = vld [vmem:[#allocation41_spill] sm:$0xff] }
 0x210   : > { %12286 = vst [vmem:[#allocation37_spill] sm:$0xff] %v9733_v4  ;;  %12288 = vst [vmem:[#allocation60_spill] sm:$0xff] %v9736_v22  ;;  %v9748_v21 = vadd.f32 %v2523_v50, %v12293_v44  ;;  %v2450_v22 = vrot.slane %v1436_v24, 1  ;;  %v3212_v17 = vsub.s32 1, %v9713_v28  ;;  %v3216_v4 = vsub.s32 2, %v9713_v28  ;;  %v12297_v50 = vld [vmem:[#allocation43_spill] sm:$0xff] }
 0x211   : > { %12290 = vst [vmem:[#allocation39_spill] sm:$0xff] %v9741_v48  ;;  %12292 = vst [vmem:[#allocation56_spill] sm:$0xff] %v9745_v53  ;;  %v2449_v33 = vsel %vm2334_vm4, %v2434_v8, %v2448_v27  ;;  %v2819_v30 = vrot.slane %v1720_v63, 2  ;;  %v3220_v0 = vsub.s32 3, %v9713_v28  ;;  %v2822_v62 = vrot.slane %v1722_v57, 2 }
 0x212   : > { %12294 = vst [vmem:[#allocation62_spill] sm:$0xff] %v9748_v21  ;;  %v9755_v34 = vadd.f32 %v2449_v33, %v12295_v18  ;;  %v2451_v20 = vsel %vm2334_vm4, %v2436_v52, %v2450_v22  ;;  %v1440_v53 = vpop.f32.mrb[94].mxu1  ;;  %v1726_v44 = vpop.f32.mrb[94].mxu0  ;;  %v9761_v35 = vrot.slane %v3204_v9, %v3208_v26  ;;  %v9763_v15 = vrot.slane %v3204_v9, %v3212_v17 }
 0x213   : > { %v9759_v24 = vadd.f32 %v2451_v20, %v12297_v50  ;;  %v2462_v21 = vrot.slane %v1440_v53, 1  ;;  %v2820_v48 = vrot.slane %v1726_v44, 2  ;;  %v1442_v8 = vpop.f32.mrb[95].mxu1  ;;  %v1728_v63 = vpop.f32.mrb[95].mxu0  ;;  %v9765_v33 = vrot.slane %v3204_v9, %v3216_v4  ;;  %v12299_v53 = vld [vmem:[#allocation45_spill] sm:$0xff] }
 0x214   : > { %12296 = vst [vmem:[#allocation41_spill] sm:$0xff] %v9755_v34  ;;  %v2464_v41 = vrot.slane %v1442_v8, 1  ;;  %v2823_v14 = vrot.slane %v1728_v63, 2  ;;  %v9769_v18 = vrot.slane %v3204_v9, %v3220_v0  ;;  %v3224_v20 = vsub.s32 4, %v9713_v28  ;;  %v12301_v63 = vld [vmem:[#allocation47_spill] sm:$0xff] }
 0x215   : > { %12298 = vst [vmem:[#allocation43_spill] sm:$0xff] %v9759_v24  ;;  %v2463_v52 = vsel %vm2334_vm4, %v2448_v27, %v2462_v21  ;;  %v2821_v57 = vsel %vm2818_vm5, %v2819_v30, %v2820_v48 }
 0x216   : > { %v9773_v44 = vadd.f32 %v2463_v52, %v12299_v53  ;;  %v3106_v26 = vadd.f32 %v2821_v57, %v9418_v47  ;;  %v2465_v50 = vsel %vm2334_vm4, %v2450_v22, %v2464_v41  ;;  %v2824_v17 = vsel %vm2818_vm5, %v2822_v62, %v2823_v14  ;;  %v1446_v8 = vpop.f32.mrb[96].mxu1  ;;  %v1732_v4 = vpop.f32.mrb[96].mxu0 }
 0x217   : > { %v9779_v24 = vadd.f32 %v2465_v50, %v12301_v63  ;;  %v3107_v27 = vadd.f32 %v2824_v17, %v9422_v10  ;;  %v2476_v30 = vrot.slane %v1446_v8, 1  ;;  %v2840_v0 = vrot.slane %v1732_v4, 2  ;;  %v1448_v34 = vpop.f32.mrb[97].mxu1  ;;  %v1734_v58 = vpop.f32.mrb[97].mxu0  ;;  %v12304_v17 = vld [vmem:[#allocation49_spill] sm:$0xff] }
 0x218   : > { %12300 = vst [vmem:[#allocation45_spill] sm:$0xff] %v9773_v44  ;;  %v9783_v52 = vadd.f32 %v9761_v35, %v3106_v26  ;;  %v2478_v53 = vrot.slane %v1448_v34, 1  ;;  %v2842_v47 = vrot.slane %v1734_v58, 2  ;;  %v3228_v22 = vsub.s32 5, %v9713_v28 }
 0x219   : > { %12302 = vst [vmem:[#allocation47_spill] sm:$0xff] %v9779_v24  ;;  %v9787_v62 = vadd.f32 %v9763_v15, %v3107_v27  ;;  %v2477_v57 = vsel %vm2334_vm4, %v2462_v21, %v2476_v30  ;;  %v2841_v50 = vsel %vm2818_vm5, %v2820_v48, %v2840_v0  ;;  %v9791_v63 = vrot.slane %v3204_v9, %v3224_v20  ;;  %v12306_v24 = vld [vmem:[#allocation51_spill] sm:$0xff] }
 0x21a   : > { %v9795_v8 = vadd.f32 %v2477_v57, %v12304_v17  ;;  %v3113_v26 = vadd.f32 %v2841_v50, %v9427_v36  ;;  %v2479_v58 = vsel %vm2334_vm4, %v2464_v41, %v2478_v53  ;;  %v1452_v34 = vpop.f32.mrb[98].mxu1  ;;  %v1738_v4 = vpop.f32.mrb[98].mxu0  ;;  %v2843_v21 = vsel %vm2818_vm5, %v2823_v14, %v2842_v47 }
 0x21b   : > { %12303 = vst [vmem:[#allocation81_spill] sm:$0xff] %v9791_v63  ;;  %v9800_v27 = vadd.f32 %v2479_v58, %v12306_v24  ;;  %v2490_v44 = vrot.slane %v1452_v34, 1  ;;  %v2854_v48 = vrot.slane %v1738_v4, 2  ;;  %v1454_v20 = vpop.f32.mrb[99].mxu1  ;;  %v1740_v28 = vpop.f32.mrb[99].mxu0  ;;  %v3114_v57 = vadd.f32 %v2843_v21, %v9435_v11  ;;  %v12310_v4 = vld [vmem:[#allocation53_spill] sm:$0xff] }
 0x21c   : > { %12305 = vst [vmem:[#allocation49_spill] sm:$0xff] %v9795_v8  ;;  %v9804_v10 = vadd.f32 %v9761_v35, %v3113_v26  ;;  %v2492_v17 = vrot.slane %v1454_v20, 1  ;;  %v9807_v36 = vrot.slane %v3204_v9, %v3228_v22  ;;  %v12309_v41 = vmax.f32 %v9783_v52, 0.0 }
 0x21d   : > { %12307 = vst [vmem:[#allocation51_spill] sm:$0xff] %v9800_v27  ;;  %v2491_v24 = vsel %vm2334_vm4, %v2476_v30, %v2490_v44  ;;  %v2855_v14 = vsel %vm2818_vm5, %v2840_v0, %v2854_v48  ;;  %v2856_v58 = vrot.slane %v1740_v28, 2  ;;  %v9824_v28 = vadd.f32 %v9763_v15, %v3114_v57  ;;  %v12314_v57 = vld [vmem:[#allocation57_spill] sm:$0xff] }
 0x21e   : > { %12308 = vst [vmem:[#allocation82_spill] sm:$0xff] %v9807_v36  ;;  %v9811_v50 = vrot.slane %v12309_v41, 1  ;;  %v9817_v27 = vadd.f32 %v2491_v24, %v12310_v4  ;;  %v3120_v26 = vadd.f32 %v2855_v14, %v9443_v25  ;;  %v1458_v11 = vpop.f32.mrb[100].mxu1  ;;  %v1744_v21 = vpop.f32.mrb[100].mxu0  ;;  %v2493_v22 = vsel %vm2334_vm4, %v2478_v53, %v2492_v17  ;;  %v12312_v4 = vld [vmem:[#allocation55_spill] sm:$0xff] }
 0x21f   : > { %v2857_v20 = vsel %vm2818_vm5, %v2842_v47, %v2856_v58  ;;  %v2504_v41 = vrot.slane %v1458_v11, 1  ;;  %v2868_v30 = vrot.slane %v1744_v21, 2  ;;  %v1460_v8 = vpop.f32.mrb[101].mxu1  ;;  %v1746_v0 = vpop.f32.mrb[101].mxu0  ;;  %v9830_v25 = vadd.f32 %v2493_v22, %v12312_v4 }
 0x220   : > { %12311 = vst [vmem:[#allocation53_spill] sm:$0xff] %v9817_v27  ;;  %v9827_v24 = vadd.f32 %v9761_v35, %v3120_v26  ;;  %v3121_v14 = vadd.f32 %v2857_v20, %v9451_v38  ;;  %v2506_v47 = vrot.slane %v1460_v8, 1  ;;  %v2870_v11 = vrot.slane %v1746_v0, 2 }
 0x221   : > { %12313 = vst [vmem:[#allocation55_spill] sm:$0xff] %v9830_v25  ;;  %v2505_v9 = vsel %vm2334_vm4, %v2490_v44, %v2504_v41  ;;  %v2869_v53 = vsel %vm2818_vm5, %v2854_v48, %v2868_v30  ;;  %v12316_v21 = vmax.f32 %v9804_v10, 0.0  ;;  %v12342_v51 = vmax.f32 %v9804_v10, 0.0 }
 0x222   : > { %v9837_v34 = vadd.f32 %v9763_v15, %v3121_v14  ;;  %v9840_v27 = vadd.f32 %v2505_v9, %v12314_v57  ;;  %v3127_v26 = vadd.f32 %v2869_v53, %v9459_v54  ;;  %v1464_v22 = vpop.f32.mrb[102].mxu1  ;;  %v1750_v4 = vpop.f32.mrb[102].mxu0  ;;  %v2507_v38 = vsel %vm2334_vm4, %v2492_v17, %v2506_v47  ;;  %v12317_v54 = vld [vmem:[#allocation59_spill] sm:$0xff]  ;;  %v12319_v57 = vld [vmem:[#allocation64_spill] sm:$0xff] }
 0x223   : > { %v2871_v44 = vsel %vm2818_vm5, %v2856_v58, %v2870_v11  ;;  %v2518_v20 = vrot.slane %v1464_v22, 1  ;;  %v2882_v48 = vrot.slane %v1750_v4, 2  ;;  %v1466_v8 = vpop.f32.mrb[103].mxu1  ;;  %v1752_v0 = vpop.f32.mrb[103].mxu0  ;;  %v9847_v25 = vrot.slane %v12316_v21, 1 }
 0x224   : > { %12315 = vst [vmem:[#allocation57_spill] sm:$0xff] %v9840_v27  ;;  %v9851_v9 = vadd.f32 %v9761_v35, %v3127_v26  ;;  %v9854_v53 = vadd.f32 %v2507_v38, %v12317_v54  ;;  %v3128_v17 = vadd.f32 %v2871_v44, %v9467_v23  ;;  %v12321_v21 = vmax.f32 %v9827_v24, 0.0  ;;  %v12322_v26 = vld [vmem:[#allocation61_spill] sm:$0xff] }
 0x225   : > { %v2519_v58 = vsel %vm2334_vm4, %v2504_v41, %v2518_v20  ;;  %v9859_v22 = vadd.f32 %v2518_v20, %v12319_v57  ;;  %v2883_v4 = vsel %vm2818_vm5, %v2868_v30, %v2882_v48  ;;  %v12324_v41 = vmax.f32 %v9837_v34, 0.0 }
 0x226   : > { %12318 = vst [vmem:[#allocation59_spill] sm:$0xff] %v9854_v53  ;;  %v9864_v27 = vrot.slane %v12321_v21, 1  ;;  %v12022_v14 = vmax.f32 %v9851_v9, 0.0  ;;  %v9868_v36 = vadd.f32 %v2519_v58, %v12322_v26  ;;  %v3134_v38 = vadd.f32 %v2883_v4, %v9475_v42  ;;  %v1756_v54 = vpop.f32.mrb[104].mxu0  ;;  %v1869_v23 = vpop.f32.mrb[104].mxu1 }
 0x227   : > { %12320 = vst [vmem:[#allocation64_spill] sm:$0xff] %v9859_v22  ;;  %v9873_v44 = vrot.slane %v12324_v41, 1  ;;  %v2520_v20 = vrot.slane %v1466_v8, 1  ;;  %v2884_v57 = vrot.slane %v1752_v0, 2  ;;  %v2896_v30 = vrot.slane %v1756_v54, 2  ;;  %v1758_v22 = vpop.f32.mrb[105].mxu0 }
 0x228   : > { %12323 = vst [vmem:[#allocation61_spill] sm:$0xff] %v9868_v36  ;;  %v1871_v53 = vpop.f32.mrb[105].mxu1  ;;  %v9877_v21 = vrot.slane %v12022_v14, 1  ;;  %v9880_v58 = vadd.f32 %v9763_v15, %v3128_v17  ;;  %v9883_v42 = vadd.f32 %v9761_v35, %v3134_v38  ;;  %v2898_v4 = vrot.slane %v1758_v22, 2  ;;  %v12326_v41 = vld [vmem:[#allocation65_spill] sm:$0xff]  ;;  %v12328_v14 = vld [vmem:[#allocation63_spill] sm:$0xff] }
 0x229   : > { %v2521_v26 = vsel %vm2334_vm4, %v2506_v47, %v2520_v20  ;;  %v9887_v36 = vadd.f32 %v2520_v20, %v12326_v41  ;;  %v2885_v8 = vsel %vm2818_vm5, %v2870_v11, %v2884_v57  ;;  %v2897_v0 = vsel %vm2818_vm5, %v2882_v48, %v2896_v30 }
 0x22a   : > { %12325 = vst [vmem:[#allocation83_spill] sm:$0xff] %v9883_v42  ;;  %v9893_v63 = vadd.f32 %v2521_v26, %v12328_v14  ;;  %v3135_v17 = vadd.f32 %v2885_v8, %v9483_v60  ;;  %v3141_v38 = vadd.f32 %v2897_v0, %v9491_v43  ;;  %v9897_v19 = vpop.f32.mrb[106].mxu0  ;;  %v9899_v22 = vpop.f32.mrb[106].mxu1  ;;  %v2825_v47 = vrot.slane %v1869_v23, 2 }
 0x22b   : > { %12327 = vst [vmem:[#allocation65_spill] sm:$0xff] %v9887_v36  ;;  %v2899_v20 = vsel %vm2818_vm5, %v2884_v57, %v2898_v4  ;;  %v2910_v11 = vrot.slane %v9897_v19, 2  ;;  %v12024_v48 = vrot.slane %v9899_v22, 2  ;;  %v9904_v41 = vpop.f32.mrb[107].mxu0  ;;  %v9906_v54 = vpop.f32.mrb[107].mxu1  ;;  %v2828_v26 = vrot.slane %v1871_v53, 2 }
 0x22c   : > { %12329 = vst [vmem:[#allocation63_spill] sm:$0xff] %v9893_v63  ;;  %v9909_v14 = vadd.f32 %v9763_v15, %v3135_v17  ;;  %v9912_v60 = vadd.f32 %v9761_v35, %v3141_v38  ;;  %v3142_v43 = vadd.f32 %v2899_v20, %v9499_v61  ;;  %v2912_v57 = vrot.slane %v9904_v41, 2 }
 0x22d   : > { %v2911_v23 = vsel %vm2818_vm5, %v2896_v30, %v2910_v11  ;;  %v2827_v19 = vsel %vm2818_vm5, %v2825_v47, %v12024_v48  ;;  %v2829_v8 = vrot.slane %v9906_v54, 2  ;;  %v12332_v0 = vmax.f32 %v9883_v42, 0.0 }
 0x22e   : > { %12330 = vst [vmem:[#allocation84_spill] sm:$0xff] %v9909_v14  ;;  %12331 = vst [vmem:[#allocation85_spill] sm:$0xff] %v9912_v60  ;;  %v12025_v38 = vmax.f32 %v9909_v14, 0.0  ;;  %v3148_v61 = vadd.f32 %v2911_v23, %v9507_v49  ;;  %v1768_v53 = vpop.f32.mrb[108].mxu0  ;;  %v1881_v30 = vpop.f32.mrb[108].mxu1  ;;  %v3108_v20 = vadd.f32 %v2827_v19, %v9430_v31  ;;  %v2913_v47 = vsel %vm2818_vm5, %v2898_v4, %v2912_v57 }
 0x22f   : > { %v9923_v17 = vrot.slane %v12332_v0, 1  ;;  %v2830_v41 = vsel %vm2818_vm5, %v2828_v26, %v2829_v8  ;;  %v3347_v54 = vmax.f32 %v9824_v28, 0.0  ;;  %v9932_v48 = vpop.f32.mrb[109].mxu0  ;;  %v9934_v0 = vpop.f32.mrb[109].mxu1  ;;  %v9941_v49 = vadd.f32 %v9763_v15, %v3142_v43 }
 0x230   : > { %v9938_v63 = vrot.slane %v12025_v38, 1  ;;  %v9944_v23 = vadd.f32 %v9761_v35, %v3148_v61  ;;  %v3149_v31 = vadd.f32 %v2913_v47, %v9515_v46  ;;  %v9948_v4 = vadd.f32 %v9765_v33, %v3108_v20 }
 0x231   : > { %v3109_v28 = vadd.f32 %v2830_v41, %v9438_v37  ;;  %v12334_v26 = vmax.f32 %v9787_v62, 0.0  ;;  %v3539_v36 = vrot.slane %v3347_v54, 1  ;;  %v3537_v43 = vsel %vm2334_vm4, %v9811_v50, %v9847_v25 }
 0x232   : > { %12333 = vst [vmem:[#allocation86_spill] sm:$0xff] %v9944_v23  ;;  %v9955_v39 = vadd.f32 %v9763_v15, %v3149_v31  ;;  %v3557_v46 = vsel %vm2334_vm4, %v9847_v25, %v9864_v27  ;;  %v9963_v61 = vpop.f32.mrb[110].mxu0  ;;  %v9965_v37 = vpop.f32.mrb[110].mxu1  ;;  %v12335_v20 = vmax.f32 %v9912_v60, 0.0  ;;  %v12337_v25 = vmax.f32 %v9944_v23, 0.0 }
 0x233   : > { %v3538_v19 = vrot.slane %v12334_v26, 1  ;;  %v3559_v26 = vsel %vm2334_vm4, %v3539_v36, %v9873_v44  ;;  %v9975_v50 = vpop.f32.mrb[111].mxu0  ;;  %v9977_v38 = vpop.f32.mrb[111].mxu1  ;;  %v9984_v14 = vadd.f32 %v9769_v18, %v3109_v28  ;;  %v12341_v42 = vmax.f32 %v9783_v52, 0.0 }
 0x234   : > { %v9969_v47 = vrot.slane %v12335_v20, 1  ;;  %v9981_v16 = vrot.slane %v12337_v25, 1  ;;  %v12340_v20 = vmax.f32 %v9787_v62, 0.0  ;;  %v3830_v41 = vmax.f32 %v3347_v54, %v3559_v26 }
 0x235   : > { %v3540_v31 = vsel %vm2334_vm4, %v3538_v19, %v3539_v36  ;;  %12339 = vst [vmem:[#allocation89_spill] sm:$0xff] %v9984_v14  ;;  %v12034_v19 = vmax.f32 %v9955_v39, 0.0  ;;  %v3822_v36 = vmax.f32 %v12341_v42, %v3537_v43  ;;  %v3829_v12 = vmax.f32 %v12342_v51, %v3557_v46 }
 0x236   : > { %12336 = vst [vmem:[#allocation87_spill] sm:$0xff] %v9969_v47  ;;  %12338 = vst [vmem:[#allocation88_spill] sm:$0xff] %v9981_v16  ;;  %v3823_v60 = vmax.f32 %v12340_v20, %v3540_v31  ;;  %v2924_v47 = vrot.slane %v1768_v53, 2  ;;  %v12343_v23 = vmax.f32 %v9948_v4, 0.0  ;;  %v2844_v28 = vrot.slane %v1881_v30, 2  ;;  %v9998_v62 = vpop.f32.mrb[112].mxu0 }
 0x237   : > { %v2926_v14 = vrot.slane %v9932_v48, 2  ;;  %v10000_v54 = vpop.f32.mrb[112].mxu1  ;;  %v7575_v31 = vpack.c.bf16 %v3829_v12, %v3822_v36  ;;  %v2846_v42 = vrot.slane %v9934_v0, 2  ;;  %v12037_v51 = vrot.slane %v9963_v61, 2  ;;  %v10005_v10 = vpop.f32.mrb[113].mxu0 }
 0x238   : > { %v9995_v25 = vrot.slane %v12343_v23, 1  ;;  %v7573_v16 = vpack.c.bf16 %v3830_v41, %v3823_v60  ;;  %v2925_v52 = vsel %vm2818_vm5, %v2910_v11, %v2924_v47  ;;  %v10007_v53 = vpop.f32.mrb[113].mxu1  ;;  %v12344_v48 = vrot.slane %v9899_v22, 2 }
 0x239   : > { %v3155_v60 = vadd.f32 %v2925_v52, %v9523_v56  ;;  %v2927_v23 = vsel %vm2818_vm5, %v2912_v57, %v2926_v14  ;;  %v12035_v12 = vrot.slane %v9965_v37, 2  ;;  %v2847_v43 = vsel %vm2818_vm5, %v2829_v8, %v2846_v42 }
 0x23a   : > { %7574 = vmatprep.subr.bf16.mxu1 %v7573_v16  ;;  %v2845_v30 = vsel %vm2818_vm5, %v12344_v48, %v2844_v28  ;;  %v3156_v0 = vadd.f32 %v2927_v23, %v9531_v55  ;;  %v2939_v16 = vsel %vm2818_vm5, %v2924_v47, %v12037_v51  ;;  %v3116_v22 = vadd.f32 %v2847_v43, %v9454_v1  ;;  %v10031_v55 = vpop.f32.mrb[114].mxu1 }
 0x23b   : > { %7576 = vmatpush1.bf16.msra.mxu1 %v7575_v31  ;;  %v3115_v11 = vadd.f32 %v2845_v30, %v9446_v29  ;;  %v10022_v56 = vadd.f32 %v9761_v35, %v3155_v60  ;;  %v3162_v57 = vadd.f32 %v2939_v16, %v9539_v3  ;;  %v2859_v46 = vsel %vm2818_vm5, %v2844_v28, %v12035_v12  ;;  %v10029_v29 = vpop.f32.mrb[114].mxu0  ;;  %v10044_v26 = vpop.f32.mrb[115].mxu1 }
 0x23c   : > { %v10035_v8 = vrot.slane %v12034_v19, 1  ;;  %v3122_v41 = vadd.f32 %v2859_v46, %v9462_v40  ;;  %v2940_v1 = vrot.slane %v9975_v50, 2  ;;  %v10042_v3 = vpop.f32.mrb[115].mxu0  ;;  %v10048_v36 = vadd.f32 %v9763_v15, %v3156_v0 }
 0x23d   : > { %v10038_v47 = vadd.f32 %v9765_v33, %v3115_v11  ;;  %v12033_v20 = vmax.f32 %v10022_v56, 0.0  ;;  %v10051_v28 = vadd.f32 %v9761_v35, %v3162_v57  ;;  %v2860_v31 = vrot.slane %v9977_v38, 2 }
 0x23e   : > { %v10056_v40 = vadd.f32 %v9765_v33, %v3122_v41  ;;  %v2941_v50 = vsel %vm2818_vm5, %v2926_v14, %v2940_v1  ;;  %v3361_v60 = vmax.f32 %v9880_v58, 0.0  ;;  %v10061_v48 = vadd.f32 %v9769_v18, %v3116_v22  ;;  %v10066_v0 = vpop.f32.mrb[116].mxu0  ;;  %v10068_v38 = vpop.f32.mrb[116].mxu1 }
 0x23f   : > { %12345 = vst [vmem:[#allocation90_spill] sm:$0xff] %v10051_v28  ;;  %v12032_v52 = vmax.f32 %v10038_v47, 0.0  ;;  %v12036_v30 = vmax.f32 %v10051_v28, 0.0  ;;  %v3163_v23 = vadd.f32 %v2941_v50, %v9547_v2  ;;  %v2861_v11 = vsel %vm2818_vm5, %v2846_v42, %v2860_v31  ;;  %v10076_v22 = vpop.f32.mrb[117].mxu0  ;;  %v10078_v57 = vpop.f32.mrb[117].mxu1 }
 0x240   : > { %12346 = vst [vmem:[#allocation91_spill] sm:$0xff] %v10056_v40  ;;  %v10072_v43 = vrot.slane %v12033_v20, 1  ;;  %v12038_v14 = vmax.f32 %v10056_v40, 0.0  ;;  %v3123_v58 = vadd.f32 %v2861_v11, %v9470_v59  ;;  %v3572_v16 = vrot.slane %v3361_v60, 1  ;;  %v12364_v40 = vld [vmem:[#allocation88_spill] sm:$0xff] }
 0x241   : > { %v10082_v2 = vrot.slane %v12032_v52, 1  ;;  %v10085_v42 = vadd.f32 %v9763_v15, %v3163_v23  ;;  %v3571_v46 = vsel %vm2334_vm4, %v9864_v27, %v9877_v21  ;;  %v3585_v59 = vsel %vm2334_vm4, %v9877_v21, %v9923_v17 }
 0x242   : > { %v10095_v41 = vrot.slane %v12036_v30, 1  ;;  %v10098_v50 = vadd.f32 %v9769_v18, %v3123_v58  ;;  %v3573_v11 = vsel %vm2334_vm4, %v9873_v44, %v3572_v16  ;;  %v3587_v23 = vsel %vm2334_vm4, %v3572_v16, %v9938_v63  ;;  %v10109_v30 = vpop.f32.mrb[118].mxu0  ;;  %v10111_v51 = vpop.f32.mrb[118].mxu1 }
 0x243   : > { %12347 = vst [vmem:[#allocation92_spill] sm:$0xff] %v10085_v42  ;;  %v12349_v27 = vmax.f32 %v9837_v34, 0.0  ;;  %v3844_v19 = vmax.f32 %v3361_v60, %v3587_v23  ;;  %v12350_v21 = vmax.f32 %v9827_v24, 0.0  ;;  %v10115_v58 = vrot.slane %v12038_v14, 1  ;;  %v10123_v60 = vpop.f32.mrb[119].mxu1 }
 0x244   : > { %12348 = vst [vmem:[#allocation93_spill] sm:$0xff] %v10098_v50  ;;  %v12351_v44 = vmax.f32 %v9851_v9, 0.0  ;;  %v2952_v52 = vrot.slane %v9998_v62, 2  ;;  %v2872_v34 = vrot.slane %v10000_v54, 2  ;;  %v12039_v24 = vmax.f32 %v10098_v50, 0.0  ;;  %v12367_v50 = vld [vmem:[#allocation85_spill] sm:$0xff] }
 0x245   : > { %v3837_v20 = vmax.f32 %v12349_v27, %v3573_v11  ;;  %v3836_v12 = vmax.f32 %v12350_v21, %v3571_v46  ;;  %v10121_v11 = vpop.f32.mrb[119].mxu0  ;;  %v2954_v23 = vrot.slane %v10005_v10, 2  ;;  %v2874_v27 = vrot.slane %v10007_v53, 2 }
 0x246   : > { %v3843_v16 = vmax.f32 %v12351_v44, %v3585_v59  ;;  %v12352_v21 = vmax.f32 %v10085_v42, 0.0  ;;  %v12353_v62 = vrot.slane %v9963_v61, 2  ;;  %v12354_v59 = vrot.slane %v9965_v37, 2 }
 0x247   : > { %v7577_v46 = vpack.c.bf16 %v3844_v19, %v3837_v20  ;;  %v2955_v53 = vsel %vm2818_vm5, %v2940_v1, %v2954_v23  ;;  %v2875_v20 = vsel %vm2818_vm5, %v2860_v31, %v2874_v27  ;;  %v12368_v42 = vmax.f32 %v12367_v50, 0.0 }
 0x248   : > { %v10130_v14 = vrot.slane %v12352_v21, 1  ;;  %v7579_v9 = vpack.c.bf16 %v3843_v16, %v3836_v12  ;;  %v2953_v54 = vsel %vm2818_vm5, %v12353_v62, %v2952_v52  ;;  %v2873_v44 = vsel %vm2818_vm5, %v12354_v59, %v2872_v34  ;;  %v10142_v21 = vpop.f32.mrb[120].mxu1  ;;  %v10144_v12 = vpop.f32.mrb[120].mxu0 }
 0x249   : > { %7578 = vmatprep.subr.bf16.mxu1 %v7577_v46  ;;  %v3169_v19 = vadd.f32 %v2953_v54, %v9555_v7  ;;  %v3129_v10 = vadd.f32 %v2873_v44, %v9478_v5  ;;  %v3170_v61 = vadd.f32 %v2955_v53, %v9563_v6  ;;  %v3130_v37 = vadd.f32 %v2875_v20, %v9486_v45  ;;  %v10150_v7 = vpop.f32.mrb[121].mxu1  ;;  %v10152_v5 = vpop.f32.mrb[121].mxu0 }
 0x24a   : > { %7580 = vmatpush1.bf16.msra.mxu1 %v7579_v9  ;;  %v2966_v16 = vrot.slane %v10029_v29, 2  ;;  %v12040_v46 = vrot.slane %v10031_v55, 2  ;;  %v2968_v9 = vrot.slane %v10042_v3, 2  ;;  %v2888_v6 = vrot.slane %v10044_v26, 2 }
 0x24b   : > { %v10155_v1 = vadd.f32 %v9761_v35, %v3169_v19  ;;  %v10158_v31 = vadd.f32 %v9765_v33, %v3129_v10  ;;  %v10164_v45 = vrot.slane %v12039_v24, 1  ;;  %v10167_v29 = vadd.f32 %v9763_v15, %v3170_v61  ;;  %v10179_v19 = vpop.f32.mrb[122].mxu1  ;;  %v10181_v10 = vpop.f32.mrb[122].mxu0 }
 0x24c   : > { %v2967_v62 = vsel %vm2818_vm5, %v2952_v52, %v2966_v16  ;;  %v2887_v54 = vsel %vm2818_vm5, %v2872_v34, %v12040_v46  ;;  %v10175_v44 = vadd.f32 %v9769_v18, %v3130_v37  ;;  %v2969_v53 = vsel %vm2818_vm5, %v2954_v23, %v2968_v9  ;;  %v12358_v34 = vld [vmem:[#allocation87_spill] sm:$0xff]  ;;  %v10189_v37 = vpop.f32.mrb[123].mxu1  ;;  %v10191_v24 = vpop.f32.mrb[123].mxu0 }
 0x24d   : > { %12355 = vst [vmem:[#allocation94_spill] sm:$0xff] %v10155_v1  ;;  %12356 = vst [vmem:[#allocation95_spill] sm:$0xff] %v10158_v31  ;;  %v12043_v59 = vmax.f32 %v10155_v1, 0.0  ;;  %v3176_v3 = vadd.f32 %v2967_v62, %v9571_v13  ;;  %v3136_v26 = vadd.f32 %v2887_v54, %v9494_v32  ;;  %v2889_v52 = vsel %vm2818_vm5, %v2874_v27, %v2888_v6  ;;  %v12363_v54 = vld [vmem:[#allocation66_spill] sm:$0xff]  ;;  %v12365_v13 = vld [vmem:[#allocation83_spill] sm:$0xff] }
 0x24e   : > { %12357 = vst [vmem:[#allocation96_spill] sm:$0xff] %v10175_v44  ;;  %v3375_v20 = vmax.f32 %v9941_v49, 0.0  ;;  %v3599_v61 = vsel %vm2334_vm4, %v9923_v17, %v12358_v34  ;;  %v12362_v49 = vld [vmem:[#allocation76_spill] sm:$0xff]  ;;  %v3137_v17 = vadd.f32 %v2889_v52, %v12363_v54  ;;  %v3613_v28 = vsel %vm2334_vm4, %v12358_v34, %v12364_v40  ;;  %v10215_v44 = vpop.f32.mrb[124].mxu1 }
 0x24f   : > { %v10195_v32 = vrot.slane %v12043_v59, 1  ;;  %v10199_v23 = vadd.f32 %v9761_v35, %v3176_v3  ;;  %v10202_v27 = vadd.f32 %v9765_v33, %v3136_v26  ;;  %v3177_v62 = vadd.f32 %v2969_v53, %v12362_v49  ;;  %12369 = vst [vmem:[#allocation76_spill] sm:$0xff] %v10215_v44  ;;  %v10217_v53 = vpop.f32.mrb[124].mxu0 }
 0x250   : > { %v3600_v46 = vrot.slane %v3375_v20, 1  ;;  %v3857_v26 = vmax.f32 %v12368_v42, %v3613_v28  ;;  %12370 = vst [vmem:[#allocation66_spill] sm:$0xff] %v10217_v53  ;;  %v10223_v49 = vadd.f32 %v9769_v18, %v3137_v17  ;;  %v10231_v50 = vpop.f32.mrb[125].mxu0  ;;  %v12374_v28 = vmax.f32 %v10158_v31, 0.0 }
 0x251   : > { %12359 = vst [vmem:[#allocation87_spill] sm:$0xff] %v10195_v32  ;;  %12360 = vst [vmem:[#allocation97_spill] sm:$0xff] %v10199_v23  ;;  %v12049_v59 = vmax.f32 %v10199_v23, 0.0  ;;  %v12366_v32 = vmax.f32 %v12365_v13, 0.0  ;;  %v10220_v52 = vadd.f32 %v9763_v15, %v3177_v62  ;;  %v12375_v62 = vld [vmem:[#allocation84_spill] sm:$0xff]  ;;  %v2982_v23 = vrot.slane %v10076_v22, 2 }
 0x252   : > { %12361 = vst [vmem:[#allocation98_spill] sm:$0xff] %v10202_v27  ;;  %v3601_v34 = vsel %vm2334_vm4, %v9938_v63, %v3600_v46  ;;  %v3615_v13 = vsel %vm2334_vm4, %v3600_v46, %v10035_v8  ;;  %12373 = vst [vmem:[#allocation85_spill] sm:$0xff] %v10231_v50  ;;  %v10235_v42 = vrot.slane %v12374_v28, 1  ;;  %v12376_v54 = vmax.f32 %v12375_v62, 0.0  ;;  %v12379_v22 = vld [vmem:[#allocation78_spill] sm:$0xff] }
 0x253   : > { %v3850_v3 = vmax.f32 %v12366_v32, %v3599_v61  ;;  %12371 = vst [vmem:[#allocation88_spill] sm:$0xff] %v10220_v52  ;;  %v10229_v61 = vpop.f32.mrb[125].mxu1  ;;  %v10239_v32 = vrot.slane %v12049_v59, 1  ;;  %v3858_v1 = vmax.f32 %v3375_v20, %v3615_v13  ;;  %v12377_v63 = vmax.f32 %v10202_v27, 0.0  ;;  %v12383_v13 = vld [vmem:[#allocation68_spill] sm:$0xff] }
 0x254   : > { %12372 = vst [vmem:[#allocation83_spill] sm:$0xff] %v10229_v61  ;;  %v3851_v17 = vmax.f32 %v12376_v54, %v3601_v34  ;;  %v12051_v46 = vmax.f32 %v10220_v52, 0.0  ;;  %v2980_v50 = vrot.slane %v10066_v0, 2  ;;  %v2900_v28 = vrot.slane %v10068_v38, 2  ;;  %v10252_v31 = vpop.f32.mrb[126].mxu1  ;;  %v10254_v34 = vpop.f32.mrb[126].mxu0 }
 0x255   : > { %v10245_v53 = vrot.slane %v12377_v63, 1  ;;  %v7583_v61 = vpack.c.bf16 %v3857_v26, %v3850_v3  ;;  %v2902_v59 = vrot.slane %v10078_v57, 2  ;;  %v2994_v0 = vrot.slane %v10109_v30, 2  ;;  %v10265_v38 = vpop.f32.mrb[127].mxu0  ;;  %v12381_v63 = vld [vmem:[#allocation67_spill] sm:$0xff] }
 0x256   : > { %v7581_v44 = vpack.c.bf16 %v3858_v1, %v3851_v17  ;;  %v10258_v20 = vrot.slane %v12051_v46, 1  ;;  %v2981_v3 = vsel %vm2818_vm5, %v2966_v16, %v2980_v50  ;;  %v10263_v1 = vpop.f32.mrb[127].mxu1  ;;  %12378 = vst [vmem:[#allocation84_spill] sm:$0xff] %v10265_v38  ;;  %v12380_v26 = vrot.slane %v10031_v55, 2  ;;  %v12382_v46 = vld [vmem:[#allocation12_spill] sm:$0xff] }
 0x257   : > { %v3183_v57 = vadd.f32 %v2981_v3, %v12379_v22  ;;  %v2983_v54 = vsel %vm2818_vm5, %v2968_v9, %v2982_v23  ;;  %v2903_v17 = vsel %vm2818_vm5, %v2888_v6, %v2902_v59  ;;  %v2995_v52 = vsel %vm2818_vm5, %v2980_v50, %v2994_v0  ;;  %v12384_v3 = vld [vmem:[#allocation13_spill] sm:$0xff]  ;;  %v12385_v22 = vld [vmem:[#allocation15_spill] sm:$0xff]  ;;  %v10283_v38 = vpop.f32.mrb[128].mxu1  ;;  %v10285_v6 = vpop.f32.mrb[128].mxu0 }
 0x258   : > { %7582 = vmatprep.subr.bf16.mxu1 %v7581_v44  ;;  %v2901_v62 = vsel %vm2818_vm5, %v12380_v26, %v2900_v28  ;;  %v3184_v30 = vadd.f32 %v2983_v54, %v12382_v46  ;;  %v3144_v27 = vadd.f32 %v2903_v17, %v12383_v13  ;;  %v3190_v55 = vadd.f32 %v2995_v52, %v12384_v3 }
 0x259   : > { %7584 = vmatpush1.bf16.msra.mxu1 %v7583_v61  ;;  %v3143_v16 = vadd.f32 %v2901_v62, %v12381_v63  ;;  %v10278_v44 = vadd.f32 %v9761_v35, %v3183_v57  ;;  %v3197_v26 = vadd.f32 %v2994_v0, %v12385_v22  ;;  %v12054_v9 = vrot.slane %v10111_v51, 2  ;;  %12386 = vst [vmem:[#allocation78_spill] sm:$0xff] %v10283_v38  ;;  %v10298_v57 = vpop.f32.mrb[129].mxu1  ;;  %v10300_v0 = vpop.f32.mrb[129].mxu0  ;;  %v12393_v22 = vld [vmem:[#allocation16_spill] sm:$0xff] }
 0x25a   : > { %12387 = vst [vmem:[#allocation67_spill] sm:$0xff] %v10285_v6  ;;  %v12388_v61 = vmax.f32 %v10223_v49, 0.0  ;;  %v10295_v50 = vadd.f32 %v9763_v15, %v3184_v30  ;;  %v2996_v52 = vrot.slane %v10121_v11, 2  ;;  %12390 = vst [vmem:[#allocation68_spill] sm:$0xff] %v10298_v57  ;;  %v3325_v54 = vadd.f32 %v9761_v35, %v3190_v55  ;;  %v12392_v30 = vld [vmem:[#allocation69_spill] sm:$0xff]  ;;  %v12394_v55 = vld [vmem:[#allocation14_spill] sm:$0xff] }
 0x25b   : > { %v10292_v13 = vadd.f32 %v9765_v33, %v3143_v16  ;;  %12391 = vst [vmem:[#allocation13_spill] sm:$0xff] %v10300_v0  ;;  %v3332_v17 = vadd.f32 %v9761_v35, %v3197_v26  ;;  %v2915_v63 = vsel %vm2818_vm5, %v2900_v28, %v12054_v9  ;;  %v10309_v16 = vadd.f32 %v9769_v18, %v3144_v27  ;;  %v10316_v35 = vpop.f32.mrb[130].mxu1  ;;  %v10318_v26 = vpop.f32.mrb[130].mxu0  ;;  %v12401_v9 = vld [vmem:[#allocation89_spill] sm:$0xff] }
 0x25c   : > { %v10289_v46 = vrot.slane %v12388_v61, 1  ;;  %v3150_v3 = vadd.f32 %v2915_v63, %v12392_v30  ;;  %v2997_v11 = vsel %vm2818_vm5, %v2982_v23, %v2996_v52  ;;  %v3198_v61 = vadd.f32 %v2996_v52, %v12393_v22  ;;  %12395 = vst [vmem:[#allocation15_spill] sm:$0xff] %v10316_v35  ;;  %12396 = vst [vmem:[#allocation69_spill] sm:$0xff] %v10318_v26  ;;  %v10329_v30 = vpop.f32.mrb[131].mxu1 }
 0x25d   : > { %12389 = vst [vmem:[#allocation12_spill] sm:$0xff] %v10292_v13  ;;  %v3423_v62 = vmax.f32 %v3325_v54, 0.0  ;;  %v3430_v57 = vmax.f32 %v3332_v17, 0.0  ;;  %v3191_v6 = vadd.f32 %v2997_v11, %v12394_v55  ;;  %v12397_v28 = vmax.f32 %v10278_v44, 0.0  ;;  %12399 = vst [vmem:[#allocation14_spill] sm:$0xff] %v10329_v30  ;;  %v10331_v54 = vpop.f32.mrb[131].mxu0 }
 0x25e   : > { %v10325_v63 = vadd.f32 %v9765_v33, %v3150_v3  ;;  %v3333_v23 = vadd.f32 %v9763_v15, %v3198_v61  ;;  %v12055_v52 = vrot.slane %v10123_v60, 2  ;;  %12400 = vst [vmem:[#allocation99_spill] sm:$0xff] %v10331_v54  ;;  %v3389_v55 = vmax.f32 %v10048_v36, 0.0  ;;  %v10352_v35 = vpop.f32.mrb[132].mxu0 }
 0x25f   : > { %v10322_v27 = vrot.slane %v12397_v28, 1  ;;  %v10333_v17 = vrot.slane %v3423_v62, 1  ;;  %v3710_v11 = vrot.slane %v3430_v57, 1  ;;  %v10336_v22 = vadd.f32 %v9763_v15, %v3191_v6  ;;  %v12403_v6 = vld [vmem:[#allocation70_spill] sm:$0xff]  ;;  %12404 = vst [vmem:[#allocation89_spill] sm:$0xff] %v10352_v35 }
 0x260   : > { %12398 = vst [vmem:[#allocation16_spill] sm:$0xff] %v10325_v63  ;;  %v3431_v3 = vmax.f32 %v3333_v23, 0.0  ;;  %v2917_v61 = vsel %vm2818_vm5, %v2902_v59, %v12055_v52  ;;  %v3342_v0 = vmax.f32 %v12401_v9, 0.0  ;;  %v12402_v30 = vmax.f32 %v10292_v13, 0.0  ;;  %v10354_v23 = vpop.f32.mrb[132].mxu1 }
 0x261   : > { %v3711_v26 = vsel %vm2334_vm4, %v10333_v17, %v3710_v11  ;;  %v3151_v36 = vadd.f32 %v2917_v61, %v12403_v6  ;;  %12405 = vst [vmem:[#allocation70_spill] sm:$0xff] %v10354_v23  ;;  %v10358_v59 = vmax.f32 %v3430_v57, %v3710_v11  ;;  %v3628_v52 = vrot.slane %v3389_v55, 1  ;;  %v10364_v13 = vpop.f32.mrb[133].mxu1 }
 0x262   : > { %v10346_v54 = vrot.slane %v12402_v30, 1  ;;  %v10356_v28 = vmax.f32 %v3423_v62, %v3711_v26  ;;  %v10360_v9 = vrot.slane %v3431_v3, 1  ;;  %v10362_v30 = vpop.f32.mrb[133].mxu0  ;;  %12409 = vst [vmem:[#allocation103_spill] sm:$0xff] %v10364_v13  ;;  %v12410_v38 = vmax.f32 %v10325_v63, 0.0 }
 0x263   : > { %12407 = vst [vmem:[#allocation101_spill] sm:$0xff] %v10358_v59  ;;  %12408 = vst [vmem:[#allocation102_spill] sm:$0xff] %v10362_v30  ;;  %v12411_v61 = vmax.f32 %v10336_v22, 0.0  ;;  %v10375_v62 = vadd.f32 %v9769_v18, %v3151_v36  ;;  %v3349_v57 = vmax.f32 %v10061_v48, 0.0  ;;  %v3629_v11 = vsel %vm2334_vm4, %v10035_v8, %v3628_v52  ;;  %v10389_v63 = vpop.f32.mrb[134].mxu0  ;;  %v10391_v48 = vpop.f32.mrb[134].mxu1 }
 0x264   : > { %12406 = vst [vmem:[#allocation100_spill] sm:$0xff] %v10356_v28  ;;  %v10368_v15 = vrot.slane %v12410_v38, 1  ;;  %v3643_v13 = vsel %vm2334_vm4, %v3628_v52, %v10130_v14  ;;  %v3544_v38 = vrot.slane %v3342_v0, 1  ;;  %v10385_v30 = vmax.f32 %v3431_v3, %v10360_v9  ;;  %12413 = vst [vmem:[#allocation104_spill] sm:$0xff] %v10389_v63  ;;  %v12417_v63 = vld [vmem:[#allocation86_spill] sm:$0xff] }
 0x265   : > { %v10372_v6 = vrot.slane %v12411_v61, 1  ;;  %v12412_v61 = vmax.f32 %v9955_v39, 0.0  ;;  %v3872_v36 = vmax.f32 %v3389_v55, %v3643_v13  ;;  %v3545_v35 = vrot.slane %v3349_v57, 1  ;;  %12414 = vst [vmem:[#allocation105_spill] sm:$0xff] %v10391_v48  ;;  %v10405_v13 = vpop.f32.mrb[135].mxu0  ;;  %v10407_v55 = vpop.f32.mrb[135].mxu1 }
 0x266   : > { %v3627_v8 = vsel %vm2334_vm4, %v12364_v40, %v10072_v43  ;;  %v3641_v52 = vsel %vm2334_vm4, %v10072_v43, %v10095_v41  ;;  %v3543_v3 = vsel %vm2334_vm4, %v9995_v25, %v10082_v2  ;;  %v3561_v39 = vsel %vm2334_vm4, %v10082_v2, %v10115_v58  ;;  %12415 = vst [vmem:[#allocation106_spill] sm:$0xff] %v10405_v13 }
 0x267   : > { %v3865_v23 = vmax.f32 %v12412_v61, %v3629_v11  ;;  %12416 = vst [vmem:[#allocation107_spill] sm:$0xff] %v10407_v55  ;;  %v3546_v40 = vsel %vm2334_vm4, %v3544_v38, %v3545_v35  ;;  %v3563_v43 = vsel %vm2334_vm4, %v3545_v35, %v10164_v45  ;;  %v12418_v25 = vmax.f32 %v12417_v63, 0.0  ;;  %v10423_v35 = vpop.f32.mrb[136].mxu0 }
 0x268   : > { %v3825_v26 = vmax.f32 %v3342_v0, %v3546_v40  ;;  %v3832_v48 = vmax.f32 %v3349_v57, %v3563_v43  ;;  %v12419_v59 = vmax.f32 %v10022_v56, 0.0  ;;  %v12420_v13 = vmax.f32 %v9948_v4, 0.0  ;;  %v10425_v0 = vpop.f32.mrb[136].mxu1 }
 0x269   : > { %v7585_v61 = vpack.c.bf16 %v3872_v36, %v3865_v23  ;;  %v3864_v28 = vmax.f32 %v12418_v25, %v3627_v8  ;;  %v12421_v11 = vmax.f32 %v10038_v47, 0.0  ;;  %v2928_v38 = vrot.slane %v10142_v21, 2  ;;  %v10429_v8 = vpop.f32.mrb[137].mxu0  ;;  %v10431_v4 = vpop.f32.mrb[137].mxu1 }
 0x26a   : > { %v3871_v2 = vmax.f32 %v12419_v59, %v3641_v52  ;;  %v3824_v55 = vmax.f32 %v12420_v13, %v3543_v3  ;;  %v2930_v36 = vrot.slane %v10150_v7, 2  ;;  %v7603_v63 = vpack.c.bf16 %v3832_v48, %v3825_v26  ;;  %12422 = vst [vmem:[#allocation86_spill] sm:$0xff] %v10431_v4  ;;  %v10450_v40 = vpop.f32.mrb[138].mxu0  ;;  %v10452_v43 = vpop.f32.mrb[138].mxu1 }
 0x26b   : > { %7586 = vmatprep.subr.bf16.mxu1 %v7585_v61  ;;  %v3831_v23 = vmax.f32 %v12421_v11, %v3561_v39  ;;  %v2831_v56 = vrot.slane %v10144_v12, 2  ;;  %v2834_v59 = vrot.slane %v10152_v5, 2  ;;  %v12423_v52 = vrot.slane %v10111_v51, 2  ;;  %v12425_v12 = vld [vmem:[#allocation71_spill] sm:$0xff]  ;;  %v12426_v5 = vld [vmem:[#allocation72_spill] sm:$0xff] }
 0x26c   : > { %v7587_v57 = vpack.c.bf16 %v3871_v2, %v3864_v28  ;;  %v12424_v7 = vrot.slane %v10123_v60, 2  ;;  %v12066_v26 = vrot.slane %v10179_v19, 2  ;;  %7604 = vmatprep.subr.bf16.mxu0 %v7603_v63  ;;  %v12065_v39 = vrot.slane %v10181_v10, 2  ;;  %v12427_v11 = vld [vmem:[#allocation96_spill] sm:$0xff]  ;;  %12428 = vst [vmem:[#allocation71_spill] sm:$0xff] %v10450_v40  ;;  %12429 = vst [vmem:[#allocation72_spill] sm:$0xff] %v10452_v43 }
 0x26d   : > { %v7605_v47 = vpack.c.bf16 %v3831_v23, %v3824_v55  ;;  %v2929_v21 = vsel %vm2818_vm5, %v12423_v52, %v2928_v38  ;;  %v12064_v13 = vrot.slane %v10189_v37, 2  ;;  %v12063_v60 = vrot.slane %v10191_v24, 2  ;;  %v12431_v63 = vld [vmem:[#allocation73_spill] sm:$0xff] }
 0x26e   : > { %v2931_v3 = vsel %vm2818_vm5, %v12424_v7, %v2930_v36  ;;  %7588 = vmatpush1.bf16.msra.mxu1 %v7587_v57  ;;  %v3157_v28 = vadd.f32 %v2929_v21, %v12425_v12  ;;  %v2943_v51 = vsel %vm2818_vm5, %v2928_v38, %v12066_v26  ;;  %v3403_v55 = vmax.f32 %v10167_v29, 0.0  ;;  %v10465_v29 = vpop.f32.mrb[139].mxu0  ;;  %v12434_v52 = vld [vmem:[#allocation17_spill] sm:$0xff] }
 0x26f   : > { %v3158_v48 = vadd.f32 %v2931_v3, %v12426_v5  ;;  %7606 = vmatpush1.bf16.msra.mxu0 %v7605_v47  ;;  %v3363_v61 = vmax.f32 %v12427_v11, 0.0  ;;  %v12430_v25 = vmax.f32 %v10375_v62, 0.0  ;;  %v3164_v57 = vadd.f32 %v2943_v51, %v12431_v63  ;;  %12432 = vst [vmem:[#allocation96_spill] sm:$0xff] %v10465_v29  ;;  %v10467_v47 = vpop.f32.mrb[139].mxu1  ;;  %v12436_v11 = vld [vmem:[#allocation18_spill] sm:$0xff]  ;;  %v12437_v63 = vld [vmem:[#allocation81_spill] sm:$0xff] }
 0x270   : > { %v10459_v23 = vadd.f32 %v9765_v33, %v3157_v28  ;;  %v2833_v38 = vsel %vm2818_vm5, %v2831_v56, %v12065_v39  ;;  %12433 = vst [vmem:[#allocation73_spill] sm:$0xff] %v10467_v47  ;;  %v2945_v7 = vsel %vm2818_vm5, %v2930_v36, %v12064_v13  ;;  %v2836_v3 = vsel %vm2818_vm5, %v2834_v59, %v12063_v60  ;;  %v12435_v56 = vld [vmem:[#allocation74_spill] sm:$0xff]  ;;  %v10489_v60 = vpop.f32.mrb[140].mxu0  ;;  %v10491_v13 = vpop.f32.mrb[140].mxu1 }
 0x271   : > { %v10456_v2 = vrot.slane %v12430_v25, 1  ;;  %v3110_v21 = vadd.f32 %v2833_v38, %v12434_v52  ;;  %v3656_v12 = vrot.slane %v3403_v55, 1  ;;  %v10478_v5 = vadd.f32 %v9765_v33, %v3164_v57  ;;  %12438 = vst [vmem:[#allocation17_spill] sm:$0xff] %v10489_v60  ;;  %12439 = vst [vmem:[#allocation74_spill] sm:$0xff] %v10491_v13  ;;  %v12444_v60 = vld [vmem:[#allocation82_spill] sm:$0xff] }
 0x272   : > { %v12067_v28 = vmax.f32 %v10459_v23, 0.0  ;;  %v3165_v51 = vadd.f32 %v2945_v7, %v12435_v56  ;;  %v3111_v25 = vadd.f32 %v2836_v3, %v12436_v11  ;;  %v3576_v59 = vrot.slane %v3363_v61, 1  ;;  %v12442_v11 = vld [vmem:[#allocation92_spill] sm:$0xff] }
 0x273   : > { %v10483_v38 = vadd.f32 %v12437_v63, %v3110_v21  ;;  %v3657_v36 = vsel %vm2334_vm4, %v10130_v14, %v3656_v12  ;;  %v3671_v52 = vsel %vm2334_vm4, %v3656_v12, %v10258_v20  ;;  %v10498_v7 = vadd.f32 %v9769_v18, %v3158_v48  ;;  %v10504_v14 = vpop.f32.mrb[141].mxu0  ;;  %v10506_v12 = vpop.f32.mrb[141].mxu1 }
 0x274   : > { %v10495_v57 = vrot.slane %v12067_v28, 1  ;;  %v12068_v21 = vmax.f32 %v10478_v5, 0.0  ;;  %v10502_v3 = vadd.f32 %v9769_v18, %v3165_v51  ;;  %12440 = vst [vmem:[#allocation18_spill] sm:$0xff] %v10504_v14  ;;  %12441 = vst [vmem:[#allocation81_spill] sm:$0xff] %v10506_v12  ;;  %v12443_v39 = vmax.f32 %v12442_v11, 0.0  ;;  %v12445_v12 = vld [vmem:[#allocation93_spill] sm:$0xff] }
 0x275   : > { %v3886_v13 = vmax.f32 %v3403_v55, %v3671_v52  ;;  %v3577_v28 = vsel %vm2334_vm4, %v10164_v45, %v3576_v59  ;;  %v10518_v51 = vadd.f32 %v12444_v60, %v3111_v25  ;;  %v3591_v14 = vsel %vm2334_vm4, %v3576_v59, %v10289_v46  ;;  %v10528_v52 = vpop.f32.mrb[142].mxu0 }
 0x276   : > { %v3879_v26 = vmax.f32 %v12443_v39, %v3657_v36  ;;  %v10515_v48 = vrot.slane %v12068_v21, 1  ;;  %v12446_v47 = vmax.f32 %v12445_v12, 0.0  ;;  %v3846_v55 = vmax.f32 %v3363_v61, %v3591_v14  ;;  %v12447_v36 = vld [vmem:[#allocation87_spill] sm:$0xff]  ;;  %12448 = vst [vmem:[#allocation92_spill] sm:$0xff] %v10528_v52  ;;  %v10530_v21 = vpop.f32.mrb[142].mxu1  ;;  %v12455_v12 = vld [vmem:[#allocation94_spill] sm:$0xff] }
 0x277   : > { %v3655_v45 = vsel %vm2334_vm4, %v10095_v41, %v12447_v36  ;;  %12449 = vst [vmem:[#allocation82_spill] sm:$0xff] %v10530_v21  ;;  %v12450_v25 = vmax.f32 %v10483_v38, 0.0  ;;  %v10544_v41 = vpop.f32.mrb[143].mxu0  ;;  %v10546_v61 = vpop.f32.mrb[143].mxu1  ;;  %v12457_v21 = vld [vmem:[#allocation91_spill] sm:$0xff] }
 0x278   : > { %v3839_v56 = vmax.f32 %v12446_v47, %v3577_v28  ;;  %v7589_v39 = vpack.c.bf16 %v3886_v13, %v3879_v26  ;;  %v3669_v47 = vsel %vm2334_vm4, %v12447_v36, %v10239_v32  ;;  %v12451_v28 = vld [vmem:[#allocation90_spill] sm:$0xff]  ;;  %v3575_v13 = vsel %vm2334_vm4, %v10115_v58, %v10235_v42  ;;  %12453 = vst [vmem:[#allocation93_spill] sm:$0xff] %v10544_v41  ;;  %v12461_v58 = vld [vmem:[#allocation76_spill] sm:$0xff] }
 0x279   : > { %v10534_v29 = vrot.slane %v12450_v25, 1  ;;  %v12452_v59 = vmax.f32 %v12451_v28, 0.0  ;;  %12454 = vst [vmem:[#allocation87_spill] sm:$0xff] %v10546_v61  ;;  %v12456_v25 = vmax.f32 %v12455_v12, 0.0  ;;  %v3589_v36 = vsel %vm2334_vm4, %v10235_v42, %v10245_v53  ;;  %v12462_v41 = vld [vmem:[#allocation66_spill] sm:$0xff]  ;;  %v12463_v61 = vld [vmem:[#allocation83_spill] sm:$0xff] }
 0x27a   : > { %7590 = vmatprep.subr.bf16.mxu1 %v7589_v39  ;;  %v7607_v14 = vpack.c.bf16 %v3846_v55, %v3839_v56  ;;  %v12458_v28 = vmax.f32 %v12457_v21, 0.0  ;;  %v2956_v40 = vrot.slane %v12461_v58, 2  ;;  %v2848_v4 = vrot.slane %v12462_v41, 2  ;;  %v12464_v55 = vld [vmem:[#allocation85_spill] sm:$0xff]  ;;  %v10565_v21 = vpop.f32.mrb[144].mxu1 }
 0x27b   : > { %v3878_v26 = vmax.f32 %v12452_v59, %v3655_v45  ;;  %v3885_v11 = vmax.f32 %v12456_v25, %v3669_v47  ;;  %v12459_v59 = vld [vmem:[#allocation95_spill] sm:$0xff]  ;;  %v2958_v39 = vrot.slane %v12463_v61, 2  ;;  %v2850_v47 = vrot.slane %v12464_v55, 2  ;;  %v10563_v25 = vpop.f32.mrb[144].mxu0  ;;  %12466 = vst [vmem:[#allocation94_spill] sm:$0xff] %v10565_v21 }
 0x27c   : > { %v3838_v45 = vmax.f32 %v12458_v28, %v3575_v13  ;;  %v12460_v52 = vmax.f32 %v12459_v59, 0.0  ;;  %7608 = vmatprep.subr.bf16.mxu0 %v7607_v14  ;;  %v12076_v12 = vrot.slane %v10252_v31, 2  ;;  %v12075_v42 = vrot.slane %v10254_v34, 2  ;;  %12465 = vst [vmem:[#allocation90_spill] sm:$0xff] %v10563_v25  ;;  %v10576_v14 = vpop.f32.mrb[145].mxu0  ;;  %v10578_v28 = vpop.f32.mrb[145].mxu1 }
 0x27d   : > { %v7591_v56 = vpack.c.bf16 %v3885_v11, %v3878_v26  ;;  %v12468_v41 = vrot.slane %v10181_v10, 2  ;;  %v12469_v11 = vrot.slane %v10189_v37, 2  ;;  %12470 = vst [vmem:[#allocation91_spill] sm:$0xff] %v10576_v14  ;;  %12471 = vst [vmem:[#allocation95_spill] sm:$0xff] %v10578_v28  ;;  %v12472_v59 = vld [vmem:[#allocation75_spill] sm:$0xff]  ;;  %v12492_v25 = vld [vmem:[#allocation97_spill] sm:$0xff] }
 0x27e   : > { %v3845_v43 = vmax.f32 %v12460_v52, %v3589_v36  ;;  %v12467_v52 = vrot.slane %v10179_v19, 2  ;;  %v12474_v19 = vld [vmem:[#allocation77_spill] sm:$0xff] }
 0x27f   : > { %v2849_v61 = vsel %vm2818_vm5, %v12468_v41, %v2848_v4  ;;  %v2959_v26 = vsel %vm2818_vm5, %v12469_v11, %v2958_v39  ;;  %7592 = vmatpush1.bf16.msra.mxu1 %v7591_v56  ;;  %v12476_v41 = vld [vmem:[#allocation20_spill] sm:$0xff]  ;;  %v2971_v11 = vsel %vm2818_vm5, %v2956_v40, %v12076_v12  ;;  %v2863_v56 = vsel %vm2818_vm5, %v2848_v4, %v12075_v42  ;;  %v12480_v4 = vld [vmem:[#allocation21_spill] sm:$0xff] }
 0x280   : > { %v7609_v13 = vpack.c.bf16 %v3845_v43, %v3838_v45  ;;  %v2957_v36 = vsel %vm2818_vm5, %v12467_v52, %v2956_v40  ;;  %v12473_v43 = vld [vmem:[#allocation19_spill] sm:$0xff]  ;;  %v3172_v55 = vadd.f32 %v2959_v26, %v12474_v19  ;;  %v12475_v52 = vrot.slane %v10191_v24, 2  ;;  %v10605_v19 = vpop.f32.mrb[146].mxu0 }
 0x281   : > { %v3171_v58 = vadd.f32 %v2957_v36, %v12472_v59  ;;  %v3117_v45 = vadd.f32 %v2849_v61, %v12473_v43  ;;  %v12077_v36 = vrot.slane %v10263_v1, 2  ;;  %v12477_v61 = vmax.f32 %v10502_v3, 0.0  ;;  %v12478_v59 = vld [vmem:[#allocation79_spill] sm:$0xff]  ;;  %12479 = vst [vmem:[#allocation76_spill] sm:$0xff] %v10605_v19  ;;  %v12488_v19 = vld [vmem:[#allocation88_spill] sm:$0xff] }
 0x282   : > { %v2851_v10 = vsel %vm2818_vm5, %v12475_v52, %v2850_v47  ;;  %7610 = vmatpush1.bf16.msra.mxu0 %v7609_v13  ;;  %v3178_v43 = vadd.f32 %v2971_v11, %v12478_v59  ;;  %v10608_v40 = vadd.f32 %v9769_v18, %v3172_v55  ;;  %v3124_v52 = vadd.f32 %v2863_v56, %v12480_v4  ;;  %v12484_v59 = vld [vmem:[#allocation22_spill] sm:$0xff] }
 0x283   : > { %v3118_v37 = vadd.f32 %v2851_v10, %v12476_v41  ;;  %v10596_v26 = vrot.slane %v12477_v61, 1  ;;  %v10599_v24 = vadd.f32 %v9765_v33, %v3171_v58  ;;  %v10602_v13 = vadd.f32 %v12437_v63, %v3117_v45  ;;  %v12481_v41 = vld [vmem:[#allocation84_spill] sm:$0xff]  ;;  %v10615_v58 = vpop.f32.mrb[147].mxu0 }
 0x284   : > { %v2973_v10 = vsel %vm2818_vm5, %v2958_v39, %v12077_v36  ;;  %v2864_v61 = vrot.slane %v12481_v41, 2  ;;  %12482 = vst [vmem:[#allocation66_spill] sm:$0xff] %v10615_v58  ;;  %v10620_v11 = vadd.f32 %v9765_v33, %v3178_v43  ;;  %v10624_v12 = vadd.f32 %v12437_v63, %v3124_v52 }
 0x285   : > { %v12078_v45 = vmax.f32 %v10599_v24, 0.0  ;;  %v3179_v55 = vadd.f32 %v2973_v10, %v12484_v59  ;;  %v3417_v39 = vmax.f32 %v10295_v50, 0.0  ;;  %v3377_v4 = vmax.f32 %v10309_v16, 0.0  ;;  %v12486_v59 = vld [vmem:[#allocation23_spill] sm:$0xff] }
 0x286   : > { %12483 = vst [vmem:[#allocation83_spill] sm:$0xff] %v10620_v11  ;;  %12485 = vst [vmem:[#allocation85_spill] sm:$0xff] %v10624_v12  ;;  %v2865_v56 = vsel %vm2818_vm5, %v2850_v47, %v2864_v61  ;;  %v10634_v36 = vadd.f32 %v12444_v60, %v3118_v37  ;;  %v12079_v43 = vmax.f32 %v10620_v11, 0.0  ;;  %v12080_v52 = vmax.f32 %v10624_v12, 0.0 }
 0x287   : > { %v10631_v41 = vrot.slane %v12078_v45, 1  ;;  %v10638_v10 = vadd.f32 %v9769_v18, %v3179_v55  ;;  %v3125_v47 = vadd.f32 %v2865_v56, %v12486_v59  ;;  %v3684_v42 = vrot.slane %v3417_v39, 1 }
 0x288   : > { %v3604_v50 = vrot.slane %v3377_v4, 1  ;;  %v12487_v16 = vmax.f32 %v10602_v13, 0.0  ;;  %v3683_v37 = vsel %vm2334_vm4, %v10239_v32, %v10322_v27  ;;  %v3697_v55 = vsel %vm2334_vm4, %v10322_v27, %v10333_v17 }
 0x289   : > { %v10655_v56 = vrot.slane %v12079_v43, 1  ;;  %v10658_v59 = vadd.f32 %v12444_v60, %v3125_v47  ;;  %v3699_v45 = vsel %vm2334_vm4, %v3684_v42, %v10372_v6  ;;  %v10666_v32 = vrot.slane %v12080_v52, 1 }
 0x28a   : > { %v10644_v58 = vrot.slane %v12487_v16, 1  ;;  %v3685_v16 = vsel %vm2334_vm4, %v10258_v20, %v3684_v42  ;;  %v12489_v28 = vmax.f32 %v12488_v19, 0.0  ;;  %v3900_v17 = vmax.f32 %v3417_v39, %v3699_v45 }
 0x28b   : > { %v3605_v43 = vsel %vm2334_vm4, %v10289_v46, %v3604_v50  ;;  %v12490_v47 = vmax.f32 %v10638_v10, 0.0  ;;  %v3619_v20 = vsel %vm2334_vm4, %v3604_v50, %v10456_v2  ;;  %v12491_v42 = vmax.f32 %v10223_v49, 0.0  ;;  %v12495_v49 = vld [vmem:[#allocation98_spill] sm:$0xff] }
 0x28c   : > { %v3893_v27 = vmax.f32 %v12489_v28, %v3685_v16  ;;  %v12493_v52 = vmax.f32 %v12492_v25, 0.0  ;;  %v3860_v19 = vmax.f32 %v3377_v4, %v3619_v20  ;;  %v12494_v28 = vmax.f32 %v10278_v44, 0.0  ;;  %v12497_v25 = vld [vmem:[#allocation78_spill] sm:$0xff]  ;;  %v12498_v44 = vld [vmem:[#allocation12_spill] sm:$0xff] }
 0x28d   : > { %v10674_v14 = vrot.slane %v12490_v47, 1  ;;  %v3853_v21 = vmax.f32 %v12491_v42, %v3605_v43  ;;  %v3603_v46 = vsel %vm2334_vm4, %v10245_v53, %v10346_v54  ;;  %v12086_v39 = vmax.f32 %v10658_v59, 0.0  ;;  %v12502_v42 = vld [vmem:[#allocation68_spill] sm:$0xff] }
 0x28e   : > { %v3892_v12 = vmax.f32 %v12493_v52, %v3683_v37  ;;  %v7593_v11 = vpack.c.bf16 %v3900_v17, %v3893_v27  ;;  %v3899_v45 = vmax.f32 %v12494_v28, %v3697_v55  ;;  %v3617_v50 = vsel %vm2334_vm4, %v10346_v54, %v10368_v15  ;;  %v12500_v17 = vld [vmem:[#allocation67_spill] sm:$0xff] }
 0x28f   : > { %v12496_v43 = vmax.f32 %v12495_v49, 0.0  ;;  %v2984_v52 = vrot.slane %v12497_v25, 2  ;;  %v7611_v4 = vpack.c.bf16 %v3860_v19, %v3853_v21  ;;  %v12499_v55 = vmax.f32 %v12498_v44, 0.0  ;;  %v12504_v21 = vld [vmem:[#allocation24_spill] sm:$0xff] }
 0x290   : > { %7594 = vmatprep.subr.bf16.mxu1 %v7593_v11  ;;  %v7595_v37 = vpack.c.bf16 %v3899_v45, %v3892_v12  ;;  %v2876_v47 = vrot.slane %v12500_v17, 2  ;;  %v12501_v53 = vrot.slane %v10252_v31, 2  ;;  %v3713_v54 = vsel %vm2334_vm4, %v10372_v6, %v10360_v9  ;;  %v12506_v31 = vld [vmem:[#allocation15_spill] sm:$0xff] }
 0x291   : > { %v3852_v16 = vmax.f32 %v12496_v43, %v3603_v46  ;;  %v3859_v27 = vmax.f32 %v12499_v55, %v3617_v50  ;;  %v2986_v28 = vrot.slane %v12502_v42, 2  ;;  %v12503_v46 = vld [vmem:[#allocation13_spill] sm:$0xff]  ;;  %7612 = vmatprep.subr.bf16.mxu0 %v7611_v4  ;;  %v12505_v19 = vrot.slane %v10254_v34, 2  ;;  %v12515_v42 = vld [vmem:[#allocation32_spill] sm:$0xff] }
 0x292   : > { %v2985_v20 = vsel %vm2818_vm5, %v12501_v53, %v2984_v52  ;;  %v2878_v49 = vrot.slane %v12503_v46, 2  ;;  %7596 = vmatpush1.bf16.msra.mxu1 %v7595_v37  ;;  %v2998_v50 = vrot.slane %v12506_v31, 2  ;;  %v12507_v43 = vld [vmem:[#allocation25_spill] sm:$0xff]  ;;  %v12508_v44 = vmax.f32 %v10336_v22, 0.0  ;;  %v12512_v37 = vld [vmem:[#allocation26_spill] sm:$0xff]  ;;  %v12513_v22 = vld [vmem:[#allocation27_spill] sm:$0xff] }
 0x293   : > { %v7613_v12 = vpack.c.bf16 %v3859_v27, %v3852_v16  ;;  %v3185_v11 = vadd.f32 %v2985_v20, %v12504_v21  ;;  %v2877_v45 = vsel %vm2818_vm5, %v12505_v19, %v2876_v47  ;;  %v12509_v6 = vrot.slane %v10263_v1, 2  ;;  %v12514_v20 = vld [vmem:[#allocation28_spill] sm:$0xff]  ;;  %v12516_v19 = vld [vmem:[#allocation69_spill] sm:$0xff] }
 0x294   : > { %v3131_v25 = vadd.f32 %v2877_v45, %v12507_v43  ;;  %v3907_v9 = vmax.f32 %v12508_v44, %v3713_v54  ;;  %v2879_v4 = vsel %vm2818_vm5, %v2864_v61, %v2878_v49  ;;  %v2999_v1 = vsel %vm2818_vm5, %v2984_v52, %v2998_v50  ;;  %v12518_v44 = vld [vmem:[#allocation101_spill] sm:$0xff]  ;;  %v7968_v34 = vld [vmem:[#allocation7] ss:$16 sps:$4 sm:$0xff]  }
 0x295   : > { %v2987_v55 = vsel %vm2818_vm5, %v12509_v6, %v2986_v28  ;;  %7614 = vmatpush1.bf16.msra.mxu0 %v7613_v12  ;;  %v10718_v16 = vadd.f32 %v9765_v33, %v3185_v11  ;;  %v3132_v17 = vadd.f32 %v2879_v4, %v12513_v22  ;;  %v3192_v54 = vadd.f32 %v2999_v1, %v12514_v20  ;;  %v12521_v4 = vld [vmem:[#allocation99_spill] sm:$0xff]  ;;  %v12522_v1 = vld [vmem:[#allocation29_spill] sm:$0xff] }
 0x296   : > { %v3186_v27 = vadd.f32 %v2987_v55, %v12512_v37  ;;  %v10730_v53 = vadd.f32 %v12437_v63, %v3131_v25  ;;  %v7597_v61 = vpack.c.bf16 %v10385_v30, %v3907_v9  ;;  %v3199_v46 = vadd.f32 %v2998_v50, %v12515_v42  ;;  %v12517_v50 = vld [vmem:[#allocation14_spill] sm:$0xff]  ;;  %v12519_v9 = vld [vmem:[#allocation100_spill] sm:$0xff] }
 0x297   : > { %v10737_v12 = vrot.slane %v12086_v39, 1  ;;  %v12087_v21 = vmax.f32 %v10718_v16, 0.0  ;;  %v2890_v52 = vrot.slane %v12516_v19, 2  ;;  %v10747_v30 = vadd.f32 %v12444_v60, %v3132_v17  ;;  %v12539_v39 = vld [vmem:[#allocation105_spill] sm:$0xff] }
 0x298   : > { %v10741_v11 = vadd.f32 %v9769_v18, %v3186_v27  ;;  %7599 = vmatprep.subr.msk.bf16.mxu1 %vm10722_vm7, %v7597_v61  ;;  %v3327_v45 = vadd.f32 %v9765_v33, %v3192_v54  ;;  %v3334_v31 = vadd.f32 %v9765_v33, %v3199_v46  ;;  %v3000_v43 = vrot.slane %v12517_v50, 2  ;;  %v12523_v54 = vld [vmem:[#allocation34_spill] sm:$0xff] }
 0x299   : > { %v12084_v25 = vmax.f32 %v10730_v53, 0.0  ;;  %v12520_v6 = vpack.c.bf16 %v12518_v44, %v12519_v9  ;;  %v2891_v55 = vsel %vm2818_vm5, %v2876_v47, %v2890_v52  ;;  %v2892_v37 = vrot.slane %v12521_v4, 2  ;;  %v12525_v44 = vld [vmem:[#allocation30_spill] sm:$0xff] }
 0x29a   : > { %v3391_v27 = vmax.f32 %v10498_v7, 0.0  ;;  %v10763_v22 = vrot.slane %v12087_v21, 1  ;;  %v3425_v33 = vmax.f32 %v3327_v45, 0.0  ;;  %v3432_v17 = vmax.f32 %v3334_v31, 0.0  ;;  %v12526_v31 = vld [vmem:[#allocation31_spill] sm:$0xff] }
 0x29b   : > { %7602 = vmatpush1.bf16.msk.msra.mxu1 %vm10722_vm7, %v12520_v6  ;;  %v3138_v61 = vadd.f32 %v2891_v55, %v12522_v1  ;;  %v3001_v20 = vsel %vm2818_vm5, %v2986_v28, %v3000_v43  ;;  %v3200_v42 = vadd.f32 %v3000_v43, %v12523_v54  ;;  %v2893_v46 = vsel %vm2818_vm5, %v2878_v49, %v2892_v37 }
 0x29c   : > { %v3632_v19 = vrot.slane %v3391_v27, 1  ;;  %v10769_v47 = vrot.slane %v3425_v33, 1  ;;  %v3714_v50 = vrot.slane %v3432_v17, 1  ;;  %v3193_v9 = vadd.f32 %v3001_v20, %v12525_v44 }
 0x29d   : > { %v10772_v7 = vadd.f32 %v12437_v63, %v3138_v61  ;;  %v3335_v45 = vadd.f32 %v9769_v18, %v3200_v42  ;;  %v3139_v6 = vadd.f32 %v2893_v46, %v12526_v31  ;;  %v10798_v46 = vrot.slane %v12084_v25, 1 }
 0x29e   : > { %v3633_v28 = vsel %vm2334_vm4, %v10456_v2, %v3632_v19  ;;  %v3647_v43 = vsel %vm2334_vm4, %v3632_v19, %v10596_v26  ;;  %v3715_v49 = vsel %vm2334_vm4, %v10769_v47, %v3714_v50  ;;  %v10783_v55 = vmax.f32 %v3432_v17, %v3714_v50 }
 0x29f   : > { %12524 = vst [vmem:[#allocation75_spill] sm:$0xff] %v10772_v7  ;;  %v12083_v4 = vmax.f32 %v10772_v7, 0.0  ;;  %v10787_v1 = vadd.f32 %v9769_v18, %v3193_v9  ;;  %v10789_v61 = vmax.f32 %v3425_v33, %v3715_v49  ;;  %v3433_v20 = vmax.f32 %v3335_v45, 0.0  ;;  %v12530_v45 = vld [vmem:[#allocation16_spill] sm:$0xff]  ;;  %v12534_v33 = vld [vmem:[#allocation70_spill] sm:$0xff] }
 0x2a0   : > { %v10792_v54 = vadd.f32 %v12444_v60, %v3139_v6  ;;  %v12529_v2 = vmax.f32 %v10375_v62, 0.0  ;;  %v3874_v19 = vmax.f32 %v3391_v27, %v3647_v43  ;;  %v3631_v18 = vsel %vm2334_vm4, %v10368_v15, %v10495_v57 }
 0x2a1   : > { %12527 = vst [vmem:[#allocation19_spill] sm:$0xff] %v10789_v61  ;;  %v12085_v17 = vmax.f32 %v10787_v1, 0.0  ;;  %v10808_v50 = vrot.slane %v12083_v4, 1  ;;  %v10810_v62 = vrot.slane %v3433_v20, 1  ;;  %v3645_v44 = vsel %vm2334_vm4, %v10495_v57, %v10515_v48 }
 0x2a2   : > { %12528 = vst [vmem:[#allocation77_spill] sm:$0xff] %v10792_v54  ;;  %v3867_v42 = vmax.f32 %v12529_v2, %v3633_v28  ;;  %v12531_v31 = vmax.f32 %v12530_v45, 0.0  ;;  %v12532_v15 = vmax.f32 %v10459_v23, 0.0  ;;  %v12533_v2 = vld [vmem:[#allocation89_spill] sm:$0xff]  ;;  %v2838_v57 = vrot.slane %v12534_v33, 2  ;;  %v12536_v45 = vld [vmem:[#allocation103_spill] sm:$0xff] }
 0x2a3   : > { %v10822_v43 = vrot.slane %v12085_v17, 1  ;;  %v10825_v49 = vmax.f32 %v3433_v20, %v10810_v62  ;;  %v2904_v4 = vrot.slane %v12533_v2, 2  ;;  %v12540_v20 = vld [vmem:[#allocation106_spill] sm:$0xff]  ;;  %v12541_v2 = vld [vmem:[#allocation33_spill] sm:$0xff] }
 0x2a4   : > { %v7615_v27 = vpack.c.bf16 %v3874_v19, %v3867_v42  ;;  %v3866_v6 = vmax.f32 %v12531_v31, %v3631_v18  ;;  %v3873_v28 = vmax.f32 %v12532_v15, %v3645_v44  ;;  %v12535_v42 = vld [vmem:[#allocation102_spill] sm:$0xff]  ;;  %v2837_v18 = vrot.slane %v12536_v45, 2  ;;  %v12537_v31 = vld [vmem:[#allocation80_spill] sm:$0xff] }
 0x2a5   : > { %v2906_v19 = vrot.slane %v12535_v42, 2  ;;  %v3232_v23 = vsub.s32 6, %v12537_v31  ;;  %v2905_v44 = vsel %vm2818_vm5, %v2890_v52, %v2904_v4  ;;  %v12538_v15 = vld [vmem:[#allocation104_spill] sm:$0xff]  ;;  %v12089_v9 = vrot.slane %v12540_v20, 2  ;;  %v12542_v42 = vld [vmem:[#allocation35_spill] sm:$0xff]  ;;  %v12543_v31 = vld [vmem:[#allocation38_spill] sm:$0xff] }
 0x2a6   : > { %7616 = vmatprep.subr.bf16.mxu0 %v7615_v27  ;;  %v7617_v25 = vpack.c.bf16 %v3873_v28, %v3866_v6  ;;  %v12090_v17 = vrot.slane %v12538_v15, 2  ;;  %v3145_v7 = vadd.f32 %v2905_v44, %v12541_v2  ;;  %v2839_v27 = vsel %vm2818_vm5, %v2837_v18, %v2838_v57  ;;  %v8294_v6 = vld [vmem:[#allocation4] sm:$0x7f]  ;;  %v10849_v44 = vld [vmem:[#allocation6] sm:$0xff]  ;;  %v12546_v2 = vld [vmem:[#allocation39_spill] sm:$0xff] }
 0x2a7   : > { %v2907_v33 = vsel %vm2818_vm5, %v2892_v37, %v2906_v19  ;;  %v10839_v28 = vrot.slane %v8294_v6, %v3232_v23  ;;  %v3112_v52 = vadd.f32 %v2839_v27, %v12543_v31  ;;  %12544 = vst [vmem:[#allocation20_spill] sm:$0xff] %v10849_v44  ;;  %v12545_v18 = vld [vmem:[#allocation37_spill] sm:$0xff]  ;;  %v12548_v27 = vmax.f32 %v10792_v54, 0.0  ;;  %6963 = vmatmul.mubr.msk.f32.vlgmr.msra.gmra.mrb[146].mxu1 %vm3927_vm8, %v10849_v44  ;;  %v12555_v54 = vld [vmem:[#allocation42_spill] sm:$0xff] }
 0x2a8   : > { %7618 = vmatpush1.bf16.msra.mxu0 %v7617_v25  ;;  %v3146_v45 = vadd.f32 %v2907_v33, %v12542_v42  ;;  %v2919_v21 = vsel %vm2818_vm5, %v2904_v4, %v12090_v17  ;;  %v2921_v25 = vsel %vm2818_vm5, %v2906_v19, %v12089_v9  ;;  %v10852_v37 = vadd.f32 %v12437_v63, %v3145_v7  ;;  %v12547_v33 = vld [vmem:[#allocation107_spill] sm:$0xff] }
 0x2a9   : > { %v3152_v23 = vadd.f32 %v2919_v21, %v12545_v18  ;;  %v3153_v6 = vadd.f32 %v2921_v25, %v12546_v2  ;;  %v2852_v42 = vrot.slane %v12547_v33, 2  ;;  %v10859_v31 = vrot.slane %v12548_v27, 1 }
 0x2aa   : > { %v10862_v4 = vadd.f32 %v10839_v28, %v3112_v52  ;;  %v3405_v19 = vmax.f32 %v10608_v40, 0.0  ;;  %v12552_v52 = vrot.slane %v12539_v39, 2  ;;  %v12553_v40 = vld [vmem:[#allocation36_spill] sm:$0xff]  ;;  %v12554_v17 = vmov 0.0  }
 0x2ab   : > { %v10867_v7 = vadd.f32 %v12437_v63, %v3152_v23  ;;  %v10870_v21 = vadd.f32 %v12444_v60, %v3153_v6  ;;  %v2853_v25 = vsel %vm2818_vm5, %v2838_v57, %v2852_v42  ;;  %4041 = vmatprep.mubr.f32.mxu1 %v12554_v17  ;;  %v10881_v23 = vld [vmem:[#allocation6 + $0x8] sm:$0xff]  ;;  %v10884_v6 = vadd.f32 %v12444_v60, %v3146_v45 }
 0x2ac   : > { %12549 = vst [vmem:[#allocation79_spill] sm:$0xff] %v10862_v4  ;;  %v2867_v2 = vsel %vm2818_vm5, %v2852_v42, %v12552_v52  ;;  %v3119_v33 = vadd.f32 %v2853_v25, %v12553_v40  ;;  %v3660_v27 = vrot.slane %v3405_v19, 1  ;;  %v12556_v44 = vmax.f32 %v10852_v37, 0.0  ;;  %6964 = vmatmul.mubr.msk.f32.gmra.mrb[148].mxu1 %vm3927_vm8, %v10881_v23 }
 0x2ad   : > { %12550 = vst [vmem:[#allocation21_spill] sm:$0xff] %v10867_v7  ;;  %12551 = vst [vmem:[#allocation84_spill] sm:$0xff] %v10870_v21  ;;  %v12095_v57 = vmax.f32 %v10867_v7, 0.0  ;;  %v3126_v18 = vadd.f32 %v2867_v2, %v12555_v54  ;;  %v12557_v52 = vmax.f32 %v10862_v4, 0.0  ;;  %v12559_v2 = vmax.f32 %v10502_v3, 0.0  ;;  %4047 = vmatprep.mubr.f32.mxu1 %v12554_v17 }
 0x2ae   : > { %v10891_v61 = vrot.slane %v12556_v44, 1  ;;  %v10894_v42 = vadd.f32 %v10839_v28, %v3119_v33  ;;  %v3661_v25 = vsel %vm2334_vm4, %v10596_v26, %v3660_v27  ;;  %v3675_v45 = vsel %vm2334_vm4, %v3660_v27, %v10674_v14 }
 0x2af   : > { %v10902_v40 = vrot.slane %v12557_v52, 1  ;;  %v10906_v54 = vrot.slane %v12095_v57, 1  ;;  %v10909_v44 = vadd.f32 %v10839_v28, %v3126_v18  ;;  %v3881_v33 = vmax.f32 %v12559_v2, %v3661_v25  ;;  %v10919_v57 = vld [vmem:[#allocation6 + $0x10] sm:$0xff] }
 0x2b0   : > { %v12099_v26 = vmax.f32 %v10894_v42, 0.0  ;;  %v3888_v27 = vmax.f32 %v3405_v19, %v3675_v45  ;;  %v3344_v9 = vmax.f32 %v10518_v51, 0.0  ;;  %v3351_v52 = vmax.f32 %v10634_v36, 0.0  ;;  %6965 = vmatmul.mubr.msk.f32.gmra.mrb[150].mxu1 %vm3927_vm8, %v10919_v57  ;;  %v12565_v36 = vld [vmem:[#allocation86_spill] sm:$0xff] }
 0x2b1   : > { %12558 = vst [vmem:[#allocation22_spill] sm:$0xff] %v10902_v40  ;;  %v12560_v18 = vmax.f32 %v10870_v21, 0.0  ;;  %v3659_v3 = vsel %vm2334_vm4, %v10515_v48, %v10631_v41  ;;  %v3673_v19 = vsel %vm2334_vm4, %v10631_v41, %v10655_v56  ;;  %v3549_v51 = vsel %vm2334_vm4, %v10534_v29, %v10644_v58  ;;  %4053 = vmatprep.mubr.f32.mxu1 %v12554_v17 }
 0x2b2   : > { %v7619_v25 = vpack.c.bf16 %v3888_v27, %v3881_v33  ;;  %v3550_v45 = vrot.slane %v3344_v9, 1  ;;  %v3551_v2 = vrot.slane %v3351_v52, 1  ;;  %v12561_v21 = vmax.f32 %v10478_v5, 0.0 }
 0x2b3   : > { %v10923_v7 = vrot.slane %v12560_v18, 1  ;;  %v10937_v18 = vrot.slane %v12099_v26, 1  ;;  %v12562_v4 = vmax.f32 %v10599_v24, 0.0  ;;  %v3565_v41 = vsel %vm2334_vm4, %v10644_v58, %v10666_v32 }
 0x2b4   : > { %v3880_v48 = vmax.f32 %v12561_v21, %v3659_v3  ;;  %7620 = vmatprep.subr.bf16.mxu0 %v7619_v25  ;;  %v3552_v29 = vsel %vm2334_vm4, %v3550_v45, %v3551_v2  ;;  %v3567_v33 = vsel %vm2334_vm4, %v3551_v2, %v10737_v12  ;;  %v12563_v27 = vmax.f32 %v10483_v38, 0.0 }
 0x2b5   : > { %v3887_v40 = vmax.f32 %v12562_v4, %v3673_v19  ;;  %v12564_v21 = vmax.f32 %v10602_v13, 0.0  ;;  %v10955_v4 = vld [vmem:[#allocation6 + $0x18] sm:$0xff]  ;;  %v3827_v3 = vmax.f32 %v3344_v9, %v3552_v29  ;;  %v3834_v19 = vmax.f32 %v3351_v52, %v3567_v33  ;;  %v12567_v9 = vld [vmem:[#allocation71_spill] sm:$0xff] }
 0x2b6   : > { %v3826_v5 = vmax.f32 %v12563_v27, %v3549_v51  ;;  %v2932_v26 = vrot.slane %v10423_v35, 2  ;;  %v2894_v45 = vrot.slane %v10425_v0, 2  ;;  %v2934_v2 = vrot.slane %v10429_v8, 2  ;;  %6966 = vmatmul.mubr.msk.f32.gmra.mrb[152].mxu1 %vm3927_vm8, %v10955_v4  ;;  %v12569_v35 = vld [vmem:[#allocation41_spill] sm:$0xff] }
 0x2b7   : > { %v3833_v24 = vmax.f32 %v12564_v21, %v3565_v41  ;;  %v7621_v58 = vpack.c.bf16 %v3887_v40, %v3880_v48  ;;  %v2880_v38 = vrot.slane %v12565_v36, 2  ;;  %v7633_v51 = vpack.c.bf16 %v3834_v19, %v3827_v3  ;;  %v12568_v40 = vld [vmem:[#allocation72_spill] sm:$0xff]  ;;  %4059 = vmatprep.mubr.f32.mxu1 %v12554_v17  ;;  %v10978_v27 = vld [vmem:[#allocation6 + $0x20] sm:$0xff]  ;;  %v12574_v19 = vld [vmem:[#allocation46_spill] sm:$0xff] }
 0x2b8   : > { %v12566_v13 = vrot.slane %v12538_v15, 2  ;;  %v12101_v52 = vrot.slane %v12567_v9, 2  ;;  %v12105_v48 = vrot.slane %v12568_v40, 2  ;;  %v12570_v0 = vrot.slane %v12540_v20, 2 }
 0x2b9   : > { %v7635_v25 = vpack.c.bf16 %v3833_v24, %v3826_v5  ;;  %7622 = vmatpush1.bf16.msra.mxu0 %v7621_v58  ;;  %v12571_v36 = vrot.slane %v12539_v39, 2  ;;  %v2895_v15 = vsel %vm2818_vm5, %v2880_v38, %v2894_v45  ;;  %7634 = vmatprep.subr.bf16.mxu1 %v7633_v51  ;;  %v12572_v5 = vld [vmem:[#allocation43_spill] sm:$0xff]  ;;  %v12573_v24 = vld [vmem:[#allocation40_spill] sm:$0xff] }
 0x2ba   : > { %v2933_v41 = vsel %vm2818_vm5, %v12566_v13, %v2932_v26  ;;  %v2935_v8 = vsel %vm2818_vm5, %v12570_v0, %v2934_v2  ;;  %v3140_v58 = vadd.f32 %v2895_v15, %v12574_v19  ;;  %v2947_v20 = vsel %vm2818_vm5, %v2932_v26, %v12101_v52  ;;  %v12578_v0 = vld [vmem:[#allocation73_spill] sm:$0xff]  ;;  %6967 = vmatmul.mubr.msk.f32.gmra.mrb[154].mxu1 %vm3927_vm8, %v10978_v27 }
 0x2bb   : > { %v3159_v29 = vadd.f32 %v2933_v41, %v12569_v35  ;;  %v2881_v33 = vsel %vm2818_vm5, %v12571_v36, %v2880_v38  ;;  %v3160_v21 = vadd.f32 %v2935_v8, %v12572_v5  ;;  %7636 = vmatpush1.bf16.msra.mxu1 %v7635_v25  ;;  %v12576_v38 = vld [vmem:[#allocation45_spill] sm:$0xff]  ;;  %v12577_v41 = vld [vmem:[#allocation96_spill] sm:$0xff]  ;;  %v2908_v51 = vrot.slane %v12578_v0, 2  ;;  %4065 = vmatprep.mubr.f32.mxu1 %v12554_v17 }
 0x2bc   : > { %v3133_v3 = vadd.f32 %v2881_v33, %v12573_v24  ;;  %v3166_v13 = vadd.f32 %v2947_v20, %v12576_v38  ;;  %v12100_v35 = vrot.slane %v12577_v41, 2  ;;  %v12579_v8 = vmax.f32 %v10909_v44, 0.0 }
 0x2bd   : > { %v10987_v39 = vadd.f32 %v12437_v63, %v3159_v29  ;;  %v11000_v15 = vadd.f32 %v10839_v28, %v3140_v58  ;;  %v3419_v26 = vmax.f32 %v10741_v11, 0.0  ;;  %v2909_v24 = vsel %vm2818_vm5, %v2894_v45, %v2908_v51  ;;  %v12582_v58 = vld [vmem:[#allocation47_spill] sm:$0xff]  ;;  %v12583_v45 = vld [vmem:[#allocation44_spill] sm:$0xff] }
 0x2be   : > { %v10994_v36 = vrot.slane %v12579_v8, 1  ;;  %v10997_v33 = vadd.f32 %v10839_v28, %v3133_v3  ;;  %v11007_v29 = vadd.f32 %v12437_v63, %v3166_v13  ;;  %v2949_v5 = vsel %vm2818_vm5, %v2934_v2, %v12100_v35  ;;  %v11014_v3 = vld [vmem:[#allocation6 + $0x28] sm:$0xff] }
 0x2bf   : > { %12575 = vst [vmem:[#allocation23_spill] sm:$0xff] %v10987_v39  ;;  %12580 = vst [vmem:[#allocation88_spill] sm:$0xff] %v11000_v15  ;;  %v12102_v25 = vmax.f32 %v10987_v39, 0.0  ;;  %v12103_v19 = vmax.f32 %v11000_v15, 0.0  ;;  %v3167_v20 = vadd.f32 %v2949_v5, %v12582_v58  ;;  %v2923_v38 = vsel %vm2818_vm5, %v2908_v51, %v12105_v48  ;;  %v12584_v8 = vld [vmem:[#allocation50_spill] sm:$0xff]  ;;  %6968 = vmatmul.mubr.msk.f32.gmra.mrb[156].mxu1 %vm3927_vm8, %v11014_v3  ;;  %v12587_v39 = vld [vmem:[#allocation83_spill] sm:$0xff] }
 0x2c0   : > { %12581 = vst [vmem:[#allocation97_spill] sm:$0xff] %v11014_v3  ;;  %v12104_v11 = vmax.f32 %v10997_v33, 0.0  ;;  %v11023_v13 = vadd.f32 %v12444_v60, %v3160_v21  ;;  %v12110_v2 = vmax.f32 %v11007_v29, 0.0  ;;  %v3147_v0 = vadd.f32 %v2909_v24, %v12583_v45  ;;  %4071 = vmatprep.mubr.f32.mxu1 %v12554_v17 }
 0x2c1   : > { %v3154_v35 = vadd.f32 %v2923_v38, %v12584_v8  ;;  %v11030_v52 = vrot.slane %v12102_v25, 1  ;;  %v11037_v58 = vadd.f32 %v12444_v60, %v3167_v20  ;;  %v3688_v51 = vrot.slane %v3419_v26, 1  ;;  %v11053_v20 = vld [vmem:[#allocation6 + $0x30] sm:$0x1f] }
 0x2c2   : > { %v11034_v5 = vrot.slane %v12104_v11, 1  ;;  %v11043_v21 = vrot.slane %v12103_v19, 1  ;;  %v11046_v24 = vadd.f32 %v10839_v28, %v3147_v0  ;;  %v3365_v45 = vmax.f32 %v10747_v30, 0.0 }
 0x2c3   : > { %12585 = vst [vmem:[#allocation98_spill] sm:$0xff] %v11037_v58  ;;  %v11049_v38 = vadd.f32 %v10839_v28, %v3154_v35  ;;  %v3689_v25 = vsel %vm2334_vm4, %v10674_v14, %v3688_v51  ;;  %v3703_v19 = vsel %vm2334_vm4, %v3688_v51, %v10822_v43  ;;  %v3687_v0 = vsel %vm2334_vm4, %v10655_v56, %v10763_v22 }
 0x2c4   : > { %v11065_v35 = vrot.slane %v12110_v2, 1  ;;  %v12586_v11 = vmax.f32 %v10638_v10, 0.0  ;;  %v3902_v8 = vmax.f32 %v3419_v26, %v3703_v19  ;;  %v3580_v14 = vrot.slane %v3365_v45, 1  ;;  %6969 = vmatmul.mubr.msk.f32.gmra.mrb[158].mxu1 %vm3927_vm8, %v11053_v20 }
 0x2c5   : > { %v3701_v51 = vsel %vm2334_vm4, %v10763_v22, %v10769_v47  ;;  %v12588_v3 = vmax.f32 %v12587_v39, 0.0  ;;  %v12589_v2 = vmax.f32 %v11037_v58, 0.0  ;;  %v12590_v10 = vmax.f32 %v11046_v24, 0.0  ;;  %4249 = vmatprep.mubr.f32.mxu1 %v12554_v17  ;;  %v12597_v58 = vld [vmem:[#allocation74_spill] sm:$0xff] }
 0x2c6   : > { %v3895_v48 = vmax.f32 %v12586_v11, %v3689_v25  ;;  %v12591_v11 = vmax.f32 %v10718_v16, 0.0  ;;  %v3581_v22 = vsel %vm2334_vm4, %v10737_v12, %v3580_v14  ;;  %v3595_v47 = vsel %vm2334_vm4, %v3580_v14, %v10859_v31 }
 0x2c7   : > { %v3894_v56 = vmax.f32 %v12588_v3, %v3687_v0  ;;  %v11080_v30 = vrot.slane %v12589_v2, 1  ;;  %v11084_v26 = vrot.slane %v12590_v10, 1  ;;  %v3579_v39 = vsel %vm2334_vm4, %v10666_v32, %v10798_v46  ;;  %v12593_v0 = vld [vmem:[#allocation85_spill] sm:$0xff] }
 0x2c8   : > { %v7623_v25 = vpack.c.bf16 %v3902_v8, %v3895_v48  ;;  %v3901_v19 = vmax.f32 %v12591_v11, %v3701_v51  ;;  %v3593_v3 = vsel %vm2334_vm4, %v10798_v46, %v10808_v50  ;;  %v12592_v16 = vmax.f32 %v10658_v59, 0.0  ;;  %v12596_v11 = vld [vmem:[#allocation17_spill] sm:$0xff] }
 0x2c9   : > { %v3848_v2 = vmax.f32 %v3365_v45, %v3595_v47  ;;  %v12594_v51 = vmax.f32 %v12593_v0, 0.0  ;;  %v12595_v10 = vmax.f32 %v10730_v53, 0.0  ;;  %v2960_v15 = vrot.slane %v12596_v11, 2  ;;  %v12603_v0 = vld [vmem:[#allocation82_spill] sm:$0xff]  ;;  %v12608_v11 = vld [vmem:[#allocation48_spill] sm:$0xff] }
 0x2ca   : > { %7624 = vmatprep.subr.bf16.mxu0 %v7623_v25  ;;  %v3841_v48 = vmax.f32 %v12592_v16, %v3581_v22  ;;  %v7625_v8 = vpack.c.bf16 %v3901_v19, %v3894_v56  ;;  %v2950_v32 = vrot.slane %v12597_v58, 2  ;;  %v3717_v46 = vsel %vm2334_vm4, %v10822_v43, %v10810_v62  ;;  %v12599_v56 = vld [vmem:[#allocation18_spill] sm:$0xff]  ;;  %v12600_v22 = vld [vmem:[#allocation81_spill] sm:$0xff]  ;;  %v12602_v16 = vld [vmem:[#allocation92_spill] sm:$0xff] }
 0x2cb   : > { %v3840_v12 = vmax.f32 %v12594_v51, %v3579_v39  ;;  %v3847_v14 = vmax.f32 %v12595_v10, %v3593_v3  ;;  %v12598_v59 = vmax.f32 %v10787_v1, 0.0  ;;  %v2962_v19 = vrot.slane %v12599_v56, 2  ;;  %v12604_v62 = vld [vmem:[#allocation49_spill] sm:$0xff] }
 0x2cc   : > { %v7637_v25 = vpack.c.bf16 %v3848_v2, %v3841_v48  ;;  %7626 = vmatpush1.bf16.msra.mxu0 %v7625_v8  ;;  %v2936_v47 = vrot.slane %v12600_v22, 2  ;;  %v12601_v53 = vrot.slane %v12567_v9, 2  ;;  %v12121_v58 = vrot.slane %v12602_v16, 2  ;;  %v12607_v9 = vld [vmem:[#allocation51_spill] sm:$0xff]  ;;  %v12611_v56 = vld [vmem:[#allocation93_spill] sm:$0xff] }
 0x2cd   : > { %v3909_v45 = vmax.f32 %v12598_v59, %v3717_v46  ;;  %v7639_v39 = vpack.c.bf16 %v3847_v14, %v3840_v12  ;;  %v12119_v51 = vrot.slane %v12603_v0, 2  ;;  %v12605_v1 = vrot.slane %v12577_v41, 2  ;;  %v12610_v59 = vld [vmem:[#allocation53_spill] sm:$0xff] }
 0x2ce   : > { %v2961_v3 = vsel %vm2818_vm5, %v12601_v53, %v2960_v15  ;;  %7638 = vmatprep.subr.bf16.mxu1 %v7637_v25  ;;  %v12606_v8 = vrot.slane %v12568_v40, 2  ;;  %v2951_v14 = vsel %vm2818_vm5, %v2936_v47, %v2950_v32  ;;  %v2975_v25 = vsel %vm2818_vm5, %v2960_v15, %v12121_v58  ;;  %v12609_v40 = vld [vmem:[#allocation54_spill] sm:$0xff]  ;;  %v12613_v15 = vld [vmem:[#allocation19_spill] sm:$0xff] }
 0x2cf   : > { %v3173_v43 = vadd.f32 %v2961_v3, %v12604_v62  ;;  %v7627_v48 = vpack.c.bf16 %v10825_v49, %v3909_v45  ;;  %v2963_v2 = vsel %vm2818_vm5, %v12605_v1, %v2962_v19  ;;  %7640 = vmatpush1.bf16.msra.mxu1 %v7639_v39  ;;  %v3168_v41 = vadd.f32 %v2951_v14, %v12609_v40  ;;  %v12615_v62 = vld [vmem:[#allocation87_spill] sm:$0xff] }
 0x2d0   : > { %v2937_v12 = vsel %vm2818_vm5, %v12606_v8, %v2936_v47  ;;  %v3174_v10 = vadd.f32 %v2963_v2, %v12607_v9  ;;  %v3180_v45 = vadd.f32 %v2975_v25, %v12610_v59  ;;  %v12120_v22 = vrot.slane %v12611_v56, 2  ;;  %v12616_v9 = vld [vmem:[#allocation55_spill] sm:$0xff]  ;;  %v12618_v59 = vld [vmem:[#allocation20_spill] sm:$0xff] }
 0x2d1   : > { %v3161_v46 = vadd.f32 %v2937_v12, %v12608_v11  ;;  %v11134_v49 = vadd.f32 %v12437_v63, %v3173_v43  ;;  %7629 = vmatprep.subr.msk.bf16.mxu0 %vm10722_vm7, %v7627_v48  ;;  %v12612_v47 = vmax.f32 %v11049_v38, 0.0  ;;  %v12614_v3 = vpack.c.bf16 %v10783_v55, %v12613_v15 }
 0x2d2   : > { %v2964_v43 = vrot.slane %v12615_v62, 2  ;;  %v3379_v48 = vmax.f32 %v10884_v6, 0.0  ;;  %v11157_v2 = vadd.f32 %v10839_v28, %v3168_v41  ;;  %v11160_v8 = vadd.f32 %v12437_v63, %v3180_v45 }
 0x2d3   : > { %v11143_v39 = vrot.slane %v12612_v47, 1  ;;  %v11146_v53 = vadd.f32 %v10839_v28, %v3161_v46  ;;  %7632 = vmatpush1.bf16.msk.msra.mxu0 %vm10722_vm7, %v12614_v3  ;;  %v12113_v1 = vmax.f32 %v11134_v49, 0.0  ;;  %v2977_v12 = vsel %vm2818_vm5, %v2962_v19, %v12120_v22  ;;  %v12617_v19 = vld [vmem:[#allocation52_spill] sm:$0xff]  ;;  %v12619_v47 = vld [vmem:[#allocation58_spill] sm:$0xff]  ;;  %v12631_v22 = vld [vmem:[#allocation91_spill] sm:$0xff] }
 0x2d4   : > { %v3181_v14 = vadd.f32 %v2977_v12, %v12616_v9  ;;  %v2965_v11 = vsel %vm2818_vm5, %v2950_v32, %v2964_v43  ;;  %v2979_v6 = vsel %vm2818_vm5, %v2964_v43, %v12119_v51  ;;  %v11176_v25 = vadd.f32 %v12444_v60, %v3174_v10 }
 0x2d5   : > { %v12114_v55 = vmax.f32 %v11146_v53, 0.0  ;;  %v11173_v46 = vrot.slane %v12113_v1, 1  ;;  %v12112_v40 = vmax.f32 %v11157_v2, 0.0  ;;  %v3175_v41 = vadd.f32 %v2965_v11, %v12617_v19 }
 0x2d6   : > { %6972 = vmatmul.mubr.msk.f32.vlgmr.msra.gmra.mrb[148].mxu0 %vm3927_vm8, %v12618_v59  ;;  %v12115_v32 = vmax.f32 %v11160_v8, 0.0  ;;  %v11184_v45 = vadd.f32 %v12444_v60, %v3181_v14  ;;  %v3182_v15 = vadd.f32 %v2979_v6, %v12619_v47  ;;  %v3608_v3 = vrot.slane %v3379_v48, 1  ;;  %v12620_v47 = vld [vmem:[#allocation77_spill] sm:$0xff] }
 0x2d7   : > { %4148 = vmatprep.mubr.f32.mxu0 %v12554_v17  ;;  %v11190_v10 = vrot.slane %v12114_v55, 1  ;;  %v11194_v62 = vrot.slane %v12112_v40, 1  ;;  %v11197_v43 = vadd.f32 %v10839_v28, %v3175_v41  ;;  %v12116_v6 = vmov 0.0|0.0  }
 0x2d8   : > { %v12118_v12 = vmax.f32 %v11184_v45, 0.0  ;;  %v11201_v9 = vadd.f32 %v10839_v28, %v3182_v15  ;;  %v3609_v14 = vsel %vm2334_vm4, %v10859_v31, %v3608_v3  ;;  %v3623_v11 = vsel %vm2334_vm4, %v3608_v3, %v10923_v7  ;;  %7663 = vmatprep.subr.bf16.mxu0 %v12116_v6  ;;  %v12625_v6 = vld [vmem:[#allocation22_spill] sm:$0xff] }
 0x2d9   : > { %v12122_v19 = vmax.f32 %v11197_v43, 0.0  ;;  %v12621_v40 = vmax.f32 %v12620_v47, 0.0  ;;  %v3862_v1 = vmax.f32 %v3379_v48, %v3623_v11  ;;  %v3607_v15 = vsel %vm2334_vm4, %v10808_v50, %v10891_v61  ;;  %v12622_v48 = vld [vmem:[#allocation75_spill] sm:$0xff]  ;;  %v12628_v50 = vld [vmem:[#allocation90_spill] sm:$0xff] }
 0x2da   : > { %6973 = vmatmul.mubr.msk.f32.gmra.mrb[150].mxu0 %vm3927_vm8, %v10881_v23  ;;  %v11218_v31 = vrot.slane %v12115_v32, 1  ;;  %v11222_v3 = vrot.slane %v12118_v12, 1  ;;  %v12624_v55 = vmax.f32 %v10852_v37, 0.0  ;;  %v3555_v12 = vsel %vm2334_vm4, %v12625_v6, %v10937_v18 }
 0x2db   : > { %v3855_v41 = vmax.f32 %v12621_v40, %v3609_v14  ;;  %v3621_v40 = vsel %vm2334_vm4, %v10891_v61, %v10906_v54  ;;  %v12623_v14 = vmax.f32 %v12622_v48, 0.0  ;;  %4154 = vmatprep.mubr.f32.mxu0 %v12554_v17  ;;  %v11238_v51 = vrot.slane %v12122_v19, 1 }
 0x2dc   : > { %v3861_v32 = vmax.f32 %v12624_v55, %v3621_v40  ;;  %v3569_v61 = vsel %vm2334_vm4, %v10937_v18, %v10994_v36  ;;  %v12629_v55 = vmax.f32 %v10894_v42, 0.0  ;;  %v12630_v40 = vld [vmem:[#allocation94_spill] sm:$0xff]  ;;  %v2990_v58 = vrot.slane %v12631_v22, 2 }
 0x2dd   : > { %v3854_v11 = vmax.f32 %v12623_v14, %v3607_v15  ;;  %v7641_v47 = vpack.c.bf16 %v3862_v1, %v3855_v41  ;;  %v12626_v15 = vld [vmem:[#allocation79_spill] sm:$0xff]  ;;  %v2988_v1 = vrot.slane %v12628_v50, 2  ;;  %v3006_v6 = vrot.slane %v12630_v40, 2 }
 0x2de   : > { %v12627_v48 = vmax.f32 %v12626_v15, 0.0  ;;  %v3835_v41 = vmax.f32 %v12629_v55, %v3569_v61  ;;  %6974 = vmatmul.mubr.msk.f32.gmra.mrb[152].mxu0 %vm3927_vm8, %v10919_v57  ;;  %v12632_v19 = vrot.slane %v12602_v16, 2  ;;  %v12633_v15 = vld [vmem:[#allocation95_spill] sm:$0xff]  ;;  %v3597_v42 = vsel %vm2334_vm4, %v11034_v5, %v11043_v21 }
 0x2df   : > { %7642 = vmatprep.subr.bf16.mxu1 %v7641_v47  ;;  %v7643_v37 = vpack.c.bf16 %v3861_v32, %v3854_v11  ;;  %v3583_v32 = vsel %vm2334_vm4, %v10994_v36, %v11034_v5  ;;  %4160 = vmatprep.mubr.f32.mxu0 %v12554_v17  ;;  %v12634_v11 = vld [vmem:[#allocation57_spill] sm:$0xff]  ;;  %v12635_v47 = vld [vmem:[#allocation60_spill] sm:$0xff]  ;;  %v12638_v36 = vrot.slane %v12603_v0, 2 }
 0x2e0   : > { %v3828_v14 = vmax.f32 %v12627_v48, %v3555_v12  ;;  %v2989_v18 = vsel %vm2818_vm5, %v12632_v19, %v2988_v1  ;;  %v2992_v12 = vrot.slane %v12633_v15, 2  ;;  %v3203_v16 = vadd.f32 %v3006_v6, %v12635_v47  ;;  %v12637_v48 = vld [vmem:[#allocation59_spill] sm:$0xff] }
 0x2e1   : > { %7644 = vmatpush1.bf16.msra.mxu1 %v7643_v37  ;;  %v3187_v50 = vadd.f32 %v2989_v18, %v12634_v11  ;;  %v12636_v19 = vrot.slane %v12611_v56, 2  ;;  %v12639_v15 = vmax.f32 %v10909_v44, 0.0  ;;  %v12640_v56 = vld [vmem:[#allocation56_spill] sm:$0xff]  ;;  %v12641_v11 = vld [vmem:[#allocation62_spill] sm:$0xff] }
 0x2e2   : > { %v7664_v22 = vpack.c.bf16 %v3835_v41, %v3828_v14  ;;  %v2993_v40 = vsel %vm2818_vm5, %v12638_v36, %v2992_v12  ;;  %v3007_v5 = vsel %vm2818_vm5, %v2992_v12, %v3006_v6  ;;  %v3338_v41 = vadd.f32 %v10839_v28, %v3203_v16  ;;  %v12645_v12 = vld [vmem:[#allocation76_spill] sm:$0xff]  ;;  %6975 = vmatmul.mubr.msk.f32.gmra.mrb[154].mxu0 %vm3927_vm8, %v10955_v4 }
 0x2e3   : > { %v2991_v61 = vsel %vm2818_vm5, %v12636_v19, %v2990_v58  ;;  %v3842_v37 = vmax.f32 %v12639_v15, %v3583_v32  ;;  %v11276_v14 = vadd.f32 %v12437_v63, %v3187_v50  ;;  %v3189_v18 = vadd.f32 %v2993_v40, %v12640_v56  ;;  %4166 = vmatprep.mubr.f32.mxu0 %v12554_v17 }
 0x2e4   : > { %v3188_v55 = vadd.f32 %v2991_v61, %v12637_v48  ;;  %7665 = vmatpush3.bf16.msra.mxu0 %v7664_v22  ;;  %v3196_v47 = vadd.f32 %v3007_v5, %v12641_v11  ;;  %v12642_v19 = vmax.f32 %v11201_v9, 0.0  ;;  %v12643_v61 = vmov 0.0|0.0   ;;  %v12646_v22 = vld [vmem:[#allocation66_spill] sm:$0xff] }
 0x2e5   : > { %7666 = vmatprep.subr.bf16.mxu0 %v12643_v61  ;;  %v12644_v6 = vmax.f32 %v10997_v33, 0.0  ;;  %v3002_v32 = vrot.slane %v12645_v12, 2  ;;  %v3004_v50 = vrot.slane %v12646_v22, 2  ;;  %v12123_v16 = vmax.f32 %v11276_v14, 0.0 }
 0x2e6   : > { %v11283_v0 = vrot.slane %v12642_v19, 1  ;;  %v3436_v48 = vmax.f32 %v3338_v41, 0.0  ;;  %v11294_v36 = vadd.f32 %v10839_v28, %v3189_v18  ;;  %v3331_v40 = vadd.f32 %v10839_v28, %v3196_v47  ;;  %v12648_v28 = vld [vmem:[#allocation61_spill] sm:$0xff]  ;;  %6976 = vmatmul.mubr.msk.f32.gmra.mrb[156].mxu0 %vm3927_vm8, %v10978_v27 }
 0x2e7   : > { %v3849_v44 = vmax.f32 %v12644_v6, %v3597_v42  ;;  %v3003_v33 = vsel %vm2818_vm5, %v2988_v1, %v3002_v32  ;;  %v12647_v42 = vld [vmem:[#allocation64_spill] sm:$0xff]  ;;  %v3005_v56 = vsel %vm2818_vm5, %v2990_v58, %v3004_v50  ;;  %v11303_v11 = vrot.slane %v12123_v16, 1  ;;  %v12649_v6 = vld [vmem:[#allocation63_spill] sm:$0xff]  ;;  %4172 = vmatprep.mubr.f32.mxu0 %v12554_v17 }
 0x2e8   : > { %v3201_v15 = vadd.f32 %v3002_v32, %v12647_v42  ;;  %v3722_v19 = vrot.slane %v3436_v48, 1  ;;  %v11306_v41 = vadd.f32 %v12444_v60, %v3188_v55  ;;  %v3429_v18 = vmax.f32 %v3331_v40, 0.0 }
 0x2e9   : > { %v7667_v5 = vpack.c.bf16 %v3849_v44, %v3842_v37  ;;  %v3194_v47 = vadd.f32 %v3003_v33, %v12648_v28  ;;  %v3195_v1 = vadd.f32 %v3005_v56, %v12649_v6  ;;  %v12650_v44 = vld [vmem:[#allocation65_spill] sm:$0xff]  ;;  %v12124_v58 = vmax.f32 %v11294_v36, 0.0 }
 0x2ea   : > { %v3336_v37 = vadd.f32 %v12437_v63, %v3201_v15  ;;  %v3202_v12 = vadd.f32 %v3004_v50, %v12650_v44  ;;  %v11312_v32 = vmax.f32 %v3436_v48, %v3722_v19  ;;  %v11315_v22 = vrot.slane %v3429_v18, 1  ;;  %v12651_v6 = vld [vmem:[#allocation21_spill] sm:$0xff] }
 0x2eb   : > { %7668 = vmatpush3.bf16.msra.mxu0 %v7667_v5  ;;  %v3393_v42 = vmax.f32 %v11023_v13, 0.0  ;;  %v3329_v55 = vadd.f32 %v12437_v63, %v3194_v47  ;;  %v11323_v5 = vadd.f32 %v12444_v60, %v3195_v1  ;;  %v3635_v33 = vsel %vm2334_vm4, %v10906_v54, %v11030_v52  ;;  %v12653_v44 = vld [vmem:[#allocation97_spill] sm:$0xff] }
 0x2ec   : > { %7669 = vmatprep.subr.bf16.mxu0 %v12643_v61  ;;  %v3434_v40 = vmax.f32 %v3336_v37, 0.0  ;;  %v11326_v50 = vadd.f32 %v12444_v60, %v3202_v12  ;;  %v3723_v48 = vsel %vm2334_vm4, %v11315_v22, %v3722_v19  ;;  %v3649_v63 = vsel %vm2334_vm4, %v11030_v52, %v11065_v35  ;;  %6977 = vmatmul.mubr.msk.f32.gmra.mrb[158].mxu0 %vm3927_vm8, %v12653_v44 }
 0x2ed   : > { %v3636_v13 = vrot.slane %v3393_v42, 1  ;;  %v11337_v15 = vmax.f32 %v3429_v18, %v3723_v48  ;;  %v3427_v56 = vmax.f32 %v3329_v55, 0.0  ;;  %v3428_v60 = vmax.f32 %v11323_v5, 0.0  ;;  %v12654_v55 = vld [vmem:[#allocation84_spill] sm:$0xff]  ;;  %4178 = vmatprep.mubr.f32.mxu0 %v12554_v17  ;;  %v7983_v5 = vld [vmem:[#allocation7 + $0x48] ss:$16 sps:$4 sm:$0xff]  }
 0x2ee   : > { %v3718_v28 = vrot.slane %v3434_v40, 1  ;;  %v12652_v54 = vmax.f32 %v12651_v6, 0.0  ;;  %v3694_v52 = vrot.slane %v12124_v58, 1  ;;  %v12655_v48 = vmax.f32 %v12654_v55, 0.0  ;;  %v12656_v6 = vld [vmem:[#allocation23_spill] sm:$0xff] }
 0x2ef   : > { %v3637_v19 = vsel %vm2334_vm4, %v10923_v7, %v3636_v13  ;;  %v3651_v37 = vsel %vm2334_vm4, %v3636_v13, %v11080_v30  ;;  %v3704_v18 = vrot.slane %v3427_v56, 1  ;;  %v3706_v7 = vrot.slane %v3428_v60, 1 }
 0x2f0   : > { %v3868_v1 = vmax.f32 %v12652_v54, %v3635_v33  ;;  %v11351_v12 = vmax.f32 %v3434_v40, %v3718_v28  ;;  %v3869_v16 = vmax.f32 %v12655_v48, %v3637_v19  ;;  %v3876_v13 = vmax.f32 %v3393_v42, %v3651_v37  ;;  %v12658_v19 = vld [vmem:[#allocation88_spill] sm:$0xff]  ;;  %6978 = vmatmul.mubr.msk.f32.gmra.mrb[160].mxu0 %vm3927_vm8, %v11053_v20 }
 0x2f1   : > { %v12657_v33 = vmax.f32 %v12656_v6, 0.0  ;;  %v3611_v47 = vsel %vm2334_vm4, %v11043_v21, %v11084_v26  ;;  %v3719_v58 = vsel %vm2334_vm4, %v3704_v18, %v3718_v28  ;;  %v3625_v40 = vsel %vm2334_vm4, %v11084_v26, %v11143_v39  ;;  %7432 = vmatprep.mubr.msk.f32.mxu0 %vm8440_vm9, %v12554_v17 }
 0x2f2   : > { %v12659_v55 = vmax.f32 %v12658_v19, 0.0  ;;  %v3639_v42 = vsel %vm2334_vm4, %v11143_v39, %v11190_v10  ;;  %v11372_v37 = vmax.f32 %v3427_v56, %v3719_v58  ;;  %v12661_v28 = vmax.f32 %v11046_v24, 0.0 }
 0x2f3   : > { %v3875_v54 = vmax.f32 %v12657_v33, %v3649_v63  ;;  %v12660_v63 = vmax.f32 %v11326_v50, 0.0  ;;  %v7645_v33 = vpack.c.bf16 %v3876_v13, %v3869_v16  ;;  %v12662_v19 = vmax.f32 %v11049_v38, 0.0 }
 0x2f4   : > { %v3856_v48 = vmax.f32 %v12659_v55, %v3611_v47  ;;  %v3863_v26 = vmax.f32 %v12661_v28, %v3625_v40  ;;  %v3653_v47 = vsel %vm2334_vm4, %v11190_v10, %v11194_v62  ;;  %v3407_v58 = vmax.f32 %v11176_v25, 0.0 }
 0x2f5   : > { %v3720_v6 = vrot.slane %v12660_v63, 1  ;;  %v7647_v21 = vpack.c.bf16 %v3875_v54, %v3868_v1  ;;  %v3870_v39 = vmax.f32 %v12662_v19, %v3639_v42  ;;  %v7660_v56 = vpack.c.bf16 %v11351_v12, %v11372_v37  ;;  %7646 = vmatprep.subr.bf16.mxu1 %v7645_v33 }
 0x2f6   : > { %v12663_v16 = vmax.f32 %v11146_v53, 0.0  ;;  %v3663_v24 = vsel %vm2334_vm4, %v11065_v35, %v11173_v46  ;;  %v3677_v10 = vsel %vm2334_vm4, %v11173_v46, %v11218_v31  ;;  %v7670_v38 = vpack.c.bf16 %v3863_v26, %v3856_v48 }
 0x2f7   : > { %7648 = vmatpush1.bf16.msra.mxu1 %v7647_v21  ;;  %v3664_v13 = vrot.slane %v3407_v58, 1  ;;  %v12664_v25 = vmax.f32 %v11007_v29, 0.0  ;;  %v12665_v12 = vmax.f32 %v11134_v49, 0.0  ;;  %v3667_v53 = vsel %vm2334_vm4, %v11194_v62, %v11238_v51  ;;  %v12667_v62 = vld [vmem:[#allocation98_spill] sm:$0xff] }
 0x2f8   : > { %v3877_v1 = vmax.f32 %v12663_v16, %v3653_v47  ;;  %v3681_v35 = vsel %vm2334_vm4, %v11238_v51, %v11283_v0  ;;  %v3695_v46 = vsel %vm2334_vm4, %v11283_v0, %v3694_v52  ;;  %7671 = vmatpush3.bf16.msra.mxu0 %v7670_v38  ;;  %v12666_v42 = vmax.f32 %v11157_v2, 0.0 }
 0x2f9   : > { %v3882_v54 = vmax.f32 %v12664_v25, %v3663_v24  ;;  %v3889_v40 = vmax.f32 %v12665_v12, %v3677_v10  ;;  %v3665_v29 = vsel %vm2334_vm4, %v11080_v30, %v3664_v13  ;;  %v3679_v49 = vsel %vm2334_vm4, %v3664_v13, %v11222_v3  ;;  %7672 = vmatprep.subr.bf16.mxu0 %v12643_v61  ;;  %v7986_v25 = vld [vmem:[#allocation7 + $0x60] ss:$16 sps:$4 sm:$0xff]   ;;  %v7994_v12 = vld [vmem:[#allocation7 + $0x84] ss:$16 sps:$4 sm:$0xff]  }
 0x2fa   : > { %v7673_v55 = vpack.c.bf16 %v3877_v1, %v3870_v39  ;;  %v3884_v37 = vmax.f32 %v12666_v42, %v3667_v53  ;;  %v12668_v63 = vmax.f32 %v12667_v62, 0.0  ;;  %v3890_v51 = vmax.f32 %v3407_v58, %v3679_v49  ;;  %v8000_v49 = vld [vmem:[#allocation7 + $0xa4] ss:$16 sps:$4 sm:$0xff]   ;;  %v7998_v62 = vld [vmem:[#allocation7 + $0xa0] ss:$16 sps:$4 sm:$0xff]  }
 0x2fb   : > { %v7651_v48 = vpack.c.bf16 %v3889_v40, %v3882_v54  ;;  %v12669_v21 = vmax.f32 %v11197_v43, 0.0  ;;  %v3709_v28 = vsel %vm2334_vm4, %v3694_v52, %v11315_v22  ;;  %v12670_v30 = vmax.f32 %v11201_v9, 0.0  ;;  %v7989_v54 = vld [vmem:[#allocation7 + $0x68] ss:$16 sps:$4 sm:$0xff]   ;;  %v7997_v40 = vld [vmem:[#allocation7 + $0x8c] ss:$16 sps:$4 sm:$0xff]  }
 0x2fc   : > { %v3883_v33 = vmax.f32 %v12668_v63, %v3665_v29  ;;  %v12671_v47 = vmax.f32 %v11294_v36, 0.0  ;;  %v3421_v2 = vmax.f32 %v11306_v41, 0.0  ;;  %v3691_v39 = vsel %vm2334_vm4, %v11218_v31, %v11303_v11  ;;  %7674 = vmatpush3.bf16.msra.mxu0 %v7673_v55  ;;  %v7995_v29 = vld [vmem:[#allocation7 + $0x88] ss:$16 sps:$4 sm:$0xff]  }
 0x2fd   : > { %v3891_v0 = vmax.f32 %v12669_v21, %v3681_v35  ;;  %v3898_v26 = vmax.f32 %v12670_v30, %v3695_v46  ;;  %v3705_v43 = vsel %vm2334_vm4, %v11303_v11, %v3704_v18  ;;  %v12672_v1 = vmax.f32 %v11160_v8, 0.0  ;;  %7675 = vmatprep.subr.bf16.mxu0 %v12643_v61  ;;  %v7992_v46 = vld [vmem:[#allocation7 + $0x80] ss:$16 sps:$4 sm:$0xff]   ;;  %v8001_v63 = vld [vmem:[#allocation7 + $0xa8] ss:$16 sps:$4 sm:$0xff]  }
 0x2fe   : > { %v3905_v19 = vmax.f32 %v12671_v47, %v3709_v28  ;;  %v7649_v16 = vpack.c.bf16 %v3890_v51, %v3883_v33  ;;  %v3692_v52 = vrot.slane %v3421_v2, 1  ;;  %v12673_v36 = vmax.f32 %v11276_v14, 0.0  ;;  %v8006_v33 = vld [vmem:[#allocation7 + $0xc4] ss:$16 sps:$4 sm:$0xff]   ;;  %v8009_v51 = vld [vmem:[#allocation7 + $0xcc] ss:$16 sps:$4 sm:$0xff]  }
 0x2ff   : > { %v7676_v58 = vpack.c.bf16 %v3891_v0, %v3884_v37  ;;  %v3896_v22 = vmax.f32 %v12672_v1, %v3691_v39  ;;  %v7682_v41 = vpack.c.bf16 %v11312_v32, %v11337_v15  ;;  %v12674_v10 = vmax.f32 %v11326_v50, 0.0  ;;  %v8004_v30 = vld [vmem:[#allocation7 + $0xc0] ss:$16 sps:$4 sm:$0xff]   ;;  %v8012_v47 = vld [vmem:[#allocation7 + $0xe4] ss:$16 sps:$4 sm:$0xff]  }
 0x300   : > { %v7679_v9 = vpack.c.bf16 %v3905_v19, %v3898_v26  ;;  %v3903_v24 = vmax.f32 %v12673_v36, %v3705_v43  ;;  %7650 = vmatprep.subr.bf16.mxu1 %v7649_v16  ;;  %v3721_v11 = vsel %vm2334_vm4, %v3706_v7, %v3720_v6  ;;  %v3693_v8 = vsel %vm2334_vm4, %v11222_v3, %v3692_v52  ;;  %v7979_v3 = vld [vmem:[#allocation7 + $0x2c] ss:$16 sps:$4 sm:$0xff]   ;;  %v8007_v26 = vld [vmem:[#allocation7 + $0xc8] ss:$16 sps:$4 sm:$0xff]   ;;  %v8010_v16 = vld [vmem:[#allocation7 + $0xe0] ss:$16 sps:$4 sm:$0xff]  }
 0x301   : > { %v3918_v31 = vmax.f32 %v12674_v10, %v3720_v6  ;;  %7652 = vmatpush1.bf16.msra.mxu1 %v7651_v48  ;;  %v3707_v18 = vsel %vm2334_vm4, %v3692_v52, %v3706_v7  ;;  %v3911_v14 = vmax.f32 %v3428_v60, %v3721_v11  ;;  %v12675_v32 = vmax.f32 %v11184_v45, 0.0  ;;  %7677 = vmatpush3.bf16.msra.mxu0 %v7676_v58  ;;  %v7977_v45 = vld [vmem:[#allocation7 + $0x28] ss:$16 sps:$4 sm:$0xff]   ;;  %v7988_v60 = vld [vmem:[#allocation7 + $0x64] ss:$16 sps:$4 sm:$0xff]  }
 0x302   : > { %v7655_v38 = vpack.c.bf16 %v3903_v24, %v3896_v22  ;;  %v3904_v50 = vmax.f32 %v3421_v2, %v3707_v18  ;;  %7678 = vmatprep.subr.bf16.mxu0 %v12643_v61  ;;  %v7991_v7 = vld [vmem:[#allocation7 + $0x6c] ss:$16 sps:$4 sm:$0xff]   ;;  %v8013_v58 = vld [vmem:[#allocation7 + $0xe8] ss:$16 sps:$4 sm:$0xff]   ;;  %v8018_v43 = vld [vmem:[#allocation7 + $0x104] ss:$16 sps:$4 sm:$0xff]  }
 0x303   : > { %v3897_v15 = vmax.f32 %v12675_v32, %v3693_v8  ;;  %v7657_v6 = vpack.c.bf16 %v3918_v31, %v3911_v14  ;;  %v8003_v48 = vld [vmem:[#allocation7 + $0xac] ss:$16 sps:$4 sm:$0xff]   ;;  %v8016_v36 = vld [vmem:[#allocation7 + $0x100] ss:$16 sps:$4 sm:$0xff]   ;;  %v8019_v24 = vld [vmem:[#allocation7 + $0x108] ss:$16 sps:$4 sm:$0xff]  }
 0x304   : > { %v8015_v19 = vld [vmem:[#allocation7 + $0xec] ss:$16 sps:$4 sm:$0xff]   ;;  %v8022_v8 = vld [vmem:[#allocation7 + $0x120] ss:$16 sps:$4 sm:$0xff]   ;;  %v8025_v18 = vld [vmem:[#allocation7 + $0x128] ss:$16 sps:$4 sm:$0xff]  }
 0x305   : > { %v7653_v13 = vpack.c.bf16 %v3904_v50, %v3897_v15  ;;  %7680 = vmatpush3.bf16.msra.mxu0 %v7679_v9  ;;  %v8021_v1 = vld [vmem:[#allocation7 + $0x10c] ss:$16 sps:$4 sm:$0xff]   ;;  %v8028_v32 = vld [vmem:[#allocation7 + $0x140] ss:$16 sps:$4 sm:$0xff]   ;;  %v8031_v15 = vld [vmem:[#allocation7 + $0x148] ss:$16 sps:$4 sm:$0xff]  }
 0x306   : > { %7681 = vmatprep.subr.bf16.mxu0 %v12643_v61  ;;  %v7982_v61 = vld [vmem:[#allocation7 + $0x44] ss:$16 sps:$4 sm:$0xff]   ;;  %v8027_v10 = vld [vmem:[#allocation7 + $0x12c] ss:$16 sps:$4 sm:$0xff]  }
 0x307   : > { %7654 = vmatprep.subr.bf16.mxu1 %v7653_v13  ;;  %v8033_v14 = vld [vmem:[#allocation7 + $0x14c] ss:$16 sps:$4 sm:$0xff]   ;;  %v8036_v50 = vld [vmem:[#allocation7 + $0x164] ss:$16 sps:$4 sm:$0xff]   ;;  %v8034_v13 = vld [vmem:[#allocation7 + $0x160] ss:$16 sps:$4 sm:$0xff]  }
 0x308   : > { %7656 = vmatpush1.bf16.msra.mxu1 %v7655_v38  ;;  %v8030_v38 = vld [vmem:[#allocation7 + $0x144] ss:$16 sps:$4 sm:$0xff]  }
 0x309   : > { %7659 = vmatprep.subr.msk.bf16.mxu1 %vm10722_vm7, %v7657_v6  ;;  %7684 = vmatpush3.bf16.msk.msra.mxu0 %vm10722_vm7, %v7682_v41  ;;  %v8024_v41 = vld [vmem:[#allocation7 + $0x124] ss:$16 sps:$4 sm:$0xff]   ;;  %v8039_v6 = vld [vmem:[#allocation7 + $0x16c] ss:$16 sps:$4 sm:$0xff]  }
 0x30c   : > { %7662 = vmatpush1.bf16.msk.msra.mxu1 %vm10722_vm7, %v7660_v56  ;;  %7433 = vmatmul.mubr.msk.f32.vlgmr.msra.gmra.mrb[162].mxu0 %vm3927_vm8, %v12618_v59 }
 0x30d   : > { %7435 = vmatprep.mubr.msk.f32.mxu0 %vm8440_vm9, %v12554_v17 }
 0x30f   : > { %6981 = vmatmul.mubr.msk.f32.vlgmr.msra.gmra.mrb[160].mxu1 %vm3927_vm8, %v12618_v59  ;;  %v7976_v59 = vld [vmem:[#allocation7 + $0x24] ss:$16 sps:$4 sm:$0xff]  }
 0x310   : > { %4255 = vmatprep.mubr.f32.mxu1 %v12554_v17  ;;  %7436 = vmatmul.mubr.msk.f32.gmra.mrb[164].mxu0 %vm3927_vm8, %v10881_v23 }
 0x311   : > { %7438 = vmatprep.mubr.msk.f32.mxu0 %vm8440_vm9, %v12554_v17 }
 0x313   : > { %6982 = vmatmul.mubr.msk.f32.gmra.mrb[162].mxu1 %vm3927_vm8, %v10881_v23  ;;  %v7970_v23 = vld [vmem:[#allocation7 + $0x4] ss:$16 sps:$4 sm:$0xff]  }
 0x314   : > { %4261 = vmatprep.mubr.f32.mxu1 %v12554_v17  ;;  %7439 = vmatmul.mubr.msk.f32.gmra.mrb[166].mxu0 %vm3927_vm8, %v10919_v57 }
 0x315   : > { %7441 = vmatprep.mubr.msk.f32.mxu0 %vm8440_vm9, %v12554_v17  ;;  %5980 = vmatprep.subr.bf16.mxu1 %v7970_v23  ;;  %v8042_v23 = vld [vmem:[#allocation7 + $0x184] ss:$16 sps:$4 sm:$0xff]  }
 0x316   : > { %5981 = vmatpush1.bf16.msra.mxu1 %v7968_v34  ;;  %v8037_v34 = vld [vmem:[#allocation7 + $0x168] ss:$16 sps:$4 sm:$0xff]  }
 0x317   : > { %6983 = vmatmul.mubr.msk.f32.gmra.mrb[164].mxu1 %vm3927_vm8, %v10919_v57  ;;  %v7971_v57 = vld [vmem:[#allocation7 + $0x8] ss:$16 sps:$4 sm:$0xff]   ;;  %5982 = vmatprep.subr.bf16.mxu1 %v7976_v59 }
 0x318   : > { %4267 = vmatprep.mubr.f32.mxu1 %v12554_v17  ;;  %7442 = vmatmul.mubr.msk.f32.gmra.mrb[168].mxu0 %vm3927_vm8, %v10955_v4 }
 0x319   : > { %7444 = vmatprep.mubr.msk.f32.mxu0 %vm8440_vm9, %v12554_v17 }
 0x31b   : > { %6984 = vmatmul.mubr.msk.f32.gmra.mrb[166].mxu1 %vm3927_vm8, %v10955_v4  ;;  %v7973_v4 = vld [vmem:[#allocation7 + $0xc] ss:$16 sps:$4 sm:$0xff]  }
 0x31c   : > { %4273 = vmatprep.mubr.f32.mxu1 %v12554_v17  ;;  %7445 = vmatmul.mubr.msk.f32.gmra.mrb[170].mxu0 %vm3927_vm8, %v10978_v27 }
 0x31d   : > { %7447 = vmatprep.mubr.msk.f32.mxu0 %vm8440_vm9, %v12554_v17  ;;  %6264 = vmatprep.subr.bf16.mxu0 %v7973_v4 }
 0x31e   : > { %6265 = vmatpush1.bf16.msra.mxu0 %v7971_v57  ;;  %v8045_v57 = vld [vmem:[#allocation7 + $0x18c] ss:$16 sps:$4 sm:$0xff]  }
 0x31f   : > { %6985 = vmatmul.mubr.msk.f32.gmra.mrb[168].mxu1 %vm3927_vm8, %v10978_v27  ;;  %v7974_v27 = vld [vmem:[#allocation7 + $0x20] ss:$16 sps:$4 sm:$0xff]   ;;  %6266 = vmatprep.subr.bf16.mxu0 %v7979_v3  ;;  %v8043_v3 = vld [vmem:[#allocation7 + $0x188] ss:$16 sps:$4 sm:$0xff]  }
 0x320   : > { %4279 = vmatprep.mubr.f32.mxu1 %v12554_v17  ;;  %7448 = vmatmul.mubr.msk.f32.gmra.mrb[172].mxu0 %vm3927_vm8, %v12653_v44 }
 0x321   : > { %7450 = vmatprep.mubr.msk.f32.mxu0 %vm8440_vm9, %v12554_v17  ;;  %5983 = vmatpush1.bf16.msra.mxu1 %v7974_v27  ;;  %v8040_v27 = vld [vmem:[#allocation7 + $0x180] ss:$16 sps:$4 sm:$0xff]  }
 0x322   : > { %6267 = vmatpush1.bf16.msra.mxu0 %v7977_v45  ;;  %5984 = vmatprep.subr.bf16.mxu1 %v7982_v61 }
 0x323   : > { %6986 = vmatmul.mubr.msk.f32.gmra.mrb[170].mxu1 %vm3927_vm8, %v12653_v44 }
 0x324   : > { %4285 = vmatprep.mubr.f32.mxu1 %v12554_v17  ;;  %7451 = vmatmul.mubr.msk.f32.gmra.mrb[174].mxu0 %vm3927_vm8, %v11053_v20  ;;  %v7980_v17 = vld [vmem:[#allocation7 + $0x40] ss:$16 sps:$4 sm:$0xff]  }
 0x325   : > { %5985 = vmatpush1.bf16.msra.mxu1 %v7980_v17  ;;  %v8051_v17 = vld [vmem:[#allocation7 + $0x1a4] ss:$16 sps:$4 sm:$0xff]  }
 0x326   : > { %5986 = vmatprep.subr.bf16.mxu1 %v7988_v60  ;;  %v8049_v60 = vld [vmem:[#allocation7 + $0x1a0] ss:$16 sps:$4 sm:$0xff]  }
 0x327   : > { %6987 = vmatmul.mubr.msk.f32.gmra.mrb[172].mxu1 %vm3927_vm8, %v11053_v20  ;;  %v7985_v20 = vld [vmem:[#allocation7 + $0x4c] ss:$16 sps:$4 sm:$0xff]  }
 0x328   : > { %6268 = vmatprep.subr.bf16.mxu0 %v7985_v20 }
 0x329   : > { %6269 = vmatpush1.bf16.msra.mxu0 %v7983_v5  ;;  %5987 = vmatpush1.bf16.msra.mxu1 %v7986_v25  ;;  %v8048_v5 = vld [vmem:[#allocation7 + $0x1ac] ss:$16 sps:$4 sm:$0xff]  }
 0x32a   : > { %6270 = vmatprep.subr.bf16.mxu0 %v7991_v7  ;;  %5988 = vmatprep.subr.bf16.mxu1 %v7994_v12  ;;  %v8057_v12 = vld [vmem:[#allocation7 + $0x1c4] ss:$16 sps:$4 sm:$0xff]  }
 0x32d   : > { %6271 = vmatpush1.bf16.msra.mxu0 %v7989_v54  ;;  %5989 = vmatpush1.bf16.msra.mxu1 %v7992_v46  ;;  %v8046_v54 = vld [vmem:[#allocation7 + $0x1a8] ss:$16 sps:$4 sm:$0xff]   ;;  %v8055_v46 = vld [vmem:[#allocation7 + $0x1c0] ss:$16 sps:$4 sm:$0xff]  }
 0x32e   : > { %6272 = vmatprep.subr.bf16.mxu0 %v7997_v40  ;;  %5990 = vmatprep.subr.bf16.mxu1 %v8000_v49  ;;  %v8054_v40 = vld [vmem:[#allocation7 + $0x1cc] ss:$16 sps:$4 sm:$0xff]  }
 0x331   : > { %6273 = vmatpush1.bf16.msra.mxu0 %v7995_v29  ;;  %5991 = vmatpush1.bf16.msra.mxu1 %v7998_v62  ;;  %v8063_v62 = vld [vmem:[#allocation7 + $0x1e4] ss:$16 sps:$4 sm:$0xff]  }
 0x332   : > { %6274 = vmatprep.subr.bf16.mxu0 %v8003_v48  ;;  %5992 = vmatprep.subr.bf16.mxu1 %v8006_v33  ;;  %v8052_v48 = vld [vmem:[#allocation7 + $0x1c8] ss:$16 sps:$4 sm:$0xff]   ;;  %v8061_v33 = vld [vmem:[#allocation7 + $0x1e0] ss:$16 sps:$4 sm:$0xff]  }
 0x335   : > { %6275 = vmatpush1.bf16.msra.mxu0 %v8001_v63  ;;  %5993 = vmatpush1.bf16.msra.mxu1 %v8004_v30  ;;  %v8060_v63 = vld [vmem:[#allocation7 + $0x1ec] ss:$16 sps:$4 sm:$0xff]   ;;  %v8058_v30 = vld [vmem:[#allocation7 + $0x1e8] ss:$16 sps:$4 sm:$0xff]  }
 0x336   : > { %6276 = vmatprep.subr.bf16.mxu0 %v8009_v51  ;;  %5994 = vmatprep.subr.bf16.mxu1 %v8012_v47 }
 0x339   : > { %6277 = vmatpush1.bf16.msra.mxu0 %v8007_v26  ;;  %5995 = vmatpush1.bf16.msra.mxu1 %v8010_v16  ;;  %v8069_v26 = vld [vmem:[#allocation7 + $0x204] ss:$16 sps:$4 sm:$0xff]   ;;  %v8066_v16 = vld [vmem:[#allocation7 + $0x20c] ss:$16 sps:$4 sm:$0xff]  }
 0x33a   : > { %6278 = vmatprep.subr.bf16.mxu0 %v8015_v19  ;;  %5996 = vmatprep.subr.bf16.mxu1 %v8018_v43 }
 0x33d   : > { %6279 = vmatpush1.bf16.msra.mxu0 %v8013_v58  ;;  %5997 = vmatpush1.bf16.msra.mxu1 %v8016_v36 }
 0x33e   : > { %6280 = vmatprep.subr.bf16.mxu0 %v8021_v1  ;;  %5998 = vmatprep.subr.bf16.mxu1 %v8024_v41 }
 0x341   : > { %6281 = vmatpush1.bf16.msra.mxu0 %v8019_v24  ;;  %5999 = vmatpush1.bf16.msra.mxu1 %v8022_v8 }
 0x342   : > { %6282 = vmatprep.subr.bf16.mxu0 %v8027_v10  ;;  %6000 = vmatprep.subr.bf16.mxu1 %v8030_v38 }
 0x345   : > { %6283 = vmatpush1.bf16.msra.mxu0 %v8025_v18  ;;  %6001 = vmatpush1.bf16.msra.mxu1 %v8028_v32 }
 0x346   : > { %6284 = vmatprep.subr.bf16.mxu0 %v8033_v14  ;;  %6002 = vmatprep.subr.bf16.mxu1 %v8036_v50 }
 0x349   : > { %6285 = vmatpush1.bf16.msra.mxu0 %v8031_v15  ;;  %6003 = vmatpush1.bf16.msra.mxu1 %v8034_v13 }
 0x34a   : > { %6286 = vmatprep.subr.bf16.mxu0 %v8039_v6  ;;  %6004 = vmatprep.subr.bf16.mxu1 %v8042_v23 }
 0x34d   : > { %6287 = vmatpush1.bf16.msra.mxu0 %v8037_v34  ;;  %6005 = vmatpush1.bf16.msra.mxu1 %v8040_v27 }
 0x34e   : > { %6288 = vmatprep.subr.bf16.mxu0 %v8045_v57  ;;  %6006 = vmatprep.subr.bf16.mxu1 %v8051_v17 }
 0x351   : > { %6289 = vmatpush1.bf16.msra.mxu0 %v8043_v3  ;;  %6007 = vmatpush1.bf16.msra.mxu1 %v8049_v60 }
 0x352   : > { %6290 = vmatprep.subr.bf16.mxu0 %v8048_v5  ;;  %6008 = vmatprep.subr.bf16.mxu1 %v8057_v12 }
 0x355   : > { %6291 = vmatpush1.bf16.msra.mxu0 %v8046_v54  ;;  %6009 = vmatpush1.bf16.msra.mxu1 %v8055_v46 }
 0x356   : > { %6292 = vmatprep.subr.bf16.mxu0 %v8054_v40  ;;  %6010 = vmatprep.subr.bf16.mxu1 %v8063_v62 }
 0x359   : > { %6293 = vmatpush1.bf16.msra.mxu0 %v8052_v48  ;;  %6011 = vmatpush1.bf16.msra.mxu1 %v8061_v33 }
 0x35a   : > { %6294 = vmatprep.subr.bf16.mxu0 %v8060_v63  ;;  %6051 = vmatprep.subr.bf16.mxu1 %v8069_v26 }
 0x35d   : > { %6295 = vmatpush1.bf16.msra.mxu0 %v8058_v30 }
 0x35e   : > { %6335 = vmatprep.subr.bf16.mxu0 %v8066_v16 }
 0x37a   : > { %v11504_v44 = vpop.f32.mrb[146].mxu1 }
 0x37b   : > { %v11506_v56 = vpop.f32.mrb[147].mxu1 }
 0x37f   : > { %v11508_v55 = vpop.f32.mrb[148].mxu1 }
 0x380   : > { %v11510_v53 = vpop.f32.mrb[149].mxu1  ;;  %v7858_v35 = vpack.i.bf16 %v11508_v55, %v11504_v44 }
 0x382   : > { %7859 = vrot.lane.b32.xlu1 %v7858_v35, %s8441_s24 }
 0x383   : > { %v11515_v42 = vpop.f32.mrb[150].mxu1 }
 0x384   : > { %v11517_v37 = vpop.f32.mrb[151].mxu1 }
 0x389   : > { %v11519_v21 = vpop.f32.mrb[152].mxu1 }
 0x38a   : > { %v7873_v0 = vpack.i.bf16 %v11519_v21, %v11515_v42  ;;  %v11523_v28 = vpop.f32.mrb[153].mxu1 }
 0x38d   : > { %v11525_v2 = vpop.f32.mrb[154].mxu1 }
 0x38e   : > { %v11527_v39 = vpop.f32.mrb[155].mxu1 }
 0x392   : > { %v11529_v22 = vpop.f32.mrb[156].mxu1 }
 0x393   : > { %v7888_v9 = vpack.i.bf16 %v11529_v22, %v11525_v2  ;;  %v11533_v52 = vpop.f32.mrb[157].mxu1 }
 0x397   : > { %v11535_v31 = vpop.f32.mrb[158].mxu1 }
 0x398   : > { %v11537_v11 = vpop.f32.mrb[159].mxu1 }
 0x3a9   : > { %v11539_v4 = vpop.f32.mrb[148].mxu0 }
 0x3aa   : > { %v7848_v59 = vpack.i.bf16 %v11539_v4, %v11506_v56  ;;  %v11543_v45 = vpop.f32.mrb[149].mxu0 }
 0x3ab   : > { %v7898_v61 = vpack.i.bf16 %v11543_v45, %v11535_v31 }
 0x3ac   : > { %7849 = vrot.lane.b32.xlu0 %v7848_v59, %s8441_s24 }
 0x3ad   : > { %v11548_v20 = vpop.f32.mrb[150].mxu0 }
 0x3ae   : > { %v7853_v7 = vpack.i.bf16 %v11548_v20, %v11510_v53  ;;  %v11552_v25 = vpop.f32.mrb[151].mxu0 }
 0x3b0   : > { %7854 = vrot.lane.b32.xlu0 %v7853_v7, %s8441_s24 }
 0x3b1   : > { %v11555_v35 = vpop.f32.mrb[152].mxu0 }
 0x3b2   : > { %v7863_v29 = vpack.i.bf16 %v11555_v35, %v11517_v37  ;;  %v11559_v49 = vpop.f32.mrb[153].mxu0 }
 0x3b4   : > { %7864 = vrot.lane.b32.xlu1 %v7863_v29, %s8441_s24 }
 0x3b5   : > { %v11562_v51 = vpop.f32.mrb[154].mxu0 }
 0x3b6   : > { %v7868_v47 = vpack.i.bf16 %v11562_v51, %v11523_v28  ;;  %v11566_v19 = vpop.f32.mrb[155].mxu0 }
 0x3b8   : > { %7874 = vrot.lane.b32.xlu1 %v7873_v0, %s8441_s24  ;;  %7869 = vrot.lane.b32.xlu0 %v7868_v47, %s8441_s24 }
 0x3b9   : > { %v11573_v58 = vpop.f32.mrb[156].mxu0 }
 0x3ba   : > { %v7878_v43 = vpack.i.bf16 %v11573_v58, %v11527_v39  ;;  %v11577_v1 = vpop.f32.mrb[157].mxu0 }
 0x3bc   : > { %7879 = vrot.lane.b32.xlu0 %v7878_v43, %s8441_s24 }
 0x3bf   : > { %v11580_v36 = vpop.f32.mrb[158].mxu0 }
 0x3c0   : > { %v7883_v0 = vpack.i.bf16 %v11580_v36, %v11533_v52  ;;  %v11584_v24 = vpop.f32.mrb[159].mxu0  ;;  %7889 = vrot.lane.b32.xlu0 %v7888_v9, %s8441_s24 }
 0x3c2   : > { %7884 = vrot.lane.b32.xlu1 %v7883_v0, %s8441_s24 }
 0x3c3   : > { %v11591_v41 = vpop.f32.mrb[160].mxu0 }
 0x3c4   : > { %v7893_v10 = vpack.i.bf16 %v11591_v41, %v11537_v11  ;;  %v11595_v8 = vpop.f32.mrb[161].mxu0  ;;  %7899 = vrot.lane.b32.xlu0 %v7898_v61, %s8441_s24 }
 0x3c6   : > { %7894 = vrot.lane.b32.xlu1 %v7893_v10, %s8441_s24 }
 0x3df   : > { %v11601_v38 = vpop.f32.mrb[162].mxu0 }
 0x3e0   : > { %v7434_v32 = vpop.f32.mrb[163].mxu0 }
 0x3e2   : > { %v11599_v18 = vpop.f32.mrb[160].mxu1 }
 0x3e3   : > { %v7903_v9 = vpack.i.bf16 %v11552_v25, %v11599_v18  ;;  %v11605_v14 = vpop.f32.mrb[161].mxu1  ;;  %v11612_v6 = vpop.f32.mrb[164].mxu0 }
 0x3e4   : > { %v7933_v15 = vpack.i.bf16 %v11601_v38, %v11605_v14  ;;  %v7437_v34 = vpop.f32.mrb[165].mxu0 }
 0x3e5   : > { %7904 = vrot.lane.b32.xlu1 %v7903_v9, %s8441_s24 }
 0x3e6   : > { %v11610_v50 = vpop.f32.mrb[162].mxu1 }
 0x3e7   : > { %4463 = vrot.lane.b32.xlu0 %v11610_v50, %s8441_s24  ;;  %v11616_v13 = vpop.f32.mrb[163].mxu1  ;;  %v11622_v27 = vpop.f32.mrb[166].mxu0 }
 0x3e8   : > { %v7938_v23 = vpack.i.bf16 %v11612_v6, %v11616_v13  ;;  %v7440_v17 = vpop.f32.mrb[167].mxu0 }
 0x3ea   : > { %v11620_v57 = vpop.f32.mrb[164].mxu1 }
 0x3eb   : > { %v7908_v59 = vpack.i.bf16 %v11620_v57, %v11559_v49  ;;  %v11626_v3 = vpop.f32.mrb[165].mxu1  ;;  %v11633_v60 = vpop.f32.mrb[168].mxu0 }
 0x3ec   : > { %v7943_v61 = vpack.i.bf16 %v11622_v27, %v11626_v3  ;;  %v7443_v12 = vpop.f32.mrb[169].mxu0 }
 0x3ed   : > { %7909 = vrot.lane.b32.xlu1 %v7908_v59, %s8441_s24 }
 0x3ee   : > { %v11631_v5 = vpop.f32.mrb[166].mxu1 }
 0x3ef   : > { %v7913_v7 = vpack.i.bf16 %v11631_v5, %v11566_v19  ;;  %v11637_v54 = vpop.f32.mrb[167].mxu1  ;;  %v11644_v29 = vpop.f32.mrb[170].mxu0 }
 0x3f0   : > { %v7948_v40 = vpack.i.bf16 %v11633_v60, %v11637_v54  ;;  %v7446_v63 = vpop.f32.mrb[171].mxu0 }
 0x3f1   : > { %7914 = vrot.lane.b32.xlu0 %v7913_v7, %s8441_s24 }
 0x3f2   : > { %v11642_v46 = vpop.f32.mrb[168].mxu1 }
 0x3f3   : > { %12676 = vst [vmem:[#allocation78_spill] sm:$0xff] %v11642_v46  ;;  %v7918_v48 = vpack.i.bf16 %v11642_v46, %v11577_v1  ;;  %v11648_v62 = vpop.f32.mrb[169].mxu1  ;;  %v11655_v26 = vpop.f32.mrb[172].mxu0  ;;  %v8072_v46 = vld [vmem:[#allocation7 + $0x22c] ss:$16 sps:$4 sm:$0xff]  }
 0x3f4   : > { %v7953_v33 = vpack.i.bf16 %v11644_v29, %v11648_v62  ;;  %v7449_v43 = vpop.f32.mrb[173].mxu0  ;;  %v7860_v7 = vpop.permute.xlu1 %7859 }
 0x3f5   : > { %7919 = vrot.lane.b32.xlu1 %v7918_v48, %s8441_s24  ;;  %v7861_v48 = vunpack.i.l.bf16 %v7860_v7 }
 0x3f6   : > { %v11653_v30 = vpop.f32.mrb[170].mxu1 }
 0x3f7   : > { %12677 = vst [vmem:[#allocation12_spill] sm:$0xff] %v11653_v30  ;;  %v7923_v47 = vpack.i.bf16 %v11653_v30, %v11584_v24  ;;  %v11659_v16 = vpop.f32.mrb[171].mxu1  ;;  %v11666_v9 = vpop.f32.mrb[174].mxu0  ;;  %v8067_v30 = vld [vmem:[#allocation7 + $0x200] ss:$16 sps:$4 sm:$0xff]  }
 0x3f8   : > { %v7958_v0 = vpack.i.bf16 %v11655_v26, %v11659_v16  ;;  %12679 = vst [vmem:[#allocation68_spill] sm:$0xff] %v11666_v9  ;;  %v7452_v59 = vpop.f32.mrb[175].mxu0 }
 0x3f9   : > { %7924 = vrot.lane.b32.xlu0 %v7923_v47, %s8441_s24 }
 0x3fa   : > { %v11664_v10 = vpop.f32.mrb[172].mxu1 }
 0x3fb   : > { %12678 = vst [vmem:[#allocation67_spill] sm:$0xff] %v11664_v10  ;;  %v7928_v32 = vpack.i.bf16 %v11664_v10, %v11595_v8  ;;  %v11670_v34 = vpop.f32.mrb[173].mxu1  ;;  %v8064_v10 = vld [vmem:[#allocation7 + $0x208] ss:$16 sps:$4 sm:$0xff]  }
 0x3fc   : > { %12680 = vst [vmem:[#allocation13_spill] sm:$0xff] %v11670_v34  ;;  %v7963_v17 = vpack.i.bf16 %v11666_v9, %v11670_v34 }
 0x3fd   : > { %7934 = vrot.lane.b32.xlu0 %v7933_v15, %s8441_s24  ;;  %7929 = vrot.lane.b32.xlu1 %v7928_v32, %s8441_s24 }
 0x401   : > { %7944 = vrot.lane.b32.xlu0 %v7943_v61, %s8441_s24  ;;  %7939 = vrot.lane.b32.xlu1 %v7938_v23, %s8441_s24  ;;  %v7862_v61 = vunpack.i.h.bf16 %v7860_v7 }
 0x405   : > { %7954 = vrot.lane.b32.xlu0 %v7953_v33, %s8441_s24  ;;  %7949 = vrot.lane.b32.xlu1 %v7948_v40, %s8441_s24 }
 0x409   : > { %7959 = vrot.lane.b32.xlu1 %v7958_v0, %s8441_s24  ;;  %7964 = vrot.lane.b32.xlu0 %v7963_v17, %s8441_s24 }
 0x41e   : > { %v11682_v12 = vpop.permute.xlu0 %7849 }
 0x41f   : > { %v12125_v15 = vunpack.i.h.bf16 %v11682_v12  ;;  %v7851_v63 = vunpack.i.l.bf16 %v11682_v12 }
 0x421   : > { %v4540_v23 = vsel %vm4539_vm10, %v7861_v48, %v7851_v63  ;;  %v4541_v40 = vsel %vm4539_vm10, %v7851_v63, %v12125_v15 }
 0x422   : > { %v11686_v47 = vpop.permute.xlu0 %7854  ;;  %v4631_v59 = vmax.f32 %v11504_v44, %v4540_v23  ;;  %v4632_v48 = vmax.f32 %v11506_v56, %v4541_v40 }
 0x423   : > { %v12132_v33 = vunpack.i.h.bf16 %v11686_v47  ;;  %v7856_v43 = vunpack.i.l.bf16 %v11686_v47 }
 0x425   : > { %v4546_v0 = vsel %vm4539_vm10, %v7862_v61, %v7856_v43  ;;  %v4547_v32 = vsel %vm4539_vm10, %v7856_v43, %v12132_v33  ;;  %v8075_v43 = vld [vmem:[#allocation7 + $0x224] ss:$16 sps:$4 sm:$0xff]  }
 0x426   : > { %v4638_v17 = vmax.f32 %v11508_v55, %v4546_v0  ;;  %v11700_v7 = vpop.permute.xlu1 %7864  ;;  %v4639_v63 = vmax.f32 %v11510_v53, %v4547_v32  ;;  %v8070_v32 = vld [vmem:[#allocation7 + $0x228] ss:$16 sps:$4 sm:$0xff]  }
 0x427   : > { %v12131_v9 = vunpack.i.h.bf16 %v11700_v7  ;;  %v7866_v34 = vunpack.i.l.bf16 %v11700_v7 }
 0x428   : > { %v4680_v15 = vpack.c.bf16 %v4638_v17, %v4631_v59  ;;  %v4681_v61 = vpack.c.bf16 %v4639_v63, %v4632_v48  ;;  %v8073_v59 = vld [vmem:[#allocation7 + $0x220] ss:$16 sps:$4 sm:$0xff]   ;;  %v8078_v48 = vld [vmem:[#allocation7 + $0x24c] ss:$16 sps:$4 sm:$0xff]   ;;  %v8081_v63 = vld [vmem:[#allocation7 + $0x244] ss:$16 sps:$4 sm:$0xff]  }
 0x429   : > { %v4553_v56 = vsel %vm4539_vm10, %v7866_v34, %v12131_v9 }
 0x42a   : > { %6296 = vmatprep.mubr.bf16.mxu0 %v4681_v61  ;;  %v7875_v44 = vpop.permute.xlu1 %7874  ;;  %6012 = vmatprep.mubr.bf16.mxu1 %v4681_v61  ;;  %v11706_v0 = vpop.permute.xlu0 %7869  ;;  %v4646_v9 = vmax.f32 %v11517_v37, %v4553_v56  ;;  %v8087_v37 = vld [vmem:[#allocation7 + $0x264] ss:$16 sps:$4 sm:$0xff]  }
 0x42b   : > { %v7877_v55 = vunpack.i.h.bf16 %v7875_v44  ;;  %v7876_v23 = vunpack.i.l.bf16 %v7875_v44  ;;  %6013 = vmatmul.mubr.bf16.vlgmr.msra.gmra.mrb[176].mxu1 %v4680_v15  ;;  %6297 = vmatmul.mubr.bf16.vlgmr.msra.gmra.mrb[176].mxu0 %v4680_v15  ;;  %v7872_v53 = vunpack.i.h.bf16 %v11706_v0  ;;  %v7871_v40 = vunpack.i.l.bf16 %v11706_v0 }
 0x42c   : > { %6052 = vmatpush1.bf16.msra.mxu1 %v8067_v30  ;;  %6336 = vmatpush1.bf16.msra.mxu0 %v8064_v10 }
 0x42d   : > { %v4552_v17 = vsel %vm4539_vm10, %v7876_v23, %v7866_v34  ;;  %6337 = vmatprep.subr.bf16.mxu0 %v8072_v46  ;;  %6053 = vmatprep.subr.bf16.mxu1 %v8075_v43  ;;  %v4558_v15 = vsel %vm4539_vm10, %v7877_v55, %v7871_v40  ;;  %v4559_v61 = vsel %vm4539_vm10, %v7871_v40, %v7872_v53  ;;  %v8076_v55 = vld [vmem:[#allocation7 + $0x248] ss:$16 sps:$4 sm:$0xff]   ;;  %v8079_v23 = vld [vmem:[#allocation7 + $0x240] ss:$16 sps:$4 sm:$0xff]   ;;  %v8084_v40 = vld [vmem:[#allocation7 + $0x26c] ss:$16 sps:$4 sm:$0xff]  }
 0x42e   : > { %v4645_v44 = vmax.f32 %v11515_v42, %v4552_v17  ;;  %v4653_v30 = vmax.f32 %v11523_v28, %v4559_v61  ;;  %v4652_v10 = vmax.f32 %v11519_v21, %v4558_v15  ;;  %v11722_v33 = vpop.permute.xlu0 %7879  ;;  %v8090_v15 = vld [vmem:[#allocation7 + $0x284] ss:$16 sps:$4 sm:$0xff]   ;;  %v8093_v61 = vld [vmem:[#allocation7 + $0x28c] ss:$16 sps:$4 sm:$0xff]  }
 0x42f   : > { %v7882_v46 = vunpack.i.h.bf16 %v11722_v33  ;;  %v7881_v34 = vunpack.i.l.bf16 %v11722_v33  ;;  %v8154_v33 = vld [vmem:[#allocation7 + $0x3e0] ss:$16 sps:$4 sm:$0xff]  }
 0x430   : > { %6054 = vmatpush1.bf16.msra.mxu1 %v8073_v59  ;;  %6338 = vmatpush1.bf16.msra.mxu0 %v8070_v32  ;;  %v4688_v43 = vpack.c.bf16 %v4653_v30, %v4646_v9  ;;  %v4687_v42 = vpack.c.bf16 %v4652_v10, %v4645_v44 }
 0x431   : > { %6339 = vmatprep.subr.bf16.mxu0 %v8078_v48  ;;  %6055 = vmatprep.subr.bf16.mxu1 %v8081_v63  ;;  %v4565_v21 = vsel %vm4539_vm10, %v7881_v34, %v7882_v46  ;;  %v8082_v48 = vld [vmem:[#allocation7 + $0x268] ss:$16 sps:$4 sm:$0xff]   ;;  %v8085_v63 = vld [vmem:[#allocation7 + $0x260] ss:$16 sps:$4 sm:$0xff]  }
 0x432   : > { %6306 = vmatprep.mubr.bf16.mxu0 %v4688_v43  ;;  %6022 = vmatprep.mubr.bf16.mxu1 %v4688_v43  ;;  %v7890_v28 = vpop.permute.xlu0 %7889 }
 0x433   : > { %6023 = vmatmul.mubr.bf16.gmra.mrb[180].mxu1 %v4687_v42  ;;  %6307 = vmatmul.mubr.bf16.gmra.mrb[180].mxu0 %v4687_v42  ;;  %v7892_v32 = vunpack.i.h.bf16 %v7890_v28  ;;  %v7891_v9 = vunpack.i.l.bf16 %v7890_v28 }
 0x434   : > { %v11729_v56 = vpop.permute.xlu1 %7884  ;;  %6056 = vmatpush1.bf16.msra.mxu1 %v8079_v23  ;;  %6340 = vmatpush1.bf16.msra.mxu0 %v8076_v55  ;;  %v4660_v55 = vmax.f32 %v11527_v39, %v4565_v21  ;;  %v8091_v39 = vld [vmem:[#allocation7 + $0x288] ss:$16 sps:$4 sm:$0xff]  }
 0x435   : > { %v12133_v59 = vunpack.i.h.bf16 %v11729_v56  ;;  %v7886_v17 = vunpack.i.l.bf16 %v11729_v56  ;;  %6341 = vmatprep.subr.bf16.mxu0 %v8084_v40  ;;  %6057 = vmatprep.subr.bf16.mxu1 %v8087_v37  ;;  %v4564_v44 = vsel %vm4539_vm10, %v7891_v9, %v7881_v34 }
 0x436   : > { %v11738_v43 = vpop.permute.xlu0 %7899  ;;  %v4659_v40 = vmax.f32 %v11525_v2, %v4564_v44  ;;  %v12681_v2 = vunpack.i.h.bf16 %v11682_v12  ;;  %v8096_v44 = vld [vmem:[#allocation7 + $0x2a4] ss:$16 sps:$4 sm:$0xff]  }
 0x437   : > { %v4570_v30 = vsel %vm4539_vm10, %v7892_v32, %v7886_v17  ;;  %v4571_v10 = vsel %vm4539_vm10, %v7886_v17, %v12133_v59  ;;  %v7902_v34 = vunpack.i.h.bf16 %v11738_v43  ;;  %v7901_v28 = vunpack.i.l.bf16 %v11738_v43  ;;  %v8088_v59 = vld [vmem:[#allocation7 + $0x280] ss:$16 sps:$4 sm:$0xff]  }
 0x438   : > { %v11740_v42 = vpop.permute.xlu1 %7894  ;;  %v4667_v23 = vmax.f32 %v11533_v52, %v4571_v10  ;;  %v4666_v37 = vmax.f32 %v11529_v22, %v4570_v30  ;;  %6058 = vmatpush1.bf16.msra.mxu1 %v8085_v63  ;;  %6342 = vmatpush1.bf16.msra.mxu0 %v8082_v48  ;;  %v8099_v63 = vld [vmem:[#allocation7 + $0x2ac] ss:$16 sps:$4 sm:$0xff]   ;;  %v8094_v30 = vld [vmem:[#allocation7 + $0x2a0] ss:$16 sps:$4 sm:$0xff]   ;;  %v8097_v10 = vld [vmem:[#allocation7 + $0x2a8] ss:$16 sps:$4 sm:$0xff]  }
 0x439   : > { %v7897_v32 = vunpack.i.h.bf16 %v11740_v42  ;;  %v7896_v9 = vunpack.i.l.bf16 %v11740_v42  ;;  %6059 = vmatprep.subr.bf16.mxu1 %v8090_v15  ;;  %6343 = vmatprep.subr.bf16.mxu0 %v8093_v61  ;;  %v11755_v22 = vsel %vm4539_vm10, %v12681_v2, %v7902_v34  ;;  %v8112_v2 = vld [vmem:[#allocation7 + $0x300] ss:$16 sps:$4 sm:$0xff]  }
 0x43a   : > { %v4695_v17 = vpack.c.bf16 %v4667_v23, %v4660_v55  ;;  %v4694_v52 = vpack.c.bf16 %v4666_v37, %v4659_v40  ;;  %v4633_v48 = vmax.f32 %v11539_v4, %v11755_v22  ;;  %v8102_v55 = vld [vmem:[#allocation7 + $0x2c4] ss:$16 sps:$4 sm:$0xff]   ;;  %v8105_v23 = vld [vmem:[#allocation7 + $0x2cc] ss:$16 sps:$4 sm:$0xff]   ;;  %v8103_v37 = vld [vmem:[#allocation7 + $0x2c8] ss:$16 sps:$4 sm:$0xff]  }
 0x43b   : > { %v4577_v21 = vsel %vm4539_vm10, %v7896_v9, %v7897_v32  ;;  %v4576_v61 = vsel %vm4539_vm10, %v7901_v28, %v7896_v9  ;;  %v8111_v9 = vld [vmem:[#allocation7 + $0x2ec] ss:$16 sps:$4 sm:$0xff]   ;;  %v8136_v4 = vld [vmem:[#allocation7 + $0x380] ss:$16 sps:$4 sm:$0xff]   ;;  %v8139_v22 = vld [vmem:[#allocation7 + $0x388] ss:$16 sps:$4 sm:$0xff]  }
 0x43c   : > { %6032 = vmatprep.mubr.bf16.mxu1 %v4695_v17  ;;  %6316 = vmatprep.mubr.bf16.mxu0 %v4695_v17  ;;  %v4674_v15 = vmax.f32 %v11537_v11, %v4577_v21  ;;  %v4673_v40 = vmax.f32 %v11535_v31, %v4576_v61  ;;  %v8100_v11 = vld [vmem:[#allocation7 + $0x2c0] ss:$16 sps:$4 sm:$0xff]   ;;  %v8114_v31 = vld [vmem:[#allocation7 + $0x304] ss:$16 sps:$4 sm:$0xff]   ;;  %v8115_v21 = vld [vmem:[#allocation7 + $0x308] ss:$16 sps:$4 sm:$0xff]  }
 0x43d   : > { %6033 = vmatmul.mubr.bf16.gmra.mrb[184].mxu1 %v4694_v52  ;;  %6317 = vmatmul.mubr.bf16.gmra.mrb[184].mxu0 %v4694_v52  ;;  %v8106_v17 = vld [vmem:[#allocation7 + $0x2e0] ss:$16 sps:$4 sm:$0xff]   ;;  %v8117_v52 = vld [vmem:[#allocation7 + $0x30c] ss:$16 sps:$4 sm:$0xff]   ;;  %v8121_v61 = vld [vmem:[#allocation7 + $0x328] ss:$16 sps:$4 sm:$0xff]  }
 0x43e   : > { %6060 = vmatpush1.bf16.msra.mxu1 %v8088_v59  ;;  %6344 = vmatpush1.bf16.msra.mxu0 %v8091_v39  ;;  %v4702_v12 = vpack.c.bf16 %v4674_v15, %v4674_v15  ;;  %v4701_v28 = vpack.c.bf16 %v4673_v40, %v4673_v40  ;;  %v8108_v59 = vld [vmem:[#allocation7 + $0x2e4] ss:$16 sps:$4 sm:$0xff]   ;;  %v8109_v39 = vld [vmem:[#allocation7 + $0x2e8] ss:$16 sps:$4 sm:$0xff]   ;;  %v8118_v15 = vld [vmem:[#allocation7 + $0x320] ss:$16 sps:$4 sm:$0xff]  }
 0x43f   : > { %6061 = vmatprep.subr.bf16.mxu1 %v8096_v44  ;;  %6345 = vmatprep.subr.bf16.mxu0 %v8099_v63  ;;  %v8120_v44 = vld [vmem:[#allocation7 + $0x324] ss:$16 sps:$4 sm:$0xff]   ;;  %v8123_v63 = vld [vmem:[#allocation7 + $0x32c] ss:$16 sps:$4 sm:$0xff]  }
 0x440   : > { %6042 = vmatprep.mubr.bf16.mxu1 %v4702_v12  ;;  %6326 = vmatprep.mubr.bf16.mxu0 %v4702_v12  ;;  %v8126_v12 = vld [vmem:[#allocation7 + $0x344] ss:$16 sps:$4 sm:$0xff]  }
 0x442   : > { %6062 = vmatpush1.bf16.msra.mxu1 %v8094_v30  ;;  %6346 = vmatpush1.bf16.msra.mxu0 %v8097_v10  ;;  %v8129_v30 = vld [vmem:[#allocation7 + $0x34c] ss:$16 sps:$4 sm:$0xff]  }
 0x443   : > { %6063 = vmatprep.subr.bf16.mxu1 %v8102_v55  ;;  %6347 = vmatprep.subr.bf16.mxu0 %v8105_v23 }
 0x445   : > { %6043 = vmatmul.mubr.bf16.gmra.mrb[188].mxu1 %v4701_v28  ;;  %6327 = vmatmul.mubr.bf16.gmra.mrb[188].mxu0 %v4701_v28  ;;  %v12682_v28 = vunpack.i.h.bf16 %v11686_v47 }
 0x446   : > { %6064 = vmatpush1.bf16.msra.mxu1 %v8100_v11  ;;  %6348 = vmatpush1.bf16.msra.mxu0 %v8103_v37  ;;  %v8124_v11 = vld [vmem:[#allocation7 + $0x340] ss:$16 sps:$4 sm:$0xff]   ;;  %v8127_v37 = vld [vmem:[#allocation7 + $0x348] ss:$16 sps:$4 sm:$0xff]  }
 0x447   : > { %6065 = vmatprep.subr.bf16.mxu1 %v8108_v59  ;;  %6349 = vmatprep.subr.bf16.mxu0 %v8111_v9 }
 0x44a   : > { %6066 = vmatpush1.bf16.msra.mxu1 %v8106_v17  ;;  %6350 = vmatpush1.bf16.msra.mxu0 %v8109_v39  ;;  %v8132_v39 = vld [vmem:[#allocation7 + $0x364] ss:$16 sps:$4 sm:$0xff]  }
 0x44b   : > { %6067 = vmatprep.subr.bf16.mxu1 %v8114_v31  ;;  %6351 = vmatprep.subr.bf16.mxu0 %v8117_v52  ;;  %v8135_v31 = vld [vmem:[#allocation7 + $0x36c] ss:$16 sps:$4 sm:$0xff]  }
 0x44e   : > { %6068 = vmatpush1.bf16.msra.mxu1 %v8112_v2  ;;  %6352 = vmatpush1.bf16.msra.mxu0 %v8115_v21 }
 0x44f   : > { %6069 = vmatprep.subr.bf16.mxu1 %v8120_v44  ;;  %6353 = vmatprep.subr.bf16.mxu0 %v8123_v63  ;;  %v8133_v44 = vld [vmem:[#allocation7 + $0x368] ss:$16 sps:$4 sm:$0xff]   ;;  %v8138_v63 = vld [vmem:[#allocation7 + $0x384] ss:$16 sps:$4 sm:$0xff]  }
 0x452   : > { %6070 = vmatpush1.bf16.msra.mxu1 %v8118_v15  ;;  %6354 = vmatpush1.bf16.msra.mxu0 %v8121_v61  ;;  %v8141_v15 = vld [vmem:[#allocation7 + $0x38c] ss:$16 sps:$4 sm:$0xff]  }
 0x453   : > { %6071 = vmatprep.subr.bf16.mxu1 %v8126_v12  ;;  %6355 = vmatprep.subr.bf16.mxu0 %v8129_v30  ;;  %v8144_v12 = vld [vmem:[#allocation7 + $0x3a4] ss:$16 sps:$4 sm:$0xff]   ;;  %v8147_v30 = vld [vmem:[#allocation7 + $0x3ac] ss:$16 sps:$4 sm:$0xff]  }
 0x456   : > { %6072 = vmatpush1.bf16.msra.mxu1 %v8124_v11  ;;  %6356 = vmatpush1.bf16.msra.mxu0 %v8127_v37 }
 0x457   : > { %v11765_v10 = vpop.permute.xlu1 %7904  ;;  %6073 = vmatprep.subr.bf16.mxu1 %v8132_v39  ;;  %6357 = vmatprep.subr.bf16.mxu0 %v8135_v31  ;;  %v8150_v39 = vld [vmem:[#allocation7 + $0x3c4] ss:$16 sps:$4 sm:$0xff]   ;;  %v8153_v31 = vld [vmem:[#allocation7 + $0x3cc] ss:$16 sps:$4 sm:$0xff]  }
 0x458   : > { %v7907_v55 = vunpack.i.h.bf16 %v11765_v10  ;;  %v7906_v23 = vunpack.i.l.bf16 %v11765_v10 }
 0x459   : > { %v11769_v40 = vpop.permute.xlu0 %4463 }
 0x45a   : > { %v4548_v59 = vsel %vm4539_vm10, %v12682_v28, %v7907_v55  ;;  %v4543_v9 = vsel %vm4539_vm10, %v7902_v34, %v7906_v23  ;;  %v4549_v17 = vsel %vm4539_vm10, %v7907_v55, %v11769_v40  ;;  %v8130_v34 = vld [vmem:[#allocation7 + $0x360] ss:$16 sps:$4 sm:$0xff]   ;;  %6358 = vmatpush1.bf16.msra.mxu0 %v8133_v44  ;;  %v8151_v44 = vld [vmem:[#allocation7 + $0x3c8] ss:$16 sps:$4 sm:$0xff]  }
 0x45b   : > { %v4640_v52 = vmax.f32 %v11548_v20, %v4548_v59  ;;  %v4641_v2 = vmax.f32 %v11552_v25, %v4549_v17  ;;  %v4634_v47 = vmax.f32 %v11543_v45, %v4543_v9  ;;  %6074 = vmatpush1.bf16.msra.mxu1 %v8130_v34  ;;  %6359 = vmatprep.subr.bf16.mxu0 %v8141_v15  ;;  %v8145_v9 = vld [vmem:[#allocation7 + $0x3a8] ss:$16 sps:$4 sm:$0xff]   ;;  %v8148_v34 = vld [vmem:[#allocation7 + $0x3c0] ss:$16 sps:$4 sm:$0xff]  }
 0x45c   : > { %6075 = vmatprep.subr.bf16.mxu1 %v8138_v63 }
 0x45d   : > { %v11787_v21 = vpack.c.bf16 %v4640_v52, %v4633_v48  ;;  %v4683_v43 = vpack.c.bf16 %v4641_v2, %v4634_v47  ;;  %v12683_v48 = vunpack.i.h.bf16 %v11700_v7  ;;  %v8142_v7 = vld [vmem:[#allocation7 + $0x3a0] ss:$16 sps:$4 sm:$0xff]  }
 0x45e   : > { %6360 = vmatpush1.bf16.msra.mxu0 %v8139_v22 }
 0x45f   : > { %6083 = vmatprep.mubr.bf16.mxu1 %v4683_v43  ;;  %6367 = vmatprep.mubr.bf16.mxu0 %v4683_v43  ;;  %v11789_v20 = vpop.permute.xlu1 %7909 }
 0x460   : > { %v7912_v45 = vunpack.i.h.bf16 %v11789_v20  ;;  %v7911_v25 = vunpack.i.l.bf16 %v11789_v20  ;;  %6076 = vmatpush1.bf16.msra.mxu1 %v8136_v4  ;;  %6361 = vmatprep.subr.bf16.mxu0 %v8147_v30 }
 0x461   : > { %6077 = vmatprep.subr.bf16.mxu1 %v8144_v12  ;;  %v12684_v12 = vunpack.i.h.bf16 %v11729_v56 }
 0x462   : > { %v4554_v61 = vsel %vm4539_vm10, %v12683_v48, %v7911_v25  ;;  %v4555_v37 = vsel %vm4539_vm10, %v7911_v25, %v7912_v45  ;;  %6362 = vmatpush1.bf16.msra.mxu0 %v8145_v9 }
 0x463   : > { %v11796_v55 = vpop.permute.xlu0 %7914  ;;  %v4647_v11 = vmax.f32 %v11555_v35, %v4554_v61  ;;  %v4648_v2 = vmax.f32 %v11559_v49, %v4555_v37  ;;  %6363 = vmatprep.subr.bf16.mxu0 %v8153_v31  ;;  %v8156_v49 = vld [vmem:[#allocation7 + $0x3e4] ss:$16 sps:$4 sm:$0xff]   ;;  %v8165_v37 = vld [vmem:[#allocation7 + $0x40c] ss:$16 sps:$4 sm:$0xff]  }
 0x464   : > { %v7917_v28 = vunpack.i.h.bf16 %v11796_v55  ;;  %v7916_v59 = vunpack.i.l.bf16 %v11796_v55  ;;  %6078 = vmatpush1.bf16.msra.mxu1 %v8142_v7  ;;  %v8186_v55 = vld [vmem:[#allocation7 + $0x484] ss:$16 sps:$4 sm:$0xff]  }
 0x465   : > { %6079 = vmatprep.subr.bf16.mxu1 %v8150_v39 }
 0x466   : > { %v4560_v17 = vsel %vm4539_vm10, %v7872_v53, %v7916_v59  ;;  %v4561_v35 = vsel %vm4539_vm10, %v7916_v59, %v7917_v28  ;;  %6364 = vmatpush1.bf16.msra.mxu0 %v8151_v44 }
 0x467   : > { %v11810_v52 = vpop.permute.xlu1 %7919  ;;  %v4655_v47 = vmax.f32 %v11566_v19, %v4561_v35  ;;  %v4654_v43 = vmax.f32 %v11562_v51, %v4560_v17  ;;  %v8159_v19 = vld [vmem:[#allocation7 + $0x3ec] ss:$16 sps:$4 sm:$0xff]  }
 0x468   : > { %v7922_v0 = vunpack.i.h.bf16 %v11810_v52  ;;  %v7921_v53 = vunpack.i.l.bf16 %v11810_v52  ;;  %6080 = vmatpush1.bf16.msra.mxu1 %v8148_v34  ;;  %6365 = vmatprep.subr.bf16.mxu0 %v8159_v19 }
 0x469   : > { %v4690_v63 = vpack.c.bf16 %v4655_v47, %v4648_v2  ;;  %v11817_v15 = vpack.c.bf16 %v4654_v43, %v4647_v11  ;;  %6081 = vmatprep.subr.bf16.mxu1 %v8156_v49  ;;  %v8162_v11 = vld [vmem:[#allocation7 + $0x404] ss:$16 sps:$4 sm:$0xff]   ;;  %v8160_v2 = vld [vmem:[#allocation7 + $0x400] ss:$16 sps:$4 sm:$0xff]  }
 0x46a   : > { %v4566_v25 = vsel %vm4539_vm10, %v7882_v46, %v7921_v53  ;;  %v4567_v22 = vsel %vm4539_vm10, %v7921_v53, %v7922_v0  ;;  %v8157_v46 = vld [vmem:[#allocation7 + $0x3e8] ss:$16 sps:$4 sm:$0xff]   ;;  %v8168_v49 = vld [vmem:[#allocation7 + $0x424] ss:$16 sps:$4 sm:$0xff]  }
 0x46b   : > { %v11822_v51 = vpop.permute.xlu0 %7924  ;;  %v4661_v4 = vmax.f32 %v11573_v58, %v4566_v25  ;;  %v4662_v9 = vmax.f32 %v11577_v1, %v4567_v22  ;;  %6366 = vmatpush1.bf16.msra.mxu0 %v8157_v46  ;;  %v8163_v25 = vld [vmem:[#allocation7 + $0x408] ss:$16 sps:$4 sm:$0xff]  }
 0x46c   : > { %v7927_v48 = vunpack.i.h.bf16 %v11822_v51  ;;  %v7926_v61 = vunpack.i.l.bf16 %v11822_v51  ;;  %6082 = vmatpush1.bf16.msra.mxu1 %v8154_v33  ;;  %6406 = vmatprep.subr.bf16.mxu0 %v8165_v37 }
 0x46d   : > { %6122 = vmatprep.subr.bf16.mxu1 %v8162_v11 }
 0x46e   : > { %v4572_v30 = vsel %vm4539_vm10, %v12684_v12, %v7926_v61  ;;  %v4573_v58 = vsel %vm4539_vm10, %v7926_v61, %v7927_v48  ;;  %6368 = vmatmul.mubr.bf16.vlgmr.msra.gmra.mrb[176].mxu0 %v11787_v21 }
 0x46f   : > { %v7935_v59 = vpop.permute.xlu0 %7934  ;;  %v11836_v7 = vpop.permute.xlu1 %7929  ;;  %v4669_v17 = vmax.f32 %v11584_v24, %v4573_v58  ;;  %v4668_v35 = vmax.f32 %v11580_v36, %v4572_v30  ;;  %6084 = vmatmul.mubr.bf16.vlgmr.msra.gmra.mrb[176].mxu1 %v11787_v21  ;;  %6377 = vmatprep.mubr.bf16.mxu0 %v4690_v63 }
 0x470   : > { %v7937_v56 = vunpack.i.h.bf16 %v7935_v59  ;;  %v7936_v39 = vunpack.i.l.bf16 %v7935_v59  ;;  %v7931_v31 = vunpack.i.l.bf16 %v11836_v7  ;;  %v7932_v24 = vunpack.i.h.bf16 %v11836_v7  ;;  %6093 = vmatprep.mubr.bf16.mxu1 %v4690_v63  ;;  %6123 = vmatpush1.bf16.msra.mxu1 %v8160_v2  ;;  %v8172_v2 = vld [vmem:[#allocation7 + $0x440] ss:$16 sps:$4 sm:$0xff]  }
 0x471   : > { %v11842_v47 = vpack.c.bf16 %v4669_v17, %v4662_v9  ;;  %v11844_v43 = vpack.c.bf16 %v4668_v35, %v4661_v4  ;;  %6407 = vmatpush1.bf16.msra.mxu0 %v8163_v25  ;;  %6124 = vmatprep.subr.bf16.mxu1 %v8168_v49 }
 0x472   : > { %v4637_v53 = vmax.f32 %v11601_v38, %v7937_v56  ;;  %v4544_v1 = vsel %vm4539_vm10, %v7906_v23, %v7936_v39  ;;  %v4578_v19 = vsel %vm4539_vm10, %v7897_v32, %v7931_v31  ;;  %v4545_v38 = vsel %vm4539_vm10, %v7936_v39, %v7937_v56  ;;  %v8171_v23 = vld [vmem:[#allocation7 + $0x42c] ss:$16 sps:$4 sm:$0xff]   ;;  %v8174_v32 = vld [vmem:[#allocation7 + $0x444] ss:$16 sps:$4 sm:$0xff]  }
 0x473   : > { %v4635_v36 = vmax.f32 %v11599_v18, %v4544_v1  ;;  %v7945_v34 = vpop.permute.xlu0 %7944  ;;  %v7940_v44 = vpop.permute.xlu1 %7939  ;;  %v8166_v18 = vld [vmem:[#allocation7 + $0x420] ss:$16 sps:$4 sm:$0xff]   ;;  %v11859_v22 = vmax.f32 %v11591_v41, %v4578_v19  ;;  %v4579_v46 = vsel %vm4539_vm10, %v7931_v31, %v7932_v24  ;;  %v8169_v41 = vld [vmem:[#allocation7 + $0x428] ss:$16 sps:$4 sm:$0xff]   ;;  %v4636_v11 = vmax.f32 %v11605_v14, %v4545_v38  ;;  %6408 = vmatprep.subr.bf16.mxu0 %v8171_v23 }
 0x474   : > { %v7942_v4 = vunpack.i.h.bf16 %v7940_v44  ;;  %v7941_v10 = vunpack.i.l.bf16 %v7940_v44  ;;  %v7947_v61 = vunpack.i.h.bf16 %v7945_v34  ;;  %v7946_v33 = vunpack.i.l.bf16 %v7945_v34  ;;  %6125 = vmatpush1.bf16.msra.mxu1 %v8166_v18 }
 0x475   : > { %v4676_v35 = vmax.f32 %v11595_v8, %v4579_v46  ;;  %6126 = vmatprep.subr.bf16.mxu1 %v8174_v32  ;;  %6409 = vmatpush1.bf16.msra.mxu0 %v8169_v41  ;;  %v12687_v46 = vld [vmem:[#allocation67_spill] sm:$0xff]  ;;  %v8190_v41 = vld [vmem:[#allocation7 + $0x4a0] ss:$16 sps:$4 sm:$0xff]  }
 0x476   : > { %v4644_v42 = vmax.f32 %v11612_v6, %v7942_v4  ;;  %v4550_v21 = vsel %vm4539_vm10, %v11769_v40, %v7941_v10  ;;  %v4551_v12 = vsel %vm4539_vm10, %v7941_v10, %v7942_v4  ;;  %v8177_v40 = vld [vmem:[#allocation7 + $0x44c] ss:$16 sps:$4 sm:$0xff]   ;;  %v4651_v39 = vmax.f32 %v11622_v27, %v7947_v61  ;;  %v8175_v27 = vld [vmem:[#allocation7 + $0x448] ss:$16 sps:$4 sm:$0xff]   ;;  %6378 = vmatmul.mubr.bf16.gmra.mrb[180].mxu0 %v11817_v15  ;;  %v8178_v10 = vld [vmem:[#allocation7 + $0x460] ss:$16 sps:$4 sm:$0xff]  }
 0x477   : > { %v7955_v30 = vpop.permute.xlu0 %7954  ;;  %v7950_v58 = vpop.permute.xlu1 %7949  ;;  %v4642_v6 = vmax.f32 %v11610_v50, %v4550_v21  ;;  %v4643_v56 = vmax.f32 %v11616_v13, %v4551_v12  ;;  %v4556_v14 = vsel %vm4539_vm10, %v7912_v45, %v7946_v33  ;;  %v4557_v31 = vsel %vm4539_vm10, %v7946_v33, %v7947_v61  ;;  %6094 = vmatmul.mubr.bf16.gmra.mrb[180].mxu1 %v11817_v15  ;;  %v12685_v61 = vld [vmem:[#allocation78_spill] sm:$0xff]  ;;  %v8187_v12 = vld [vmem:[#allocation7 + $0x488] ss:$16 sps:$4 sm:$0xff]  }
 0x478   : > { %v11869_v37 = vpack.c.bf16 %v4644_v42, %v4637_v53  ;;  %v7957_v63 = vunpack.i.h.bf16 %v7955_v30  ;;  %v7956_v59 = vunpack.i.l.bf16 %v7955_v30  ;;  %v7952_v9 = vunpack.i.h.bf16 %v7950_v58  ;;  %6410 = vmatprep.subr.bf16.mxu0 %v8177_v40  ;;  %6103 = vmatprep.mubr.bf16.mxu1 %v11842_v47  ;;  %v8184_v33 = vld [vmem:[#allocation7 + $0x480] ss:$16 sps:$4 sm:$0xff]   ;;  %v8192_v30 = vld [vmem:[#allocation7 + $0x4a4] ss:$16 sps:$4 sm:$0xff]   ;;  %v8207_v40 = vld [vmem:[#allocation7 + $0x4ec] ss:$16 sps:$4 sm:$0xff]  }
 0x479   : > { %v7951_v17 = vunpack.i.l.bf16 %v7950_v58  ;;  %v11879_v50 = vpack.c.bf16 %v4642_v6, %v4635_v36  ;;  %v11886_v20 = vpack.c.bf16 %v4643_v56, %v4636_v11  ;;  %v4650_v19 = vmax.f32 %v11626_v3, %v4557_v31  ;;  %6127 = vmatpush1.bf16.msra.mxu1 %v8172_v2  ;;  %6387 = vmatprep.mubr.bf16.mxu0 %v11842_v47  ;;  %v12686_v42 = vld [vmem:[#allocation12_spill] sm:$0xff]  ;;  %v8193_v11 = vld [vmem:[#allocation7 + $0x4a8] ss:$16 sps:$4 sm:$0xff]  }
 0x47a   : > { %v4665_v53 = vmax.f32 %v11644_v29, %v7957_v63  ;;  %v4658_v1 = vmax.f32 %v11633_v60, %v7952_v9  ;;  %v4568_v45 = vsel %vm4539_vm10, %v7922_v0, %v7956_v59  ;;  %v8180_v60 = vld [vmem:[#allocation7 + $0x464] ss:$16 sps:$4 sm:$0xff]   ;;  %v8183_v29 = vld [vmem:[#allocation7 + $0x46c] ss:$16 sps:$4 sm:$0xff]   ;;  %v4569_v0 = vsel %vm4539_vm10, %v7956_v59, %v7957_v63  ;;  %6411 = vmatpush1.bf16.msra.mxu0 %v8175_v27  ;;  %v8205_v56 = vld [vmem:[#allocation7 + $0x4e8] ss:$16 sps:$4 sm:$0xff]  }
 0x47b   : > { %v4563_v8 = vsel %vm4539_vm10, %v7951_v17, %v7952_v9  ;;  %v7960_v34 = vpop.permute.xlu1 %7959  ;;  %v11884_v13 = vpop.permute.xlu0 %7964  ;;  %v4562_v38 = vsel %vm4539_vm10, %v7917_v28, %v7951_v17  ;;  %6128 = vmatprep.subr.bf16.mxu1 %v8180_v60  ;;  %6412 = vmatprep.subr.bf16.mxu0 %v8183_v29  ;;  %v4649_v51 = vmax.f32 %v11620_v57, %v4556_v14  ;;  %v8198_v6 = vld [vmem:[#allocation7 + $0x4c4] ss:$16 sps:$4 sm:$0xff]   ;;  %v8201_v63 = vld [vmem:[#allocation7 + $0x4cc] ss:$16 sps:$4 sm:$0xff]   ;;  %v8196_v9 = vld [vmem:[#allocation7 + $0x4c0] ss:$16 sps:$4 sm:$0xff]  }
 0x47c   : > { %v7962_v36 = vunpack.i.h.bf16 %v7960_v34  ;;  %v7961_v44 = vunpack.i.l.bf16 %v7960_v34  ;;  %v7966_v25 = vunpack.i.l.bf16 %v11884_v13  ;;  %v11894_v49 = vpack.c.bf16 %v4658_v1, %v4651_v39  ;;  %v8204_v17 = vld [vmem:[#allocation7 + $0x4e4] ss:$16 sps:$4 sm:$0xff]   ;;  %v8208_v14 = vld [vmem:[#allocation7 + $0x500] ss:$16 sps:$4 sm:$0xff]   ;;  %v8211_v31 = vld [vmem:[#allocation7 + $0x508] ss:$16 sps:$4 sm:$0xff]  }
 0x47d   : > { %v4657_v52 = vmax.f32 %v11637_v54, %v4563_v8  ;;  %v8181_v54 = vld [vmem:[#allocation7 + $0x468] ss:$16 sps:$4 sm:$0xff]   ;;  %v4656_v18 = vmax.f32 %v11631_v5, %v4562_v38  ;;  %v4664_v7 = vmax.f32 %v11648_v62, %v4569_v0  ;;  %v4663_v47 = vmax.f32 %v12685_v61, %v4568_v45  ;;  %6129 = vmatpush1.bf16.msra.mxu1 %v8178_v10  ;;  %v8195_v62 = vld [vmem:[#allocation7 + $0x4ac] ss:$16 sps:$4 sm:$0xff]   ;;  %v8210_v39 = vld [vmem:[#allocation7 + $0x504] ss:$16 sps:$4 sm:$0xff]  }
 0x47e   : > { %v4672_v4 = vmax.f32 %v11655_v26, %v7962_v36  ;;  %v4575_v15 = vsel %vm4539_vm10, %v7961_v44, %v7962_v36  ;;  %v4574_v23 = vsel %vm4539_vm10, %v7927_v48, %v7961_v44  ;;  %v4580_v3 = vsel %vm4539_vm10, %v7932_v24, %v7966_v25  ;;  %v8189_v48 = vld [vmem:[#allocation7 + $0x48c] ss:$16 sps:$4 sm:$0xff]   ;;  %6413 = vmatpush1.bf16.msra.mxu0 %v8181_v54  ;;  %v8216_v2 = vld [vmem:[#allocation7 + $0x524] ss:$16 sps:$4 sm:$0xff]   ;;  %v8214_v1 = vld [vmem:[#allocation7 + $0x520] ss:$16 sps:$4 sm:$0xff]  }
 0x47f   : > { %v11914_v26 = vpack.c.bf16 %v4657_v52, %v4650_v19  ;;  %v4671_v24 = vmax.f32 %v11659_v16, %v4575_v15  ;;  %v4670_v32 = vmax.f32 %v12686_v42, %v4574_v23  ;;  %v11925_v21 = vmax.f32 %v12687_v46, %v4580_v3  ;;  %6130 = vmatprep.subr.bf16.mxu1 %v8186_v55  ;;  %v8217_v8 = vld [vmem:[#allocation7 + $0x528] ss:$16 sps:$4 sm:$0xff]   ;;  %v8222_v34 = vld [vmem:[#allocation7 + $0x544] ss:$16 sps:$4 sm:$0xff]   ;;  %v8225_v27 = vld [vmem:[#allocation7 + $0x54c] ss:$16 sps:$4 sm:$0xff]  }
 0x480   : > { %v11916_v28 = vpack.c.bf16 %v4672_v4, %v4665_v53  ;;  %v4704_v57 = vpack.c.bf16 %v4676_v35, %v4676_v35  ;;  %v11927_v58 = vpack.c.bf16 %v4656_v18, %v4649_v51  ;;  %6104 = vmatmul.mubr.bf16.gmra.mrb[184].mxu1 %v11844_v43  ;;  %6388 = vmatmul.mubr.bf16.gmra.mrb[184].mxu0 %v11844_v43  ;;  %v8199_v43 = vld [vmem:[#allocation7 + $0x4c8] ss:$16 sps:$4 sm:$0xff]   ;;  %v8202_v35 = vld [vmem:[#allocation7 + $0x4e0] ss:$16 sps:$4 sm:$0xff]   ;;  %v8219_v53 = vld [vmem:[#allocation7 + $0x52c] ss:$16 sps:$4 sm:$0xff]  }
 0x481   : > { %v11929_v5 = vpack.c.bf16 %v4671_v24, %v4664_v7  ;;  %v11933_v16 = vpack.c.bf16 %v4670_v32, %v4663_v47  ;;  %6414 = vmatprep.subr.bf16.mxu0 %v8189_v48  ;;  %6131 = vmatpush1.bf16.msra.mxu1 %v8184_v33  ;;  %v4703_v59 = vpack.c.bf16 %v11859_v22, %v11859_v22  ;;  %v8213_v22 = vld [vmem:[#allocation7 + $0x50c] ss:$16 sps:$4 sm:$0xff]   ;;  %v8223_v45 = vld [vmem:[#allocation7 + $0x548] ss:$16 sps:$4 sm:$0xff]   ;;  %v8228_v36 = vld [vmem:[#allocation7 + $0x564] ss:$16 sps:$4 sm:$0xff]  }
 0x482   : > { %6113 = vmatprep.mubr.bf16.mxu1 %v4704_v57  ;;  %6397 = vmatprep.mubr.bf16.mxu0 %v4704_v57  ;;  %v8231_v44 = vld [vmem:[#allocation7 + $0x56c] ss:$16 sps:$4 sm:$0xff]   ;;  %v8226_v60 = vld [vmem:[#allocation7 + $0x560] ss:$16 sps:$4 sm:$0xff]   ;;  %v8229_v29 = vld [vmem:[#allocation7 + $0x568] ss:$16 sps:$4 sm:$0xff]  }
 0x483   : > { %6415 = vmatpush1.bf16.msra.mxu0 %v8187_v12  ;;  %6132 = vmatprep.subr.bf16.mxu1 %v8192_v30  ;;  %v8234_v19 = vld [vmem:[#allocation7 + $0x584] ss:$16 sps:$4 sm:$0xff]   ;;  %v8237_v52 = vld [vmem:[#allocation7 + $0x58c] ss:$16 sps:$4 sm:$0xff]   ;;  %v8232_v0 = vld [vmem:[#allocation7 + $0x580] ss:$16 sps:$4 sm:$0xff]  }
 0x484   : > { %6416 = vmatprep.subr.bf16.mxu0 %v8195_v62  ;;  %v8235_v38 = vld [vmem:[#allocation7 + $0x588] ss:$16 sps:$4 sm:$0xff]   ;;  %v8240_v4 = vld [vmem:[#allocation7 + $0x5a4] ss:$16 sps:$4 sm:$0xff]   ;;  %v8243_v15 = vld [vmem:[#allocation7 + $0x5ac] ss:$16 sps:$4 sm:$0xff]  }
 0x485   : > { %6133 = vmatpush1.bf16.msra.mxu1 %v8190_v41  ;;  %v8238_v10 = vld [vmem:[#allocation7 + $0x5a0] ss:$16 sps:$4 sm:$0xff]   ;;  %v8241_v23 = vld [vmem:[#allocation7 + $0x5a8] ss:$16 sps:$4 sm:$0xff]   ;;  %v8246_v3 = vld [vmem:[#allocation7 + $0x5c4] ss:$16 sps:$4 sm:$0xff]  }
 0x486   : > { %6134 = vmatprep.subr.bf16.mxu1 %v8198_v6  ;;  %v8249_v54 = vld [vmem:[#allocation7 + $0x5cc] ss:$16 sps:$4 sm:$0xff]   ;;  %v8244_v55 = vld [vmem:[#allocation7 + $0x5c0] ss:$16 sps:$4 sm:$0xff]   ;;  %v8247_v51 = vld [vmem:[#allocation7 + $0x5c8] ss:$16 sps:$4 sm:$0xff]   ;;  %v7967_v6 = vunpack.i.h.bf16 %v11884_v13 }
 0x487   : > { %6417 = vmatpush1.bf16.msra.mxu0 %v8193_v11  ;;  %v8252_v48 = vld [vmem:[#allocation7 + $0x5e4] ss:$16 sps:$4 sm:$0xff]   ;;  %v8255_v18 = vld [vmem:[#allocation7 + $0x5ec] ss:$16 sps:$4 sm:$0xff]   ;;  %v8250_v7 = vld [vmem:[#allocation7 + $0x5e0] ss:$16 sps:$4 sm:$0xff]  }
 0x488   : > { %6114 = vmatmul.mubr.bf16.gmra.mrb[188].mxu1 %v4703_v59  ;;  %6398 = vmatmul.mubr.bf16.gmra.mrb[188].mxu0 %v4703_v59  ;;  %v8253_v24 = vld [vmem:[#allocation7 + $0x5e8] ss:$16 sps:$4 sm:$0xff]   ;;  %v8258_v61 = vld [vmem:[#allocation7 + $0x604] ss:$16 sps:$4 sm:$0xff]   ;;  %v8261_v47 = vld [vmem:[#allocation7 + $0x60c] ss:$16 sps:$4 sm:$0xff]  }
 0x489   : > { %6418 = vmatprep.subr.bf16.mxu0 %v8201_v63  ;;  %6154 = vmatprep.mubr.bf16.mxu1 %v11886_v20  ;;  %v8256_v33 = vld [vmem:[#allocation7 + $0x600] ss:$16 sps:$4 sm:$0xff]   ;;  %v8259_v42 = vld [vmem:[#allocation7 + $0x608] ss:$16 sps:$4 sm:$0xff]   ;;  %v8264_v32 = vld [vmem:[#allocation7 + $0x624] ss:$16 sps:$4 sm:$0xff]  }
 0x48a   : > { %6135 = vmatpush1.bf16.msra.mxu1 %v8196_v9  ;;  %6438 = vmatprep.mubr.bf16.mxu0 %v11886_v20  ;;  %v8220_v20 = vld [vmem:[#allocation7 + $0x540] ss:$16 sps:$4 sm:$0xff]   ;;  %v8267_v46 = vld [vmem:[#allocation7 + $0x62c] ss:$16 sps:$4 sm:$0xff]   ;;  %v8442_v12 = vmov 65535  }
 0x48b   : > { %6419 = vmatpush1.bf16.msra.mxu0 %v8199_v43  ;;  %6136 = vmatprep.subr.bf16.mxu1 %v8204_v17  ;;  %v5966_v57 = vsel %vm2334_vm4, 4294967295, %v8442_v12  ;;  %v8262_v30 = vld [vmem:[#allocation7 + $0x620] ss:$16 sps:$4 sm:$0xff]   ;;  %v8265_v62 = vld [vmem:[#allocation7 + $0x628] ss:$16 sps:$4 sm:$0xff]  }
 0x48c   : > { %6420 = vmatprep.subr.bf16.mxu0 %v8207_v40  ;;  %v8270_v41 = vld [vmem:[#allocation7 + $0x644] ss:$16 sps:$4 sm:$0xff]   ;;  %v8273_v63 = vld [vmem:[#allocation7 + $0x64c] ss:$16 sps:$4 sm:$0xff]   ;;  %v8268_v9 = vld [vmem:[#allocation7 + $0x640] ss:$16 sps:$4 sm:$0xff]  }
 0x48d   : > { %v8276_v11 = vld [vmem:[#allocation7 + $0x664] ss:$16 sps:$4 sm:$0xff]   ;;  %v8279_v59 = vld [vmem:[#allocation7 + $0x66c] ss:$16 sps:$4 sm:$0xff]   ;;  %v8274_v43 = vld [vmem:[#allocation7 + $0x660] ss:$16 sps:$4 sm:$0xff]  }
 0x48e   : > { %6137 = vmatpush1.bf16.msra.mxu1 %v8202_v35  ;;  %v8271_v17 = vld [vmem:[#allocation7 + $0x648] ss:$16 sps:$4 sm:$0xff]   ;;  %v4581_v35 = vsel %vm4539_vm10, %v7966_v25, %v7967_v6  ;;  %v4705_v25 = vpack.c.bf16 %v11925_v21, %v11925_v21  ;;  %v12689_v21 = vld [vmem:[#allocation68_spill] sm:$0xff] }
 0x48f   : > { %6421 = vmatpush1.bf16.msra.mxu0 %v8205_v56  ;;  %6138 = vmatprep.subr.bf16.mxu1 %v8210_v39  ;;  %v8277_v40 = vld [vmem:[#allocation7 + $0x668] ss:$16 sps:$4 sm:$0xff]  }
 0x490   : > { %6422 = vmatprep.subr.bf16.mxu0 %v8213_v22  ;;  %v12688_v22 = vld [vmem:[#allocation13_spill] sm:$0xff] }
 0x492   : > { %6139 = vmatpush1.bf16.msra.mxu1 %v8208_v14  ;;  %v4678_v14 = vmax.f32 %v12688_v22, %v4581_v35 }
 0x493   : > { %6423 = vmatpush1.bf16.msra.mxu0 %v8211_v31  ;;  %6140 = vmatprep.subr.bf16.mxu1 %v8216_v2 }
 0x494   : > { %6424 = vmatprep.subr.bf16.mxu0 %v8219_v53  ;;  %v4706_v13 = vpack.c.bf16 %v4678_v14, %v4678_v14 }
 0x496   : > { %6141 = vmatpush1.bf16.msra.mxu1 %v8214_v1 }
 0x497   : > { %6425 = vmatpush1.bf16.msra.mxu0 %v8217_v8  ;;  %6142 = vmatprep.subr.bf16.mxu1 %v8222_v34 }
 0x498   : > { %6426 = vmatprep.subr.bf16.mxu0 %v8225_v27 }
 0x49a   : > { %6143 = vmatpush1.bf16.msra.mxu1 %v8220_v20 }
 0x49b   : > { %6427 = vmatpush1.bf16.msra.mxu0 %v8223_v45  ;;  %6144 = vmatprep.subr.bf16.mxu1 %v8228_v36 }
 0x49c   : > { %6428 = vmatprep.subr.bf16.mxu0 %v8231_v44 }
 0x49e   : > { %6145 = vmatpush1.bf16.msra.mxu1 %v8226_v60 }
 0x49f   : > { %6429 = vmatpush1.bf16.msra.mxu0 %v8229_v29  ;;  %6146 = vmatprep.subr.bf16.mxu1 %v8234_v19 }
 0x4a0   : > { %6430 = vmatprep.subr.bf16.mxu0 %v8237_v52 }
 0x4a2   : > { %6147 = vmatpush1.bf16.msra.mxu1 %v8232_v0 }
 0x4a3   : > { %6431 = vmatpush1.bf16.msra.mxu0 %v8235_v38  ;;  %6148 = vmatprep.subr.bf16.mxu1 %v8240_v4 }
 0x4a4   : > { %6432 = vmatprep.subr.bf16.mxu0 %v8243_v15 }
 0x4a6   : > { %6149 = vmatpush1.bf16.msra.mxu1 %v8238_v10 }
 0x4a7   : > { %6433 = vmatpush1.bf16.msra.mxu0 %v8241_v23  ;;  %6150 = vmatprep.subr.bf16.mxu1 %v8246_v3 }
 0x4a8   : > { %6434 = vmatprep.subr.bf16.mxu0 %v8249_v54 }
 0x4aa   : > { %6151 = vmatpush1.bf16.msra.mxu1 %v8244_v55 }
 0x4ab   : > { %6435 = vmatpush1.bf16.msra.mxu0 %v8247_v51  ;;  %6152 = vmatprep.subr.bf16.mxu1 %v8252_v48 }
 0x4ac   : > { %6436 = vmatprep.subr.bf16.mxu0 %v8255_v18 }
 0x4ae   : > { %6153 = vmatpush1.bf16.msra.mxu1 %v8250_v7 }
 0x4af   : > { %6437 = vmatpush1.bf16.msra.mxu0 %v8253_v24  ;;  %6193 = vmatprep.subr.bf16.mxu1 %v8258_v61 }
 0x4b0   : > { %6477 = vmatprep.subr.bf16.mxu0 %v8261_v47 }
 0x4b1   : > { %6155 = vmatmul.mubr.bf16.vlgmr.msra.gmra.mrb[176].mxu1 %v11879_v50 }
 0x4b2   : > { %6439 = vmatmul.mubr.bf16.vlgmr.msra.gmra.mrb[176].mxu0 %v11879_v50  ;;  %6164 = vmatprep.mubr.bf16.mxu1 %v11914_v26  ;;  %v5967_v50 = vsel %vm5965_vm11, %v5966_v57, 0 }
 0x4b3   : > { %6448 = vmatprep.mubr.bf16.mxu0 %v11914_v26  ;;  %6194 = vmatpush1.bf16.msra.mxu1 %v8256_v33  ;;  %v5972_v26 = vand.u32 %v8276_v11, %v5967_v50  ;;  %v5978_v56 = vand.u32 %v8279_v59, %v5967_v50  ;;  %v5969_v39 = vand.u32 %v8274_v43, %v5967_v50 }
 0x4b4   : > { %6478 = vmatpush1.bf16.msra.mxu0 %v8259_v42  ;;  %6195 = vmatprep.subr.bf16.mxu1 %v8264_v32  ;;  %v5975_v31 = vand.u32 %v8277_v40, %v5967_v50 }
 0x4b5   : > { %6479 = vmatprep.subr.bf16.mxu0 %v8267_v46 }
 0x4b7   : > { %6196 = vmatpush1.bf16.msra.mxu1 %v8262_v30 }
 0x4b8   : > { %6480 = vmatpush1.bf16.msra.mxu0 %v8265_v62  ;;  %6197 = vmatprep.subr.bf16.mxu1 %v8270_v41  ;;  %v6655_v41 = vld [vmem:[%s11977_s19 + $0x60] sm:$0x77] }
 0x4b9   : > { %6165 = vmatmul.mubr.bf16.gmra.mrb[180].mxu1 %v11927_v58  ;;  %6481 = vmatprep.subr.bf16.mxu0 %v8273_v63  ;;  %v6658_v63 = vld [vmem:[%s11977_s19 + $0x68] sm:$0x77] }
 0x4ba   : > { %6449 = vmatmul.mubr.bf16.gmra.mrb[180].mxu0 %v11927_v58  ;;  %6174 = vmatprep.mubr.bf16.mxu1 %v11929_v5  ;;  %v8443_v58 = vmov 0  }
 0x4bb   : > { %6458 = vmatprep.mubr.bf16.mxu0 %v11929_v5  ;;  %6198 = vmatpush1.bf16.msra.mxu1 %v8268_v9 }
 0x4bc   : > { %6482 = vmatpush1.bf16.msra.mxu0 %v8271_v17  ;;  %6199 = vmatprep.subr.bf16.mxu1 %v5972_v26 }
 0x4bd   : > { %6483 = vmatprep.subr.bf16.mxu0 %v5978_v56 }
 0x4bf   : > { %6200 = vmatpush1.bf16.msra.mxu1 %v5969_v39 }
 0x4c0   : > { %6484 = vmatpush1.bf16.msra.mxu0 %v5975_v31 }
 0x4c1   : > { %6175 = vmatmul.mubr.bf16.gmra.mrb[184].mxu1 %v11933_v16 }
 0x4c2   : > { %6459 = vmatmul.mubr.bf16.gmra.mrb[184].mxu0 %v11933_v16  ;;  %6184 = vmatprep.mubr.bf16.mxu1 %v4706_v13 }
 0x4c3   : > { %6468 = vmatprep.mubr.bf16.mxu0 %v4706_v13 }
 0x4c9   : > { %6185 = vmatmul.mubr.bf16.gmra.mrb[188].mxu1 %v4705_v25 }
 0x4ca   : > { %6469 = vmatmul.mubr.bf16.gmra.mrb[188].mxu0 %v4705_v25  ;;  %6225 = vmatprep.mubr.bf16.mxu1 %v8443_v58 }
 0x4cb   : > { %6509 = vmatprep.mubr.bf16.mxu0 %v8443_v58 }
 0x4d1   : > { %7204 = vmatmul.mubr.msk.bf16.vlgmr.msra.gmra.mrb[176].mxu1 %vm5952_vm12, %v11869_v37 }
 0x4d2   : > { %7208 = vmatmul.mubr.msk.bf16.vlgmr.msra.gmra.mrb[176].mxu0 %vm5952_vm12, %v11869_v37  ;;  %6235 = vmatprep.mubr.bf16.mxu1 %v8443_v58  ;;  %v4679_v37 = vmax.f32 %v12689_v21, %v7967_v6 }
 0x4d3   : > { %6519 = vmatprep.mubr.bf16.mxu0 %v8443_v58 }
 0x4d4   : > { %v4707_v5 = vpack.c.bf16 %v4679_v37, %v4679_v37 }
 0x4d9   : > { %7205 = vmatmul.mubr.msk.bf16.gmra.mrb[180].mxu1 %vm5952_vm12, %v11894_v49 }
 0x4da   : > { %7209 = vmatmul.mubr.msk.bf16.gmra.mrb[180].mxu0 %vm5952_vm12, %v11894_v49  ;;  %6245 = vmatprep.mubr.bf16.mxu1 %v8443_v58 }
 0x4db   : > { %6529 = vmatprep.mubr.bf16.mxu0 %v8443_v58 }
 0x4e1   : > { %7206 = vmatmul.mubr.msk.bf16.gmra.mrb[184].mxu1 %vm5952_vm12, %v11916_v28 }
 0x4e2   : > { %7210 = vmatmul.mubr.msk.bf16.gmra.mrb[184].mxu0 %vm5952_vm12, %v11916_v28  ;;  %6255 = vmatprep.mubr.bf16.mxu1 %v8443_v58 }
 0x4e3   : > { %6539 = vmatprep.mubr.bf16.mxu0 %v8443_v58 }
 0x4e9   : > { %7207 = vmatmul.mubr.msk.bf16.gmra.mrb[188].mxu1 %vm5952_vm12, %v4707_v5 }
 0x4ea   : > { %7211 = vmatmul.mubr.msk.bf16.gmra.mrb[188].mxu0 %vm5952_vm12, %v4707_v5 }
 0x5a4   : > { %v6227_v16 = vpop.f32.mrb[176].mxu1 }
 0x5a5   : > { %v6511_v2 = vpop.f32.mrb[176].mxu0  ;;  %v6229_v49 = vpop.f32.mrb[177].mxu1 }
 0x5a6   : > { %v7228_v28 = vpack.c.bf16 %v6229_v49, %v6227_v16  ;;  %v6513_v53 = vpop.f32.mrb[177].mxu0  ;;  %v6231_v1 = vpop.f32.mrb[178].mxu1 }
 0x5a7   : > { %v7229_v8 = vpack.c.bf16 %v6513_v53, %v6511_v2  ;;  %v6515_v34 = vpop.f32.mrb[178].mxu0  ;;  %v6233_v27 = vpop.f32.mrb[179].mxu1 }
 0x5a8   : > { %6636 = vst [vmem:[%s11977_s19] sm:$0xff] %v7228_v28  ;;  %v7230_v20 = vpack.c.bf16 %v6233_v27, %v6231_v1  ;;  %v6517_v45 = vpop.f32.mrb[179].mxu0 }
 0x5a9   : > { %6637 = vst [vmem:[%s11977_s19 + $0x8] sm:$0xff] %v7229_v8  ;;  %v7231_v36 = vpack.c.bf16 %v6517_v45, %v6515_v34 }
 0x5aa   : > { %6638 = vst [vmem:[%s11977_s19 + $0x10] sm:$0xff] %v7230_v20 }
 0x5ab   : > { %6639 = vst [vmem:[%s11977_s19 + $0x18] sm:$0xff] %v7231_v36 }
 0x5ac   : > { %v6237_v44 = vpop.f32.mrb[180].mxu1 }
 0x5ad   : > { %v6521_v60 = vpop.f32.mrb[180].mxu0  ;;  %v6239_v29 = vpop.f32.mrb[181].mxu1 }
 0x5ae   : > { %v7232_v19 = vpack.c.bf16 %v6239_v29, %v6237_v44  ;;  %v6523_v52 = vpop.f32.mrb[181].mxu0  ;;  %v6241_v0 = vpop.f32.mrb[182].mxu1 }
 0x5af   : > { %v7233_v38 = vpack.c.bf16 %v6523_v52, %v6521_v60  ;;  %v6525_v4 = vpop.f32.mrb[182].mxu0  ;;  %v6243_v15 = vpop.f32.mrb[183].mxu1 }
 0x5b0   : > { %6640 = vst [vmem:[%s11977_s19 + $0x20] sm:$0xff] %v7232_v19  ;;  %v7234_v10 = vpack.c.bf16 %v6243_v15, %v6241_v0  ;;  %v6527_v23 = vpop.f32.mrb[183].mxu0 }
 0x5b1   : > { %6641 = vst [vmem:[%s11977_s19 + $0x28] sm:$0xff] %v7233_v38  ;;  %v7235_v3 = vpack.c.bf16 %v6527_v23, %v6525_v4 }
 0x5b2   : > { %6642 = vst [vmem:[%s11977_s19 + $0x30] sm:$0xff] %v7234_v10 }
 0x5b3   : > { %6643 = vst [vmem:[%s11977_s19 + $0x38] sm:$0xff] %v7235_v3 }
 0x5b4   : > { %v6247_v54 = vpop.f32.mrb[184].mxu1 }
 0x5b5   : > { %v6531_v55 = vpop.f32.mrb[184].mxu0  ;;  %v6249_v51 = vpop.f32.mrb[185].mxu1 }
 0x5b6   : > { %v7236_v48 = vpack.c.bf16 %v6249_v51, %v6247_v54  ;;  %v6533_v18 = vpop.f32.mrb[185].mxu0  ;;  %v6251_v7 = vpop.f32.mrb[186].mxu1 }
 0x5b7   : > { %v7237_v24 = vpack.c.bf16 %v6533_v18, %v6531_v55  ;;  %v6535_v61 = vpop.f32.mrb[186].mxu0  ;;  %v6253_v47 = vpop.f32.mrb[187].mxu1 }
 0x5b8   : > { %6644 = vst [vmem:[%s11977_s19 + $0x40] sm:$0xff] %v7236_v48  ;;  %v7238_v33 = vpack.c.bf16 %v6253_v47, %v6251_v7  ;;  %v6537_v42 = vpop.f32.mrb[187].mxu0 }
 0x5b9   : > { %6645 = vst [vmem:[%s11977_s19 + $0x48] sm:$0xff] %v7237_v24  ;;  %v7239_v32 = vpack.c.bf16 %v6537_v42, %v6535_v61 }
 0x5ba   : > { %6646 = vst [vmem:[%s11977_s19 + $0x50] sm:$0xff] %v7238_v33 }
 0x5bb   : > { %6647 = vst [vmem:[%s11977_s19 + $0x58] sm:$0xff] %v7239_v32 }
 0x5bc   : > { %v6257_v57 = vpop.f32.mrb[188].mxu1 }
 0x5bd   : > { %v6541_v30 = vpop.f32.mrb[188].mxu0  ;;  %v6259_v62 = vpop.f32.mrb[189].mxu1 }
 0x5be   : > { %v7240_v11 = vpack.c.bf16 %v6259_v62, %v6257_v57  ;;  %v6543_v6 = vpop.f32.mrb[189].mxu0  ;;  %v6261_v50 = vpop.f32.mrb[190].mxu1 }
 0x5bf   : > { %v7241_v59 = vpack.c.bf16 %v6543_v6, %v6541_v30  ;;  %v6545_v9 = vpop.f32.mrb[190].mxu0  ;;  %v6262_v43 = vpop.f32.mrb[191].mxu1 }
 0x5c0   : > { %v6656_v17 = vsel %vm6654_vm3, %v7240_v11, %v6655_v41  ;;  %v6546_v26 = vpop.f32.mrb[191].mxu0 }
 0x5c1   : > { %6657 = vst [vmem:[%s11977_s19 + $0x60] sm:$0x77] %v6656_v17  ;;  %v6659_v40 = vsel %vm6654_vm3, %v7241_v59, %v6658_v63 }
 0x5c2   : > { %6660 = vst [vmem:[%s11977_s19 + $0x68] sm:$0x77] %v6659_v40 }
 0x5c3 PF: > { %s18_s18 = sadd.s32 1, %s8425_s18  }
 0x5c4   : > { %p15_p11 = scmp.ge.s32.totalorder %s18_s18, 4  }
 0x5c6   :  { %17 = sbr.rel (!%p15_p11) target bundleno = 3 (0x3), region = 89 }
 0x5cd   :  { %6682 = vsyncpa [#allocation3], 1 }
 0x5ce   :  { %6684 = vsyncpa [#allocation3 + $0x1], 1 }
 0x5cf   :  { %6685 = vsyncpa [#allocation5], 1 }
 0x5d0   :  { %6686 = vsyncpa [#allocation8], 1 }

// kernel: forward.3
= control target key start
LH: loop header
LB: loop body
LE: loop exit
PB: predicated region body
PF: predicated region fallthrough
CT: control target
= control target key end

     0   :  { %s13231_s15 = smov 0   ;;  %s13233_s16 = smov 0   ;;  %s14388_s0 = inlined_call_operand.vmem [shape: bf16[2,27136], index: 0, kind: input, shape index: {}]   ;;  %s14389_s1 = inlined_call_operand.vmem [shape: bf16[2,27136,64], index: 1, kind: input, shape index: {}]   ;;  %s14390_s2 = inlined_call_operand.vmem [shape: f32[2,1,64], index: 2, kind: input, shape index: {}]   ;;  %s14391_s3 = inlined_call_operand.vmem [shape: f32[2,64,2], index: 3, kind: input, shape index: {}]   ;;  %s14392_s4 = inlined_call_operand.vmem [shape: f32[2,2,2], index: 4, kind: output, shape index: {}]  }
   0x1   :  { %s13235_s17 = smov 0   ;;  %s13237_s18 = smov 0  }
   0x2   :  { %s13239_s19 = smov 0  }
   0x3 LB: > { %s23_s20 = sadd.s32 1, %s13191_s17  ;;  %s26_s21 = sadd.s32 1, %s13195_s18  ;;  %s13199_s19 = sphi %s13239_s19, %s14_s19   ;;  %s13195_s18 = sphi %s13237_s18, %s14396_s18   ;;  %s13191_s17 = sphi %s13235_s17, %s14395_s17   ;;  %s13187_s16 = sphi %s13233_s16, %s14394_s16   ;;  %s13183_s15 = sphi %s13231_s15, %s14393_s15  }
   0x4   : > { %p24_p0 = scmp.ge.s32.totalorder %s23_s20, 2  ;;  %p10187_p1 = scmp.ge.s32.totalorder %s13199_s19, 1 }
   0x5   : > { %p209_p2 = scmp.lt.s32.totalorder %s13199_s19, 5 }
   0x6   : > { %s14398_s20 = smov (%p24_p0, %s23_s20), 0  ;;  %s14400_s21 = smov (!%p24_p0, %s26_s21), %s13195_s18 }
   0x7   : > { %p210_p3 = pnand %p10187_p1, %p209_p2  ;;  %p28_p4 = scmp.ge.s32.totalorder %s14400_s21, 2 }
   0x8   : > { %s250_s22 = smul.u32 (!%p210_p3), 106, %s13183_s15  ;;  %p256_p5 = scmp.lt.s32.totalorder (!%p210_p3), %s13187_s16, 1 }
   0x9   : > { %s14402_s21 = smov (%p28_p4, %s14400_s21), 0  ;;  %213 = sbr.rel (%p210_p3) target bundleno = 1339 (0x53b), region = 36 }
   0xa   : > { %s255_s23 = smul.u32 (!%p210_p3), 1696, %s13183_s15  ;;  %p251_p6 = scmp.lt.s32.totalorder (!%p210_p3), %s250_s22, 211 }
   0xb   : > { %p10192_p8 = scmp.ne.s32.totalorder (!%p210_p3), %s13183_s15, 0 }
   0xc   : > { %p258_p7 = scmp.lt.s32.totalorder (!%p210_p3), %s255_s23, 3391 }
  0x10   : > { %s14404_s16 = smov (!%p256_p5, %s13187_s16), 1  ;;  %s14406_s22 = smov (!%p251_p6, %s250_s22), 211 }
  0x11   : > { %s12254_s24 = smul.u32 3392, %s14404_s16  ;;  %s13271_s27 = scalar_lea.vmem %s14388_s0, %s14406_s22  ;;  %vm282_vm0 = vcmask (!%p10192_p8), 517120   ;;  %v13201_v0 = vmov (!%p10192_p8), 0.0  }
  0x12   : > { %s267_s30 = scalar_lea.vmem %s14390_s2, %s14404_s16  ;;  %s14408_s23 = smov (!%p258_p7, %s255_s23), 3391  ;;  %283 = vst.msk [vmem:[#allocation2] sm:$0x3] (!%p10192_p8), %vm282_vm0, %v13201_v0 }
  0x13   : > { %s11047_s5 = sshll.u32 %s14404_s16, 6  ;;  %s10191_s6 = sshll.u32 %s14404_s16, 1 }
  0x14   : > { %s261_s7 = sadd.s32 %s12254_s24, %s14408_s23  ;;  %s13282_s10 = scalar_lea.vmem %s14391_s3, %s11047_s5 }
  0x15   : > { %s10188_s11 = sshll.u32 %s261_s7, 2  ;;  %s13287_s14 = scalar_lea.vmem %s14392_s4, %s10191_s6 }
  0x16   : > { %s13292_s26 = scalar_lea.vmem %s14389_s1, %s10188_s11  ;;  %281 = sbr.rel (%p10192_p8) target bundleno = 29 (0x1d), region = 40 }
  0x1d PF: > { %v12300_v1 = vld [vmem:[%s13292_s26 + $0x40] sm:$0xff]   ;;  %v12304_v5 = vld [vmem:[%s13292_s26 + $0x48] sm:$0xff]   ;;  %v12308_v9 = vld [vmem:[%s13292_s26 + $0x50] sm:$0xff]   ;;  %v2013_v30 = vlaneseq  ;;  %v13202_v36 = vmov 1966171168   ;;  %vm9983_vm1 = vcmask 517120  }
  0x1e   : > { %v12301_v2 = vld [vmem:[%s13292_s26 + $0xc0] sm:$0xff]   ;;  %11048 = vmatprep.subr.bf16.mxu0 %v12300_v1  ;;  %v12305_v6 = vld [vmem:[%s13292_s26 + $0xc8] sm:$0xff]   ;;  %v12309_v10 = vld [vmem:[%s13292_s26 + $0xd0] sm:$0xff]   ;;  %v2011_v37 = vunpack.c.l.s4 %v13202_v36  ;;  %p11042_p9 = scmp.ne.s32.totalorder %s13183_s15, 1 }
  0x1f   : > { %v12302_v3 = vld [vmem:[%s13292_s26] sm:$0xff]   ;;  %11070 = vmatprep.subr.bf16.mxu1 %v12301_v2  ;;  %v12306_v7 = vld [vmem:[%s13292_s26 + $0x8] sm:$0xff]   ;;  %v12310_v11 = vld [vmem:[%s13292_s26 + $0x10] sm:$0xff]   ;;  %v2014_v34 = vshrl.u32 %v2013_v30, 7  ;;  %vm13204_vm2 = vmmov (!%p11042_p9), 0   ;;  %vm10007_vm3 = vcmask (!%p11042_p9), 523264  }
  0x20   : > { %v12303_v4 = vld [vmem:[%s13292_s26 + $0x80] sm:$0xff]   ;;  %11049 = vmatpush3.bf16.msra.mxu0 %v12302_v3  ;;  %v12307_v8 = vld [vmem:[%s13292_s26 + $0x88] sm:$0xff]   ;;  %v12311_v12 = vld [vmem:[%s13292_s26 + $0x90] sm:$0xff]   ;;  %v2012_v40 = vunpack.c.0.s8 %v2011_v37  ;;  %vm10081_vm4 = vcmask (!%p11042_p9), 9216  }
  0x21   : > { %11071 = vmatpush3.bf16.msra.mxu1 %v12303_v4  ;;  %11050 = vmatprep.subr.bf16.mxu0 %v12304_v5  ;;  %v12312_v13 = vld [vmem:[%s13292_s26 + $0x58] sm:$0xff]   ;;  %v12316_v17 = vld [vmem:[%s13292_s26 + $0x60] sm:$0xff]   ;;  %v12320_v21 = vld [vmem:[%s13292_s26 + $0x68] sm:$0xff]  }
  0x22   : > { %11072 = vmatprep.subr.bf16.mxu1 %v12305_v6  ;;  %v12313_v14 = vld [vmem:[%s13292_s26 + $0xd8] sm:$0xff]   ;;  %v12317_v18 = vld [vmem:[%s13292_s26 + $0xe0] sm:$0xff]   ;;  %v12321_v22 = vld [vmem:[%s13292_s26 + $0xe8] sm:$0xff]   ;;  %v13330_v42 = vsub.s32 %v2012_v40, %v2014_v34 }
  0x23   : > { %v12314_v15 = vld [vmem:[%s13292_s26 + $0x18] sm:$0xff]   ;;  %v12318_v19 = vld [vmem:[%s13292_s26 + $0x20] sm:$0xff]   ;;  %v12322_v23 = vld [vmem:[%s13292_s26 + $0x28] sm:$0xff]  }
  0x24   : > { %11051 = vmatpush3.bf16.msra.mxu0 %v12306_v7  ;;  %v12315_v16 = vld [vmem:[%s13292_s26 + $0x98] sm:$0xff]   ;;  %v12319_v20 = vld [vmem:[%s13292_s26 + $0xa0] sm:$0xff]   ;;  %v12323_v24 = vld [vmem:[%s13292_s26 + $0xa8] sm:$0xff]  }
  0x25   : > { %11073 = vmatpush3.bf16.msra.mxu1 %v12307_v8  ;;  %11052 = vmatprep.subr.bf16.mxu0 %v12308_v9  ;;  %v12324_v25 = vld [vmem:[%s13292_s26 + $0x70] sm:$0xff]   ;;  %v12328_v29 = vld [vmem:[%s13292_s26 + $0x78] sm:$0xff]   ;;  %v12333_v35 = vld [vmem:[%s13292_s26 + $0x140] sm:$0xff]  }
  0x26   : > { %11074 = vmatprep.subr.bf16.mxu1 %v12309_v10  ;;  %v12325_v26 = vld [vmem:[%s13292_s26 + $0xf0] sm:$0xff]   ;;  %v12329_v31 = vld [vmem:[%s13292_s26 + $0xf8] sm:$0xff]   ;;  %v285_v38 = vld [vmem:[%s13271_s27] sm:$0xff] }
  0x27   : > { %v12326_v27 = vld [vmem:[%s13292_s26 + $0x30] sm:$0xff]   ;;  %v12330_v32 = vld [vmem:[%s13292_s26 + $0x38] sm:$0xff]   ;;  %v2009_v39 = vcombine.high %v285_v38, %v285_v38  ;;  %v12335_v41 = vld [vmem:[%s13292_s26 + $0x1c0] sm:$0xff]   ;;  %v2016_v43 = vrot.slane %v285_v38, %v13330_v42 }
  0x28   : > { %11053 = vmatpush3.bf16.msra.mxu0 %v12310_v11  ;;  %v12327_v28 = vld [vmem:[%s13292_s26 + $0xb0] sm:$0xff]   ;;  %v12331_v33 = vld [vmem:[%s13292_s26 + $0xb8] sm:$0xff]   ;;  %v12334_v48 = vld [vmem:[%s13292_s26 + $0x100] sm:$0xff]  }
  0x29   : > { %11075 = vmatpush3.bf16.msra.mxu1 %v12311_v12  ;;  %11054 = vmatprep.subr.bf16.mxu0 %v12312_v13  ;;  %v13334_v44 = vrot.slane %v2009_v39, %v13330_v42  ;;  %v2024_v45 = vcombine.high %v2016_v43, %v2016_v43  ;;  %v2032_v46 = vrot.slane %v2016_v43, %v13330_v42  ;;  %v12336_v50 = vld [vmem:[%s13292_s26 + $0x180] sm:$0xff]   ;;  %v12337_v53 = vld [vmem:[%s13292_s26 + $0x148] sm:$0xff]   ;;  %v12341_v59 = vld [vmem:[%s13292_s26 + $0x150] sm:$0xff]  }
  0x2a   : > { %11076 = vmatprep.subr.bf16.mxu1 %v12313_v14  ;;  %v12338_v55 = vld [vmem:[%s13292_s26 + $0x108] sm:$0xff]   ;;  %v12342_v60 = vld [vmem:[%s13292_s26 + $0x110] sm:$0xff]   ;;  %v12345_v63 = vld [vmem:[%s13292_s26 + $0x158] sm:$0xff]  }
  0x2b   : > { %v2025_v47 = vcombine.high %v13334_v44, %v13334_v44  ;;  %v2046_v49 = vrot.slane %v2024_v45, %v13330_v42  ;;  %v2054_v52 = vcombine.high %v2032_v46, %v2032_v46  ;;  %v12339_v56 = vld [vmem:[%s13292_s26 + $0x1c8] sm:$0xff]   ;;  %v12343_v61 = vld [vmem:[%s13292_s26 + $0x1d0] sm:$0xff]   ;;  %v12346_v0 = vld [vmem:[%s13292_s26 + $0x118] sm:$0xff]  }
  0x2c   : > { %11055 = vmatpush3.bf16.msra.mxu0 %v12314_v15  ;;  %v12340_v58 = vld [vmem:[%s13292_s26 + $0x188] sm:$0xff]   ;;  %v12344_v62 = vld [vmem:[%s13292_s26 + $0x190] sm:$0xff]   ;;  %v12347_v1 = vld [vmem:[%s13292_s26 + $0x1d8] sm:$0xff]  }
  0x2d   : > { %11077 = vmatpush3.bf16.msra.mxu1 %v12315_v16  ;;  %11056 = vmatprep.subr.bf16.mxu0 %v12316_v17  ;;  %v2053_v51 = vrot.slane %v2025_v47, %v13330_v42  ;;  %v2056_v54 = vcombine.high %v2046_v49, %v2046_v49  ;;  %v12348_v2 = vld [vmem:[%s13292_s26 + $0x198] sm:$0xff]   ;;  %v12349_v3 = vld [vmem:[%s13292_s26 + $0x160] sm:$0xff]   ;;  %v12353_v7 = vld [vmem:[%s13292_s26 + $0x168] sm:$0xff]  }
  0x2e   : > { %11078 = vmatprep.subr.bf16.mxu1 %v12317_v18  ;;  %7894 = vmatprep.mubr.bf16.mxu0 %v2046_v49  ;;  %v12350_v4 = vld [vmem:[%s13292_s26 + $0x120] sm:$0xff]   ;;  %v12354_v8 = vld [vmem:[%s13292_s26 + $0x128] sm:$0xff]   ;;  %v12357_v11 = vld [vmem:[%s13292_s26 + $0x170] sm:$0xff]  }
  0x2f   : > { %v2057_v57 = vcombine.high %v2053_v51, %v2053_v51  ;;  %7934 = vmatprep.mubr.bf16.mxu1 %v2056_v54  ;;  %v12351_v5 = vld [vmem:[%s13292_s26 + $0x1e0] sm:$0xff]   ;;  %v12355_v9 = vld [vmem:[%s13292_s26 + $0x1e8] sm:$0xff]   ;;  %v12358_v12 = vld [vmem:[%s13292_s26 + $0x130] sm:$0xff]  }
  0x30   : > { %11057 = vmatpush3.bf16.msra.mxu0 %v12318_v19  ;;  %v12352_v6 = vld [vmem:[%s13292_s26 + $0x1a0] sm:$0xff]   ;;  %v12356_v10 = vld [vmem:[%s13292_s26 + $0x1a8] sm:$0xff]   ;;  %v12359_v13 = vld [vmem:[%s13292_s26 + $0x1f0] sm:$0xff]   ;;  %v2039_v19 = vrot.slane %v13334_v44, %v13330_v42 }
  0x31   : > { %11079 = vmatpush3.bf16.msra.mxu1 %v12319_v20  ;;  %11058 = vmatprep.subr.bf16.mxu0 %v12320_v21  ;;  %v12360_v14 = vld [vmem:[%s13292_s26 + $0x1b0] sm:$0xff]   ;;  %v12361_v15 = vld [vmem:[%s13292_s26 + $0x178] sm:$0xff]   ;;  %v12365_v20 = vld [vmem:[%s13292_s26 + $0x240] sm:$0xff]  }
  0x32   : > { %11080 = vmatprep.subr.bf16.mxu1 %v12321_v22  ;;  %v12362_v16 = vld [vmem:[%s13292_s26 + $0x138] sm:$0xff]   ;;  %v12366_v21 = vld [vmem:[%s13292_s26 + $0x200] sm:$0xff]   ;;  %v12374_v30 = vld [vmem:[%s13292_s26 + $0x210] sm:$0xff]  }
  0x33   : > { %v12363_v17 = vld [vmem:[%s13292_s26 + $0x1f8] sm:$0xff]   ;;  %v12367_v22 = vld [vmem:[%s13292_s26 + $0x2c0] sm:$0xff]   ;;  %v12386_v43 = vld [vmem:[%s13292_s26 + $0x228] sm:$0xff]  }
  0x34   : > { %11059 = vmatpush3.bf16.msra.mxu0 %v12322_v23  ;;  %v12364_v18 = vld [vmem:[%s13292_s26 + $0x1b8] sm:$0xff]   ;;  %v12368_v23 = vld [vmem:[%s13292_s26 + $0x280] sm:$0xff]   ;;  %v12387_v44 = vld [vmem:[%s13292_s26 + $0x2e8] sm:$0xff]  }
  0x35   : > { %11081 = vmatpush3.bf16.msra.mxu1 %v12323_v24  ;;  %11060 = vmatprep.subr.bf16.mxu0 %v12324_v25  ;;  %v2055_v24 = vcombine.high %v2039_v19, %v2039_v19  ;;  %v12369_v25 = vld [vmem:[%s13292_s26 + $0x248] sm:$0xff]   ;;  %v12378_v34 = vld [vmem:[%s13292_s26 + $0x218] sm:$0xff]   ;;  %v12381_v37 = vld [vmem:[%s13292_s26 + $0x260] sm:$0xff]  }
  0x36   : > { %11082 = vmatprep.subr.bf16.mxu1 %v12325_v26  ;;  %v12370_v26 = vld [vmem:[%s13292_s26 + $0x208] sm:$0xff]   ;;  %v12380_v36 = vld [vmem:[%s13292_s26 + $0x298] sm:$0xff]   ;;  %v12382_v38 = vld [vmem:[%s13292_s26 + $0x220] sm:$0xff]  }
  0x37   : > { %v12383_v39 = vld [vmem:[%s13292_s26 + $0x2e0] sm:$0xff]   ;;  %v12388_v45 = vld [vmem:[%s13292_s26 + $0x2a8] sm:$0xff]   ;;  %v12389_v47 = vld [vmem:[%s13292_s26 + $0x270] sm:$0xff]  }
  0x38   : > { %11061 = vmatpush3.bf16.msra.mxu0 %v12326_v27  ;;  %v12371_v27 = vld [vmem:[%s13292_s26 + $0x2c8] sm:$0xff]   ;;  %v12384_v40 = vld [vmem:[%s13292_s26 + $0x2a0] sm:$0xff]   ;;  %v12392_v54 = vld [vmem:[%s13292_s26 + $0x2b0] sm:$0xff]  }
  0x39   : > { %11083 = vmatpush3.bf16.msra.mxu1 %v12327_v28  ;;  %11062 = vmatprep.subr.bf16.mxu0 %v12328_v29  ;;  %v12372_v28 = vld [vmem:[%s13292_s26 + $0x288] sm:$0xff]   ;;  %v12373_v29 = vld [vmem:[%s13292_s26 + $0x250] sm:$0xff]  }
  0x3a   : > { %11084 = vmatprep.subr.bf16.mxu1 %v12329_v31  ;;  %v12375_v31 = vld [vmem:[%s13292_s26 + $0x2d0] sm:$0xff]  }
  0x3c   : > { %11063 = vmatpush3.bf16.msra.mxu0 %v12330_v32  ;;  %v12376_v32 = vld [vmem:[%s13292_s26 + $0x290] sm:$0xff]  }
  0x3d   : > { %11085 = vmatpush3.bf16.msra.mxu1 %v12331_v33  ;;  %11092 = vmatprep.subr.bf16.mxu0 %v12333_v35  ;;  %v12377_v33 = vld [vmem:[%s13292_s26 + $0x258] sm:$0xff]  }
  0x3e   : > { %11114 = vmatprep.subr.bf16.mxu1 %v12335_v41  ;;  %v12379_v35 = vld [vmem:[%s13292_s26 + $0x2d8] sm:$0xff]   ;;  %v12385_v41 = vld [vmem:[%s13292_s26 + $0x268] sm:$0xff]  }
  0x3f   : > { %7895 = vmatmul.mubr.bf16.vlgmr.msra.gmra.mrb[0].mxu0 %v2032_v46  ;;  %v286_v46 = vld [vmem:[%s13271_s27 + $0x8] sm:$0xff] }
  0x40   : > { %11093 = vmatpush3.bf16.msra.mxu0 %v12334_v48  ;;  %7935 = vmatmul.mubr.bf16.vlgmr.msra.gmra.mrb[0].mxu1 %v2054_v52  ;;  %v2065_v48 = vrot.slane %v286_v46, %v13330_v42  ;;  %v2058_v49 = vcombine.high %v286_v46, %v286_v46  ;;  %v12439_v46 = vld [vmem:[%s13292_s26 + $0x410] sm:$0xff]  }
  0x41   : > { %11094 = vmatprep.subr.bf16.mxu0 %v12337_v53  ;;  %11115 = vmatpush3.bf16.msra.mxu1 %v12336_v50  ;;  %v12390_v50 = vld [vmem:[%s13292_s26 + $0x230] sm:$0xff]  }
  0x42   : > { %7974 = vmatprep.mubr.bf16.mxu0 %v2053_v51  ;;  %11116 = vmatprep.subr.bf16.mxu1 %v12339_v56  ;;  %v12391_v51 = vld [vmem:[%s13292_s26 + $0x2f0] sm:$0xff]   ;;  %v2073_v52 = vcombine.high %v2065_v48, %v2065_v48  ;;  %v13403_v53 = vrot.slane %v2058_v49, %v13330_v42  ;;  %v12442_v49 = vld [vmem:[%s13292_s26 + $0x458] sm:$0xff]  }
  0x43   : > { %8014 = vmatprep.mubr.bf16.mxu1 %v2057_v57  ;;  %v12394_v57 = vld [vmem:[%s13292_s26 + $0x238] sm:$0xff]  }
  0x44   : > { %11095 = vmatpush3.bf16.msra.mxu0 %v12338_v55  ;;  %v12393_v55 = vld [vmem:[%s13292_s26 + $0x278] sm:$0xff]   ;;  %v2095_v56 = vrot.slane %v2073_v52, %v13330_v42 }
  0x45   : > { %11096 = vmatprep.subr.bf16.mxu0 %v12341_v59  ;;  %11117 = vmatpush3.bf16.msra.mxu1 %v12340_v58  ;;  %v2074_v58 = vcombine.high %v13403_v53, %v13403_v53  ;;  %v12395_v59 = vld [vmem:[%s13292_s26 + $0x2f8] sm:$0xff]  }
  0x46   : > { %11118 = vmatprep.subr.bf16.mxu1 %v12343_v61  ;;  %v12396_v61 = vld [vmem:[%s13292_s26 + $0x2b8] sm:$0xff]  }
  0x47   : > { %v12445_v52 = vld [vmem:[%s13292_s26 + $0x498] sm:$0xff]  }
  0x48   : > { %11097 = vmatpush3.bf16.msra.mxu0 %v12342_v60  ;;  %v2105_v60 = vcombine.high %v2095_v56, %v2095_v56 }
  0x49   : > { %11098 = vmatprep.subr.bf16.mxu0 %v12345_v63  ;;  %11119 = vmatpush3.bf16.msra.mxu1 %v12344_v62  ;;  %v2081_v62 = vrot.slane %v2065_v48, %v13330_v42  ;;  %v12397_v63 = vld [vmem:[%s13292_s26 + $0x340] sm:$0xff]   ;;  %v12441_v48 = vld [vmem:[%s13292_s26 + $0x490] sm:$0xff]  }
  0x4a   : > { %11120 = vmatprep.subr.bf16.mxu1 %v12347_v1  ;;  %v2102_v1 = vrot.slane %v2074_v58, %v13330_v42  ;;  %v12451_v58 = vld [vmem:[%s13292_s26 + $0x428] sm:$0xff]  }
  0x4c   : > { %11099 = vmatpush3.bf16.msra.mxu0 %v12346_v0  ;;  %v12398_v0 = vld [vmem:[%s13292_s26 + $0x300] sm:$0xff]  }
  0x4d   : > { %11100 = vmatprep.subr.bf16.mxu0 %v12349_v3  ;;  %11121 = vmatpush3.bf16.msra.mxu1 %v12348_v2  ;;  %v12399_v2 = vld [vmem:[%s13292_s26 + $0x3c0] sm:$0xff]  }
  0x4e   : > { %11122 = vmatprep.subr.bf16.mxu1 %v12351_v5  ;;  %v12400_v3 = vld [vmem:[%s13292_s26 + $0x380] sm:$0xff]   ;;  %v12401_v5 = vld [vmem:[%s13292_s26 + $0x348] sm:$0xff]  }
  0x50   : > { %11101 = vmatpush3.bf16.msra.mxu0 %v12350_v4  ;;  %v2103_v4 = vcombine.high %v2081_v62, %v2081_v62 }
  0x51   : > { %11102 = vmatprep.subr.bf16.mxu0 %v12353_v7  ;;  %11123 = vmatpush3.bf16.msra.mxu1 %v12352_v6  ;;  %v12402_v6 = vld [vmem:[%s13292_s26 + $0x308] sm:$0xff]   ;;  %v2106_v7 = vcombine.high %v2102_v1, %v2102_v1 }
  0x52   : > { %11124 = vmatprep.subr.bf16.mxu1 %v12355_v9  ;;  %v12404_v9 = vld [vmem:[%s13292_s26 + $0x388] sm:$0xff]  }
  0x54   : > { %11103 = vmatpush3.bf16.msra.mxu0 %v12354_v8  ;;  %v12403_v8 = vld [vmem:[%s13292_s26 + $0x3c8] sm:$0xff]  }
  0x55   : > { %11104 = vmatprep.subr.bf16.mxu0 %v12357_v11  ;;  %11125 = vmatpush3.bf16.msra.mxu1 %v12356_v10  ;;  %v12405_v10 = vld [vmem:[%s13292_s26 + $0x350] sm:$0xff]  }
  0x56   : > { %11126 = vmatprep.subr.bf16.mxu1 %v12359_v13  ;;  %v12406_v11 = vld [vmem:[%s13292_s26 + $0x310] sm:$0xff]  }
  0x57   : > { %v12408_v13 = vld [vmem:[%s13292_s26 + $0x390] sm:$0xff]  }
  0x58   : > { %11105 = vmatpush3.bf16.msra.mxu0 %v12358_v12  ;;  %v12407_v12 = vld [vmem:[%s13292_s26 + $0x3d0] sm:$0xff]  }
  0x59   : > { %11106 = vmatprep.subr.bf16.mxu0 %v12361_v15  ;;  %11127 = vmatpush3.bf16.msra.mxu1 %v12360_v14  ;;  %v12409_v14 = vld [vmem:[%s13292_s26 + $0x358] sm:$0xff]  }
  0x5a   : > { %11128 = vmatprep.subr.bf16.mxu1 %v12363_v17  ;;  %v12410_v15 = vld [vmem:[%s13292_s26 + $0x318] sm:$0xff]  }
  0x5b   : > { %v12412_v17 = vld [vmem:[%s13292_s26 + $0x398] sm:$0xff]  }
  0x5c   : > { %11107 = vmatpush3.bf16.msra.mxu0 %v12362_v16  ;;  %v12411_v16 = vld [vmem:[%s13292_s26 + $0x3d8] sm:$0xff]  }
  0x5d   : > { %11136 = vmatprep.subr.bf16.mxu0 %v12365_v20  ;;  %11129 = vmatpush3.bf16.msra.mxu1 %v12364_v18  ;;  %v12413_v18 = vld [vmem:[%s13292_s26 + $0x360] sm:$0xff]  }
  0x5e   : > { %11158 = vmatprep.subr.bf16.mxu1 %v12367_v22  ;;  %v12415_v20 = vld [vmem:[%s13292_s26 + $0x3e0] sm:$0xff]   ;;  %v12417_v22 = vld [vmem:[%s13292_s26 + $0x368] sm:$0xff]  }
  0x5f   : > { %7975 = vmatmul.mubr.bf16.vlgmr.msra.gmra.mrb[4].mxu0 %v2039_v19  ;;  %v12414_v19 = vld [vmem:[%s13292_s26 + $0x320] sm:$0xff]  }
  0x60   : > { %11137 = vmatpush3.bf16.msra.mxu0 %v12366_v21  ;;  %8015 = vmatmul.mubr.bf16.vlgmr.msra.gmra.mrb[4].mxu1 %v2055_v24  ;;  %v12416_v21 = vld [vmem:[%s13292_s26 + $0x3a0] sm:$0xff]   ;;  %v12419_v24 = vld [vmem:[%s13292_s26 + $0x3e8] sm:$0xff]  }
  0x61   : > { %11138 = vmatprep.subr.bf16.mxu0 %v12369_v25  ;;  %11159 = vmatpush3.bf16.msra.mxu1 %v12368_v23  ;;  %v12418_v23 = vld [vmem:[%s13292_s26 + $0x328] sm:$0xff]  }
  0x62   : > { %11160 = vmatprep.subr.bf16.mxu1 %v12371_v27  ;;  %8054 = vmatprep.mubr.bf16.mxu0 %v2095_v56  ;;  %v12420_v25 = vld [vmem:[%s13292_s26 + $0x3a8] sm:$0xff]   ;;  %v12422_v27 = vld [vmem:[%s13292_s26 + $0x330] sm:$0xff]   ;;  %v12449_v56 = vld [vmem:[%s13292_s26 + $0x4a0] sm:$0xff]  }
  0x63   : > { %8094 = vmatprep.mubr.bf16.mxu1 %v2105_v60  ;;  %v12453_v60 = vld [vmem:[%s13292_s26 + $0x4a8] sm:$0xff]  }
  0x64   : > { %11139 = vmatpush3.bf16.msra.mxu0 %v12370_v26  ;;  %v12421_v26 = vld [vmem:[%s13292_s26 + $0x370] sm:$0xff]  }
  0x65   : > { %11140 = vmatprep.subr.bf16.mxu0 %v12373_v29  ;;  %11161 = vmatpush3.bf16.msra.mxu1 %v12372_v28  ;;  %v12423_v28 = vld [vmem:[%s13292_s26 + $0x3f0] sm:$0xff]  }
  0x66   : > { %11162 = vmatprep.subr.bf16.mxu1 %v12375_v31  ;;  %v12424_v29 = vld [vmem:[%s13292_s26 + $0x3b0] sm:$0xff]   ;;  %v12426_v31 = vld [vmem:[%s13292_s26 + $0x338] sm:$0xff]  }
  0x68   : > { %11141 = vmatpush3.bf16.msra.mxu0 %v12374_v30  ;;  %v12425_v30 = vld [vmem:[%s13292_s26 + $0x378] sm:$0xff]  }
  0x69   : > { %11142 = vmatprep.subr.bf16.mxu0 %v12377_v33  ;;  %11163 = vmatpush3.bf16.msra.mxu1 %v12376_v32  ;;  %v12427_v32 = vld [vmem:[%s13292_s26 + $0x3f8] sm:$0xff]  }
  0x6a   : > { %11164 = vmatprep.subr.bf16.mxu1 %v12379_v35  ;;  %v12429_v33 = vld [vmem:[%s13292_s26 + $0x3b8] sm:$0xff]   ;;  %v12430_v35 = vld [vmem:[%s13292_s26 + $0x440] sm:$0xff]  }
  0x6c   : > { %11143 = vmatpush3.bf16.msra.mxu0 %v12378_v34  ;;  %v2088_v34 = vrot.slane %v13403_v53, %v13330_v42  ;;  %v12446_v53 = vld [vmem:[%s13292_s26 + $0x460] sm:$0xff]  }
  0x6d   : > { %11144 = vmatprep.subr.bf16.mxu0 %v12381_v37  ;;  %11165 = vmatpush3.bf16.msra.mxu1 %v12380_v36  ;;  %v12431_v36 = vld [vmem:[%s13292_s26 + $0x400] sm:$0xff]  }
  0x6e   : > { %11166 = vmatprep.subr.bf16.mxu1 %v12383_v39  ;;  %v12432_v37 = vld [vmem:[%s13292_s26 + $0x4c0] sm:$0xff]   ;;  %v2104_v39 = vcombine.high %v2088_v34, %v2088_v34 }
  0x70   : > { %11145 = vmatpush3.bf16.msra.mxu0 %v12382_v38  ;;  %v12433_v38 = vld [vmem:[%s13292_s26 + $0x480] sm:$0xff]  }
  0x71   : > { %11146 = vmatprep.subr.bf16.mxu0 %v12385_v41  ;;  %11167 = vmatpush3.bf16.msra.mxu1 %v12384_v40  ;;  %v12434_v40 = vld [vmem:[%s13292_s26 + $0x448] sm:$0xff]  }
  0x72   : > { %11168 = vmatprep.subr.bf16.mxu1 %v12387_v44  ;;  %v12435_v41 = vld [vmem:[%s13292_s26 + $0x408] sm:$0xff]  }
  0x73   : > { %v12437_v44 = vld [vmem:[%s13292_s26 + $0x488] sm:$0xff]  }
  0x74   : > { %11147 = vmatpush3.bf16.msra.mxu0 %v12386_v43  ;;  %v12436_v43 = vld [vmem:[%s13292_s26 + $0x4c8] sm:$0xff]  }
  0x75   : > { %11148 = vmatprep.subr.bf16.mxu0 %v12389_v47  ;;  %11169 = vmatpush3.bf16.msra.mxu1 %v12388_v45  ;;  %v12438_v45 = vld [vmem:[%s13292_s26 + $0x450] sm:$0xff]  }
  0x76   : > { %11170 = vmatprep.subr.bf16.mxu1 %v12391_v51  ;;  %v12440_v47 = vld [vmem:[%s13292_s26 + $0x4d0] sm:$0xff]   ;;  %v12444_v51 = vld [vmem:[%s13292_s26 + $0x4d8] sm:$0xff]  }
  0x78   : > { %11149 = vmatpush3.bf16.msra.mxu0 %v12390_v50  ;;  %v12443_v50 = vld [vmem:[%s13292_s26 + $0x418] sm:$0xff]  }
  0x79   : > { %11150 = vmatprep.subr.bf16.mxu0 %v12393_v55  ;;  %11171 = vmatpush3.bf16.msra.mxu1 %v12392_v54  ;;  %v12447_v54 = vld [vmem:[%s13292_s26 + $0x420] sm:$0xff]  }
  0x7a   : > { %11172 = vmatprep.subr.bf16.mxu1 %v12395_v59  ;;  %v12448_v55 = vld [vmem:[%s13292_s26 + $0x4e0] sm:$0xff]   ;;  %v12452_v59 = vld [vmem:[%s13292_s26 + $0x4e8] sm:$0xff]  }
  0x7c   : > { %11151 = vmatpush3.bf16.msra.mxu0 %v12394_v57  ;;  %v12450_v57 = vld [vmem:[%s13292_s26 + $0x468] sm:$0xff]  }
  0x7d   : > { %11180 = vmatprep.subr.bf16.mxu0 %v12397_v63  ;;  %11173 = vmatpush3.bf16.msra.mxu1 %v12396_v61  ;;  %v287_v61 = vld [vmem:[%s13271_s27 + $0x10] sm:$0xff] }
  0x7e   : > { %11202 = vmatprep.subr.bf16.mxu1 %v12399_v2  ;;  %v2114_v63 = vrot.slane %v287_v61, %v13330_v42  ;;  %v12456_v2 = vld [vmem:[%s13292_s26 + $0x4f0] sm:$0xff]  }
  0x7f   : > { %8055 = vmatmul.mubr.bf16.vlgmr.msra.gmra.mrb[8].mxu0 %v2081_v62  ;;  %v12454_v62 = vld [vmem:[%s13292_s26 + $0x470] sm:$0xff]  }
  0x80   : > { %11181 = vmatpush3.bf16.msra.mxu0 %v12398_v0  ;;  %8134 = vmatprep.mubr.bf16.mxu0 %v2102_v1  ;;  %v2107_v0 = vcombine.high %v287_v61, %v287_v61  ;;  %v12455_v1 = vld [vmem:[%s13292_s26 + $0x430] sm:$0xff]  }
  0x81   : > { %8095 = vmatmul.mubr.bf16.vlgmr.msra.gmra.mrb[8].mxu1 %v2103_v4  ;;  %11182 = vmatprep.subr.bf16.mxu0 %v12401_v5  ;;  %v12457_v5 = vld [vmem:[%s13292_s26 + $0x4b0] sm:$0xff]  }
  0x82   : > { %11203 = vmatpush3.bf16.msra.mxu1 %v12400_v3  ;;  %8174 = vmatprep.mubr.bf16.mxu1 %v2106_v7  ;;  %v2122_v3 = vcombine.high %v2114_v63, %v2114_v63  ;;  %v13479_v4 = vrot.slane %v2107_v0, %v13330_v42  ;;  %v12504_v61 = vld [vmem:[%s13292_s26 + $0x610] sm:$0xff]   ;;  %v12507_v0 = vld [vmem:[%s13292_s26 + $0x658] sm:$0xff]  }
  0x83   : > { %11204 = vmatprep.subr.bf16.mxu1 %v12403_v8  ;;  %v12459_v8 = vld [vmem:[%s13292_s26 + $0x438] sm:$0xff]  }
  0x84   : > { %11183 = vmatpush3.bf16.msra.mxu0 %v12402_v6  ;;  %v12458_v6 = vld [vmem:[%s13292_s26 + $0x478] sm:$0xff]   ;;  %v2144_v7 = vrot.slane %v2122_v3, %v13330_v42 }
  0x85   : > { %11184 = vmatprep.subr.bf16.mxu0 %v12405_v10  ;;  %v12460_v10 = vld [vmem:[%s13292_s26 + $0x4f8] sm:$0xff]  }
  0x86   : > { %11205 = vmatpush3.bf16.msra.mxu1 %v12404_v9  ;;  %v2123_v9 = vcombine.high %v13479_v4, %v13479_v4  ;;  %v12510_v3 = vld [vmem:[%s13292_s26 + $0x698] sm:$0xff]  }
  0x87   : > { %11206 = vmatprep.subr.bf16.mxu1 %v12407_v12  ;;  %v12461_v12 = vld [vmem:[%s13292_s26 + $0x4b8] sm:$0xff]  }
  0x88   : > { %11185 = vmatpush3.bf16.msra.mxu0 %v12406_v11  ;;  %v2154_v11 = vcombine.high %v2144_v7, %v2144_v7 }
  0x89   : > { %11186 = vmatprep.subr.bf16.mxu0 %v12409_v14  ;;  %v12462_v14 = vld [vmem:[%s13292_s26 + $0x540] sm:$0xff]  }
  0x8a   : > { %11207 = vmatpush3.bf16.msra.mxu1 %v12408_v13  ;;  %v2130_v13 = vrot.slane %v2114_v63, %v13330_v42  ;;  %v12506_v63 = vld [vmem:[%s13292_s26 + $0x690] sm:$0xff]  }
  0x8b   : > { %11208 = vmatprep.subr.bf16.mxu1 %v12411_v16  ;;  %v2151_v16 = vrot.slane %v2123_v9, %v13330_v42  ;;  %v12516_v9 = vld [vmem:[%s13292_s26 + $0x628] sm:$0xff]  }
  0x8c   : > { %11187 = vmatpush3.bf16.msra.mxu0 %v12410_v15  ;;  %v12463_v15 = vld [vmem:[%s13292_s26 + $0x500] sm:$0xff]  }
  0x8d   : > { %11188 = vmatprep.subr.bf16.mxu0 %v12413_v18  ;;  %v12465_v18 = vld [vmem:[%s13292_s26 + $0x580] sm:$0xff]  }
  0x8e   : > { %11209 = vmatpush3.bf16.msra.mxu1 %v12412_v17  ;;  %v12464_v17 = vld [vmem:[%s13292_s26 + $0x5c0] sm:$0xff]  }
  0x8f   : > { %11210 = vmatprep.subr.bf16.mxu1 %v12415_v20  ;;  %v12466_v20 = vld [vmem:[%s13292_s26 + $0x548] sm:$0xff]  }
  0x90   : > { %11189 = vmatpush3.bf16.msra.mxu0 %v12414_v19  ;;  %v2152_v19 = vcombine.high %v2130_v13, %v2130_v13 }
  0x91   : > { %11190 = vmatprep.subr.bf16.mxu0 %v12417_v22  ;;  %v2155_v22 = vcombine.high %v2151_v16, %v2151_v16 }
  0x92   : > { %11211 = vmatpush3.bf16.msra.mxu1 %v12416_v21  ;;  %v12467_v21 = vld [vmem:[%s13292_s26 + $0x508] sm:$0xff]  }
  0x93   : > { %11212 = vmatprep.subr.bf16.mxu1 %v12419_v24  ;;  %v12469_v24 = vld [vmem:[%s13292_s26 + $0x588] sm:$0xff]  }
  0x94   : > { %11191 = vmatpush3.bf16.msra.mxu0 %v12418_v23  ;;  %v12468_v23 = vld [vmem:[%s13292_s26 + $0x5c8] sm:$0xff]  }
  0x95   : > { %11192 = vmatprep.subr.bf16.mxu0 %v12421_v26  ;;  %v12471_v26 = vld [vmem:[%s13292_s26 + $0x510] sm:$0xff]  }
  0x96   : > { %11213 = vmatpush3.bf16.msra.mxu1 %v12420_v25  ;;  %v12470_v25 = vld [vmem:[%s13292_s26 + $0x550] sm:$0xff]  }
  0x97   : > { %11214 = vmatprep.subr.bf16.mxu1 %v12423_v28  ;;  %v12473_v28 = vld [vmem:[%s13292_s26 + $0x590] sm:$0xff]  }
  0x98   : > { %11193 = vmatpush3.bf16.msra.mxu0 %v12422_v27  ;;  %v12472_v27 = vld [vmem:[%s13292_s26 + $0x5d0] sm:$0xff]  }
  0x99   : > { %11194 = vmatprep.subr.bf16.mxu0 %v12425_v30  ;;  %v12475_v30 = vld [vmem:[%s13292_s26 + $0x518] sm:$0xff]  }
  0x9a   : > { %11215 = vmatpush3.bf16.msra.mxu1 %v12424_v29  ;;  %v12474_v29 = vld [vmem:[%s13292_s26 + $0x558] sm:$0xff]  }
  0x9b   : > { %11216 = vmatprep.subr.bf16.mxu1 %v12427_v32  ;;  %v12477_v32 = vld [vmem:[%s13292_s26 + $0x598] sm:$0xff]  }
  0x9c   : > { %11195 = vmatpush3.bf16.msra.mxu0 %v12426_v31  ;;  %v12476_v31 = vld [vmem:[%s13292_s26 + $0x5d8] sm:$0xff]  }
  0x9d   : > { %11224 = vmatprep.subr.bf16.mxu0 %v12430_v35  ;;  %v12480_v35 = vld [vmem:[%s13292_s26 + $0x5e0] sm:$0xff]  }
  0x9e   : > { %11217 = vmatpush3.bf16.msra.mxu1 %v12429_v33  ;;  %v12478_v33 = vld [vmem:[%s13292_s26 + $0x560] sm:$0xff]  }
  0x9f   : > { %8135 = vmatmul.mubr.bf16.vlgmr.msra.gmra.mrb[12].mxu0 %v2088_v34  ;;  %11246 = vmatprep.subr.bf16.mxu1 %v12432_v37  ;;  %v12479_v34 = vld [vmem:[%s13292_s26 + $0x520] sm:$0xff]   ;;  %v12482_v37 = vld [vmem:[%s13292_s26 + $0x568] sm:$0xff]  }
  0xa0   : > { %11225 = vmatpush3.bf16.msra.mxu0 %v12431_v36  ;;  %8214 = vmatprep.mubr.bf16.mxu0 %v2144_v7  ;;  %v12481_v36 = vld [vmem:[%s13292_s26 + $0x5a0] sm:$0xff]  }
  0xa1   : > { %8175 = vmatmul.mubr.bf16.vlgmr.msra.gmra.mrb[12].mxu1 %v2104_v39  ;;  %11226 = vmatprep.subr.bf16.mxu0 %v12434_v40  ;;  %v12484_v39 = vld [vmem:[%s13292_s26 + $0x5e8] sm:$0xff]   ;;  %v12514_v7 = vld [vmem:[%s13292_s26 + $0x6a0] sm:$0xff]  }
  0xa2   : > { %11247 = vmatpush3.bf16.msra.mxu1 %v12433_v38  ;;  %8254 = vmatprep.mubr.bf16.mxu1 %v2154_v11  ;;  %v12483_v38 = vld [vmem:[%s13292_s26 + $0x528] sm:$0xff]  }
  0xa3   : > { %11248 = vmatprep.subr.bf16.mxu1 %v12436_v43  ;;  %v12485_v40 = vld [vmem:[%s13292_s26 + $0x5a8] sm:$0xff]   ;;  %v12487_v43 = vld [vmem:[%s13292_s26 + $0x530] sm:$0xff]  }
  0xa4   : > { %11227 = vmatpush3.bf16.msra.mxu0 %v12435_v41  ;;  %v12486_v41 = vld [vmem:[%s13292_s26 + $0x570] sm:$0xff]   ;;  %v12518_v11 = vld [vmem:[%s13292_s26 + $0x6a8] sm:$0xff]  }
  0xa5   : > { %11228 = vmatprep.subr.bf16.mxu0 %v12438_v45  ;;  %v12489_v45 = vld [vmem:[%s13292_s26 + $0x5b0] sm:$0xff]  }
  0xa6   : > { %11249 = vmatpush3.bf16.msra.mxu1 %v12437_v44  ;;  %v12488_v44 = vld [vmem:[%s13292_s26 + $0x5f0] sm:$0xff]  }
  0xa7   : > { %11250 = vmatprep.subr.bf16.mxu1 %v12440_v47  ;;  %v12491_v47 = vld [vmem:[%s13292_s26 + $0x538] sm:$0xff]  }
  0xa8   : > { %11229 = vmatpush3.bf16.msra.mxu0 %v12439_v46  ;;  %v12490_v46 = vld [vmem:[%s13292_s26 + $0x578] sm:$0xff]  }
  0xa9   : > { %11230 = vmatprep.subr.bf16.mxu0 %v12442_v49  ;;  %v12494_v49 = vld [vmem:[%s13292_s26 + $0x5b8] sm:$0xff]  }
  0xaa   : > { %11251 = vmatpush3.bf16.msra.mxu1 %v12441_v48  ;;  %v12492_v48 = vld [vmem:[%s13292_s26 + $0x5f8] sm:$0xff]  }
  0xab   : > { %11252 = vmatprep.subr.bf16.mxu1 %v12444_v51  ;;  %v12495_v51 = vld [vmem:[%s13292_s26 + $0x640] sm:$0xff]  }
  0xac   : > { %11231 = vmatpush3.bf16.msra.mxu0 %v12443_v50  ;;  %v2137_v50 = vrot.slane %v13479_v4, %v13330_v42  ;;  %v12511_v4 = vld [vmem:[%s13292_s26 + $0x660] sm:$0xff]  }
  0xad   : > { %11232 = vmatprep.subr.bf16.mxu0 %v12446_v53  ;;  %v12497_v53 = vld [vmem:[%s13292_s26 + $0x6c0] sm:$0xff]  }
  0xae   : > { %11253 = vmatpush3.bf16.msra.mxu1 %v12445_v52  ;;  %v12496_v52 = vld [vmem:[%s13292_s26 + $0x600] sm:$0xff]  }
  0xaf   : > { %11254 = vmatprep.subr.bf16.mxu1 %v12448_v55  ;;  %v2153_v55 = vcombine.high %v2137_v50, %v2137_v50 }
  0xb0   : > { %11233 = vmatpush3.bf16.msra.mxu0 %v12447_v54  ;;  %v12498_v54 = vld [vmem:[%s13292_s26 + $0x680] sm:$0xff]  }
  0xb1   : > { %11234 = vmatprep.subr.bf16.mxu0 %v12450_v57  ;;  %v12500_v57 = vld [vmem:[%s13292_s26 + $0x608] sm:$0xff]  }
  0xb2   : > { %11255 = vmatpush3.bf16.msra.mxu1 %v12449_v56  ;;  %v12499_v56 = vld [vmem:[%s13292_s26 + $0x648] sm:$0xff]  }
  0xb3   : > { %11256 = vmatprep.subr.bf16.mxu1 %v12452_v59  ;;  %v12502_v59 = vld [vmem:[%s13292_s26 + $0x688] sm:$0xff]  }
  0xb4   : > { %11235 = vmatpush3.bf16.msra.mxu0 %v12451_v58  ;;  %v12501_v58 = vld [vmem:[%s13292_s26 + $0x6c8] sm:$0xff]  }
  0xb5   : > { %11236 = vmatprep.subr.bf16.mxu0 %v12454_v62  ;;  %v12505_v62 = vld [vmem:[%s13292_s26 + $0x6d0] sm:$0xff]  }
  0xb6   : > { %11257 = vmatpush3.bf16.msra.mxu1 %v12453_v60  ;;  %v12503_v60 = vld [vmem:[%s13292_s26 + $0x650] sm:$0xff]  }
  0xb7   : > { %11258 = vmatprep.subr.bf16.mxu1 %v12456_v2  ;;  %v12509_v2 = vld [vmem:[%s13292_s26 + $0x6d8] sm:$0xff]  }
  0xb8   : > { %11237 = vmatpush3.bf16.msra.mxu0 %v12455_v1  ;;  %v12508_v1 = vld [vmem:[%s13292_s26 + $0x618] sm:$0xff]  }
  0xb9   : > { %11238 = vmatprep.subr.bf16.mxu0 %v12458_v6  ;;  %v12513_v6 = vld [vmem:[%s13292_s26 + $0x6e0] sm:$0xff]  }
  0xba   : > { %11259 = vmatpush3.bf16.msra.mxu1 %v12457_v5  ;;  %v12512_v5 = vld [vmem:[%s13292_s26 + $0x620] sm:$0xff]  }
  0xbb   : > { %11260 = vmatprep.subr.bf16.mxu1 %v12460_v10  ;;  %v12517_v10 = vld [vmem:[%s13292_s26 + $0x6e8] sm:$0xff]  }
  0xbc   : > { %11239 = vmatpush3.bf16.msra.mxu0 %v12459_v8  ;;  %v12515_v8 = vld [vmem:[%s13292_s26 + $0x668] sm:$0xff]  }
  0xbd   : > { %11268 = vmatprep.subr.bf16.mxu0 %v12462_v14  ;;  %v12520_v14 = vld [vmem:[%s13292_s26 + $0x630] sm:$0xff]  }
  0xbe   : > { %11261 = vmatpush3.bf16.msra.mxu1 %v12461_v12  ;;  %v12519_v12 = vld [vmem:[%s13292_s26 + $0x670] sm:$0xff]  }
  0xbf   : > { %8215 = vmatmul.mubr.bf16.vlgmr.msra.gmra.mrb[16].mxu0 %v2130_v13  ;;  %11290 = vmatprep.subr.bf16.mxu1 %v12464_v17  ;;  %v288_v13 = vld [vmem:[%s13271_s27 + $0x18] sm:$0xff]  ;;  %v12521_v17 = vld [vmem:[%s13292_s26 + $0x6f0] sm:$0xff]  }
  0xc0   : > { %11269 = vmatpush3.bf16.msra.mxu0 %v12463_v15  ;;  %8294 = vmatprep.mubr.bf16.mxu0 %v2151_v16  ;;  %v2163_v15 = vrot.slane %v288_v13, %v13330_v42  ;;  %v2156_v16 = vcombine.high %v288_v13, %v288_v13  ;;  %v12560_v13 = vld [vmem:[%s13292_s26 + $0x840] sm:$0xff]  }
  0xc1   : > { %8255 = vmatmul.mubr.bf16.vlgmr.msra.gmra.mrb[16].mxu1 %v2152_v19  ;;  %11270 = vmatprep.subr.bf16.mxu0 %v12466_v20 }
  0xc2   : > { %11291 = vmatpush3.bf16.msra.mxu1 %v12465_v18  ;;  %8334 = vmatprep.mubr.bf16.mxu1 %v2155_v22  ;;  %v12522_v18 = vld [vmem:[%s13292_s26 + $0x6b0] sm:$0xff]   ;;  %v2171_v19 = vcombine.high %v2163_v15, %v2163_v15  ;;  %v13556_v20 = vrot.slane %v2156_v16, %v13330_v42  ;;  %v12524_v22 = vld [vmem:[%s13292_s26 + $0x638] sm:$0xff]   ;;  %v12563_v16 = vld [vmem:[%s13292_s26 + $0x880] sm:$0xff]  }
  0xc3   : > { %11292 = vmatprep.subr.bf16.mxu1 %v12468_v23 }
  0xc4   : > { %11271 = vmatpush3.bf16.msra.mxu0 %v12467_v21  ;;  %v12523_v21 = vld [vmem:[%s13292_s26 + $0x678] sm:$0xff]   ;;  %v2193_v23 = vrot.slane %v2171_v19, %v13330_v42  ;;  %v12565_v19 = vld [vmem:[%s13292_s26 + $0x808] sm:$0xff]  }
  0xc5   : > { %11272 = vmatprep.subr.bf16.mxu0 %v12470_v25  ;;  %v12525_v25 = vld [vmem:[%s13292_s26 + $0x6f8] sm:$0xff]  }
  0xc6   : > { %11293 = vmatpush3.bf16.msra.mxu1 %v12469_v24  ;;  %v2172_v24 = vcombine.high %v13556_v20, %v13556_v20 }
  0xc7   : > { %11294 = vmatprep.subr.bf16.mxu1 %v12472_v27  ;;  %v2203_v27 = vcombine.high %v2193_v23, %v2193_v23 }
  0xc8   : > { %11273 = vmatpush3.bf16.msra.mxu0 %v12471_v26  ;;  %v12526_v26 = vld [vmem:[%s13292_s26 + $0x6b8] sm:$0xff]  }
  0xc9   : > { %11274 = vmatprep.subr.bf16.mxu0 %v12474_v29  ;;  %v12527_v29 = vld [vmem:[%s13292_s26 + $0x740] sm:$0xff]  }
  0xca   : > { %11295 = vmatpush3.bf16.msra.mxu1 %v12473_v28  ;;  %v2179_v28 = vrot.slane %v2163_v15, %v13330_v42  ;;  %v12562_v15 = vld [vmem:[%s13292_s26 + $0x8c0] sm:$0xff]  }
  0xcb   : > { %11296 = vmatprep.subr.bf16.mxu1 %v12476_v31  ;;  %v2200_v31 = vrot.slane %v2172_v24, %v13330_v42  ;;  %v12570_v24 = vld [vmem:[%s13292_s26 + $0x8d0] sm:$0xff]  }
  0xcc   : > { %11275 = vmatpush3.bf16.msra.mxu0 %v12475_v30  ;;  %v12528_v30 = vld [vmem:[%s13292_s26 + $0x700] sm:$0xff]  }
  0xcd   : > { %11276 = vmatprep.subr.bf16.mxu0 %v12478_v33  ;;  %v12530_v33 = vld [vmem:[%s13292_s26 + $0x780] sm:$0xff]  }
  0xce   : > { %11297 = vmatpush3.bf16.msra.mxu1 %v12477_v32  ;;  %v12529_v32 = vld [vmem:[%s13292_s26 + $0x7c0] sm:$0xff]  }
  0xcf   : > { %11298 = vmatprep.subr.bf16.mxu1 %v12480_v35  ;;  %v12531_v35 = vld [vmem:[%s13292_s26 + $0x748] sm:$0xff]  }
  0xd0   : > { %11277 = vmatpush3.bf16.msra.mxu0 %v12479_v34  ;;  %v2201_v34 = vcombine.high %v2179_v28, %v2179_v28 }
  0xd1   : > { %11278 = vmatprep.subr.bf16.mxu0 %v12482_v37  ;;  %v2204_v37 = vcombine.high %v2200_v31, %v2200_v31 }
  0xd2   : > { %11299 = vmatpush3.bf16.msra.mxu1 %v12481_v36  ;;  %v12532_v36 = vld [vmem:[%s13292_s26 + $0x708] sm:$0xff]  }
  0xd3   : > { %11300 = vmatprep.subr.bf16.mxu1 %v12484_v39  ;;  %v12534_v39 = vld [vmem:[%s13292_s26 + $0x788] sm:$0xff]  }
  0xd4   : > { %11279 = vmatpush3.bf16.msra.mxu0 %v12483_v38  ;;  %v12533_v38 = vld [vmem:[%s13292_s26 + $0x7c8] sm:$0xff]  }
  0xd5   : > { %11280 = vmatprep.subr.bf16.mxu0 %v12486_v41  ;;  %v12536_v41 = vld [vmem:[%s13292_s26 + $0x710] sm:$0xff]  }
  0xd6   : > { %11301 = vmatpush3.bf16.msra.mxu1 %v12485_v40  ;;  %v12535_v40 = vld [vmem:[%s13292_s26 + $0x750] sm:$0xff]  }
  0xd7   : > { %11302 = vmatprep.subr.bf16.mxu1 %v12488_v44  ;;  %v12538_v44 = vld [vmem:[%s13292_s26 + $0x790] sm:$0xff]  }
  0xd8   : > { %11281 = vmatpush3.bf16.msra.mxu0 %v12487_v43  ;;  %v12537_v43 = vld [vmem:[%s13292_s26 + $0x7d0] sm:$0xff]  }
  0xd9   : > { %11282 = vmatprep.subr.bf16.mxu0 %v12490_v46  ;;  %v12540_v46 = vld [vmem:[%s13292_s26 + $0x718] sm:$0xff]  }
  0xda   : > { %11303 = vmatpush3.bf16.msra.mxu1 %v12489_v45  ;;  %v12539_v45 = vld [vmem:[%s13292_s26 + $0x758] sm:$0xff]  }
  0xdb   : > { %11304 = vmatprep.subr.bf16.mxu1 %v12492_v48  ;;  %v12542_v48 = vld [vmem:[%s13292_s26 + $0x798] sm:$0xff]  }
  0xdc   : > { %11283 = vmatpush3.bf16.msra.mxu0 %v12491_v47  ;;  %v12541_v47 = vld [vmem:[%s13292_s26 + $0x7d8] sm:$0xff]  }
  0xdd   : > { %11312 = vmatprep.subr.bf16.mxu0 %v12495_v51  ;;  %v12545_v51 = vld [vmem:[%s13292_s26 + $0x7e0] sm:$0xff]  }
  0xde   : > { %11305 = vmatpush3.bf16.msra.mxu1 %v12494_v49  ;;  %v12543_v49 = vld [vmem:[%s13292_s26 + $0x760] sm:$0xff]  }
  0xdf   : > { %8295 = vmatmul.mubr.bf16.vlgmr.msra.gmra.mrb[20].mxu0 %v2137_v50  ;;  %11334 = vmatprep.subr.bf16.mxu1 %v12497_v53  ;;  %v12544_v50 = vld [vmem:[%s13292_s26 + $0x720] sm:$0xff]   ;;  %v12547_v53 = vld [vmem:[%s13292_s26 + $0x768] sm:$0xff]  }
  0xe0   : > { %11313 = vmatpush3.bf16.msra.mxu0 %v12496_v52  ;;  %8374 = vmatprep.mubr.bf16.mxu0 %v2193_v23  ;;  %v12546_v52 = vld [vmem:[%s13292_s26 + $0x7a0] sm:$0xff]   ;;  %v12569_v23 = vld [vmem:[%s13292_s26 + $0x810] sm:$0xff]  }
  0xe1   : > { %8335 = vmatmul.mubr.bf16.vlgmr.msra.gmra.mrb[20].mxu1 %v2153_v55  ;;  %11314 = vmatprep.subr.bf16.mxu0 %v12499_v56  ;;  %v12549_v55 = vld [vmem:[%s13292_s26 + $0x7e8] sm:$0xff]  }
  0xe2   : > { %11335 = vmatpush3.bf16.msra.mxu1 %v12498_v54  ;;  %8414 = vmatprep.mubr.bf16.mxu1 %v2203_v27  ;;  %v12548_v54 = vld [vmem:[%s13292_s26 + $0x728] sm:$0xff]   ;;  %v12573_v27 = vld [vmem:[%s13292_s26 + $0x818] sm:$0xff]  }
  0xe3   : > { %11336 = vmatprep.subr.bf16.mxu1 %v12501_v58  ;;  %v12550_v56 = vld [vmem:[%s13292_s26 + $0x7a8] sm:$0xff]  }
  0xe4   : > { %11315 = vmatpush3.bf16.msra.mxu0 %v12500_v57  ;;  %v12551_v57 = vld [vmem:[%s13292_s26 + $0x770] sm:$0xff]  }
  0xe5   : > { %11316 = vmatprep.subr.bf16.mxu0 %v12503_v60 }
  0xe6   : > { %11337 = vmatpush3.bf16.msra.mxu1 %v12502_v59  ;;  %v12552_v59 = vld [vmem:[%s13292_s26 + $0x730] sm:$0xff]  }
  0xe7   : > { %11338 = vmatprep.subr.bf16.mxu1 %v12505_v62 }
  0xe8   : > { %11317 = vmatpush3.bf16.msra.mxu0 %v12504_v61  ;;  %v12553_v61 = vld [vmem:[%s13292_s26 + $0x7f0] sm:$0xff]  }
  0xe9   : > { %11318 = vmatprep.subr.bf16.mxu0 %v12507_v0 }
  0xea   : > { %11339 = vmatpush3.bf16.msra.mxu1 %v12506_v63 }
  0xeb   : > { %11340 = vmatprep.subr.bf16.mxu1 %v12509_v2  ;;  %v12555_v2 = vld [vmem:[%s13292_s26 + $0x778] sm:$0xff]  }
  0xec   : > { %11319 = vmatpush3.bf16.msra.mxu0 %v12508_v1  ;;  %v12554_v1 = vld [vmem:[%s13292_s26 + $0x7b0] sm:$0xff]  }
  0xed   : > { %11320 = vmatprep.subr.bf16.mxu0 %v12511_v4 }
  0xee   : > { %11341 = vmatpush3.bf16.msra.mxu1 %v12510_v3 }
  0xef   : > { %11342 = vmatprep.subr.bf16.mxu1 %v12513_v6  ;;  %v12556_v6 = vld [vmem:[%s13292_s26 + $0x738] sm:$0xff]  }
  0xf0   : > { %11321 = vmatpush3.bf16.msra.mxu0 %v12512_v5 }
  0xf1   : > { %11322 = vmatprep.subr.bf16.mxu0 %v12515_v8  ;;  %v12557_v8 = vld [vmem:[%s13292_s26 + $0x7f8] sm:$0xff]  }
  0xf2   : > { %11343 = vmatpush3.bf16.msra.mxu1 %v12514_v7 }
  0xf3   : > { %11344 = vmatprep.subr.bf16.mxu1 %v12517_v10 }
  0xf4   : > { %11323 = vmatpush3.bf16.msra.mxu0 %v12516_v9 }
  0xf5   : > { %11324 = vmatprep.subr.bf16.mxu0 %v12519_v12  ;;  %v2186_v12 = vrot.slane %v13556_v20, %v13330_v42  ;;  %v12566_v20 = vld [vmem:[%s13292_s26 + $0x8c8] sm:$0xff]  }
  0xf6   : > { %11345 = vmatpush3.bf16.msra.mxu1 %v12518_v11  ;;  %v12559_v11 = vld [vmem:[%s13292_s26 + $0x7b8] sm:$0xff]  }
  0xf7   : > { %11346 = vmatprep.subr.bf16.mxu1 %v12521_v17  ;;  %v2202_v17 = vcombine.high %v2186_v12, %v2186_v12 }
  0xf8   : > { %11325 = vmatpush3.bf16.msra.mxu0 %v12520_v14  ;;  %v12561_v14 = vld [vmem:[%s13292_s26 + $0x800] sm:$0xff]  }
  0xf9   : > { %11326 = vmatprep.subr.bf16.mxu0 %v12523_v21  ;;  %v12567_v21 = vld [vmem:[%s13292_s26 + $0x888] sm:$0xff]  }
  0xfa   : > { %11347 = vmatpush3.bf16.msra.mxu1 %v12522_v18  ;;  %v12564_v18 = vld [vmem:[%s13292_s26 + $0x848] sm:$0xff]  }
  0xfb   : > { %11348 = vmatprep.subr.bf16.mxu1 %v12525_v25  ;;  %v12571_v25 = vld [vmem:[%s13292_s26 + $0x890] sm:$0xff]  }
  0xfc   : > { %11327 = vmatpush3.bf16.msra.mxu0 %v12524_v22  ;;  %v12568_v22 = vld [vmem:[%s13292_s26 + $0x850] sm:$0xff]  }
  0xfd   : > { %11356 = vmatprep.subr.bf16.mxu0 %v12527_v29  ;;  %v12575_v29 = vld [vmem:[%s13292_s26 + $0x898] sm:$0xff]  }
  0xfe   : > { %11349 = vmatpush3.bf16.msra.mxu1 %v12526_v26  ;;  %v12572_v26 = vld [vmem:[%s13292_s26 + $0x858] sm:$0xff]  }
  0xff   : > { %8375 = vmatmul.mubr.bf16.vlgmr.msra.gmra.mrb[24].mxu0 %v2179_v28  ;;  %11378 = vmatprep.subr.bf16.mxu1 %v12529_v32  ;;  %v12574_v28 = vld [vmem:[%s13292_s26 + $0x8d8] sm:$0xff]   ;;  %v12578_v32 = vld [vmem:[%s13292_s26 + $0x8e0] sm:$0xff]  }
 0x100   : > { %11357 = vmatpush3.bf16.msra.mxu0 %v12528_v30  ;;  %8454 = vmatprep.mubr.bf16.mxu0 %v2200_v31  ;;  %v12576_v30 = vld [vmem:[%s13292_s26 + $0x860] sm:$0xff]  }
 0x101   : > { %8415 = vmatmul.mubr.bf16.vlgmr.msra.gmra.mrb[24].mxu1 %v2201_v34  ;;  %11358 = vmatprep.subr.bf16.mxu0 %v12531_v35  ;;  %v12577_v31 = vld [vmem:[%s13292_s26 + $0x820] sm:$0xff]   ;;  %v12580_v34 = vld [vmem:[%s13292_s26 + $0x868] sm:$0xff]  }
 0x102   : > { %11379 = vmatpush3.bf16.msra.mxu1 %v12530_v33  ;;  %8494 = vmatprep.mubr.bf16.mxu1 %v2204_v37  ;;  %v12579_v33 = vld [vmem:[%s13292_s26 + $0x8a0] sm:$0xff]   ;;  %v12581_v35 = vld [vmem:[%s13292_s26 + $0x828] sm:$0xff]  }
 0x103   : > { %11380 = vmatprep.subr.bf16.mxu1 %v12533_v38  ;;  %v12583_v37 = vld [vmem:[%s13292_s26 + $0x8a8] sm:$0xff]   ;;  %v12584_v38 = vld [vmem:[%s13292_s26 + $0x870] sm:$0xff]  }
 0x104   : > { %11359 = vmatpush3.bf16.msra.mxu0 %v12532_v36  ;;  %v12582_v36 = vld [vmem:[%s13292_s26 + $0x8e8] sm:$0xff]  }
 0x105   : > { %11360 = vmatprep.subr.bf16.mxu0 %v12535_v40 }
 0x106   : > { %11381 = vmatpush3.bf16.msra.mxu1 %v12534_v39  ;;  %v289_v39 = vld [vmem:[%s13271_s27 + $0x20] sm:$0xff] }
 0x107   : > { %11382 = vmatprep.subr.bf16.mxu1 %v12537_v43  ;;  %v2212_v43 = vrot.slane %v289_v39, %v13330_v42 }
 0x108   : > { %11361 = vmatpush3.bf16.msra.mxu0 %v12536_v41  ;;  %v12585_v41 = vld [vmem:[%s13292_s26 + $0x830] sm:$0xff]  }
 0x109   : > { %11362 = vmatprep.subr.bf16.mxu0 %v12539_v45 }
 0x10a   : > { %11383 = vmatpush3.bf16.msra.mxu1 %v12538_v44  ;;  %v2205_v44 = vcombine.high %v289_v39, %v289_v39  ;;  %v12619_v39 = vld [vmem:[%s13292_s26 + $0x9b0] sm:$0xff]  }
 0x10b   : > { %11384 = vmatprep.subr.bf16.mxu1 %v12541_v47 }
 0x10c   : > { %11363 = vmatpush3.bf16.msra.mxu0 %v12540_v46  ;;  %v12586_v46 = vld [vmem:[%s13292_s26 + $0x8f0] sm:$0xff]  }
 0x10d   : > { %11364 = vmatprep.subr.bf16.mxu0 %v12543_v49 }
 0x10e   : > { %11385 = vmatpush3.bf16.msra.mxu1 %v12542_v48 }
 0x10f   : > { %11386 = vmatprep.subr.bf16.mxu1 %v12545_v51  ;;  %v13633_v51 = vrot.slane %v2205_v44, %v13330_v42 }
 0x110   : > { %11365 = vmatpush3.bf16.msra.mxu0 %v12544_v50  ;;  %v2220_v50 = vcombine.high %v2212_v43, %v2212_v43 }
 0x111   : > { %11366 = vmatprep.subr.bf16.mxu0 %v12547_v53 }
 0x112   : > { %v11064_v58 = vpop.f32.mrb[0].mxu0  ;;  %11387 = vmatpush3.bf16.msra.mxu1 %v12546_v52 }
 0x113   : > { %v11065_v60 = vpop.f32.mrb[1].mxu0  ;;  %11388 = vmatprep.subr.bf16.mxu1 %v12549_v55  ;;  %v11086_v62 = vpop.f32.mrb[0].mxu1  ;;  %v12588_v55 = vld [vmem:[%s13292_s26 + $0x878] sm:$0xff]  }
 0x114   : > { %v11066_v63 = vadd.f32 %v11065_v60, %v11064_v58  ;;  %v11067_v0 = vpop.f32.mrb[2].mxu0  ;;  %11367 = vmatpush3.bf16.msra.mxu0 %v12548_v54  ;;  %v11087_v3 = vpop.f32.mrb[1].mxu1  ;;  %v12587_v54 = vld [vmem:[%s13292_s26 + $0x8b0] sm:$0xff]   ;;  %v12589_v58 = vld [vmem:[%s13292_s26 + $0x838] sm:$0xff]  }
 0x115   : > { %v11068_v4 = vpop.f32.mrb[3].mxu0  ;;  %11368 = vmatprep.subr.bf16.mxu0 %v12551_v57  ;;  %v11088_v5 = vadd.f32 %v11087_v3, %v11086_v62  ;;  %v11089_v7 = vpop.f32.mrb[2].mxu1  ;;  %v12590_v60 = vld [vmem:[%s13292_s26 + $0x8f8] sm:$0xff]   ;;  %v2221_v62 = vcombine.high %v13633_v51, %v13633_v51  ;;  %v2228_v3 = vrot.slane %v2212_v43, %v13330_v42 }
 0x116   : > { %11389 = vmatpush3.bf16.msra.mxu1 %v12550_v56  ;;  %v11090_v9 = vpop.f32.mrb[3].mxu1  ;;  %v12591_v0 = vld [vmem:[%s13292_s26 + $0x8b8] sm:$0xff]   ;;  %v12592_v4 = vld [vmem:[%s13292_s26 + $0x940] sm:$0xff]  }
 0x117   : > { %11390 = vmatprep.subr.bf16.mxu1 %v12553_v61  ;;  %v13598_v10 = vadd.f32 %v11088_v5, %v11066_v63  ;;  %v12593_v5 = vld [vmem:[%s13292_s26 + $0x900] sm:$0xff]   ;;  %v2250_v9 = vcombine.high %v2228_v3, %v2228_v3 }
 0x118   : > { %11369 = vmatpush3.bf16.msra.mxu0 %v12552_v59  ;;  %v2242_v59 = vrot.slane %v2220_v50, %v13330_v42  ;;  %v12594_v7 = vld [vmem:[%s13292_s26 + $0x9c0] sm:$0xff]  }
 0x119   : > { %11370 = vmatprep.subr.bf16.mxu0 %v12555_v2 }
 0x11a   : > { %11391 = vmatpush3.bf16.msra.mxu1 %v12554_v1  ;;  %v2252_v1 = vcombine.high %v2242_v59, %v2242_v59 }
 0x11b   : > { %11392 = vmatprep.subr.bf16.mxu1 %v12557_v8  ;;  %v12595_v8 = vld [vmem:[%s13292_s26 + $0x980] sm:$0xff]  }
 0x11c   : > { %11371 = vmatpush3.bf16.msra.mxu0 %v12556_v6  ;;  %v2249_v6 = vrot.slane %v2221_v62, %v13330_v42  ;;  %v12633_v62 = vld [vmem:[%s13292_s26 + $0xa50] sm:$0xff]  }
 0x11d   : > { %11400 = vmatprep.subr.bf16.mxu0 %v12560_v13  ;;  %v12598_v13 = vld [vmem:[%s13292_s26 + $0x9c8] sm:$0xff]  }
 0x11e   : > { %11393 = vmatpush3.bf16.msra.mxu1 %v12559_v11  ;;  %v12597_v11 = vld [vmem:[%s13292_s26 + $0x908] sm:$0xff]  }
 0x11f   : > { %8455 = vmatmul.mubr.bf16.vlgmr.msra.gmra.mrb[28].mxu0 %v2186_v12  ;;  %11422 = vmatprep.subr.bf16.mxu1 %v12562_v15  ;;  %v2253_v12 = vcombine.high %v2249_v6, %v2249_v6  ;;  %v12600_v15 = vld [vmem:[%s13292_s26 + $0x950] sm:$0xff]  }
 0x120   : > { %11401 = vmatpush3.bf16.msra.mxu0 %v12561_v14  ;;  %8534 = vmatprep.mubr.bf16.mxu0 %v2242_v59  ;;  %v12599_v14 = vld [vmem:[%s13292_s26 + $0x988] sm:$0xff]  }
 0x121   : > { %8495 = vmatmul.mubr.bf16.vlgmr.msra.gmra.mrb[28].mxu1 %v2202_v17  ;;  %11402 = vmatprep.subr.bf16.mxu0 %v12564_v18  ;;  %v12602_v17 = vld [vmem:[%s13292_s26 + $0x9d0] sm:$0xff]   ;;  %v12629_v59 = vld [vmem:[%s13292_s26 + $0xa48] sm:$0xff]  }
 0x122   : > { %11423 = vmatpush3.bf16.msra.mxu1 %v12563_v16  ;;  %8574 = vmatprep.mubr.bf16.mxu1 %v2252_v1  ;;  %v12601_v16 = vld [vmem:[%s13292_s26 + $0x910] sm:$0xff]  }
 0x123   : > { %11424 = vmatprep.subr.bf16.mxu1 %v12566_v20  ;;  %v12603_v18 = vld [vmem:[%s13292_s26 + $0x990] sm:$0xff]   ;;  %v12605_v20 = vld [vmem:[%s13292_s26 + $0x918] sm:$0xff]  }
 0x124   : > { %11403 = vmatpush3.bf16.msra.mxu0 %v12565_v19  ;;  %v12604_v19 = vld [vmem:[%s13292_s26 + $0x958] sm:$0xff]   ;;  %v12636_v1 = vld [vmem:[%s13292_s26 + $0xa90] sm:$0xff]  }
 0x125   : > { %11404 = vmatprep.subr.bf16.mxu0 %v12568_v22  ;;  %v12607_v22 = vld [vmem:[%s13292_s26 + $0x998] sm:$0xff]  }
 0x126   : > { %11425 = vmatpush3.bf16.msra.mxu1 %v12567_v21  ;;  %v12606_v21 = vld [vmem:[%s13292_s26 + $0x9d8] sm:$0xff]  }
 0x127   : > { %11426 = vmatprep.subr.bf16.mxu1 %v12570_v24  ;;  %v12609_v24 = vld [vmem:[%s13292_s26 + $0x920] sm:$0xff]  }
 0x128   : > { %11405 = vmatpush3.bf16.msra.mxu0 %v12569_v23  ;;  %v12608_v23 = vld [vmem:[%s13292_s26 + $0x960] sm:$0xff]  }
 0x129   : > { %11406 = vmatprep.subr.bf16.mxu0 %v12572_v26  ;;  %v12611_v26 = vld [vmem:[%s13292_s26 + $0x9a0] sm:$0xff]  }
 0x12a   : > { %11427 = vmatpush3.bf16.msra.mxu1 %v12571_v25  ;;  %v12610_v25 = vld [vmem:[%s13292_s26 + $0x9e0] sm:$0xff]  }
 0x12b   : > { %11428 = vmatprep.subr.bf16.mxu1 %v12574_v28  ;;  %v12613_v28 = vld [vmem:[%s13292_s26 + $0x928] sm:$0xff]  }
 0x12c   : > { %11407 = vmatpush3.bf16.msra.mxu0 %v12573_v27  ;;  %v12612_v27 = vld [vmem:[%s13292_s26 + $0x968] sm:$0xff]  }
 0x12d   : > { %11408 = vmatprep.subr.bf16.mxu0 %v12576_v30  ;;  %v12615_v30 = vld [vmem:[%s13292_s26 + $0x9a8] sm:$0xff]  }
 0x12e   : > { %11429 = vmatpush3.bf16.msra.mxu1 %v12575_v29  ;;  %v12614_v29 = vld [vmem:[%s13292_s26 + $0x9e8] sm:$0xff]  }
 0x12f   : > { %11430 = vmatprep.subr.bf16.mxu1 %v12578_v32 }
 0x130   : > { %11409 = vmatpush3.bf16.msra.mxu0 %v12577_v31  ;;  %v12616_v31 = vld [vmem:[%s13292_s26 + $0x970] sm:$0xff]  }
 0x131   : > { %11410 = vmatprep.subr.bf16.mxu0 %v12580_v34 }
 0x132   : > { %v11108_v40 = vpop.f32.mrb[4].mxu0  ;;  %11431 = vmatpush3.bf16.msra.mxu1 %v12579_v33  ;;  %v12617_v33 = vld [vmem:[%s13292_s26 + $0x930] sm:$0xff]  }
 0x133   : > { %v11109_v45 = vpop.f32.mrb[5].mxu0  ;;  %11432 = vmatprep.subr.bf16.mxu1 %v12582_v36  ;;  %v11130_v49 = vpop.f32.mrb[4].mxu1 }
 0x134   : > { %v11110_v47 = vadd.f32 %v11109_v45, %v11108_v40  ;;  %v11111_v48 = vpop.f32.mrb[6].mxu0  ;;  %11411 = vmatpush3.bf16.msra.mxu0 %v12581_v35  ;;  %v11131_v53 = vpop.f32.mrb[5].mxu1  ;;  %v12618_v35 = vld [vmem:[%s13292_s26 + $0x9f0] sm:$0xff]   ;;  %v12620_v40 = vld [vmem:[%s13292_s26 + $0x978] sm:$0xff]  }
 0x135   : > { %v11112_v52 = vpop.f32.mrb[7].mxu0  ;;  %11412 = vmatprep.subr.bf16.mxu0 %v12584_v38  ;;  %v11132_v57 = vadd.f32 %v11131_v53, %v11130_v49  ;;  %v11133_v61 = vpop.f32.mrb[6].mxu1  ;;  %v12622_v48 = vld [vmem:[%s13292_s26 + $0x9f8] sm:$0xff]   ;;  %v2235_v53 = vrot.slane %v13633_v51, %v13330_v42  ;;  %v12631_v51 = vld [vmem:[%s13292_s26 + $0xac8] sm:$0xff]  }
 0x136   : > { %v7977_v56 = vadd.f32 %v11110_v47, %v13598_v10  ;;  %11433 = vmatpush3.bf16.msra.mxu1 %v12583_v37  ;;  %v11134_v2 = vpop.f32.mrb[7].mxu1  ;;  %v12596_v10 = vld [vmem:[%s13292_s26 + $0x948] sm:$0xff]   ;;  %v12624_v52 = vld [vmem:[%s13292_s26 + $0x9b8] sm:$0xff]  }
 0x137   : > { %11434 = vmatprep.subr.bf16.mxu1 %v12586_v46  ;;  %v12621_v46 = vld [vmem:[%s13292_s26 + $0x938] sm:$0xff]   ;;  %v12632_v61 = vld [vmem:[%s13292_s26 + $0xa88] sm:$0xff]  }
 0x138   : > { %v13643_v63 = vadd.f32 %v11132_v57, %v7977_v56  ;;  %11413 = vmatpush3.bf16.msra.mxu0 %v12585_v41  ;;  %v12627_v56 = vld [vmem:[%s13292_s26 + $0xac0] sm:$0xff]   ;;  %v12637_v2 = vld [vmem:[%s13292_s26 + $0xa58] sm:$0xff]  }
 0x139   : > { %11414 = vmatprep.subr.bf16.mxu0 %v12588_v55  ;;  %v12626_v55 = vld [vmem:[%s13292_s26 + $0xa00] sm:$0xff]  }
 0x13a   : > { %11435 = vmatpush3.bf16.msra.mxu1 %v12587_v54  ;;  %v12625_v54 = vld [vmem:[%s13292_s26 + $0xa40] sm:$0xff]  }
 0x13b   : > { %11436 = vmatprep.subr.bf16.mxu1 %v12590_v60  ;;  %v12628_v57 = vld [vmem:[%s13292_s26 + $0xa80] sm:$0xff]   ;;  %v12630_v60 = vld [vmem:[%s13292_s26 + $0xa08] sm:$0xff]  }
 0x13c   : > { %11415 = vmatpush3.bf16.msra.mxu0 %v12589_v58  ;;  %v2251_v58 = vcombine.high %v2235_v53, %v2235_v53 }
 0x13d   : > { %11444 = vmatprep.subr.bf16.mxu0 %v12592_v4  ;;  %v12639_v4 = vld [vmem:[%s13292_s26 + $0xad8] sm:$0xff]  }
 0x13e   : > { %11437 = vmatpush3.bf16.msra.mxu1 %v12591_v0  ;;  %v12635_v0 = vld [vmem:[%s13292_s26 + $0xad0] sm:$0xff]  }
 0x13f   : > { %8535 = vmatmul.mubr.bf16.vlgmr.msra.gmra.mrb[32].mxu0 %v2228_v3  ;;  %11466 = vmatprep.subr.bf16.mxu1 %v12594_v7  ;;  %v12638_v3 = vld [vmem:[%s13292_s26 + $0xa18] sm:$0xff]   ;;  %v12642_v7 = vld [vmem:[%s13292_s26 + $0xa20] sm:$0xff]  }
 0x140   : > { %11445 = vmatpush3.bf16.msra.mxu0 %v12593_v5  ;;  %8614 = vmatprep.mubr.bf16.mxu0 %v2249_v6  ;;  %v12640_v5 = vld [vmem:[%s13292_s26 + $0xa98] sm:$0xff]   ;;  %v12641_v6 = vld [vmem:[%s13292_s26 + $0xa60] sm:$0xff]  }
 0x141   : > { %8575 = vmatmul.mubr.bf16.vlgmr.msra.gmra.mrb[32].mxu1 %v2250_v9  ;;  %11446 = vmatprep.subr.bf16.mxu0 %v12596_v10  ;;  %v12644_v9 = vld [vmem:[%s13292_s26 + $0xaa0] sm:$0xff]   ;;  %v12645_v10 = vld [vmem:[%s13292_s26 + $0xa68] sm:$0xff]  }
 0x142   : > { %11467 = vmatpush3.bf16.msra.mxu1 %v12595_v8  ;;  %8654 = vmatprep.mubr.bf16.mxu1 %v2253_v12  ;;  %v12643_v8 = vld [vmem:[%s13292_s26 + $0xae0] sm:$0xff]   ;;  %v12647_v12 = vld [vmem:[%s13292_s26 + $0xae8] sm:$0xff]  }
 0x143   : > { %11468 = vmatprep.subr.bf16.mxu1 %v12598_v13  ;;  %v12648_v13 = vld [vmem:[%s13292_s26 + $0xaa8] sm:$0xff]  }
 0x144   : > { %11447 = vmatpush3.bf16.msra.mxu0 %v12597_v11  ;;  %v12646_v11 = vld [vmem:[%s13292_s26 + $0xa28] sm:$0xff]  }
 0x145   : > { %11448 = vmatprep.subr.bf16.mxu0 %v12600_v15 }
 0x146   : > { %11469 = vmatpush3.bf16.msra.mxu1 %v12599_v14  ;;  %v12649_v14 = vld [vmem:[%s13292_s26 + $0xa70] sm:$0xff]  }
 0x147   : > { %11470 = vmatprep.subr.bf16.mxu1 %v12602_v17  ;;  %v290_v17 = vld [vmem:[%s13271_s27 + $0x28] sm:$0xff] }
 0x148   : > { %11449 = vmatpush3.bf16.msra.mxu0 %v12601_v16  ;;  %v12650_v16 = vld [vmem:[%s13292_s26 + $0xa30] sm:$0xff]  }
 0x149   : > { %11450 = vmatprep.subr.bf16.mxu0 %v12604_v19  ;;  %v12651_v19 = vld [vmem:[%s13292_s26 + $0xaf0] sm:$0xff]  }
 0x14a   : > { %11471 = vmatpush3.bf16.msra.mxu1 %v12603_v18 }
 0x14b   : > { %11472 = vmatprep.subr.bf16.mxu1 %v12606_v21  ;;  %v2254_v21 = vcombine.high %v290_v17, %v290_v17 }
 0x14c   : > { %11451 = vmatpush3.bf16.msra.mxu0 %v12605_v20  ;;  %v2261_v20 = vrot.slane %v290_v17, %v13330_v42 }
 0x14d   : > { %11452 = vmatprep.subr.bf16.mxu0 %v12608_v23 }
 0x14e   : > { %11473 = vmatpush3.bf16.msra.mxu1 %v12607_v22 }
 0x14f   : > { %11474 = vmatprep.subr.bf16.mxu1 %v12610_v25 }
 0x150   : > { %11453 = vmatpush3.bf16.msra.mxu0 %v12609_v24 }
 0x151   : > { %11454 = vmatprep.subr.bf16.mxu0 %v12612_v27  ;;  %v12652_v27 = vld [vmem:[%s13292_s26 + $0xab0] sm:$0xff]  }
 0x152   : > { %v11152_v32 = vpop.f32.mrb[8].mxu0  ;;  %11475 = vmatpush3.bf16.msra.mxu1 %v12611_v26 }
 0x153   : > { %v11153_v34 = vpop.f32.mrb[9].mxu0  ;;  %11476 = vmatprep.subr.bf16.mxu1 %v12614_v29  ;;  %v2269_v29 = vcombine.high %v2261_v20, %v2261_v20 }
 0x154   : > { %v11154_v36 = vadd.f32 %v11153_v34, %v11152_v32  ;;  %v11155_v37 = vpop.f32.mrb[10].mxu0  ;;  %v11174_v38 = vpop.f32.mrb[8].mxu1  ;;  %11455 = vmatpush3.bf16.msra.mxu0 %v12613_v28  ;;  %v12653_v28 = vld [vmem:[%s13292_s26 + $0xa78] sm:$0xff]  }
 0x155   : > { %v11156_v41 = vpop.f32.mrb[11].mxu0  ;;  %v11175_v43 = vpop.f32.mrb[9].mxu1  ;;  %11456 = vmatprep.subr.bf16.mxu0 %v12616_v31  ;;  %v12655_v34 = vld [vmem:[%s13292_s26 + $0xaf8] sm:$0xff]  }
 0x156   : > { %v8057_v44 = vadd.f32 %v11154_v36, %v13643_v63  ;;  %v11176_v45 = vadd.f32 %v11175_v43, %v11174_v38  ;;  %11477 = vmatpush3.bf16.msra.mxu1 %v12615_v30  ;;  %v11177_v47 = vpop.f32.mrb[10].mxu1  ;;  %v12634_v63 = vld [vmem:[%s13292_s26 + $0xa10] sm:$0xff]   ;;  %v13717_v30 = vrot.slane %v2254_v21, %v13330_v42  ;;  %v2277_v41 = vrot.slane %v2261_v20, %v13330_v42  ;;  %v12657_v43 = vld [vmem:[%s13292_s26 + $0xb40] sm:$0xff]   ;;  %v12686_v21 = vld [vmem:[%s13292_s26 + $0xb38] sm:$0xff]  }
 0x157   : > { %11478 = vmatprep.subr.bf16.mxu1 %v12618_v35  ;;  %v11178_v49 = vpop.f32.mrb[11].mxu1  ;;  %v2291_v35 = vrot.slane %v2269_v29, %v13330_v42  ;;  %v12659_v47 = vld [vmem:[%s13292_s26 + $0xbc0] sm:$0xff]  }
 0x158   : > { %v13680_v50 = vadd.f32 %v11176_v45, %v8057_v44  ;;  %11457 = vmatpush3.bf16.msra.mxu0 %v12617_v33  ;;  %v12654_v33 = vld [vmem:[%s13292_s26 + $0xa38] sm:$0xff]   ;;  %v2270_v37 = vcombine.high %v13717_v30, %v13717_v30  ;;  %v12658_v45 = vld [vmem:[%s13292_s26 + $0xb00] sm:$0xff]   ;;  %v2299_v49 = vcombine.high %v2277_v41, %v2277_v41 }
 0x159   : > { %11458 = vmatprep.subr.bf16.mxu0 %v12620_v40  ;;  %v2301_v44 = vcombine.high %v2291_v35, %v2291_v35  ;;  %v12691_v29 = vld [vmem:[%s13292_s26 + $0xc00] sm:$0xff]  }
 0x15a   : > { %11479 = vmatpush3.bf16.msra.mxu1 %v12619_v39  ;;  %v12656_v39 = vld [vmem:[%s13292_s26 + $0xab8] sm:$0xff]  }
 0x15b   : > { %11480 = vmatprep.subr.bf16.mxu1 %v12622_v48  ;;  %v12660_v48 = vld [vmem:[%s13292_s26 + $0xb80] sm:$0xff]  }
 0x15c   : > { %11459 = vmatpush3.bf16.msra.mxu0 %v12621_v46  ;;  %v2298_v46 = vrot.slane %v2270_v37, %v13330_v42  ;;  %v12698_v37 = vld [vmem:[%s13292_s26 + $0xc50] sm:$0xff]  }
 0x15d   : > { %11488 = vmatprep.subr.bf16.mxu0 %v12625_v54  ;;  %v12663_v54 = vld [vmem:[%s13292_s26 + $0xbc8] sm:$0xff]  }
 0x15e   : > { %11481 = vmatpush3.bf16.msra.mxu1 %v12624_v52  ;;  %v12662_v52 = vld [vmem:[%s13292_s26 + $0xb08] sm:$0xff]  }
 0x15f   : > { %8615 = vmatmul.mubr.bf16.vlgmr.msra.gmra.mrb[36].mxu0 %v2235_v53  ;;  %11510 = vmatprep.subr.bf16.mxu1 %v12627_v56  ;;  %v2302_v53 = vcombine.high %v2298_v46, %v2298_v46  ;;  %v12665_v56 = vld [vmem:[%s13292_s26 + $0xb50] sm:$0xff]  }
 0x160   : > { %11489 = vmatpush3.bf16.msra.mxu0 %v12626_v55  ;;  %8694 = vmatprep.mubr.bf16.mxu0 %v2291_v35  ;;  %v12664_v55 = vld [vmem:[%s13292_s26 + $0xb88] sm:$0xff]  }
 0x161   : > { %8655 = vmatmul.mubr.bf16.vlgmr.msra.gmra.mrb[36].mxu1 %v2251_v58  ;;  %11490 = vmatprep.subr.bf16.mxu0 %v12629_v59  ;;  %v12667_v58 = vld [vmem:[%s13292_s26 + $0xbd0] sm:$0xff]   ;;  %v12695_v35 = vld [vmem:[%s13292_s26 + $0xc08] sm:$0xff]  }
 0x162   : > { %11511 = vmatpush3.bf16.msra.mxu1 %v12628_v57  ;;  %8734 = vmatprep.mubr.bf16.mxu1 %v2301_v44  ;;  %v12666_v57 = vld [vmem:[%s13292_s26 + $0xb10] sm:$0xff]   ;;  %v12704_v44 = vld [vmem:[%s13292_s26 + $0xcd8] sm:$0xff]  }
 0x163   : > { %11512 = vmatprep.subr.bf16.mxu1 %v12631_v51  ;;  %v12668_v59 = vld [vmem:[%s13292_s26 + $0xb90] sm:$0xff]   ;;  %v12670_v51 = vld [vmem:[%s13292_s26 + $0xb18] sm:$0xff]  }
 0x164   : > { %11491 = vmatpush3.bf16.msra.mxu0 %v12630_v60  ;;  %v12669_v60 = vld [vmem:[%s13292_s26 + $0xb58] sm:$0xff]  }
 0x165   : > { %11492 = vmatprep.subr.bf16.mxu0 %v12633_v62  ;;  %v12672_v62 = vld [vmem:[%s13292_s26 + $0xb98] sm:$0xff]  }
 0x166   : > { %11513 = vmatpush3.bf16.msra.mxu1 %v12632_v61  ;;  %v12671_v61 = vld [vmem:[%s13292_s26 + $0xbd8] sm:$0xff]  }
 0x167   : > { %11514 = vmatprep.subr.bf16.mxu1 %v12635_v0  ;;  %v12674_v0 = vld [vmem:[%s13292_s26 + $0xb20] sm:$0xff]  }
 0x168   : > { %11493 = vmatpush3.bf16.msra.mxu0 %v12634_v63  ;;  %v12673_v63 = vld [vmem:[%s13292_s26 + $0xb60] sm:$0xff]  }
 0x169   : > { %11494 = vmatprep.subr.bf16.mxu0 %v12637_v2  ;;  %v12676_v2 = vld [vmem:[%s13292_s26 + $0xba0] sm:$0xff]  }
 0x16a   : > { %11515 = vmatpush3.bf16.msra.mxu1 %v12636_v1  ;;  %v12675_v1 = vld [vmem:[%s13292_s26 + $0xbe0] sm:$0xff]  }
 0x16b   : > { %11516 = vmatprep.subr.bf16.mxu1 %v12639_v4  ;;  %v12678_v4 = vld [vmem:[%s13292_s26 + $0xb28] sm:$0xff]  }
 0x16c   : > { %11495 = vmatpush3.bf16.msra.mxu0 %v12638_v3  ;;  %v12677_v3 = vld [vmem:[%s13292_s26 + $0xb68] sm:$0xff]  }
 0x16d   : > { %11496 = vmatprep.subr.bf16.mxu0 %v12641_v6  ;;  %v12680_v6 = vld [vmem:[%s13292_s26 + $0xba8] sm:$0xff]  }
 0x16e   : > { %11517 = vmatpush3.bf16.msra.mxu1 %v12640_v5  ;;  %v12679_v5 = vld [vmem:[%s13292_s26 + $0xbe8] sm:$0xff]  }
 0x16f   : > { %11518 = vmatprep.subr.bf16.mxu1 %v12643_v8 }
 0x170   : > { %11497 = vmatpush3.bf16.msra.mxu0 %v12642_v7  ;;  %v12681_v7 = vld [vmem:[%s13292_s26 + $0xb70] sm:$0xff]  }
 0x171   : > { %11498 = vmatprep.subr.bf16.mxu0 %v12645_v10 }
 0x172   : > { %v11196_v15 = vpop.f32.mrb[12].mxu0  ;;  %11519 = vmatpush3.bf16.msra.mxu1 %v12644_v9  ;;  %v12682_v9 = vld [vmem:[%s13292_s26 + $0xb30] sm:$0xff]  }
 0x173   : > { %v11197_v18 = vpop.f32.mrb[13].mxu0  ;;  %11520 = vmatprep.subr.bf16.mxu1 %v12647_v12 }
 0x174   : > { %v11198_v22 = vadd.f32 %v11197_v18, %v11196_v15  ;;  %v11199_v23 = vpop.f32.mrb[14].mxu0  ;;  %v11218_v24 = vpop.f32.mrb[12].mxu1  ;;  %11499 = vmatpush3.bf16.msra.mxu0 %v12646_v11  ;;  %v12683_v11 = vld [vmem:[%s13292_s26 + $0xbf0] sm:$0xff]  }
 0x175   : > { %v11200_v25 = vpop.f32.mrb[15].mxu0  ;;  %v11219_v26 = vpop.f32.mrb[13].mxu1  ;;  %11500 = vmatprep.subr.bf16.mxu0 %v12649_v14  ;;  %v12684_v15 = vld [vmem:[%s13292_s26 + $0xbb0] sm:$0xff]   ;;  %v12687_v23 = vld [vmem:[%s13292_s26 + $0xbf8] sm:$0xff]  }
 0x176   : > { %v8137_v31 = vadd.f32 %v11198_v22, %v13680_v50  ;;  %v11220_v32 = vadd.f32 %v11219_v26, %v11218_v24  ;;  %11521 = vmatpush3.bf16.msra.mxu1 %v12648_v13  ;;  %v11221_v36 = vpop.f32.mrb[14].mxu1  ;;  %v12661_v50 = vld [vmem:[%s13292_s26 + $0xb48] sm:$0xff]   ;;  %v12689_v26 = vld [vmem:[%s13292_s26 + $0xbb8] sm:$0xff]  }
 0x177   : > { %11522 = vmatprep.subr.bf16.mxu1 %v12651_v19  ;;  %v11222_v40 = vpop.f32.mrb[15].mxu1  ;;  %v12697_v36 = vld [vmem:[%s13292_s26 + $0xc88] sm:$0xff]  }
 0x178   : > { %v13725_v38 = vadd.f32 %v11220_v32, %v8137_v31  ;;  %11501 = vmatpush3.bf16.msra.mxu0 %v12650_v16  ;;  %v12685_v16 = vld [vmem:[%s13292_s26 + $0xb78] sm:$0xff]   ;;  %v12692_v31 = vld [vmem:[%s13292_s26 + $0xcc0] sm:$0xff]   ;;  %v12701_v40 = vld [vmem:[%s13292_s26 + $0xc90] sm:$0xff]  }
 0x179   : > { %11502 = vmatprep.subr.bf16.mxu0 %v12653_v28  ;;  %v12690_v28 = vld [vmem:[%s13292_s26 + $0xc40] sm:$0xff]  }
 0x17a   : > { %11523 = vmatpush3.bf16.msra.mxu1 %v12652_v27  ;;  %v2284_v27 = vrot.slane %v13717_v30, %v13330_v42  ;;  %v12693_v32 = vld [vmem:[%s13292_s26 + $0xc80] sm:$0xff]   ;;  %v12696_v30 = vld [vmem:[%s13292_s26 + $0xcc8] sm:$0xff]  }
 0x17b   : > { %11524 = vmatprep.subr.bf16.mxu1 %v12655_v34  ;;  %v12694_v34 = vld [vmem:[%s13292_s26 + $0xc48] sm:$0xff]  }
 0x17c   : > { %11503 = vmatpush3.bf16.msra.mxu0 %v12654_v33  ;;  %v2300_v33 = vcombine.high %v2284_v27, %v2284_v27 }
 0x17d   : > { %11532 = vmatprep.subr.bf16.mxu0 %v12657_v43  ;;  %v12703_v43 = vld [vmem:[%s13292_s26 + $0xc18] sm:$0xff]  }
 0x17e   : > { %11525 = vmatpush3.bf16.msra.mxu1 %v12656_v39  ;;  %v12700_v39 = vld [vmem:[%s13292_s26 + $0xcd0] sm:$0xff]  }
 0x17f   : > { %8695 = vmatmul.mubr.bf16.vlgmr.msra.gmra.mrb[40].mxu0 %v2277_v41  ;;  %11554 = vmatprep.subr.bf16.mxu1 %v12659_v47  ;;  %v12702_v41 = vld [vmem:[%s13292_s26 + $0xc58] sm:$0xff]   ;;  %v12707_v47 = vld [vmem:[%s13292_s26 + $0xc20] sm:$0xff]  }
 0x180   : > { %11533 = vmatpush3.bf16.msra.mxu0 %v12658_v45  ;;  %8774 = vmatprep.mubr.bf16.mxu0 %v2298_v46  ;;  %v12705_v45 = vld [vmem:[%s13292_s26 + $0xc98] sm:$0xff]   ;;  %v12706_v46 = vld [vmem:[%s13292_s26 + $0xc60] sm:$0xff]  }
 0x181   : > { %8735 = vmatmul.mubr.bf16.vlgmr.msra.gmra.mrb[40].mxu1 %v2299_v49  ;;  %11534 = vmatprep.subr.bf16.mxu0 %v12661_v50  ;;  %v12709_v49 = vld [vmem:[%s13292_s26 + $0xca0] sm:$0xff]   ;;  %v12710_v50 = vld [vmem:[%s13292_s26 + $0xc68] sm:$0xff]  }
 0x182   : > { %11555 = vmatpush3.bf16.msra.mxu1 %v12660_v48  ;;  %8814 = vmatprep.mubr.bf16.mxu1 %v2302_v53  ;;  %v12708_v48 = vld [vmem:[%s13292_s26 + $0xce0] sm:$0xff]   ;;  %v12712_v53 = vld [vmem:[%s13292_s26 + $0xce8] sm:$0xff]  }
 0x183   : > { %11556 = vmatprep.subr.bf16.mxu1 %v12663_v54  ;;  %v12713_v54 = vld [vmem:[%s13292_s26 + $0xca8] sm:$0xff]  }
 0x184   : > { %11535 = vmatpush3.bf16.msra.mxu0 %v12662_v52  ;;  %v12711_v52 = vld [vmem:[%s13292_s26 + $0xc28] sm:$0xff]  }
 0x185   : > { %11536 = vmatprep.subr.bf16.mxu0 %v12665_v56 }
 0x186   : > { %11557 = vmatpush3.bf16.msra.mxu1 %v12664_v55  ;;  %v12714_v55 = vld [vmem:[%s13292_s26 + $0xc70] sm:$0xff]  }
 0x187   : > { %11558 = vmatprep.subr.bf16.mxu1 %v12667_v58 }
 0x188   : > { %11537 = vmatpush3.bf16.msra.mxu0 %v12666_v57  ;;  %v12715_v57 = vld [vmem:[%s13292_s26 + $0xc30] sm:$0xff]  }
 0x189   : > { %11538 = vmatprep.subr.bf16.mxu0 %v12669_v60  ;;  %v291_v60 = vld [vmem:[%s13271_s27 + $0x30] sm:$0xff] }
 0x18a   : > { %11559 = vmatpush3.bf16.msra.mxu1 %v12668_v59  ;;  %v12716_v59 = vld [vmem:[%s13292_s26 + $0xcf0] sm:$0xff]  }
 0x18b   : > { %11560 = vmatprep.subr.bf16.mxu1 %v12671_v61 }
 0x18c   : > { %11539 = vmatpush3.bf16.msra.mxu0 %v12670_v51 }
 0x18d   : > { %11540 = vmatprep.subr.bf16.mxu0 %v12673_v63  ;;  %v2310_v63 = vrot.slane %v291_v60, %v13330_v42 }
 0x18e   : > { %11561 = vmatpush3.bf16.msra.mxu1 %v12672_v62 }
 0x18f   : > { %11562 = vmatprep.subr.bf16.mxu1 %v12675_v1 }
 0x190   : > { %11541 = vmatpush3.bf16.msra.mxu0 %v12674_v0  ;;  %v2303_v0 = vcombine.high %v291_v60, %v291_v60 }
 0x191   : > { %11542 = vmatprep.subr.bf16.mxu0 %v12677_v3  ;;  %v12717_v3 = vld [vmem:[%s13292_s26 + $0xcb0] sm:$0xff]  }
 0x192   : > { %v11240_v8 = vpop.f32.mrb[16].mxu0  ;;  %11563 = vmatpush3.bf16.msra.mxu1 %v12676_v2 }
 0x193   : > { %v11241_v10 = vpop.f32.mrb[17].mxu0  ;;  %11564 = vmatprep.subr.bf16.mxu1 %v12679_v5 }
 0x194   : > { %v11242_v12 = vadd.f32 %v11241_v10, %v11240_v8  ;;  %v11243_v13 = vpop.f32.mrb[18].mxu0  ;;  %v11262_v14 = vpop.f32.mrb[16].mxu1  ;;  %11543 = vmatpush3.bf16.msra.mxu0 %v12678_v4  ;;  %v12718_v4 = vld [vmem:[%s13292_s26 + $0xc78] sm:$0xff]   ;;  %v2318_v8 = vcombine.high %v2310_v63, %v2310_v63 }
 0x195   : > { %v11244_v17 = vpop.f32.mrb[19].mxu0  ;;  %v11263_v18 = vpop.f32.mrb[17].mxu1  ;;  %11544 = vmatprep.subr.bf16.mxu0 %v12681_v7  ;;  %v12719_v7 = vld [vmem:[%s13292_s26 + $0xc38] sm:$0xff]  }
 0x196   : > { %v8217_v19 = vadd.f32 %v11242_v12, %v13725_v38  ;;  %v11264_v20 = vadd.f32 %v11263_v18, %v11262_v14  ;;  %11565 = vmatpush3.bf16.msra.mxu1 %v12680_v6  ;;  %v11265_v22 = vpop.f32.mrb[18].mxu1  ;;  %v12699_v38 = vld [vmem:[%s13292_s26 + $0xc10] sm:$0xff]   ;;  %v2340_v13 = vrot.slane %v2318_v8, %v13330_v42  ;;  %v12721_v14 = vld [vmem:[%s13292_s26 + $0xcb8] sm:$0xff]   ;;  %v12722_v17 = vld [vmem:[%s13292_s26 + $0xd40] sm:$0xff]  }
 0x197   : > { %11566 = vmatprep.subr.bf16.mxu1 %v12683_v11  ;;  %v11266_v24 = vpop.f32.mrb[19].mxu1  ;;  %v13802_v11 = vrot.slane %v2303_v0, %v13330_v42 }
 0x198   : > { %v13762_v25 = vadd.f32 %v11264_v20, %v8217_v19  ;;  %11545 = vmatpush3.bf16.msra.mxu0 %v12682_v9  ;;  %v12720_v9 = vld [vmem:[%s13292_s26 + $0xcf8] sm:$0xff]   ;;  %v2350_v19 = vcombine.high %v2340_v13, %v2340_v13  ;;  %v12723_v20 = vld [vmem:[%s13292_s26 + $0xd00] sm:$0xff]  }
 0x199   : > { %11546 = vmatprep.subr.bf16.mxu0 %v12685_v16  ;;  %v2326_v16 = vrot.slane %v2310_v63, %v13330_v42  ;;  %v2319_v18 = vcombine.high %v13802_v11, %v13802_v11  ;;  %v12752_v63 = vld [vmem:[%s13292_s26 + $0xdf8] sm:$0xff]  }
 0x19a   : > { %11567 = vmatpush3.bf16.msra.mxu1 %v12684_v15 }
 0x19b   : > { %11568 = vmatprep.subr.bf16.mxu1 %v12687_v23  ;;  %v2347_v22 = vrot.slane %v2319_v18, %v13330_v42  ;;  %v12725_v23 = vld [vmem:[%s13292_s26 + $0xd80] sm:$0xff]   ;;  %v2348_v24 = vcombine.high %v2326_v16, %v2326_v16  ;;  %v12768_v18 = vld [vmem:[%s13292_s26 + $0xe18] sm:$0xff]  }
 0x19c   : > { %11547 = vmatpush3.bf16.msra.mxu0 %v12686_v21  ;;  %v12724_v21 = vld [vmem:[%s13292_s26 + $0xdc0] sm:$0xff]  }
 0x19d   : > { %11576 = vmatprep.subr.bf16.mxu0 %v12690_v28  ;;  %v12728_v28 = vld [vmem:[%s13292_s26 + $0xdc8] sm:$0xff]  }
 0x19e   : > { %11569 = vmatpush3.bf16.msra.mxu1 %v12689_v26  ;;  %v12727_v26 = vld [vmem:[%s13292_s26 + $0xd08] sm:$0xff]  }
 0x19f   : > { %8775 = vmatmul.mubr.bf16.vlgmr.msra.gmra.mrb[44].mxu0 %v2284_v27  ;;  %11598 = vmatprep.subr.bf16.mxu1 %v12692_v31  ;;  %v2351_v27 = vcombine.high %v2347_v22, %v2347_v22  ;;  %v12730_v31 = vld [vmem:[%s13292_s26 + $0xd50] sm:$0xff]  }
 0x1a0   : > { %11577 = vmatpush3.bf16.msra.mxu0 %v12691_v29  ;;  %8854 = vmatprep.mubr.bf16.mxu0 %v2340_v13  ;;  %v12729_v29 = vld [vmem:[%s13292_s26 + $0xd88] sm:$0xff]   ;;  %v12763_v13 = vld [vmem:[%s13292_s26 + $0xe50] sm:$0xff]  }
 0x1a1   : > { %8815 = vmatmul.mubr.bf16.vlgmr.msra.gmra.mrb[44].mxu1 %v2300_v33  ;;  %11578 = vmatprep.subr.bf16.mxu0 %v12694_v34  ;;  %v12732_v33 = vld [vmem:[%s13292_s26 + $0xdd0] sm:$0xff]  }
 0x1a2   : > { %11599 = vmatpush3.bf16.msra.mxu1 %v12693_v32  ;;  %8894 = vmatprep.mubr.bf16.mxu1 %v2350_v19  ;;  %v12731_v32 = vld [vmem:[%s13292_s26 + $0xd10] sm:$0xff]   ;;  %v12769_v19 = vld [vmem:[%s13292_s26 + $0xed8] sm:$0xff]  }
 0x1a3   : > { %11600 = vmatprep.subr.bf16.mxu1 %v12696_v30  ;;  %v12733_v34 = vld [vmem:[%s13292_s26 + $0xd90] sm:$0xff]   ;;  %v12735_v30 = vld [vmem:[%s13292_s26 + $0xd18] sm:$0xff]  }
 0x1a4   : > { %11579 = vmatpush3.bf16.msra.mxu0 %v12695_v35  ;;  %v12734_v35 = vld [vmem:[%s13292_s26 + $0xd58] sm:$0xff]  }
 0x1a5   : > { %11580 = vmatprep.subr.bf16.mxu0 %v12698_v37  ;;  %v12737_v37 = vld [vmem:[%s13292_s26 + $0xd98] sm:$0xff]  }
 0x1a6   : > { %11601 = vmatpush3.bf16.msra.mxu1 %v12697_v36  ;;  %v12736_v36 = vld [vmem:[%s13292_s26 + $0xdd8] sm:$0xff]  }
 0x1a7   : > { %11602 = vmatprep.subr.bf16.mxu1 %v12700_v39  ;;  %v12739_v39 = vld [vmem:[%s13292_s26 + $0xd20] sm:$0xff]  }
 0x1a8   : > { %11581 = vmatpush3.bf16.msra.mxu0 %v12699_v38  ;;  %v12738_v38 = vld [vmem:[%s13292_s26 + $0xd60] sm:$0xff]  }
 0x1a9   : > { %11582 = vmatprep.subr.bf16.mxu0 %v12702_v41  ;;  %v12741_v41 = vld [vmem:[%s13292_s26 + $0xda0] sm:$0xff]  }
 0x1aa   : > { %11603 = vmatpush3.bf16.msra.mxu1 %v12701_v40  ;;  %v12740_v40 = vld [vmem:[%s13292_s26 + $0xde0] sm:$0xff]  }
 0x1ab   : > { %11604 = vmatprep.subr.bf16.mxu1 %v12704_v44  ;;  %v12743_v44 = vld [vmem:[%s13292_s26 + $0xd28] sm:$0xff]  }
 0x1ac   : > { %11583 = vmatpush3.bf16.msra.mxu0 %v12703_v43  ;;  %v12742_v43 = vld [vmem:[%s13292_s26 + $0xd68] sm:$0xff]  }
 0x1ad   : > { %11584 = vmatprep.subr.bf16.mxu0 %v12706_v46  ;;  %v12745_v46 = vld [vmem:[%s13292_s26 + $0xda8] sm:$0xff]  }
 0x1ae   : > { %11605 = vmatpush3.bf16.msra.mxu1 %v12705_v45  ;;  %v12744_v45 = vld [vmem:[%s13292_s26 + $0xde8] sm:$0xff]  }
 0x1af   : > { %11606 = vmatprep.subr.bf16.mxu1 %v12708_v48 }
 0x1b0   : > { %11585 = vmatpush3.bf16.msra.mxu0 %v12707_v47  ;;  %v12746_v47 = vld [vmem:[%s13292_s26 + $0xd70] sm:$0xff]  }
 0x1b1   : > { %11586 = vmatprep.subr.bf16.mxu0 %v12710_v50 }
 0x1b2   : > { %v11284_v56 = vpop.f32.mrb[20].mxu0  ;;  %11607 = vmatpush3.bf16.msra.mxu1 %v12709_v49  ;;  %v12747_v49 = vld [vmem:[%s13292_s26 + $0xd30] sm:$0xff]  }
 0x1b3   : > { %v11285_v58 = vpop.f32.mrb[21].mxu0  ;;  %11608 = vmatprep.subr.bf16.mxu1 %v12712_v53 }
 0x1b4   : > { %v11286_v51 = vadd.f32 %v11285_v58, %v11284_v56  ;;  %v11287_v61 = vpop.f32.mrb[22].mxu0  ;;  %v11306_v62 = vpop.f32.mrb[20].mxu1  ;;  %11587 = vmatpush3.bf16.msra.mxu0 %v12711_v52  ;;  %v12748_v52 = vld [vmem:[%s13292_s26 + $0xdf0] sm:$0xff]  }
 0x1b5   : > { %v11288_v1 = vpop.f32.mrb[23].mxu0  ;;  %v11307_v2 = vpop.f32.mrb[21].mxu1  ;;  %11588 = vmatprep.subr.bf16.mxu0 %v12714_v55  ;;  %v12749_v56 = vld [vmem:[%s13292_s26 + $0xdb0] sm:$0xff]   ;;  %v12751_v61 = vld [vmem:[%s13292_s26 + $0xd38] sm:$0xff]  }
 0x1b6   : > { %v8297_v5 = vadd.f32 %v11286_v51, %v13762_v25  ;;  %v11308_v6 = vadd.f32 %v11307_v2, %v11306_v62  ;;  %11609 = vmatpush3.bf16.msra.mxu1 %v12713_v54  ;;  %v11309_v10 = vpop.f32.mrb[22].mxu1  ;;  %v12726_v25 = vld [vmem:[%s13292_s26 + $0xd48] sm:$0xff]   ;;  %v12754_v2 = vld [vmem:[%s13292_s26 + $0xdb8] sm:$0xff]  }
 0x1b7   : > { %11610 = vmatprep.subr.bf16.mxu1 %v12716_v59  ;;  %v11310_v15 = vpop.f32.mrb[23].mxu1  ;;  %v12760_v10 = vld [vmem:[%s13292_s26 + $0xe08] sm:$0xff]  }
 0x1b8   : > { %v13804_v12 = vadd.f32 %v11308_v6, %v8297_v5  ;;  %11589 = vmatpush3.bf16.msra.mxu0 %v12715_v57  ;;  %v12750_v57 = vld [vmem:[%s13292_s26 + $0xd78] sm:$0xff]   ;;  %v12756_v5 = vld [vmem:[%s13292_s26 + $0xe00] sm:$0xff]   ;;  %v12765_v15 = vld [vmem:[%s13292_s26 + $0xed0] sm:$0xff]  }
 0x1b9   : > { %11590 = vmatprep.subr.bf16.mxu0 %v12718_v4  ;;  %v12755_v4 = vld [vmem:[%s13292_s26 + $0xe40] sm:$0xff]  }
 0x1ba   : > { %11611 = vmatpush3.bf16.msra.mxu1 %v12717_v3  ;;  %v2333_v3 = vrot.slane %v13802_v11, %v13330_v42  ;;  %v12757_v6 = vld [vmem:[%s13292_s26 + $0xec0] sm:$0xff]   ;;  %v12761_v11 = vld [vmem:[%s13292_s26 + $0xec8] sm:$0xff]  }
 0x1bb   : > { %11612 = vmatprep.subr.bf16.mxu1 %v12720_v9  ;;  %v12759_v9 = vld [vmem:[%s13292_s26 + $0xe48] sm:$0xff]  }
 0x1bc   : > { %11591 = vmatpush3.bf16.msra.mxu0 %v12719_v7  ;;  %v12758_v7 = vld [vmem:[%s13292_s26 + $0xe80] sm:$0xff]   ;;  %v2349_v8 = vcombine.high %v2333_v3, %v2333_v3 }
 0x1bd   : > { %11620 = vmatprep.subr.bf16.mxu0 %v12722_v17  ;;  %v12767_v17 = vld [vmem:[%s13292_s26 + $0xe58] sm:$0xff]  }
 0x1be   : > { %11613 = vmatpush3.bf16.msra.mxu1 %v12721_v14  ;;  %v12764_v14 = vld [vmem:[%s13292_s26 + $0xe10] sm:$0xff]  }
 0x1bf   : > { %8855 = vmatmul.mubr.bf16.vlgmr.msra.gmra.mrb[48].mxu0 %v2326_v16  ;;  %11642 = vmatprep.subr.bf16.mxu1 %v12724_v21  ;;  %v12766_v16 = vld [vmem:[%s13292_s26 + $0xe90] sm:$0xff]   ;;  %v12771_v21 = vld [vmem:[%s13292_s26 + $0xe60] sm:$0xff]  }
 0x1c0   : > { %11621 = vmatpush3.bf16.msra.mxu0 %v12723_v20  ;;  %8934 = vmatprep.mubr.bf16.mxu0 %v2347_v22  ;;  %v12770_v20 = vld [vmem:[%s13292_s26 + $0xe98] sm:$0xff]   ;;  %v12772_v22 = vld [vmem:[%s13292_s26 + $0xe20] sm:$0xff]  }
 0x1c1   : > { %8895 = vmatmul.mubr.bf16.vlgmr.msra.gmra.mrb[48].mxu1 %v2348_v24  ;;  %11622 = vmatprep.subr.bf16.mxu0 %v12726_v25  ;;  %v12774_v24 = vld [vmem:[%s13292_s26 + $0xea0] sm:$0xff]   ;;  %v12775_v25 = vld [vmem:[%s13292_s26 + $0xe68] sm:$0xff]  }
 0x1c2   : > { %11643 = vmatpush3.bf16.msra.mxu1 %v12725_v23  ;;  %8974 = vmatprep.mubr.bf16.mxu1 %v2351_v27  ;;  %v12773_v23 = vld [vmem:[%s13292_s26 + $0xee0] sm:$0xff]   ;;  %v12777_v27 = vld [vmem:[%s13292_s26 + $0xee8] sm:$0xff]  }
 0x1c3   : > { %11644 = vmatprep.subr.bf16.mxu1 %v12728_v28  ;;  %v12778_v28 = vld [vmem:[%s13292_s26 + $0xea8] sm:$0xff]  }
 0x1c4   : > { %11623 = vmatpush3.bf16.msra.mxu0 %v12727_v26  ;;  %v12776_v26 = vld [vmem:[%s13292_s26 + $0xe28] sm:$0xff]  }
 0x1c5   : > { %11624 = vmatprep.subr.bf16.mxu0 %v12730_v31 }
 0x1c6   : > { %11645 = vmatpush3.bf16.msra.mxu1 %v12729_v29  ;;  %v12779_v29 = vld [vmem:[%s13292_s26 + $0xe70] sm:$0xff]  }
 0x1c7   : > { %11646 = vmatprep.subr.bf16.mxu1 %v12732_v33 }
 0x1c8   : > { %11625 = vmatpush3.bf16.msra.mxu0 %v12731_v32  ;;  %v12780_v32 = vld [vmem:[%s13292_s26 + $0xe30] sm:$0xff]  }
 0x1c9   : > { %11626 = vmatprep.subr.bf16.mxu0 %v12734_v35 }
 0x1ca   : > { %11647 = vmatpush3.bf16.msra.mxu1 %v12733_v34  ;;  %v12781_v34 = vld [vmem:[%s13292_s26 + $0xef0] sm:$0xff]  }
 0x1cb   : > { %11648 = vmatprep.subr.bf16.mxu1 %v12736_v36 }
 0x1cc   : > { %11627 = vmatpush3.bf16.msra.mxu0 %v12735_v30 }
 0x1cd   : > { %11628 = vmatprep.subr.bf16.mxu0 %v12738_v38  ;;  %v12783_v38 = vld [vmem:[%s13292_s26 + $0xe78] sm:$0xff]  }
 0x1ce   : > { %11649 = vmatpush3.bf16.msra.mxu1 %v12737_v37  ;;  %v12782_v37 = vld [vmem:[%s13292_s26 + $0xeb0] sm:$0xff]  }
 0x1cf   : > { %11650 = vmatprep.subr.bf16.mxu1 %v12740_v40 }
 0x1d0   : > { %11629 = vmatpush3.bf16.msra.mxu0 %v12739_v39  ;;  %v292_v39 = vld [vmem:[%s13271_s27 + $0x38] sm:$0xff] }
 0x1d1   : > { %11630 = vmatprep.subr.bf16.mxu0 %v12742_v43  ;;  %v2359_v43 = vrot.slane %v292_v39, %v13330_v42 }
 0x1d2   : > { %v11328_v48 = vpop.f32.mrb[24].mxu0  ;;  %11651 = vmatpush3.bf16.msra.mxu1 %v12741_v41 }
 0x1d3   : > { %v11329_v50 = vpop.f32.mrb[25].mxu0  ;;  %11652 = vmatprep.subr.bf16.mxu1 %v12744_v45 }
 0x1d4   : > { %v11330_v53 = vadd.f32 %v11329_v50, %v11328_v48  ;;  %v11331_v54 = vpop.f32.mrb[26].mxu0  ;;  %v11350_v55 = vpop.f32.mrb[24].mxu1  ;;  %11631 = vmatpush3.bf16.msra.mxu0 %v12743_v44  ;;  %v2352_v44 = vcombine.high %v292_v39, %v292_v39  ;;  %v2367_v50 = vcombine.high %v2359_v43, %v2359_v43 }
 0x1d5   : > { %v11332_v58 = vpop.f32.mrb[27].mxu0  ;;  %v11351_v59 = vpop.f32.mrb[25].mxu1  ;;  %11632 = vmatprep.subr.bf16.mxu0 %v12746_v47  ;;  %v12784_v47 = vld [vmem:[%s13292_s26 + $0xe38] sm:$0xff]  }
 0x1d6   : > { %v8377_v60 = vadd.f32 %v11330_v53, %v13804_v12  ;;  %v11352_v51 = vadd.f32 %v11351_v59, %v11350_v55  ;;  %11653 = vmatpush3.bf16.msra.mxu1 %v12745_v46  ;;  %v11353_v62 = vpop.f32.mrb[26].mxu1  ;;  %v12762_v12 = vld [vmem:[%s13292_s26 + $0xe88] sm:$0xff]   ;;  %v13884_v53 = vrot.slane %v2352_v44, %v13330_v42  ;;  %v12786_v55 = vld [vmem:[%s13292_s26 + $0xeb8] sm:$0xff]   ;;  %v12787_v58 = vld [vmem:[%s13292_s26 + $0xf40] sm:$0xff]  }
 0x1d7   : > { %11654 = vmatprep.subr.bf16.mxu1 %v12748_v52  ;;  %v11354_v0 = vpop.f32.mrb[27].mxu1  ;;  %v12820_v44 = vld [vmem:[%s13292_s26 + $0x1040] sm:$0xff]  }
 0x1d8   : > { %v13844_v1 = vadd.f32 %v11352_v51, %v8377_v60  ;;  %11633 = vmatpush3.bf16.msra.mxu0 %v12747_v49  ;;  %v12785_v49 = vld [vmem:[%s13292_s26 + $0xef8] sm:$0xff]   ;;  %v2368_v59 = vcombine.high %v13884_v53, %v13884_v53  ;;  %v12788_v60 = vld [vmem:[%s13292_s26 + $0xf00] sm:$0xff]  }
 0x1d9   : > { %11634 = vmatprep.subr.bf16.mxu0 %v12750_v57  ;;  %v2375_v57 = vrot.slane %v2359_v43, %v13330_v42  ;;  %v2382_v43 = vrot.slane %v13884_v53, %v13330_v42  ;;  %v12827_v53 = vld [vmem:[%s13292_s26 + $0x1088] sm:$0xff]  }
 0x1da   : > { %11655 = vmatpush3.bf16.msra.mxu1 %v12749_v56  ;;  %v2389_v56 = vrot.slane %v2367_v50, %v13330_v42  ;;  %v2396_v62 = vrot.slane %v2368_v59, %v13330_v42  ;;  %v12825_v50 = vld [vmem:[%s13292_s26 + $0x1008] sm:$0xff]   ;;  %v12833_v59 = vld [vmem:[%s13292_s26 + $0x1018] sm:$0xff]  }
 0x1db   : > { %11656 = vmatprep.subr.bf16.mxu1 %v12752_v63  ;;  %v12790_v63 = vld [vmem:[%s13292_s26 + $0xf80] sm:$0xff]   ;;  %v2397_v0 = vcombine.high %v2375_v57, %v2375_v57 }
 0x1dc   : > { %11635 = vmatpush3.bf16.msra.mxu0 %v12751_v61  ;;  %v2399_v51 = vcombine.high %v2389_v56, %v2389_v56  ;;  %v12789_v61 = vld [vmem:[%s13292_s26 + $0xfc0] sm:$0xff]  }
 0x1dd   : > { %11664 = vmatprep.subr.bf16.mxu0 %v12755_v4  ;;  %v12793_v4 = vld [vmem:[%s13292_s26 + $0xfc8] sm:$0xff]  }
 0x1de   : > { %11657 = vmatpush3.bf16.msra.mxu1 %v12754_v2  ;;  %v12792_v2 = vld [vmem:[%s13292_s26 + $0xf08] sm:$0xff]  }
 0x1df   : > { %8935 = vmatmul.mubr.bf16.vlgmr.msra.gmra.mrb[52].mxu0 %v2333_v3  ;;  %11686 = vmatprep.subr.bf16.mxu1 %v12757_v6  ;;  %v2400_v3 = vcombine.high %v2396_v62, %v2396_v62  ;;  %v12795_v6 = vld [vmem:[%s13292_s26 + $0xf50] sm:$0xff]  }
 0x1e0   : > { %11665 = vmatpush3.bf16.msra.mxu0 %v12756_v5  ;;  %9014 = vmatprep.mubr.bf16.mxu0 %v2389_v56  ;;  %v12794_v5 = vld [vmem:[%s13292_s26 + $0xf88] sm:$0xff]   ;;  %v12830_v56 = vld [vmem:[%s13292_s26 + $0x10d0] sm:$0xff]  }
 0x1e1   : > { %8975 = vmatmul.mubr.bf16.vlgmr.msra.gmra.mrb[52].mxu1 %v2349_v8  ;;  %11666 = vmatprep.subr.bf16.mxu0 %v12759_v9  ;;  %v12797_v8 = vld [vmem:[%s13292_s26 + $0xfd0] sm:$0xff]  }
 0x1e2   : > { %11687 = vmatpush3.bf16.msra.mxu1 %v12758_v7  ;;  %9054 = vmatprep.mubr.bf16.mxu1 %v2399_v51  ;;  %v12796_v7 = vld [vmem:[%s13292_s26 + $0xf10] sm:$0xff]   ;;  %v12835_v51 = vld [vmem:[%s13292_s26 + $0x1098] sm:$0xff]  }
 0x1e3   : > { %11688 = vmatprep.subr.bf16.mxu1 %v12761_v11  ;;  %v12798_v9 = vld [vmem:[%s13292_s26 + $0xf90] sm:$0xff]   ;;  %v12800_v11 = vld [vmem:[%s13292_s26 + $0xf18] sm:$0xff]  }
 0x1e4   : > { %11667 = vmatpush3.bf16.msra.mxu0 %v12760_v10  ;;  %v12799_v10 = vld [vmem:[%s13292_s26 + $0xf58] sm:$0xff]  }
 0x1e5   : > { %11668 = vmatprep.subr.bf16.mxu0 %v12763_v13  ;;  %v12802_v13 = vld [vmem:[%s13292_s26 + $0xf98] sm:$0xff]  }
 0x1e6   : > { %11689 = vmatpush3.bf16.msra.mxu1 %v12762_v12  ;;  %v12801_v12 = vld [vmem:[%s13292_s26 + $0xfd8] sm:$0xff]  }
 0x1e7   : > { %11690 = vmatprep.subr.bf16.mxu1 %v12765_v15  ;;  %v12804_v15 = vld [vmem:[%s13292_s26 + $0xf20] sm:$0xff]  }
 0x1e8   : > { %11669 = vmatpush3.bf16.msra.mxu0 %v12764_v14  ;;  %v12803_v14 = vld [vmem:[%s13292_s26 + $0xf60] sm:$0xff]  }
 0x1e9   : > { %11670 = vmatprep.subr.bf16.mxu0 %v12767_v17  ;;  %v12806_v17 = vld [vmem:[%s13292_s26 + $0xfa0] sm:$0xff]  }
 0x1ea   : > { %11691 = vmatpush3.bf16.msra.mxu1 %v12766_v16  ;;  %v12805_v16 = vld [vmem:[%s13292_s26 + $0xfe0] sm:$0xff]  }
 0x1eb   : > { %11692 = vmatprep.subr.bf16.mxu1 %v12769_v19  ;;  %v12808_v19 = vld [vmem:[%s13292_s26 + $0xf28] sm:$0xff]  }
 0x1ec   : > { %11671 = vmatpush3.bf16.msra.mxu0 %v12768_v18  ;;  %v12807_v18 = vld [vmem:[%s13292_s26 + $0xf68] sm:$0xff]  }
 0x1ed   : > { %11672 = vmatprep.subr.bf16.mxu0 %v12771_v21  ;;  %v12810_v21 = vld [vmem:[%s13292_s26 + $0xfa8] sm:$0xff]  }
 0x1ee   : > { %11693 = vmatpush3.bf16.msra.mxu1 %v12770_v20  ;;  %v12809_v20 = vld [vmem:[%s13292_s26 + $0xfe8] sm:$0xff]  }
 0x1ef   : > { %11694 = vmatprep.subr.bf16.mxu1 %v12773_v23 }
 0x1f0   : > { %11673 = vmatpush3.bf16.msra.mxu0 %v12772_v22  ;;  %v12811_v22 = vld [vmem:[%s13292_s26 + $0xf70] sm:$0xff]  }
 0x1f1   : > { %11674 = vmatprep.subr.bf16.mxu0 %v12775_v25 }
 0x1f2   : > { %v11372_v31 = vpop.f32.mrb[28].mxu0  ;;  %11695 = vmatpush3.bf16.msra.mxu1 %v12774_v24  ;;  %v12812_v24 = vld [vmem:[%s13292_s26 + $0xf30] sm:$0xff]  }
 0x1f3   : > { %v11373_v33 = vpop.f32.mrb[29].mxu0  ;;  %11696 = vmatprep.subr.bf16.mxu1 %v12777_v27 }
 0x1f4   : > { %v11374_v35 = vadd.f32 %v11373_v33, %v11372_v31  ;;  %v11375_v30 = vpop.f32.mrb[30].mxu0  ;;  %v11394_v36 = vpop.f32.mrb[28].mxu1  ;;  %11675 = vmatpush3.bf16.msra.mxu0 %v12776_v26  ;;  %v12813_v26 = vld [vmem:[%s13292_s26 + $0xff0] sm:$0xff]  }
 0x1f5   : > { %v11376_v40 = vpop.f32.mrb[31].mxu0  ;;  %v11395_v41 = vpop.f32.mrb[29].mxu1  ;;  %11676 = vmatprep.subr.bf16.mxu0 %v12779_v29  ;;  %v12814_v31 = vld [vmem:[%s13292_s26 + $0xfb0] sm:$0xff]  }
 0x1f6   : > { %v8457_v45 = vadd.f32 %v11374_v35, %v13844_v1  ;;  %v11396_v46 = vadd.f32 %v11395_v41, %v11394_v36  ;;  %11697 = vmatpush3.bf16.msra.mxu1 %v12778_v28  ;;  %v11397_v48 = vpop.f32.mrb[30].mxu1  ;;  %v12791_v1 = vld [vmem:[%s13292_s26 + $0xf48] sm:$0xff]   ;;  %v12816_v36 = vld [vmem:[%s13292_s26 + $0xf38] sm:$0xff]  }
 0x1f7   : > { %11698 = vmatprep.subr.bf16.mxu1 %v12781_v34  ;;  %v11398_v52 = vpop.f32.mrb[31].mxu1  ;;  %v12819_v41 = vld [vmem:[%s13292_s26 + $0xfb8] sm:$0xff]   ;;  %v2398_v48 = vcombine.high %v2382_v43, %v2382_v43 }
 0x1f8   : > { %v13886_v54 = vadd.f32 %v11396_v46, %v8457_v45  ;;  %11677 = vmatpush3.bf16.msra.mxu0 %v12780_v32  ;;  %v12815_v32 = vld [vmem:[%s13292_s26 + $0xf78] sm:$0xff]   ;;  %v12821_v45 = vld [vmem:[%s13292_s26 + $0x1000] sm:$0xff]   ;;  %v12826_v52 = vld [vmem:[%s13292_s26 + $0x10c8] sm:$0xff]  }
 0x1f9   : > { %11678 = vmatprep.subr.bf16.mxu0 %v12783_v38  ;;  %v12817_v38 = vld [vmem:[%s13292_s26 + $0xff8] sm:$0xff]   ;;  %v12822_v46 = vld [vmem:[%s13292_s26 + $0x10c0] sm:$0xff]  }
 0x1fa   : > { %11699 = vmatpush3.bf16.msra.mxu1 %v12782_v37 }
 0x1fb   : > { %11700 = vmatprep.subr.bf16.mxu1 %v12785_v49  ;;  %v12824_v49 = vld [vmem:[%s13292_s26 + $0x1048] sm:$0xff]  }
 0x1fc   : > { %11679 = vmatpush3.bf16.msra.mxu0 %v12784_v47  ;;  %v12823_v47 = vld [vmem:[%s13292_s26 + $0x1080] sm:$0xff]  }
 0x1fd   : > { %11708 = vmatprep.subr.bf16.mxu0 %v12787_v58  ;;  %v12832_v58 = vld [vmem:[%s13292_s26 + $0x1058] sm:$0xff]  }
 0x1fe   : > { %11701 = vmatpush3.bf16.msra.mxu1 %v12786_v55  ;;  %v12829_v55 = vld [vmem:[%s13292_s26 + $0x1010] sm:$0xff]  }
 0x1ff   : > { %9015 = vmatmul.mubr.bf16.vlgmr.msra.gmra.mrb[56].mxu0 %v2375_v57  ;;  %11730 = vmatprep.subr.bf16.mxu1 %v12789_v61  ;;  %v12831_v57 = vld [vmem:[%s13292_s26 + $0x1090] sm:$0xff]   ;;  %v12836_v61 = vld [vmem:[%s13292_s26 + $0x1060] sm:$0xff]  }
 0x200   : > { %11709 = vmatpush3.bf16.msra.mxu0 %v12788_v60  ;;  %9094 = vmatprep.mubr.bf16.mxu0 %v2396_v62  ;;  %v12834_v60 = vld [vmem:[%s13292_s26 + $0x10d8] sm:$0xff]   ;;  %v12837_v62 = vld [vmem:[%s13292_s26 + $0x1020] sm:$0xff]  }
 0x201   : > { %9055 = vmatmul.mubr.bf16.vlgmr.msra.gmra.mrb[56].mxu1 %v2397_v0  ;;  %11710 = vmatprep.subr.bf16.mxu0 %v12791_v1  ;;  %v12839_v0 = vld [vmem:[%s13292_s26 + $0x10a0] sm:$0xff]   ;;  %v12840_v1 = vld [vmem:[%s13292_s26 + $0x1068] sm:$0xff]  }
 0x202   : > { %11731 = vmatpush3.bf16.msra.mxu1 %v12790_v63  ;;  %9134 = vmatprep.mubr.bf16.mxu1 %v2400_v3  ;;  %v12838_v63 = vld [vmem:[%s13292_s26 + $0x10e0] sm:$0xff]   ;;  %v12842_v3 = vld [vmem:[%s13292_s26 + $0x10e8] sm:$0xff]  }
 0x203   : > { %11732 = vmatprep.subr.bf16.mxu1 %v12793_v4  ;;  %v12843_v4 = vld [vmem:[%s13292_s26 + $0x10a8] sm:$0xff]  }
 0x204   : > { %11711 = vmatpush3.bf16.msra.mxu0 %v12792_v2  ;;  %v12841_v2 = vld [vmem:[%s13292_s26 + $0x1028] sm:$0xff]  }
 0x205   : > { %11712 = vmatprep.subr.bf16.mxu0 %v12795_v6 }
 0x206   : > { %11733 = vmatpush3.bf16.msra.mxu1 %v12794_v5  ;;  %v12844_v5 = vld [vmem:[%s13292_s26 + $0x1070] sm:$0xff]  }
 0x207   : > { %11734 = vmatprep.subr.bf16.mxu1 %v12797_v8 }
 0x208   : > { %11713 = vmatpush3.bf16.msra.mxu0 %v12796_v7  ;;  %v12845_v7 = vld [vmem:[%s13292_s26 + $0x1030] sm:$0xff]  }
 0x209   : > { %11714 = vmatprep.subr.bf16.mxu0 %v12799_v10 }
 0x20a   : > { %11735 = vmatpush3.bf16.msra.mxu1 %v12798_v9  ;;  %v12846_v9 = vld [vmem:[%s13292_s26 + $0x10f0] sm:$0xff]  }
 0x20b   : > { %11736 = vmatprep.subr.bf16.mxu1 %v12801_v12 }
 0x20c   : > { %11715 = vmatpush3.bf16.msra.mxu0 %v12800_v11 }
 0x20d   : > { %11716 = vmatprep.subr.bf16.mxu0 %v12803_v14  ;;  %v12848_v14 = vld [vmem:[%s13292_s26 + $0x1078] sm:$0xff]  }
 0x20e   : > { %11737 = vmatpush3.bf16.msra.mxu1 %v12802_v13  ;;  %v12847_v13 = vld [vmem:[%s13292_s26 + $0x10b0] sm:$0xff]  }
 0x20f   : > { %11738 = vmatprep.subr.bf16.mxu1 %v12805_v16 }
 0x210   : > { %11717 = vmatpush3.bf16.msra.mxu0 %v12804_v15 }
 0x211   : > { %11718 = vmatprep.subr.bf16.mxu0 %v12807_v18 }
 0x212   : > { %v11416_v23 = vpop.f32.mrb[32].mxu0  ;;  %11739 = vmatpush3.bf16.msra.mxu1 %v12806_v17 }
 0x213   : > { %v11417_v25 = vpop.f32.mrb[33].mxu0  ;;  %11740 = vmatprep.subr.bf16.mxu1 %v12809_v20  ;;  %v293_v20 = vld [vmem:[%s13271_s27 + $0x40] sm:$0xff] }
 0x214   : > { %v11418_v27 = vadd.f32 %v11417_v25, %v11416_v23  ;;  %v11419_v28 = vpop.f32.mrb[34].mxu0  ;;  %v11438_v29 = vpop.f32.mrb[32].mxu1  ;;  %11719 = vmatpush3.bf16.msra.mxu0 %v12808_v19  ;;  %v12849_v19 = vld [vmem:[%s13292_s26 + $0x1038] sm:$0xff]   ;;  %v2408_v23 = vrot.slane %v293_v20, %v13330_v42  ;;  %v2401_v25 = vcombine.high %v293_v20, %v293_v20  ;;  %v12886_v20 = vld [vmem:[%s13292_s26 + $0x1200] sm:$0xff]  }
 0x215   : > { %v11420_v33 = vpop.f32.mrb[35].mxu0  ;;  %v11439_v34 = vpop.f32.mrb[33].mxu1  ;;  %11720 = vmatprep.subr.bf16.mxu0 %v12811_v22  ;;  %v12850_v22 = vld [vmem:[%s13292_s26 + $0x10f8] sm:$0xff]  }
 0x216   : > { %v8537_v35 = vadd.f32 %v11418_v27, %v13886_v54  ;;  %v11440_v30 = vadd.f32 %v11439_v34, %v11438_v29  ;;  %11741 = vmatpush3.bf16.msra.mxu1 %v12810_v21  ;;  %v11441_v37 = vpop.f32.mrb[34].mxu1  ;;  %v12828_v54 = vld [vmem:[%s13292_s26 + $0x1050] sm:$0xff]   ;;  %v12851_v27 = vld [vmem:[%s13292_s26 + $0x10b8] sm:$0xff]   ;;  %v2416_v28 = vcombine.high %v2408_v23, %v2408_v23  ;;  %v2424_v29 = vrot.slane %v2408_v23, %v13330_v42  ;;  %v12853_v33 = vld [vmem:[%s13292_s26 + $0x1100] sm:$0xff]  }
 0x217   : > { %11742 = vmatprep.subr.bf16.mxu1 %v12813_v26  ;;  %v11442_v39 = vpop.f32.mrb[35].mxu1 }
 0x218   : > { %v13926_v40 = vadd.f32 %v11440_v30, %v8537_v35  ;;  %11721 = vmatpush3.bf16.msra.mxu0 %v12812_v24  ;;  %v2438_v34 = vrot.slane %v2416_v28, %v13330_v42  ;;  %v12854_v35 = vld [vmem:[%s13292_s26 + $0x11c0] sm:$0xff]   ;;  %v12856_v39 = vld [vmem:[%s13292_s26 + $0x1148] sm:$0xff]   ;;  %v12893_v28 = vld [vmem:[%s13292_s26 + $0x1250] sm:$0xff]  }
 0x219   : > { %11722 = vmatprep.subr.bf16.mxu0 %v12815_v32  ;;  %v13971_v32 = vrot.slane %v2401_v25, %v13330_v42  ;;  %v12890_v25 = vld [vmem:[%s13292_s26 + $0x1208] sm:$0xff]  }
 0x21a   : > { %11743 = vmatpush3.bf16.msra.mxu1 %v12814_v31  ;;  %v12852_v31 = vld [vmem:[%s13292_s26 + $0x1140] sm:$0xff]   ;;  %v2448_v37 = vcombine.high %v2438_v34, %v2438_v34 }
 0x21b   : > { %11744 = vmatprep.subr.bf16.mxu1 %v12817_v38  ;;  %v2417_v30 = vcombine.high %v13971_v32, %v13971_v32  ;;  %v2446_v38 = vcombine.high %v2424_v29, %v2424_v29 }
 0x21c   : > { %11723 = vmatpush3.bf16.msra.mxu0 %v12816_v36  ;;  %v12855_v36 = vld [vmem:[%s13292_s26 + $0x1180] sm:$0xff]  }
 0x21d   : > { %11752 = vmatprep.subr.bf16.mxu0 %v12820_v44 }
 0x21e   : > { %11745 = vmatpush3.bf16.msra.mxu1 %v12819_v41  ;;  %v12857_v41 = vld [vmem:[%s13292_s26 + $0x1108] sm:$0xff]  }
 0x21f   : > { %9095 = vmatmul.mubr.bf16.vlgmr.msra.gmra.mrb[60].mxu0 %v2382_v43  ;;  %11774 = vmatprep.subr.bf16.mxu1 %v12822_v46  ;;  %v12858_v43 = vld [vmem:[%s13292_s26 + $0x11c8] sm:$0xff]   ;;  %v12860_v46 = vld [vmem:[%s13292_s26 + $0x1150] sm:$0xff]  }
 0x220   : > { %11753 = vmatpush3.bf16.msra.mxu0 %v12821_v45  ;;  %9174 = vmatprep.mubr.bf16.mxu0 %v2438_v34  ;;  %v12859_v45 = vld [vmem:[%s13292_s26 + $0x1188] sm:$0xff]   ;;  %v12898_v34 = vld [vmem:[%s13292_s26 + $0x1218] sm:$0xff]  }
 0x221   : > { %9135 = vmatmul.mubr.bf16.vlgmr.msra.gmra.mrb[60].mxu1 %v2398_v48  ;;  %11754 = vmatprep.subr.bf16.mxu0 %v12824_v49  ;;  %v12862_v48 = vld [vmem:[%s13292_s26 + $0x11d0] sm:$0xff]  }
 0x222   : > { %11775 = vmatpush3.bf16.msra.mxu1 %v12823_v47  ;;  %9214 = vmatprep.mubr.bf16.mxu1 %v2448_v37  ;;  %v12861_v47 = vld [vmem:[%s13292_s26 + $0x1110] sm:$0xff]   ;;  %v12902_v37 = vld [vmem:[%s13292_s26 + $0x1220] sm:$0xff]  }
 0x223   : > { %11776 = vmatprep.subr.bf16.mxu1 %v12826_v52  ;;  %v12863_v49 = vld [vmem:[%s13292_s26 + $0x1190] sm:$0xff]   ;;  %v12865_v52 = vld [vmem:[%s13292_s26 + $0x1118] sm:$0xff]  }
 0x224   : > { %11755 = vmatpush3.bf16.msra.mxu0 %v12825_v50  ;;  %v12864_v50 = vld [vmem:[%s13292_s26 + $0x1158] sm:$0xff]  }
 0x225   : > { %11756 = vmatprep.subr.bf16.mxu0 %v12828_v54  ;;  %v12867_v54 = vld [vmem:[%s13292_s26 + $0x1198] sm:$0xff]  }
 0x226   : > { %11777 = vmatpush3.bf16.msra.mxu1 %v12827_v53  ;;  %v12866_v53 = vld [vmem:[%s13292_s26 + $0x11d8] sm:$0xff]  }
 0x227   : > { %11778 = vmatprep.subr.bf16.mxu1 %v12830_v56  ;;  %v12869_v56 = vld [vmem:[%s13292_s26 + $0x1120] sm:$0xff]  }
 0x228   : > { %11757 = vmatpush3.bf16.msra.mxu0 %v12829_v55  ;;  %v12868_v55 = vld [vmem:[%s13292_s26 + $0x1160] sm:$0xff]  }
 0x229   : > { %11758 = vmatprep.subr.bf16.mxu0 %v12832_v58  ;;  %v12871_v58 = vld [vmem:[%s13292_s26 + $0x11a0] sm:$0xff]  }
 0x22a   : > { %11779 = vmatpush3.bf16.msra.mxu1 %v12831_v57  ;;  %v12870_v57 = vld [vmem:[%s13292_s26 + $0x11e0] sm:$0xff]  }
 0x22b   : > { %11780 = vmatprep.subr.bf16.mxu1 %v12834_v60  ;;  %v12873_v60 = vld [vmem:[%s13292_s26 + $0x1128] sm:$0xff]  }
 0x22c   : > { %11759 = vmatpush3.bf16.msra.mxu0 %v12833_v59  ;;  %v12872_v59 = vld [vmem:[%s13292_s26 + $0x1168] sm:$0xff]  }
 0x22d   : > { %11760 = vmatprep.subr.bf16.mxu0 %v12836_v61  ;;  %v12875_v61 = vld [vmem:[%s13292_s26 + $0x11a8] sm:$0xff]  }
 0x22e   : > { %11781 = vmatpush3.bf16.msra.mxu1 %v12835_v51  ;;  %v12874_v51 = vld [vmem:[%s13292_s26 + $0x11e8] sm:$0xff]  }
 0x22f   : > { %11782 = vmatprep.subr.bf16.mxu1 %v12838_v63 }
 0x230   : > { %11761 = vmatpush3.bf16.msra.mxu0 %v12837_v62  ;;  %v12876_v62 = vld [vmem:[%s13292_s26 + $0x1170] sm:$0xff]  }
 0x231   : > { %11762 = vmatprep.subr.bf16.mxu0 %v12840_v1 }
 0x232   : > { %v11460_v6 = vpop.f32.mrb[36].mxu0  ;;  %11783 = vmatpush3.bf16.msra.mxu1 %v12839_v0  ;;  %v12877_v0 = vld [vmem:[%s13292_s26 + $0x1130] sm:$0xff]  }
 0x233   : > { %v11461_v8 = vpop.f32.mrb[37].mxu0  ;;  %11784 = vmatprep.subr.bf16.mxu1 %v12842_v3 }
 0x234   : > { %v11462_v10 = vadd.f32 %v11461_v8, %v11460_v6  ;;  %v11463_v11 = vpop.f32.mrb[38].mxu0  ;;  %v11482_v12 = vpop.f32.mrb[36].mxu1  ;;  %11763 = vmatpush3.bf16.msra.mxu0 %v12841_v2  ;;  %v12878_v2 = vld [vmem:[%s13292_s26 + $0x11f0] sm:$0xff]  }
 0x235   : > { %v11464_v15 = vpop.f32.mrb[39].mxu0  ;;  %v11483_v16 = vpop.f32.mrb[37].mxu1  ;;  %11764 = vmatprep.subr.bf16.mxu0 %v12844_v5  ;;  %v12879_v6 = vld [vmem:[%s13292_s26 + $0x11b0] sm:$0xff]  }
 0x236   : > { %v8617_v17 = vadd.f32 %v11462_v10, %v13926_v40  ;;  %v11484_v18 = vadd.f32 %v11483_v16, %v11482_v12  ;;  %11785 = vmatpush3.bf16.msra.mxu1 %v12843_v4  ;;  %v11485_v21 = vpop.f32.mrb[38].mxu1  ;;  %v2445_v40 = vrot.slane %v2417_v30, %v13330_v42  ;;  %v12881_v12 = vld [vmem:[%s13292_s26 + $0x1138] sm:$0xff]  }
 0x237   : > { %11786 = vmatprep.subr.bf16.mxu1 %v12846_v9  ;;  %v11486_v24 = vpop.f32.mrb[39].mxu1  ;;  %v12887_v21 = vld [vmem:[%s13292_s26 + $0x12c0] sm:$0xff]   ;;  %v12900_v30 = vld [vmem:[%s13292_s26 + $0x1298] sm:$0xff]  }
 0x238   : > { %v13965_v26 = vadd.f32 %v11484_v18, %v8617_v17  ;;  %11765 = vmatpush3.bf16.msra.mxu0 %v12845_v7  ;;  %v2449_v44 = vcombine.high %v2445_v40, %v2445_v40  ;;  %v12880_v7 = vld [vmem:[%s13292_s26 + $0x1178] sm:$0xff]   ;;  %v2431_v18 = vrot.slane %v13971_v32, %v13330_v42  ;;  %v12889_v24 = vld [vmem:[%s13292_s26 + $0x1248] sm:$0xff]   ;;  %v12896_v32 = vld [vmem:[%s13292_s26 + $0x1290] sm:$0xff]  }
 0x239   : > { %11766 = vmatprep.subr.bf16.mxu0 %v12848_v14  ;;  %v12882_v14 = vld [vmem:[%s13292_s26 + $0x11f8] sm:$0xff]  }
 0x23a   : > { %11787 = vmatpush3.bf16.msra.mxu1 %v12847_v13  ;;  %v12884_v17 = vld [vmem:[%s13292_s26 + $0x11b8] sm:$0xff]   ;;  %v2447_v23 = vcombine.high %v2431_v18, %v2431_v18 }
 0x23b   : > { %11788 = vmatprep.subr.bf16.mxu1 %v12850_v22  ;;  %v12888_v22 = vld [vmem:[%s13292_s26 + $0x1280] sm:$0xff]  }
 0x23c   : > { %11767 = vmatpush3.bf16.msra.mxu0 %v12849_v19  ;;  %v12885_v19 = vld [vmem:[%s13292_s26 + $0x1240] sm:$0xff]  }
 0x23d   : > { %11796 = vmatprep.subr.bf16.mxu0 %v12852_v31  ;;  %v12895_v31 = vld [vmem:[%s13292_s26 + $0x12d0] sm:$0xff]  }
 0x23e   : > { %11789 = vmatpush3.bf16.msra.mxu1 %v12851_v27  ;;  %v12892_v27 = vld [vmem:[%s13292_s26 + $0x1288] sm:$0xff]  }
 0x23f   : > { %9175 = vmatmul.mubr.bf16.vlgmr.msra.gmra.mrb[64].mxu0 %v2424_v29  ;;  %11818 = vmatprep.subr.bf16.mxu1 %v12854_v35  ;;  %v12894_v29 = vld [vmem:[%s13292_s26 + $0x1210] sm:$0xff]   ;;  %v12899_v35 = vld [vmem:[%s13292_s26 + $0x12d8] sm:$0xff]  }
 0x240   : > { %11797 = vmatpush3.bf16.msra.mxu0 %v12853_v33  ;;  %9254 = vmatprep.mubr.bf16.mxu0 %v2445_v40  ;;  %v12897_v33 = vld [vmem:[%s13292_s26 + $0x1258] sm:$0xff]   ;;  %v12905_v40 = vld [vmem:[%s13292_s26 + $0x1268] sm:$0xff]  }
 0x241   : > { %9215 = vmatmul.mubr.bf16.vlgmr.msra.gmra.mrb[64].mxu1 %v2446_v38  ;;  %11798 = vmatprep.subr.bf16.mxu0 %v12856_v39  ;;  %v12903_v38 = vld [vmem:[%s13292_s26 + $0x12e0] sm:$0xff]  }
 0x242   : > { %11819 = vmatpush3.bf16.msra.mxu1 %v12855_v36  ;;  %9294 = vmatprep.mubr.bf16.mxu1 %v2449_v44  ;;  %v12901_v36 = vld [vmem:[%s13292_s26 + $0x1260] sm:$0xff]   ;;  %v12908_v44 = vld [vmem:[%s13292_s26 + $0x12a8] sm:$0xff]  }
 0x243   : > { %11820 = vmatprep.subr.bf16.mxu1 %v12858_v43  ;;  %v12904_v39 = vld [vmem:[%s13292_s26 + $0x12a0] sm:$0xff]   ;;  %v12907_v43 = vld [vmem:[%s13292_s26 + $0x12e8] sm:$0xff]  }
 0x244   : > { %11799 = vmatpush3.bf16.msra.mxu0 %v12857_v41  ;;  %v12906_v41 = vld [vmem:[%s13292_s26 + $0x1228] sm:$0xff]  }
 0x245   : > { %11800 = vmatprep.subr.bf16.mxu0 %v12860_v46 }
 0x246   : > { %11821 = vmatpush3.bf16.msra.mxu1 %v12859_v45  ;;  %v12909_v45 = vld [vmem:[%s13292_s26 + $0x1270] sm:$0xff]  }
 0x247   : > { %11822 = vmatprep.subr.bf16.mxu1 %v12862_v48 }
 0x248   : > { %11801 = vmatpush3.bf16.msra.mxu0 %v12861_v47  ;;  %v12910_v47 = vld [vmem:[%s13292_s26 + $0x1230] sm:$0xff]  }
 0x249   : > { %11802 = vmatprep.subr.bf16.mxu0 %v12864_v50 }
 0x24a   : > { %11823 = vmatpush3.bf16.msra.mxu1 %v12863_v49  ;;  %v12911_v49 = vld [vmem:[%s13292_s26 + $0x12f0] sm:$0xff]  }
 0x24b   : > { %11824 = vmatprep.subr.bf16.mxu1 %v12866_v53 }
 0x24c   : > { %11803 = vmatpush3.bf16.msra.mxu0 %v12865_v52 }
 0x24d   : > { %11804 = vmatprep.subr.bf16.mxu0 %v12868_v55  ;;  %v12913_v55 = vld [vmem:[%s13292_s26 + $0x1278] sm:$0xff]  }
 0x24e   : > { %11825 = vmatpush3.bf16.msra.mxu1 %v12867_v54  ;;  %v12912_v54 = vld [vmem:[%s13292_s26 + $0x12b0] sm:$0xff]  }
 0x24f   : > { %11826 = vmatprep.subr.bf16.mxu1 %v12870_v57 }
 0x250   : > { %11805 = vmatpush3.bf16.msra.mxu0 %v12869_v56 }
 0x251   : > { %11806 = vmatprep.subr.bf16.mxu0 %v12872_v59 }
 0x252   : > { %v11504_v63 = vpop.f32.mrb[40].mxu0  ;;  %11827 = vmatpush3.bf16.msra.mxu1 %v12871_v58 }
 0x253   : > { %v11505_v1 = vpop.f32.mrb[41].mxu0  ;;  %11828 = vmatprep.subr.bf16.mxu1 %v12874_v51  ;;  %v12915_v51 = vld [vmem:[%s13292_s26 + $0x12f8] sm:$0xff]  }
 0x254   : > { %v11506_v3 = vadd.f32 %v11505_v1, %v11504_v63  ;;  %v11507_v4 = vpop.f32.mrb[42].mxu0  ;;  %v11526_v5 = vpop.f32.mrb[40].mxu1  ;;  %11807 = vmatpush3.bf16.msra.mxu0 %v12873_v60  ;;  %v12914_v60 = vld [vmem:[%s13292_s26 + $0x1238] sm:$0xff]  }
 0x255   : > { %v11508_v8 = vpop.f32.mrb[43].mxu0  ;;  %v11527_v9 = vpop.f32.mrb[41].mxu1  ;;  %11808 = vmatprep.subr.bf16.mxu0 %v12876_v62  ;;  %v294_v62 = vld [vmem:[%s13271_s27 + $0x48] sm:$0xff]  ;;  %v12917_v4 = vld [vmem:[%s13292_s26 + $0x1340] sm:$0xff]  }
 0x256   : > { %v8697_v10 = vadd.f32 %v11506_v3, %v13965_v26  ;;  %v11528_v11 = vadd.f32 %v11527_v9, %v11526_v5  ;;  %11829 = vmatpush3.bf16.msra.mxu1 %v12875_v61  ;;  %v11529_v13 = vpop.f32.mrb[42].mxu1  ;;  %v12891_v26 = vld [vmem:[%s13292_s26 + $0x12c8] sm:$0xff]   ;;  %v2457_v1 = vrot.slane %v294_v62, %v13330_v42  ;;  %v2450_v3 = vcombine.high %v294_v62, %v294_v62  ;;  %v12919_v9 = vld [vmem:[%s13292_s26 + $0x13c0] sm:$0xff]  }
 0x257   : > { %11830 = vmatprep.subr.bf16.mxu1 %v12878_v2  ;;  %v11530_v15 = vpop.f32.mrb[43].mxu1  ;;  %v12916_v2 = vld [vmem:[%s13292_s26 + $0x12b8] sm:$0xff]   ;;  %v12953_v62 = vld [vmem:[%s13292_s26 + $0x1480] sm:$0xff]  }
 0x258   : > { %v14008_v16 = vadd.f32 %v11528_v11, %v8697_v10  ;;  %11809 = vmatpush3.bf16.msra.mxu0 %v12877_v0  ;;  %v2465_v5 = vcombine.high %v2457_v1, %v2457_v1  ;;  %v14054_v8 = vrot.slane %v2450_v3, %v13330_v42  ;;  %v12920_v11 = vld [vmem:[%s13292_s26 + $0x1380] sm:$0xff]   ;;  %v12957_v3 = vld [vmem:[%s13292_s26 + $0x1488] sm:$0xff]  }
 0x259   : > { %11810 = vmatprep.subr.bf16.mxu0 %v12880_v7  ;;  %v12918_v7 = vld [vmem:[%s13292_s26 + $0x1300] sm:$0xff]  }
 0x25a   : > { %11831 = vmatpush3.bf16.msra.mxu1 %v12879_v6  ;;  %v2473_v6 = vrot.slane %v2457_v1, %v13330_v42  ;;  %v2487_v10 = vrot.slane %v2465_v5, %v13330_v42  ;;  %v12955_v1 = vld [vmem:[%s13292_s26 + $0x1408] sm:$0xff]   ;;  %v12959_v5 = vld [vmem:[%s13292_s26 + $0x1410] sm:$0xff]  }
 0x25b   : > { %11832 = vmatprep.subr.bf16.mxu1 %v12882_v14  ;;  %v12921_v14 = vld [vmem:[%s13292_s26 + $0x1348] sm:$0xff]  }
 0x25c   : > { %11811 = vmatpush3.bf16.msra.mxu0 %v12881_v12  ;;  %v2466_v12 = vcombine.high %v14054_v8, %v14054_v8  ;;  %v2495_v13 = vcombine.high %v2473_v6, %v2473_v6  ;;  %v2497_v15 = vcombine.high %v2487_v10, %v2487_v10 }
 0x25d   : > { %11840 = vmatprep.subr.bf16.mxu0 %v12885_v19  ;;  %v12924_v19 = vld [vmem:[%s13292_s26 + $0x1388] sm:$0xff]  }
 0x25e   : > { %11833 = vmatpush3.bf16.msra.mxu1 %v12884_v17  ;;  %v2494_v17 = vrot.slane %v2466_v12, %v13330_v42  ;;  %v12966_v12 = vld [vmem:[%s13292_s26 + $0x1460] sm:$0xff]  }
 0x25f   : > { %9255 = vmatmul.mubr.bf16.vlgmr.msra.gmra.mrb[68].mxu0 %v2431_v18  ;;  %11862 = vmatprep.subr.bf16.mxu1 %v12887_v21  ;;  %v12923_v18 = vld [vmem:[%s13292_s26 + $0x13c8] sm:$0xff]   ;;  %v12925_v21 = vld [vmem:[%s13292_s26 + $0x1350] sm:$0xff]  }
 0x260   : > { %11841 = vmatpush3.bf16.msra.mxu0 %v12886_v20  ;;  %9334 = vmatprep.mubr.bf16.mxu0 %v2487_v10  ;;  %v2498_v20 = vcombine.high %v2494_v17, %v2494_v17  ;;  %v12964_v10 = vld [vmem:[%s13292_s26 + $0x14d8] sm:$0xff]  }
 0x261   : > { %9295 = vmatmul.mubr.bf16.vlgmr.msra.gmra.mrb[68].mxu1 %v2447_v23  ;;  %11842 = vmatprep.subr.bf16.mxu0 %v12889_v24  ;;  %v12927_v23 = vld [vmem:[%s13292_s26 + $0x13d0] sm:$0xff]  }
 0x262   : > { %11863 = vmatpush3.bf16.msra.mxu1 %v12888_v22  ;;  %9374 = vmatprep.mubr.bf16.mxu1 %v2497_v15  ;;  %v12926_v22 = vld [vmem:[%s13292_s26 + $0x1310] sm:$0xff]   ;;  %v12969_v15 = vld [vmem:[%s13292_s26 + $0x14a0] sm:$0xff]  }
 0x263   : > { %11864 = vmatprep.subr.bf16.mxu1 %v12891_v26  ;;  %v12928_v24 = vld [vmem:[%s13292_s26 + $0x1390] sm:$0xff]   ;;  %v12930_v26 = vld [vmem:[%s13292_s26 + $0x1318] sm:$0xff]  }
 0x264   : > { %11843 = vmatpush3.bf16.msra.mxu0 %v12890_v25  ;;  %v12929_v25 = vld [vmem:[%s13292_s26 + $0x1358] sm:$0xff]  }
 0x265   : > { %11844 = vmatprep.subr.bf16.mxu0 %v12893_v28  ;;  %v12932_v28 = vld [vmem:[%s13292_s26 + $0x1398] sm:$0xff]  }
 0x266   : > { %11865 = vmatpush3.bf16.msra.mxu1 %v12892_v27  ;;  %v12931_v27 = vld [vmem:[%s13292_s26 + $0x13d8] sm:$0xff]  }
 0x267   : > { %11866 = vmatprep.subr.bf16.mxu1 %v12895_v31  ;;  %v12934_v31 = vld [vmem:[%s13292_s26 + $0x1320] sm:$0xff]  }
 0x268   : > { %11845 = vmatpush3.bf16.msra.mxu0 %v12894_v29  ;;  %v12933_v29 = vld [vmem:[%s13292_s26 + $0x1360] sm:$0xff]  }
 0x269   : > { %11846 = vmatprep.subr.bf16.mxu0 %v12897_v33  ;;  %v12936_v33 = vld [vmem:[%s13292_s26 + $0x13a0] sm:$0xff]  }
 0x26a   : > { %11867 = vmatpush3.bf16.msra.mxu1 %v12896_v32  ;;  %v12935_v32 = vld [vmem:[%s13292_s26 + $0x13e0] sm:$0xff]  }
 0x26b   : > { %11868 = vmatprep.subr.bf16.mxu1 %v12899_v35  ;;  %v12938_v35 = vld [vmem:[%s13292_s26 + $0x1328] sm:$0xff]  }
 0x26c   : > { %11847 = vmatpush3.bf16.msra.mxu0 %v12898_v34  ;;  %v12937_v34 = vld [vmem:[%s13292_s26 + $0x1368] sm:$0xff]  }
 0x26d   : > { %11848 = vmatprep.subr.bf16.mxu0 %v12901_v36  ;;  %v12940_v36 = vld [vmem:[%s13292_s26 + $0x13a8] sm:$0xff]  }
 0x26e   : > { %11869 = vmatpush3.bf16.msra.mxu1 %v12900_v30  ;;  %v12939_v30 = vld [vmem:[%s13292_s26 + $0x13e8] sm:$0xff]  }
 0x26f   : > { %11870 = vmatprep.subr.bf16.mxu1 %v12903_v38 }
 0x270   : > { %11849 = vmatpush3.bf16.msra.mxu0 %v12902_v37  ;;  %v12941_v37 = vld [vmem:[%s13292_s26 + $0x1370] sm:$0xff]  }
 0x271   : > { %11850 = vmatprep.subr.bf16.mxu0 %v12905_v40 }
 0x272   : > { %v11548_v46 = vpop.f32.mrb[44].mxu0  ;;  %11871 = vmatpush3.bf16.msra.mxu1 %v12904_v39  ;;  %v12942_v39 = vld [vmem:[%s13292_s26 + $0x1330] sm:$0xff]  }
 0x273   : > { %v11549_v48 = vpop.f32.mrb[45].mxu0  ;;  %11872 = vmatprep.subr.bf16.mxu1 %v12907_v43 }
 0x274   : > { %v11550_v50 = vadd.f32 %v11549_v48, %v11548_v46  ;;  %v11551_v52 = vpop.f32.mrb[46].mxu0  ;;  %v11570_v53 = vpop.f32.mrb[44].mxu1  ;;  %11851 = vmatpush3.bf16.msra.mxu0 %v12906_v41  ;;  %v12943_v41 = vld [vmem:[%s13292_s26 + $0x13f0] sm:$0xff]  }
 0x275   : > { %v11552_v56 = vpop.f32.mrb[47].mxu0  ;;  %v11571_v57 = vpop.f32.mrb[45].mxu1  ;;  %11852 = vmatprep.subr.bf16.mxu0 %v12909_v45  ;;  %v12944_v46 = vld [vmem:[%s13292_s26 + $0x13b0] sm:$0xff]  }
 0x276   : > { %v8777_v58 = vadd.f32 %v11550_v50, %v14008_v16  ;;  %v11572_v59 = vadd.f32 %v11571_v57, %v11570_v53  ;;  %11873 = vmatpush3.bf16.msra.mxu1 %v12908_v44  ;;  %v11573_v61 = vpop.f32.mrb[46].mxu1  ;;  %v12922_v16 = vld [vmem:[%s13292_s26 + $0x1308] sm:$0xff]   ;;  %v12946_v53 = vld [vmem:[%s13292_s26 + $0x1338] sm:$0xff]  }
 0x277   : > { %11874 = vmatprep.subr.bf16.mxu1 %v12911_v49  ;;  %v11574_v63 = vpop.f32.mrb[47].mxu1  ;;  %v12952_v61 = vld [vmem:[%s13292_s26 + $0x14c0] sm:$0xff]  }
 0x278   : > { %v14046_v0 = vadd.f32 %v11572_v59, %v8777_v58  ;;  %11853 = vmatpush3.bf16.msra.mxu0 %v12910_v47  ;;  %v12945_v47 = vld [vmem:[%s13292_s26 + $0x1378] sm:$0xff]   ;;  %v2480_v59 = vrot.slane %v14054_v8, %v13330_v42 }
 0x279   : > { %11854 = vmatprep.subr.bf16.mxu0 %v12913_v55  ;;  %v12947_v55 = vld [vmem:[%s13292_s26 + $0x13f8] sm:$0xff]  }
 0x27a   : > { %11875 = vmatpush3.bf16.msra.mxu1 %v12912_v54  ;;  %v12949_v58 = vld [vmem:[%s13292_s26 + $0x13b8] sm:$0xff]   ;;  %v2496_v63 = vcombine.high %v2480_v59, %v2480_v59 }
 0x27b   : > { %11876 = vmatprep.subr.bf16.mxu1 %v12915_v51  ;;  %v12951_v51 = vld [vmem:[%s13292_s26 + $0x1400] sm:$0xff]   ;;  %v12962_v8 = vld [vmem:[%s13292_s26 + $0x1458] sm:$0xff]  }
 0x27c   : > { %11855 = vmatpush3.bf16.msra.mxu0 %v12914_v60  ;;  %v12950_v60 = vld [vmem:[%s13292_s26 + $0x1440] sm:$0xff]  }
 0x27d   : > { %11884 = vmatprep.subr.bf16.mxu0 %v12917_v4  ;;  %v12958_v4 = vld [vmem:[%s13292_s26 + $0x1450] sm:$0xff]  }
 0x27e   : > { %11877 = vmatpush3.bf16.msra.mxu1 %v12916_v2  ;;  %v12956_v2 = vld [vmem:[%s13292_s26 + $0x14c8] sm:$0xff]  }
 0x27f   : > { %9335 = vmatmul.mubr.bf16.vlgmr.msra.gmra.mrb[72].mxu0 %v2473_v6  ;;  %11906 = vmatprep.subr.bf16.mxu1 %v12919_v9  ;;  %v12960_v6 = vld [vmem:[%s13292_s26 + $0x14d0] sm:$0xff]   ;;  %v12963_v9 = vld [vmem:[%s13292_s26 + $0x1418] sm:$0xff]  }
 0x280   : > { %11885 = vmatpush3.bf16.msra.mxu0 %v12918_v7  ;;  %9414 = vmatprep.mubr.bf16.mxu0 %v2494_v17  ;;  %v12961_v7 = vld [vmem:[%s13292_s26 + $0x1490] sm:$0xff]   ;;  %v12971_v17 = vld [vmem:[%s13292_s26 + $0x1428] sm:$0xff]  }
 0x281   : > { %9375 = vmatmul.mubr.bf16.vlgmr.msra.gmra.mrb[72].mxu1 %v2495_v13  ;;  %11886 = vmatprep.subr.bf16.mxu0 %v12921_v14  ;;  %v12967_v13 = vld [vmem:[%s13292_s26 + $0x1420] sm:$0xff]  }
 0x282   : > { %11907 = vmatpush3.bf16.msra.mxu1 %v12920_v11  ;;  %9454 = vmatprep.mubr.bf16.mxu1 %v2498_v20  ;;  %v12965_v11 = vld [vmem:[%s13292_s26 + $0x1498] sm:$0xff]   ;;  %v12968_v14 = vld [vmem:[%s13292_s26 + $0x14e0] sm:$0xff]   ;;  %v12974_v20 = vld [vmem:[%s13292_s26 + $0x1470] sm:$0xff]  }
 0x283   : > { %11908 = vmatprep.subr.bf16.mxu1 %v12923_v18  ;;  %v12972_v18 = vld [vmem:[%s13292_s26 + $0x14e8] sm:$0xff]  }
 0x284   : > { %11887 = vmatpush3.bf16.msra.mxu0 %v12922_v16  ;;  %v12970_v16 = vld [vmem:[%s13292_s26 + $0x1468] sm:$0xff]  }
 0x285   : > { %11888 = vmatprep.subr.bf16.mxu0 %v12925_v21 }
 0x286   : > { %11909 = vmatpush3.bf16.msra.mxu1 %v12924_v19  ;;  %v12973_v19 = vld [vmem:[%s13292_s26 + $0x14a8] sm:$0xff]  }
 0x287   : > { %11910 = vmatprep.subr.bf16.mxu1 %v12927_v23 }
 0x288   : > { %11889 = vmatpush3.bf16.msra.mxu0 %v12926_v22  ;;  %v12975_v22 = vld [vmem:[%s13292_s26 + $0x1430] sm:$0xff]  }
 0x289   : > { %11890 = vmatprep.subr.bf16.mxu0 %v12929_v25 }
 0x28a   : > { %11911 = vmatpush3.bf16.msra.mxu1 %v12928_v24  ;;  %v12976_v24 = vld [vmem:[%s13292_s26 + $0x14f0] sm:$0xff]  }
 0x28b   : > { %11912 = vmatprep.subr.bf16.mxu1 %v12931_v27 }
 0x28c   : > { %11891 = vmatpush3.bf16.msra.mxu0 %v12930_v26 }
 0x28d   : > { %11892 = vmatprep.subr.bf16.mxu0 %v12933_v29  ;;  %v12978_v29 = vld [vmem:[%s13292_s26 + $0x1478] sm:$0xff]  }
 0x28e   : > { %11913 = vmatpush3.bf16.msra.mxu1 %v12932_v28  ;;  %v12977_v28 = vld [vmem:[%s13292_s26 + $0x14b0] sm:$0xff]  }
 0x28f   : > { %11914 = vmatprep.subr.bf16.mxu1 %v12935_v32 }
 0x290   : > { %11893 = vmatpush3.bf16.msra.mxu0 %v12934_v31 }
 0x291   : > { %11894 = vmatprep.subr.bf16.mxu0 %v12937_v34 }
 0x292   : > { %v11592_v38 = vpop.f32.mrb[48].mxu0  ;;  %11915 = vmatpush3.bf16.msra.mxu1 %v12936_v33 }
 0x293   : > { %v11593_v40 = vpop.f32.mrb[49].mxu0  ;;  %11916 = vmatprep.subr.bf16.mxu1 %v12939_v30 }
 0x294   : > { %v11594_v43 = vadd.f32 %v11593_v40, %v11592_v38  ;;  %v11595_v44 = vpop.f32.mrb[50].mxu0  ;;  %v11614_v45 = vpop.f32.mrb[48].mxu1  ;;  %11895 = vmatpush3.bf16.msra.mxu0 %v12938_v35  ;;  %v12979_v35 = vld [vmem:[%s13292_s26 + $0x1438] sm:$0xff]  }
 0x295   : > { %v11596_v48 = vpop.f32.mrb[51].mxu0  ;;  %v11615_v49 = vpop.f32.mrb[49].mxu1  ;;  %11896 = vmatprep.subr.bf16.mxu0 %v12941_v37  ;;  %v12982_v44 = vld [vmem:[%s13292_s26 + $0x1540] sm:$0xff]  }
 0x296   : > { %v8857_v50 = vadd.f32 %v11594_v43, %v14046_v0  ;;  %v11616_v52 = vadd.f32 %v11615_v49, %v11614_v45  ;;  %11917 = vmatpush3.bf16.msra.mxu1 %v12940_v36  ;;  %v11617_v54 = vpop.f32.mrb[50].mxu1  ;;  %v12954_v0 = vld [vmem:[%s13292_s26 + $0x1448] sm:$0xff]   ;;  %v12980_v36 = vld [vmem:[%s13292_s26 + $0x14f8] sm:$0xff]   ;;  %v12984_v48 = vld [vmem:[%s13292_s26 + $0x15c0] sm:$0xff]  }
 0x297   : > { %11918 = vmatprep.subr.bf16.mxu1 %v12943_v41  ;;  %v11618_v56 = vpop.f32.mrb[51].mxu1  ;;  %v12981_v41 = vld [vmem:[%s13292_s26 + $0x14b8] sm:$0xff]   ;;  %v12986_v54 = vld [vmem:[%s13292_s26 + $0x1548] sm:$0xff]  }
 0x298   : > { %v14090_v57 = vadd.f32 %v11616_v52, %v8857_v50  ;;  %11897 = vmatpush3.bf16.msra.mxu0 %v12942_v39  ;;  %v295_v39 = vld [vmem:[%s13271_s27 + $0x50] sm:$0xff]  ;;  %v12983_v50 = vld [vmem:[%s13292_s26 + $0x1500] sm:$0xff]  }
 0x299   : > { %11898 = vmatprep.subr.bf16.mxu0 %v12945_v47  ;;  %v2506_v40 = vrot.slane %v295_v39, %v13330_v42  ;;  %v2499_v43 = vcombine.high %v295_v39, %v295_v39  ;;  %v12985_v56 = vld [vmem:[%s13292_s26 + $0x1580] sm:$0xff]  }
 0x29a   : > { %11919 = vmatpush3.bf16.msra.mxu1 %v12944_v46  ;;  %v13018_v39 = vld [vmem:[%s13292_s26 + $0x1680] sm:$0xff]  }
 0x29b   : > { %11920 = vmatprep.subr.bf16.mxu1 %v12947_v55  ;;  %v2514_v45 = vcombine.high %v2506_v40, %v2506_v40  ;;  %v2522_v46 = vrot.slane %v2506_v40, %v13330_v42  ;;  %v14135_v47 = vrot.slane %v2499_v43, %v13330_v42  ;;  %v13021_v40 = vld [vmem:[%s13292_s26 + $0x16c8] sm:$0xff]   ;;  %v13023_v43 = vld [vmem:[%s13292_s26 + $0x1650] sm:$0xff]  }
 0x29c   : > { %11899 = vmatpush3.bf16.msra.mxu0 %v12946_v53 }
 0x29d   : > { %11928 = vmatprep.subr.bf16.mxu0 %v12950_v60  ;;  %v2536_v49 = vrot.slane %v2514_v45, %v13330_v42  ;;  %v2515_v52 = vcombine.high %v14135_v47, %v14135_v47  ;;  %v2544_v53 = vcombine.high %v2522_v46, %v2522_v46  ;;  %v13025_v45 = vld [vmem:[%s13292_s26 + $0x16d0] sm:$0xff]  }
 0x29e   : > { %11921 = vmatpush3.bf16.msra.mxu1 %v12949_v58  ;;  %v12988_v58 = vld [vmem:[%s13292_s26 + $0x15c8] sm:$0xff]  }
 0x29f   : > { %9415 = vmatmul.mubr.bf16.vlgmr.msra.gmra.mrb[76].mxu0 %v2480_v59  ;;  %11950 = vmatprep.subr.bf16.mxu1 %v12952_v61  ;;  %v2546_v55 = vcombine.high %v2536_v49, %v2536_v49  ;;  %v12987_v59 = vld [vmem:[%s13292_s26 + $0x1508] sm:$0xff]  }
 0x2a0   : > { %11929 = vmatpush3.bf16.msra.mxu0 %v12951_v51  ;;  %9494 = vmatprep.mubr.bf16.mxu0 %v2536_v49  ;;  %v12990_v51 = vld [vmem:[%s13292_s26 + $0x1550] sm:$0xff]   ;;  %v12989_v61 = vld [vmem:[%s13292_s26 + $0x1588] sm:$0xff]   ;;  %v13029_v49 = vld [vmem:[%s13292_s26 + $0x16d8] sm:$0xff]  }
 0x2a1   : > { %9455 = vmatmul.mubr.bf16.vlgmr.msra.gmra.mrb[76].mxu1 %v2496_v63  ;;  %11930 = vmatprep.subr.bf16.mxu0 %v12954_v0  ;;  %v12991_v63 = vld [vmem:[%s13292_s26 + $0x1510] sm:$0xff]   ;;  %v12994_v0 = vld [vmem:[%s13292_s26 + $0x1558] sm:$0xff]  }
 0x2a2   : > { %11951 = vmatpush3.bf16.msra.mxu1 %v12953_v62  ;;  %9534 = vmatprep.mubr.bf16.mxu1 %v2546_v55  ;;  %v12992_v62 = vld [vmem:[%s13292_s26 + $0x15d0] sm:$0xff]   ;;  %v13032_v55 = vld [vmem:[%s13292_s26 + $0x1620] sm:$0xff]  }
 0x2a3   : > { %11952 = vmatprep.subr.bf16.mxu1 %v12956_v2  ;;  %v12996_v2 = vld [vmem:[%s13292_s26 + $0x15d8] sm:$0xff]  }
 0x2a4   : > { %11931 = vmatpush3.bf16.msra.mxu0 %v12955_v1  ;;  %v12993_v1 = vld [vmem:[%s13292_s26 + $0x1590] sm:$0xff]  }
 0x2a5   : > { %11932 = vmatprep.subr.bf16.mxu0 %v12958_v4  ;;  %v12998_v4 = vld [vmem:[%s13292_s26 + $0x1560] sm:$0xff]  }
 0x2a6   : > { %11953 = vmatpush3.bf16.msra.mxu1 %v12957_v3  ;;  %v12995_v3 = vld [vmem:[%s13292_s26 + $0x1518] sm:$0xff]  }
 0x2a7   : > { %11954 = vmatprep.subr.bf16.mxu1 %v12960_v6  ;;  %v13000_v6 = vld [vmem:[%s13292_s26 + $0x15e0] sm:$0xff]  }
 0x2a8   : > { %11933 = vmatpush3.bf16.msra.mxu0 %v12959_v5  ;;  %v12997_v5 = vld [vmem:[%s13292_s26 + $0x1598] sm:$0xff]  }
 0x2a9   : > { %11934 = vmatprep.subr.bf16.mxu0 %v12962_v8  ;;  %v13002_v8 = vld [vmem:[%s13292_s26 + $0x1568] sm:$0xff]  }
 0x2aa   : > { %11955 = vmatpush3.bf16.msra.mxu1 %v12961_v7  ;;  %v12999_v7 = vld [vmem:[%s13292_s26 + $0x1520] sm:$0xff]  }
 0x2ab   : > { %11956 = vmatprep.subr.bf16.mxu1 %v12964_v10  ;;  %v13004_v10 = vld [vmem:[%s13292_s26 + $0x15e8] sm:$0xff]  }
 0x2ac   : > { %11935 = vmatpush3.bf16.msra.mxu0 %v12963_v9  ;;  %v13001_v9 = vld [vmem:[%s13292_s26 + $0x15a0] sm:$0xff]  }
 0x2ad   : > { %11936 = vmatprep.subr.bf16.mxu0 %v12966_v12 }
 0x2ae   : > { %11957 = vmatpush3.bf16.msra.mxu1 %v12965_v11  ;;  %v13003_v11 = vld [vmem:[%s13292_s26 + $0x1528] sm:$0xff]  }
 0x2af   : > { %11958 = vmatprep.subr.bf16.mxu1 %v12968_v14 }
 0x2b0   : > { %11937 = vmatpush3.bf16.msra.mxu0 %v12967_v13  ;;  %v13006_v13 = vld [vmem:[%s13292_s26 + $0x1570] sm:$0xff]  }
 0x2b1   : > { %11938 = vmatprep.subr.bf16.mxu0 %v12970_v16 }
 0x2b2   : > { %v11636_v21 = vpop.f32.mrb[52].mxu0  ;;  %11959 = vmatpush3.bf16.msra.mxu1 %v12969_v15  ;;  %v13005_v15 = vld [vmem:[%s13292_s26 + $0x15a8] sm:$0xff]  }
 0x2b3   : > { %v11637_v23 = vpop.f32.mrb[53].mxu0  ;;  %11960 = vmatprep.subr.bf16.mxu1 %v12972_v18 }
 0x2b4   : > { %v11638_v25 = vadd.f32 %v11637_v23, %v11636_v21  ;;  %v11639_v26 = vpop.f32.mrb[54].mxu0  ;;  %v11658_v27 = vpop.f32.mrb[52].mxu1  ;;  %11939 = vmatpush3.bf16.msra.mxu0 %v12971_v17 }
 0x2b5   : > { %v11640_v31 = vpop.f32.mrb[55].mxu0  ;;  %v11659_v32 = vpop.f32.mrb[53].mxu1  ;;  %11940 = vmatprep.subr.bf16.mxu0 %v12974_v20  ;;  %v13008_v20 = vld [vmem:[%s13292_s26 + $0x15f0] sm:$0xff]  }
 0x2b6   : > { %v8937_v33 = vadd.f32 %v11638_v25, %v14090_v57  ;;  %v11660_v34 = vadd.f32 %v11659_v32, %v11658_v27  ;;  %11961 = vmatpush3.bf16.msra.mxu1 %v12973_v19  ;;  %v11661_v30 = vpop.f32.mrb[54].mxu1  ;;  %v2543_v57 = vrot.slane %v2515_v52, %v13330_v42  ;;  %v13007_v19 = vld [vmem:[%s13292_s26 + $0x1530] sm:$0xff]   ;;  %v13010_v25 = vld [vmem:[%s13292_s26 + $0x1578] sm:$0xff]   ;;  %v13031_v52 = vld [vmem:[%s13292_s26 + $0x1660] sm:$0xff]  }
 0x2b7   : > { %11962 = vmatprep.subr.bf16.mxu1 %v12976_v24  ;;  %v11662_v37 = vpop.f32.mrb[55].mxu1  ;;  %v13009_v27 = vld [vmem:[%s13292_s26 + $0x15b0] sm:$0xff]   ;;  %v13012_v31 = vld [vmem:[%s13292_s26 + $0x15f8] sm:$0xff]   ;;  %v13017_v30 = vld [vmem:[%s13292_s26 + $0x16c0] sm:$0xff]  }
 0x2b8   : > { %v14127_v38 = vadd.f32 %v11660_v34, %v8937_v33  ;;  %11941 = vmatpush3.bf16.msra.mxu0 %v12975_v22  ;;  %v2547_v60 = vcombine.high %v2543_v57, %v2543_v57  ;;  %v13011_v32 = vld [vmem:[%s13292_s26 + $0x1538] sm:$0xff]   ;;  %v2529_v33 = vrot.slane %v14135_v47, %v13330_v42  ;;  %v13015_v34 = vld [vmem:[%s13292_s26 + $0x1640] sm:$0xff]  }
 0x2b9   : > { %11942 = vmatprep.subr.bf16.mxu0 %v12978_v29  ;;  %v13027_v47 = vld [vmem:[%s13292_s26 + $0x1658] sm:$0xff]  }
 0x2ba   : > { %11963 = vmatpush3.bf16.msra.mxu1 %v12977_v28  ;;  %v2545_v37 = vcombine.high %v2529_v33, %v2529_v33 }
 0x2bb   : > { %11964 = vmatprep.subr.bf16.mxu1 %v12980_v36  ;;  %v13016_v36 = vld [vmem:[%s13292_s26 + $0x1600] sm:$0xff]  }
 0x2bc   : > { %11943 = vmatpush3.bf16.msra.mxu0 %v12979_v35  ;;  %v13014_v35 = vld [vmem:[%s13292_s26 + $0x15b8] sm:$0xff]  }
 0x2bd   : > { %11972 = vmatprep.subr.bf16.mxu0 %v12982_v44  ;;  %v13022_v44 = vld [vmem:[%s13292_s26 + $0x1688] sm:$0xff]  }
 0x2be   : > { %11965 = vmatpush3.bf16.msra.mxu1 %v12981_v41  ;;  %v13020_v41 = vld [vmem:[%s13292_s26 + $0x1608] sm:$0xff]  }
 0x2bf   : > { %11994 = vmatprep.subr.bf16.mxu1 %v12984_v48  ;;  %9495 = vmatmul.mubr.bf16.vlgmr.msra.gmra.mrb[80].mxu0 %v2522_v46  ;;  %v13024_v46 = vld [vmem:[%s13292_s26 + $0x1610] sm:$0xff]  }
 0x2c0   : > { %11973 = vmatpush3.bf16.msra.mxu0 %v12983_v50  ;;  %9574 = vmatprep.mubr.bf16.mxu0 %v2543_v57  ;;  %v13026_v48 = vld [vmem:[%s13292_s26 + $0x1690] sm:$0xff]   ;;  %v13028_v50 = vld [vmem:[%s13292_s26 + $0x1618] sm:$0xff]   ;;  %v13034_v57 = vld [vmem:[%s13292_s26 + $0x16a0] sm:$0xff]  }
 0x2c1   : > { %9535 = vmatmul.mubr.bf16.vlgmr.msra.gmra.mrb[80].mxu1 %v2544_v53  ;;  %11974 = vmatprep.subr.bf16.mxu0 %v12986_v54  ;;  %v13030_v53 = vld [vmem:[%s13292_s26 + $0x1698] sm:$0xff]   ;;  %v13033_v54 = vld [vmem:[%s13292_s26 + $0x16e0] sm:$0xff]  }
 0x2c2   : > { %11995 = vmatpush3.bf16.msra.mxu1 %v12985_v56  ;;  %9614 = vmatprep.mubr.bf16.mxu1 %v2547_v60  ;;  %v13035_v56 = vld [vmem:[%s13292_s26 + $0x1668] sm:$0xff]  }
 0x2c3   : > { %11996 = vmatprep.subr.bf16.mxu1 %v12988_v58  ;;  %v13037_v58 = vld [vmem:[%s13292_s26 + $0x16e8] sm:$0xff]  }
 0x2c4   : > { %11975 = vmatpush3.bf16.msra.mxu0 %v12987_v59  ;;  %v13036_v59 = vld [vmem:[%s13292_s26 + $0x1628] sm:$0xff]  }
 0x2c5   : > { %11976 = vmatprep.subr.bf16.mxu0 %v12990_v51  ;;  %v13039_v51 = vld [vmem:[%s13292_s26 + $0x1670] sm:$0xff]  }
 0x2c6   : > { %11997 = vmatpush3.bf16.msra.mxu1 %v12989_v61 }
 0x2c7   : > { %11998 = vmatprep.subr.bf16.mxu1 %v12992_v62  ;;  %v13038_v62 = vld [vmem:[%s13292_s26 + $0x16a8] sm:$0xff]  }
 0x2c8   : > { %11977 = vmatpush3.bf16.msra.mxu0 %v12991_v63 }
 0x2c9   : > { %11978 = vmatprep.subr.bf16.mxu0 %v12994_v0 }
 0x2ca   : > { %11999 = vmatpush3.bf16.msra.mxu1 %v12993_v1 }
 0x2cb   : > { %12000 = vmatprep.subr.bf16.mxu1 %v12996_v2  ;;  %v13040_v2 = vld [vmem:[%s13292_s26 + $0x1630] sm:$0xff]  }
 0x2cc   : > { %11979 = vmatpush3.bf16.msra.mxu0 %v12995_v3  ;;  %v13041_v3 = vld [vmem:[%s13292_s26 + $0x16f0] sm:$0xff]  }
 0x2cd   : > { %11980 = vmatprep.subr.bf16.mxu0 %v12998_v4 }
 0x2ce   : > { %12001 = vmatpush3.bf16.msra.mxu1 %v12997_v5 }
 0x2cf   : > { %12002 = vmatprep.subr.bf16.mxu1 %v13000_v6  ;;  %v13042_v6 = vld [vmem:[%s13292_s26 + $0x16b0] sm:$0xff]  }
 0x2d0   : > { %11981 = vmatpush3.bf16.msra.mxu0 %v12999_v7 }
 0x2d1   : > { %11982 = vmatprep.subr.bf16.mxu0 %v13002_v8 }
 0x2d2   : > { %v11680_v12 = vpop.f32.mrb[56].mxu0  ;;  %12003 = vmatpush3.bf16.msra.mxu1 %v13001_v9  ;;  %v13043_v9 = vld [vmem:[%s13292_s26 + $0x1678] sm:$0xff]  }
 0x2d3   : > { %v11681_v14 = vpop.f32.mrb[57].mxu0  ;;  %12004 = vmatprep.subr.bf16.mxu1 %v13004_v10 }
 0x2d4   : > { %v11682_v16 = vadd.f32 %v11681_v14, %v11680_v12  ;;  %v11683_v17 = vpop.f32.mrb[58].mxu0  ;;  %v11702_v18 = vpop.f32.mrb[56].mxu1  ;;  %11983 = vmatpush3.bf16.msra.mxu0 %v13003_v11  ;;  %v13044_v11 = vld [vmem:[%s13292_s26 + $0x1638] sm:$0xff]  }
 0x2d5   : > { %v11684_v21 = vpop.f32.mrb[59].mxu0  ;;  %v11703_v22 = vpop.f32.mrb[57].mxu1  ;;  %11984 = vmatprep.subr.bf16.mxu0 %v13006_v13  ;;  %v13045_v14 = vld [vmem:[%s13292_s26 + $0x16f8] sm:$0xff]  }
 0x2d6   : > { %v9017_v23 = vadd.f32 %v11682_v16, %v14127_v38  ;;  %v11704_v24 = vadd.f32 %v11703_v22, %v11702_v18  ;;  %v11705_v26 = vpop.f32.mrb[58].mxu1  ;;  %12005 = vmatpush3.bf16.msra.mxu1 %v13005_v15  ;;  %v13019_v38 = vld [vmem:[%s13292_s26 + $0x1648] sm:$0xff]   ;;  %v296_v15 = vld [vmem:[%s13271_s27 + $0x58] sm:$0xff]  ;;  %v13048_v22 = vld [vmem:[%s13292_s26 + $0x1700] sm:$0xff]  }
 0x2d7   : > { %v11706_v28 = vpop.f32.mrb[59].mxu1  ;;  %12006 = vmatprep.subr.bf16.mxu1 %v13008_v20  ;;  %v2555_v16 = vrot.slane %v296_v15, %v13330_v42  ;;  %v13046_v17 = vld [vmem:[%s13292_s26 + $0x16b8] sm:$0xff]   ;;  %v2548_v18 = vcombine.high %v296_v15, %v296_v15  ;;  %v13050_v26 = vld [vmem:[%s13292_s26 + $0x1780] sm:$0xff]   ;;  %v13084_v15 = vld [vmem:[%s13292_s26 + $0x1848] sm:$0xff]  }
 0x2d8   : > { %v14170_v29 = vadd.f32 %v11704_v24, %v9017_v23  ;;  %11985 = vmatpush3.bf16.msra.mxu0 %v13007_v19  ;;  %v13047_v19 = vld [vmem:[%s13292_s26 + $0x1740] sm:$0xff]  }
 0x2d9   : > { %11986 = vmatprep.subr.bf16.mxu0 %v13010_v25  ;;  %v2563_v20 = vcombine.high %v2555_v16, %v2555_v16  ;;  %v2571_v21 = vrot.slane %v2555_v16, %v13330_v42  ;;  %v14218_v23 = vrot.slane %v2548_v18, %v13330_v42  ;;  %v13049_v24 = vld [vmem:[%s13292_s26 + $0x17c0] sm:$0xff]   ;;  %v13085_v16 = vld [vmem:[%s13292_s26 + $0x1808] sm:$0xff]  }
 0x2da   : > { %12007 = vmatpush3.bf16.msra.mxu1 %v13009_v27  ;;  %v13087_v18 = vld [vmem:[%s13292_s26 + $0x1888] sm:$0xff]  }
 0x2db   : > { %12008 = vmatprep.subr.bf16.mxu1 %v13012_v31  ;;  %v2585_v25 = vrot.slane %v2563_v20, %v13330_v42  ;;  %v2564_v27 = vcombine.high %v14218_v23, %v14218_v23  ;;  %v2593_v28 = vcombine.high %v2571_v21, %v2571_v21  ;;  %v13089_v20 = vld [vmem:[%s13292_s26 + $0x1810] sm:$0xff]  }
 0x2dc   : > { %11987 = vmatpush3.bf16.msra.mxu0 %v13011_v32  ;;  %v13052_v32 = vld [vmem:[%s13292_s26 + $0x1708] sm:$0xff]  }
 0x2dd   : > { %12016 = vmatprep.subr.bf16.mxu0 %v13015_v34  ;;  %v2595_v31 = vcombine.high %v2585_v25, %v2585_v25  ;;  %v13053_v34 = vld [vmem:[%s13292_s26 + $0x17c8] sm:$0xff]  }
 0x2de   : > { %12009 = vmatpush3.bf16.msra.mxu1 %v13014_v35  ;;  %v13054_v35 = vld [vmem:[%s13292_s26 + $0x1788] sm:$0xff]  }
 0x2df   : > { %9575 = vmatmul.mubr.bf16.vlgmr.msra.gmra.mrb[84].mxu0 %v2529_v33  ;;  %12038 = vmatprep.subr.bf16.mxu1 %v13017_v30  ;;  %v2592_v33 = vrot.slane %v2564_v27, %v13330_v42  ;;  %v13096_v27 = vld [vmem:[%s13292_s26 + $0x1860] sm:$0xff]  }
 0x2e0   : > { %12017 = vmatpush3.bf16.msra.mxu0 %v13016_v36  ;;  %9654 = vmatprep.mubr.bf16.mxu0 %v2585_v25  ;;  %v13055_v36 = vld [vmem:[%s13292_s26 + $0x1750] sm:$0xff]   ;;  %v13094_v25 = vld [vmem:[%s13292_s26 + $0x18d8] sm:$0xff]  }
 0x2e1   : > { %9615 = vmatmul.mubr.bf16.vlgmr.msra.gmra.mrb[84].mxu1 %v2545_v37  ;;  %12018 = vmatprep.subr.bf16.mxu0 %v13019_v38  ;;  %v2596_v30 = vcombine.high %v2592_v33, %v2592_v33  ;;  %v13056_v37 = vld [vmem:[%s13292_s26 + $0x1710] sm:$0xff]  }
 0x2e2   : > { %12039 = vmatpush3.bf16.msra.mxu1 %v13018_v39  ;;  %9694 = vmatprep.mubr.bf16.mxu1 %v2595_v31  ;;  %v13057_v38 = vld [vmem:[%s13292_s26 + $0x17d0] sm:$0xff]   ;;  %v13099_v31 = vld [vmem:[%s13292_s26 + $0x18a0] sm:$0xff]  }
 0x2e3   : > { %12040 = vmatprep.subr.bf16.mxu1 %v13021_v40  ;;  %v13058_v39 = vld [vmem:[%s13292_s26 + $0x1790] sm:$0xff]   ;;  %v13059_v40 = vld [vmem:[%s13292_s26 + $0x1758] sm:$0xff]  }
 0x2e4   : > { %12019 = vmatpush3.bf16.msra.mxu0 %v13020_v41  ;;  %v13060_v41 = vld [vmem:[%s13292_s26 + $0x1718] sm:$0xff]  }
 0x2e5   : > { %12020 = vmatprep.subr.bf16.mxu0 %v13023_v43  ;;  %v13061_v43 = vld [vmem:[%s13292_s26 + $0x17d8] sm:$0xff]  }
 0x2e6   : > { %12041 = vmatpush3.bf16.msra.mxu1 %v13022_v44  ;;  %v13062_v44 = vld [vmem:[%s13292_s26 + $0x1798] sm:$0xff]  }
 0x2e7   : > { %12042 = vmatprep.subr.bf16.mxu1 %v13025_v45  ;;  %v13063_v45 = vld [vmem:[%s13292_s26 + $0x1760] sm:$0xff]  }
 0x2e8   : > { %12021 = vmatpush3.bf16.msra.mxu0 %v13024_v46  ;;  %v13064_v46 = vld [vmem:[%s13292_s26 + $0x1720] sm:$0xff]  }
 0x2e9   : > { %12022 = vmatprep.subr.bf16.mxu0 %v13027_v47  ;;  %v13065_v47 = vld [vmem:[%s13292_s26 + $0x17e0] sm:$0xff]  }
 0x2ea   : > { %12043 = vmatpush3.bf16.msra.mxu1 %v13026_v48  ;;  %v13066_v48 = vld [vmem:[%s13292_s26 + $0x17a0] sm:$0xff]  }
 0x2eb   : > { %12044 = vmatprep.subr.bf16.mxu1 %v13029_v49  ;;  %v13067_v49 = vld [vmem:[%s13292_s26 + $0x1768] sm:$0xff]  }
 0x2ec   : > { %12023 = vmatpush3.bf16.msra.mxu0 %v13028_v50  ;;  %v13068_v50 = vld [vmem:[%s13292_s26 + $0x1728] sm:$0xff]  }
 0x2ed   : > { %12024 = vmatprep.subr.bf16.mxu0 %v13031_v52  ;;  %v13069_v52 = vld [vmem:[%s13292_s26 + $0x17e8] sm:$0xff]  }
 0x2ee   : > { %12045 = vmatpush3.bf16.msra.mxu1 %v13030_v53 }
 0x2ef   : > { %12046 = vmatprep.subr.bf16.mxu1 %v13033_v54  ;;  %v13070_v54 = vld [vmem:[%s13292_s26 + $0x17a8] sm:$0xff]  }
 0x2f0   : > { %12025 = vmatpush3.bf16.msra.mxu0 %v13032_v55 }
 0x2f1   : > { %12026 = vmatprep.subr.bf16.mxu0 %v13035_v56  ;;  %v13071_v56 = vld [vmem:[%s13292_s26 + $0x1770] sm:$0xff]  }
 0x2f2   : > { %v11724_v60 = vpop.f32.mrb[60].mxu0  ;;  %12047 = vmatpush3.bf16.msra.mxu1 %v13034_v57 }
 0x2f3   : > { %v11725_v61 = vpop.f32.mrb[61].mxu0  ;;  %12048 = vmatprep.subr.bf16.mxu1 %v13037_v58 }
 0x2f4   : > { %v11726_v63 = vadd.f32 %v11725_v61, %v11724_v60  ;;  %v11727_v0 = vpop.f32.mrb[62].mxu0  ;;  %v11746_v1 = vpop.f32.mrb[60].mxu1  ;;  %12027 = vmatpush3.bf16.msra.mxu0 %v13036_v59  ;;  %v13072_v60 = vld [vmem:[%s13292_s26 + $0x1730] sm:$0xff]  }
 0x2f5   : > { %v11728_v4 = vpop.f32.mrb[63].mxu0  ;;  %v11747_v5 = vpop.f32.mrb[61].mxu1  ;;  %12028 = vmatprep.subr.bf16.mxu0 %v13039_v51  ;;  %v13073_v51 = vld [vmem:[%s13292_s26 + $0x17f0] sm:$0xff]  }
 0x2f6   : > { %v9097_v7 = vadd.f32 %v11726_v63, %v14170_v29  ;;  %v11748_v8 = vadd.f32 %v11747_v5, %v11746_v1  ;;  %v11749_v10 = vpop.f32.mrb[62].mxu1  ;;  %12049 = vmatpush3.bf16.msra.mxu1 %v13038_v62  ;;  %v13051_v29 = vld [vmem:[%s13292_s26 + $0x1748] sm:$0xff]   ;;  %v13074_v1 = vld [vmem:[%s13292_s26 + $0x17b0] sm:$0xff]  }
 0x2f7   : > { %v11750_v12 = vpop.f32.mrb[63].mxu1  ;;  %12050 = vmatprep.subr.bf16.mxu1 %v13041_v3  ;;  %v13075_v3 = vld [vmem:[%s13292_s26 + $0x1778] sm:$0xff]   ;;  %v13080_v10 = vld [vmem:[%s13292_s26 + $0x1840] sm:$0xff]  }
 0x2f8   : > { %v14208_v13 = vadd.f32 %v11748_v8, %v9097_v7  ;;  %12029 = vmatpush3.bf16.msra.mxu0 %v13040_v2  ;;  %v13077_v7 = vld [vmem:[%s13292_s26 + $0x17f8] sm:$0xff]   ;;  %v13082_v12 = vld [vmem:[%s13292_s26 + $0x18c0] sm:$0xff]  }
 0x2f9   : > { %12030 = vmatprep.subr.bf16.mxu0 %v13043_v9  ;;  %v13079_v8 = vld [vmem:[%s13292_s26 + $0x17b8] sm:$0xff]   ;;  %v2578_v9 = vrot.slane %v14218_v23, %v13330_v42 }
 0x2fa   : > { %12051 = vmatpush3.bf16.msra.mxu1 %v13042_v6  ;;  %v13076_v6 = vld [vmem:[%s13292_s26 + $0x1738] sm:$0xff]  }
 0x2fb   : > { %12052 = vmatprep.subr.bf16.mxu1 %v13045_v14  ;;  %v2594_v14 = vcombine.high %v2578_v9, %v2578_v9  ;;  %v13092_v23 = vld [vmem:[%s13292_s26 + $0x1858] sm:$0xff]  }
 0x2fc   : > { %12031 = vmatpush3.bf16.msra.mxu0 %v13044_v11  ;;  %v13081_v11 = vld [vmem:[%s13292_s26 + $0x1800] sm:$0xff]  }
 0x2fd   : > { %12060 = vmatprep.subr.bf16.mxu0 %v13047_v19  ;;  %v13088_v19 = vld [vmem:[%s13292_s26 + $0x1850] sm:$0xff]  }
 0x2fe   : > { %12053 = vmatpush3.bf16.msra.mxu1 %v13046_v17  ;;  %v13086_v17 = vld [vmem:[%s13292_s26 + $0x18c8] sm:$0xff]  }
 0x2ff   : > { %12082 = vmatprep.subr.bf16.mxu1 %v13049_v24  ;;  %9655 = vmatmul.mubr.bf16.vlgmr.msra.gmra.mrb[88].mxu0 %v2571_v21  ;;  %v13090_v21 = vld [vmem:[%s13292_s26 + $0x18d0] sm:$0xff]   ;;  %v13093_v24 = vld [vmem:[%s13292_s26 + $0x1818] sm:$0xff]  }
 0x300   : > { %12061 = vmatpush3.bf16.msra.mxu0 %v13048_v22  ;;  %9734 = vmatprep.mubr.bf16.mxu0 %v2592_v33  ;;  %v13091_v22 = vld [vmem:[%s13292_s26 + $0x1890] sm:$0xff]   ;;  %v13101_v33 = vld [vmem:[%s13292_s26 + $0x1828] sm:$0xff]  }
 0x301   : > { %9695 = vmatmul.mubr.bf16.vlgmr.msra.gmra.mrb[88].mxu1 %v2593_v28  ;;  %12062 = vmatprep.subr.bf16.mxu0 %v13051_v29  ;;  %v13097_v28 = vld [vmem:[%s13292_s26 + $0x1820] sm:$0xff]  }
 0x302   : > { %12083 = vmatpush3.bf16.msra.mxu1 %v13050_v26  ;;  %9774 = vmatprep.mubr.bf16.mxu1 %v2596_v30  ;;  %v13095_v26 = vld [vmem:[%s13292_s26 + $0x1898] sm:$0xff]   ;;  %v13098_v29 = vld [vmem:[%s13292_s26 + $0x18e0] sm:$0xff]   ;;  %v13103_v30 = vld [vmem:[%s13292_s26 + $0x18a8] sm:$0xff]  }
 0x303   : > { %12084 = vmatprep.subr.bf16.mxu1 %v13053_v34  ;;  %v13102_v34 = vld [vmem:[%s13292_s26 + $0x18e8] sm:$0xff]  }
 0x304   : > { %12063 = vmatpush3.bf16.msra.mxu0 %v13052_v32  ;;  %v13100_v32 = vld [vmem:[%s13292_s26 + $0x1868] sm:$0xff]  }
 0x305   : > { %12064 = vmatprep.subr.bf16.mxu0 %v13055_v36 }
 0x306   : > { %12085 = vmatpush3.bf16.msra.mxu1 %v13054_v35 }
 0x307   : > { %12086 = vmatprep.subr.bf16.mxu1 %v13057_v38 }
 0x308   : > { %12065 = vmatpush3.bf16.msra.mxu0 %v13056_v37  ;;  %v13104_v37 = vld [vmem:[%s13292_s26 + $0x1870] sm:$0xff]  }
 0x309   : > { %12066 = vmatprep.subr.bf16.mxu0 %v13059_v40 }
 0x30a   : > { %12087 = vmatpush3.bf16.msra.mxu1 %v13058_v39 }
 0x30b   : > { %12088 = vmatprep.subr.bf16.mxu1 %v13061_v43  ;;  %v13106_v43 = vld [vmem:[%s13292_s26 + $0x18f0] sm:$0xff]  }
 0x30c   : > { %12067 = vmatpush3.bf16.msra.mxu0 %v13060_v41  ;;  %v13105_v41 = vld [vmem:[%s13292_s26 + $0x1830] sm:$0xff]  }
 0x30d   : > { %12068 = vmatprep.subr.bf16.mxu0 %v13063_v45 }
 0x30e   : > { %12089 = vmatpush3.bf16.msra.mxu1 %v13062_v44 }
 0x30f   : > { %12090 = vmatprep.subr.bf16.mxu1 %v13065_v47 }
 0x310   : > { %12069 = vmatpush3.bf16.msra.mxu0 %v13064_v46 }
 0x311   : > { %12070 = vmatprep.subr.bf16.mxu0 %v13067_v49 }
 0x312   : > { %v11768_v53 = vpop.f32.mrb[64].mxu0  ;;  %12091 = vmatpush3.bf16.msra.mxu1 %v13066_v48  ;;  %v13107_v48 = vld [vmem:[%s13292_s26 + $0x18b0] sm:$0xff]  }
 0x313   : > { %v11769_v55 = vpop.f32.mrb[65].mxu0  ;;  %12092 = vmatprep.subr.bf16.mxu1 %v13069_v52 }
 0x314   : > { %v11770_v57 = vadd.f32 %v11769_v55, %v11768_v53  ;;  %v11771_v58 = vpop.f32.mrb[66].mxu0  ;;  %v11790_v59 = vpop.f32.mrb[64].mxu1  ;;  %12071 = vmatpush3.bf16.msra.mxu0 %v13068_v50  ;;  %v13108_v50 = vld [vmem:[%s13292_s26 + $0x1878] sm:$0xff]  }
 0x315   : > { %v11772_v61 = vpop.f32.mrb[67].mxu0  ;;  %v11791_v62 = vpop.f32.mrb[65].mxu1  ;;  %12072 = vmatprep.subr.bf16.mxu0 %v13071_v56  ;;  %v13110_v55 = vld [vmem:[%s13292_s26 + $0x18f8] sm:$0xff]   ;;  %v297_v56 = vld [vmem:[%s13271_s27 + $0x60] sm:$0xff] }
 0x316   : > { %v9177_v63 = vadd.f32 %v11770_v57, %v14208_v13  ;;  %v11792_v0 = vadd.f32 %v11791_v62, %v11790_v59  ;;  %v11793_v2 = vpop.f32.mrb[66].mxu1  ;;  %12093 = vmatpush3.bf16.msra.mxu1 %v13070_v54  ;;  %v13083_v13 = vld [vmem:[%s13292_s26 + $0x1880] sm:$0xff]   ;;  %v13109_v54 = vld [vmem:[%s13292_s26 + $0x1838] sm:$0xff]   ;;  %v2604_v57 = vrot.slane %v297_v56, %v13330_v42  ;;  %v2597_v59 = vcombine.high %v297_v56, %v297_v56  ;;  %v13149_v56 = vld [vmem:[%s13292_s26 + $0x1a50] sm:$0xff]  }
 0x317   : > { %v11794_v4 = vpop.f32.mrb[67].mxu1  ;;  %12094 = vmatprep.subr.bf16.mxu1 %v13073_v51  ;;  %v13111_v58 = vld [vmem:[%s13292_s26 + $0x18b8] sm:$0xff]  }
 0x318   : > { %v14252_v5 = vadd.f32 %v11792_v0, %v9177_v63  ;;  %12073 = vmatpush3.bf16.msra.mxu0 %v13072_v60  ;;  %v13112_v60 = vld [vmem:[%s13292_s26 + $0x1940] sm:$0xff]   ;;  %v2612_v51 = vcombine.high %v2604_v57, %v2604_v57  ;;  %v2620_v61 = vrot.slane %v2604_v57, %v13330_v42  ;;  %v14299_v62 = vrot.slane %v2597_v59, %v13330_v42  ;;  %v13116_v4 = vld [vmem:[%s13292_s26 + $0x1948] sm:$0xff]   ;;  %v13150_v57 = vld [vmem:[%s13292_s26 + $0x1a10] sm:$0xff]  }
 0x319   : > { %12074 = vmatprep.subr.bf16.mxu0 %v13075_v3  ;;  %v13114_v63 = vld [vmem:[%s13292_s26 + $0x19c0] sm:$0xff]   ;;  %v13152_v59 = vld [vmem:[%s13292_s26 + $0x1a18] sm:$0xff]  }
 0x31a   : > { %12095 = vmatpush3.bf16.msra.mxu1 %v13074_v1  ;;  %v2634_v0 = vrot.slane %v2612_v51, %v13330_v42  ;;  %v13113_v1 = vld [vmem:[%s13292_s26 + $0x1900] sm:$0xff]   ;;  %v2613_v2 = vcombine.high %v14299_v62, %v14299_v62  ;;  %v2642_v3 = vcombine.high %v2620_v61, %v2620_v61  ;;  %v10193_v51 = vld.sshfl [vmem:[%s13271_s27 + $0x68] sm:$0x11 pattern:$0x75316420] }
 0x31b   : > { %12096 = vmatprep.subr.bf16.mxu1 %v13077_v7 }
 0x31c   : > { %12075 = vmatpush3.bf16.msra.mxu0 %v13076_v6  ;;  %v13115_v6 = vld [vmem:[%s13292_s26 + $0x1980] sm:$0xff]   ;;  %v2641_v7 = vrot.slane %v2613_v2, %v13330_v42 }
 0x31d   : > { %12104 = vmatprep.subr.bf16.mxu0 %v13080_v10 }
 0x31e   : > { %12097 = vmatpush3.bf16.msra.mxu1 %v13079_v8  ;;  %v13118_v8 = vld [vmem:[%s13292_s26 + $0x19c8] sm:$0xff]   ;;  %v2645_v10 = vcombine.high %v2641_v7, %v2641_v7 }
 0x31f   : > { %9735 = vmatmul.mubr.bf16.vlgmr.msra.gmra.mrb[92].mxu0 %v2578_v9  ;;  %12126 = vmatprep.subr.bf16.mxu1 %v13082_v12  ;;  %v13117_v9 = vld [vmem:[%s13292_s26 + $0x1908] sm:$0xff]  }
 0x320   : > { %12105 = vmatpush3.bf16.msra.mxu0 %v13081_v11  ;;  %9814 = vmatprep.mubr.bf16.mxu0 %v2634_v0  ;;  %v13120_v11 = vld [vmem:[%s13292_s26 + $0x1950] sm:$0xff]   ;;  %v13119_v12 = vld [vmem:[%s13292_s26 + $0x1988] sm:$0xff]  }
 0x321   : > { %9775 = vmatmul.mubr.bf16.vlgmr.msra.gmra.mrb[92].mxu1 %v2594_v14  ;;  %12106 = vmatprep.subr.bf16.mxu0 %v13084_v15  ;;  %v13121_v14 = vld [vmem:[%s13292_s26 + $0x1910] sm:$0xff]   ;;  %v13124_v15 = vld [vmem:[%s13292_s26 + $0x1958] sm:$0xff]  }
 0x322   : > { %12127 = vmatpush3.bf16.msra.mxu1 %v13083_v13  ;;  %v13122_v13 = vld [vmem:[%s13292_s26 + $0x19d0] sm:$0xff]  }
 0x323   : > { %12128 = vmatprep.subr.bf16.mxu1 %v13086_v17  ;;  %v13126_v17 = vld [vmem:[%s13292_s26 + $0x19d8] sm:$0xff]  }
 0x324   : > { %12107 = vmatpush3.bf16.msra.mxu0 %v13085_v16  ;;  %v13123_v16 = vld [vmem:[%s13292_s26 + $0x1990] sm:$0xff]  }
 0x325   : > { %12108 = vmatprep.subr.bf16.mxu0 %v13088_v19  ;;  %v13128_v19 = vld [vmem:[%s13292_s26 + $0x1960] sm:$0xff]  }
 0x326   : > { %12129 = vmatpush3.bf16.msra.mxu1 %v13087_v18  ;;  %v13125_v18 = vld [vmem:[%s13292_s26 + $0x1918] sm:$0xff]  }
 0x327   : > { %12130 = vmatprep.subr.bf16.mxu1 %v13090_v21  ;;  %v13130_v21 = vld [vmem:[%s13292_s26 + $0x19e0] sm:$0xff]  }
 0x328   : > { %12109 = vmatpush3.bf16.msra.mxu0 %v13089_v20  ;;  %v13127_v20 = vld [vmem:[%s13292_s26 + $0x1998] sm:$0xff]  }
 0x329   : > { %12110 = vmatprep.subr.bf16.mxu0 %v13092_v23  ;;  %v13132_v23 = vld [vmem:[%s13292_s26 + $0x1968] sm:$0xff]  }
 0x32a   : > { %12131 = vmatpush3.bf16.msra.mxu1 %v13091_v22  ;;  %v13129_v22 = vld [vmem:[%s13292_s26 + $0x1920] sm:$0xff]  }
 0x32b   : > { %12132 = vmatprep.subr.bf16.mxu1 %v13094_v25 }
 0x32c   : > { %12111 = vmatpush3.bf16.msra.mxu0 %v13093_v24  ;;  %v13131_v24 = vld [vmem:[%s13292_s26 + $0x19a0] sm:$0xff]  }
 0x32d   : > { %12112 = vmatprep.subr.bf16.mxu0 %v13096_v27 }
 0x32e   : > { %12133 = vmatpush3.bf16.msra.mxu1 %v13095_v26  ;;  %v13134_v26 = vld [vmem:[%s13292_s26 + $0x19e8] sm:$0xff]  }
 0x32f   : > { %12134 = vmatprep.subr.bf16.mxu1 %v13098_v29 }
 0x330   : > { %12113 = vmatpush3.bf16.msra.mxu0 %v13097_v28  ;;  %v13133_v28 = vld [vmem:[%s13292_s26 + $0x1928] sm:$0xff]  }
 0x331   : > { %12114 = vmatprep.subr.bf16.mxu0 %v13100_v32 }
 0x332   : > { %v11812_v35 = vpop.f32.mrb[68].mxu0  ;;  %12135 = vmatpush3.bf16.msra.mxu1 %v13099_v31 }
 0x333   : > { %v11813_v36 = vpop.f32.mrb[69].mxu0  ;;  %12136 = vmatprep.subr.bf16.mxu1 %v13102_v34  ;;  %v13136_v34 = vld [vmem:[%s13292_s26 + $0x1970] sm:$0xff]  }
 0x334   : > { %v11814_v38 = vadd.f32 %v11813_v36, %v11812_v35  ;;  %v11815_v39 = vpop.f32.mrb[70].mxu0  ;;  %v11834_v40 = vpop.f32.mrb[68].mxu1  ;;  %12115 = vmatpush3.bf16.msra.mxu0 %v13101_v33  ;;  %v13135_v33 = vld [vmem:[%s13292_s26 + $0x19a8] sm:$0xff]  }
 0x335   : > { %v11816_v44 = vpop.f32.mrb[71].mxu0  ;;  %v11835_v45 = vpop.f32.mrb[69].mxu1  ;;  %12116 = vmatprep.subr.bf16.mxu0 %v13104_v37 }
 0x336   : > { %v9257_v46 = vadd.f32 %v11814_v38, %v14252_v5  ;;  %v11836_v47 = vadd.f32 %v11835_v45, %v11834_v40  ;;  %v11837_v49 = vpop.f32.mrb[70].mxu1  ;;  %12137 = vmatpush3.bf16.msra.mxu1 %v13103_v30  ;;  %v2644_v5 = vcombine.high %v2634_v0, %v2634_v0  ;;  %v13138_v38 = vld [vmem:[%s13292_s26 + $0x19f0] sm:$0xff]   ;;  %v13140_v44 = vld [vmem:[%s13292_s26 + $0x1978] sm:$0xff]   ;;  %v13155_v0 = vld [vmem:[%s13292_s26 + $0x1a68] sm:$0xff]  }
 0x337   : > { %v11838_v52 = vpop.f32.mrb[71].mxu1  ;;  %12138 = vmatprep.subr.bf16.mxu1 %v13106_v43  ;;  %v13137_v40 = vld [vmem:[%s13292_s26 + $0x1930] sm:$0xff]   ;;  %v13145_v49 = vld [vmem:[%s13292_s26 + $0x1a40] sm:$0xff]  }
 0x338   : > { %v14289_v53 = vadd.f32 %v11836_v47, %v9257_v46  ;;  %12117 = vmatpush3.bf16.msra.mxu0 %v13105_v41  ;;  %9854 = vmatprep.mubr.bf16.mxu1 %v2644_v5  ;;  %v13139_v45 = vld [vmem:[%s13292_s26 + $0x19b0] sm:$0xff]   ;;  %v13142_v46 = vld [vmem:[%s13292_s26 + $0x19f8] sm:$0xff]   ;;  %v13146_v52 = vld [vmem:[%s13292_s26 + $0x1a00] sm:$0xff]  }
 0x339   : > { %12118 = vmatprep.subr.bf16.mxu0 %v13108_v50  ;;  %v13141_v47 = vld [vmem:[%s13292_s26 + $0x1938] sm:$0xff]  }
 0x33a   : > { %12139 = vmatpush3.bf16.msra.mxu1 %v13107_v48  ;;  %v2627_v48 = vrot.slane %v14299_v62, %v13330_v42  ;;  %v13144_v50 = vld [vmem:[%s13292_s26 + $0x19b8] sm:$0xff]   ;;  %v13154_v62 = vld [vmem:[%s13292_s26 + $0x1a20] sm:$0xff]  }
 0x33b   : > { %12140 = vmatprep.subr.bf16.mxu1 %v13110_v55  ;;  %v13148_v55 = vld [vmem:[%s13292_s26 + $0x1a08] sm:$0xff]  }
 0x33c   : > { %12119 = vmatpush3.bf16.msra.mxu0 %v13109_v54  ;;  %v13147_v54 = vld [vmem:[%s13292_s26 + $0x1a48] sm:$0xff]  }
 0x33d   : > { %12148 = vmatprep.subr.bf16.mxu0 %v13112_v60  ;;  %v13153_v60 = vld [vmem:[%s13292_s26 + $0x1a60] sm:$0xff]  }
 0x33e   : > { %12141 = vmatpush3.bf16.msra.mxu1 %v13111_v58  ;;  %v13151_v58 = vld [vmem:[%s13292_s26 + $0x1a58] sm:$0xff]  }
 0x33f   : > { %12170 = vmatprep.subr.bf16.mxu1 %v13114_v63  ;;  %9815 = vmatmul.mubr.bf16.vlgmr.msra.gmra.mrb[96].mxu0 %v2620_v61  ;;  %v2653_v61 = vcombine.high %v10193_v51, %v10193_v51 }
 0x340   : > { %12149 = vmatpush3.bf16.msra.mxu0 %v13113_v1  ;;  %9894 = vmatprep.mubr.bf16.mxu0 %v2641_v7  ;;  %v13157_v7 = vld [vmem:[%s13292_s26 + $0x1a70] sm:$0xff]  }
 0x341   : > { %9855 = vmatmul.mubr.bf16.vlgmr.msra.gmra.mrb[96].mxu1 %v2642_v3  ;;  %12150 = vmatprep.subr.bf16.mxu0 %v13116_v4  ;;  %v2667_v63 = vrot.slane %v2653_v61, %v13330_v42  ;;  %v13156_v3 = vld [vmem:[%s13292_s26 + $0x1a28] sm:$0xff]  }
 0x342   : > { %12171 = vmatpush3.bf16.msra.mxu1 %v13115_v6  ;;  %9934 = vmatprep.mubr.bf16.mxu1 %v2645_v10 }
 0x343   : > { %12172 = vmatprep.subr.bf16.mxu1 %v13118_v8 }
 0x344   : > { %12151 = vmatpush3.bf16.msra.mxu0 %v13117_v9 }
 0x345   : > { %12152 = vmatprep.subr.bf16.mxu0 %v13120_v11 }
 0x346   : > { %12173 = vmatpush3.bf16.msra.mxu1 %v13119_v12 }
 0x347   : > { %12174 = vmatprep.subr.bf16.mxu1 %v13122_v13  ;;  %v13158_v13 = vld [vmem:[%s13292_s26 + $0x1a30] sm:$0xff]  }
 0x348   : > { %12153 = vmatpush3.bf16.msra.mxu0 %v13121_v14 }
 0x349   : > { %12154 = vmatprep.subr.bf16.mxu0 %v13124_v15 }
 0x34a   : > { %12175 = vmatpush3.bf16.msra.mxu1 %v13123_v16  ;;  %v13159_v16 = vld [vmem:[%s13292_s26 + $0x1a78] sm:$0xff]  }
 0x34b   : > { %12176 = vmatprep.subr.bf16.mxu1 %v13126_v17  ;;  %v13160_v17 = vld [vmem:[%s13292_s26 + $0x1a38] sm:$0xff]  }
 0x34c   : > { %12155 = vmatpush3.bf16.msra.mxu0 %v13125_v18  ;;  %v2660_v18 = vrot.slane %v10193_v51, %v13330_v42 }
 0x34d   : > { %12156 = vmatprep.subr.bf16.mxu0 %v13128_v19 }
 0x34e   : > { %12177 = vmatpush3.bf16.msra.mxu1 %v13127_v20 }
 0x34f   : > { %12178 = vmatprep.subr.bf16.mxu1 %v13130_v21 }
 0x350   : > { %12157 = vmatpush3.bf16.msra.mxu0 %v13129_v22 }
 0x351   : > { %12158 = vmatprep.subr.bf16.mxu0 %v13132_v23 }
 0x352   : > { %v11856_v25 = vpop.f32.mrb[72].mxu0  ;;  %12179 = vmatpush3.bf16.msra.mxu1 %v13131_v24 }
 0x353   : > { %v11857_v27 = vpop.f32.mrb[73].mxu0  ;;  %12180 = vmatprep.subr.bf16.mxu1 %v13134_v26 }
 0x354   : > { %v11858_v29 = vadd.f32 %v11857_v27, %v11856_v25  ;;  %v11859_v31 = vpop.f32.mrb[74].mxu0  ;;  %v11878_v32 = vpop.f32.mrb[72].mxu1  ;;  %12159 = vmatpush3.bf16.msra.mxu0 %v13133_v28 }
 0x355   : > { %v11860_v35 = vpop.f32.mrb[75].mxu0  ;;  %v11879_v30 = vpop.f32.mrb[73].mxu1  ;;  %12160 = vmatprep.subr.bf16.mxu0 %v13136_v34 }
 0x356   : > { %v9337_v36 = vadd.f32 %v11858_v29, %v14289_v53  ;;  %v11880_v37 = vadd.f32 %v11879_v30, %v11878_v32  ;;  %v11881_v39 = vpop.f32.mrb[74].mxu1  ;;  %12181 = vmatpush3.bf16.msra.mxu1 %v13135_v33  ;;  %v2643_v53 = vcombine.high %v2627_v48, %v2627_v48 }
 0x357   : > { %v11882_v41 = vpop.f32.mrb[75].mxu1  ;;  %12182 = vmatprep.subr.bf16.mxu1 %v13138_v38 }
 0x358   : > { %v9377_v43 = vadd.f32 %v11880_v37, %v9337_v36  ;;  %12161 = vmatpush3.bf16.msra.mxu0 %v13137_v40 }
 0x359   : > { %12162 = vmatprep.subr.bf16.mxu0 %v13140_v44 }
 0x35a   : > { %12183 = vmatpush3.bf16.msra.mxu1 %v13139_v45 }
 0x35b   : > { %12184 = vmatprep.subr.bf16.mxu1 %v13142_v46 }
 0x35c   : > { %12163 = vmatpush3.bf16.msra.mxu0 %v13141_v47 }
 0x35d   : > { %12192 = vmatprep.subr.bf16.mxu0 %v13145_v49 }
 0x35e   : > { %12185 = vmatpush3.bf16.msra.mxu1 %v13144_v50 }
 0x35f   : > { %9895 = vmatmul.mubr.bf16.vlgmr.msra.gmra.mrb[100].mxu0 %v2627_v48 }
 0x360   : > { %12193 = vmatpush3.bf16.msra.mxu0 %v13146_v52  ;;  %9974 = vmatprep.mubr.bf16.mxu0 %v2667_v63 }
 0x361   : > { %9935 = vmatmul.mubr.bf16.vlgmr.msra.gmra.mrb[100].mxu1 %v2643_v53  ;;  %12194 = vmatprep.subr.bf16.mxu0 %v13147_v54 }
 0x364   : > { %12195 = vmatpush3.bf16.msra.mxu0 %v13148_v55 }
 0x365   : > { %12196 = vmatprep.subr.bf16.mxu0 %v13149_v56 }
 0x368   : > { %12197 = vmatpush3.bf16.msra.mxu0 %v13150_v57 }
 0x369   : > { %12198 = vmatprep.subr.bf16.mxu0 %v13151_v58 }
 0x36c   : > { %12199 = vmatpush3.bf16.msra.mxu0 %v13152_v59 }
 0x36d   : > { %12200 = vmatprep.subr.bf16.mxu0 %v13153_v60 }
 0x370   : > { %12201 = vmatpush3.bf16.msra.mxu0 %v13154_v62 }
 0x371   : > { %12202 = vmatprep.subr.bf16.mxu0 %v13155_v0 }
 0x372   : > { %v11900_v1 = vpop.f32.mrb[76].mxu0 }
 0x373   : > { %v11901_v2 = vpop.f32.mrb[77].mxu0 }
 0x374   : > { %v11902_v4 = vadd.f32 %v11901_v2, %v11900_v1  ;;  %v11903_v5 = vpop.f32.mrb[78].mxu0  ;;  %v11922_v6 = vpop.f32.mrb[76].mxu1  ;;  %12203 = vmatpush3.bf16.msra.mxu0 %v13156_v3 }
 0x375   : > { %v11904_v8 = vpop.f32.mrb[79].mxu0  ;;  %v11923_v9 = vpop.f32.mrb[77].mxu1  ;;  %12204 = vmatprep.subr.bf16.mxu0 %v13157_v7 }
 0x376   : > { %v9417_v10 = vadd.f32 %v11902_v4, %v9377_v43  ;;  %v11924_v11 = vadd.f32 %v11923_v9, %v11922_v6  ;;  %v11925_v12 = vpop.f32.mrb[78].mxu1 }
 0x377   : > { %v11926_v14 = vpop.f32.mrb[79].mxu1 }
 0x378   : > { %v9457_v15 = vadd.f32 %v11924_v11, %v9417_v10  ;;  %12205 = vmatpush3.bf16.msra.mxu0 %v13158_v13 }
 0x379   : > { %12206 = vmatprep.subr.bf16.mxu0 %v13159_v16 }
 0x37c   : > { %12207 = vmatpush3.bf16.msra.mxu0 %v13160_v17 }
 0x37f   : > { %9975 = vmatmul.mubr.bf16.vlgmr.msra.gmra.mrb[104].mxu0 %v2660_v18 }
 0x392   : > { %v11944_v19 = vpop.f32.mrb[80].mxu0 }
 0x393   : > { %v11945_v20 = vpop.f32.mrb[81].mxu0 }
 0x394   : > { %v11946_v21 = vadd.f32 %v11945_v20, %v11944_v19  ;;  %v11947_v22 = vpop.f32.mrb[82].mxu0  ;;  %v11966_v23 = vpop.f32.mrb[80].mxu1 }
 0x395   : > { %v11948_v24 = vpop.f32.mrb[83].mxu0  ;;  %v11967_v25 = vpop.f32.mrb[81].mxu1 }
 0x396   : > { %v9497_v26 = vadd.f32 %v11946_v21, %v9457_v15  ;;  %v11968_v27 = vadd.f32 %v11967_v25, %v11966_v23  ;;  %v11969_v28 = vpop.f32.mrb[82].mxu1 }
 0x397   : > { %v11970_v29 = vpop.f32.mrb[83].mxu1 }
 0x398   : > { %v9537_v31 = vadd.f32 %v11968_v27, %v9497_v26 }
 0x3b2   : > { %v11988_v32 = vpop.f32.mrb[84].mxu0 }
 0x3b3   : > { %v11989_v33 = vpop.f32.mrb[85].mxu0 }
 0x3b4   : > { %v11990_v34 = vadd.f32 %v11989_v33, %v11988_v32  ;;  %v11991_v35 = vpop.f32.mrb[86].mxu0  ;;  %v12010_v30 = vpop.f32.mrb[84].mxu1  ;;  %v284_v32 = vld [vmem:[#allocation2] sm:$0x3] }
 0x3b5   : > { %v11992_v42 = vpop.f32.mrb[87].mxu0  ;;  %v12011_v36 = vpop.f32.mrb[85].mxu1 }
 0x3b6   : > { %v9577_v37 = vadd.f32 %v11990_v34, %v9537_v31  ;;  %v12012_v38 = vadd.f32 %v12011_v36, %v12010_v30  ;;  %v12013_v39 = vpop.f32.mrb[86].mxu1  ;;  %v9999_v30 = vld [vmem:[%s13282_s10] sm:$0xff] (!%p11042_p9)  ;;  %v10000_v42 = vld [vmem:[%s13282_s10 + $0x8] sm:$0xff] (!%p11042_p9)  ;;  %v10001_v36 = vld [vmem:[%s13282_s10 + $0x10] sm:$0xff] (!%p11042_p9) }
 0x3b7   : > { %v12014_v40 = vpop.f32.mrb[87].mxu1  ;;  %v10002_v39 = vld [vmem:[%s13282_s10 + $0x18] sm:$0xff] (!%p11042_p9) }
 0x3b8   : > { %v9617_v41 = vadd.f32 %v12012_v38, %v9577_v37  ;;  %v13203_v37 = vmov (!%p11042_p9), 0.0|0.0   ;;  %v12243_v38 = vpack.c.bf16 (!%p11042_p9), %v10000_v42, %v9999_v30  ;;  %v13205_v40 = vmov (!%p11042_p9), 0.0  }
 0x3b9   : > { %12242 = vmatprep.subr.bf16.mxu0 (!%p11042_p9), %v13203_v37  ;;  %12239 = vmatprep.mubr.msk.f32.mxu0 (!%p11042_p9), %vm13204_vm2, %v13205_v40 }
 0x3ba   : > { %12244 = vmatpush3.bf16.msra.mxu0 (!%p11042_p9), %v12243_v38 }
 0x3bb   : > { %12245 = vmatprep.subr.bf16.mxu0 (!%p11042_p9), %v13203_v37 }
 0x3d2   : > { %v12032_v43 = vpop.f32.mrb[88].mxu0 }
 0x3d3   : > { %v12033_v44 = vpop.f32.mrb[89].mxu0 }
 0x3d4   : > { %v12034_v45 = vadd.f32 %v12033_v44, %v12032_v43  ;;  %v12035_v46 = vpop.f32.mrb[90].mxu0  ;;  %v12054_v47 = vpop.f32.mrb[88].mxu1  ;;  %v10003_v43 = vld [vmem:[%s13282_s10 + $0x20] sm:$0xff] (!%p11042_p9)  ;;  %v10004_v44 = vld [vmem:[%s13282_s10 + $0x28] sm:$0xff] (!%p11042_p9) }
 0x3d5   : > { %v12036_v48 = vpop.f32.mrb[91].mxu0  ;;  %v12055_v49 = vpop.f32.mrb[89].mxu1 }
 0x3d6   : > { %v9657_v50 = vadd.f32 %v12034_v45, %v9617_v41  ;;  %v12056_v52 = vadd.f32 %v12055_v49, %v12054_v47  ;;  %v12057_v53 = vpop.f32.mrb[90].mxu1  ;;  %v12246_v41 = vpack.c.bf16 (!%p11042_p9), %v10002_v39, %v10001_v36  ;;  %v12249_v45 = vpack.c.bf16 (!%p11042_p9), %v10004_v44, %v10003_v43  ;;  %v11043_v47 = vld [vmem:[%s267_s30] ss:$0 sm:$0xff] (!%p11042_p9)  ;;  %v10005_v48 = vld [vmem:[%s13282_s10 + $0x30] sm:$0xff] (!%p11042_p9)  ;;  %v10006_v49 = vld [vmem:[%s13282_s10 + $0x38] sm:$0xff] (!%p11042_p9) }
 0x3d7   : > { %v12058_v54 = vpop.f32.mrb[91].mxu1 }
 0x3d8   : > { %v9697_v55 = vadd.f32 %v12056_v52, %v9657_v50  ;;  %12247 = vmatpush3.bf16.msra.mxu0 (!%p11042_p9), %v12246_v41  ;;  %v12252_v52 = vpack.c.bf16 (!%p11042_p9), %v10006_v49, %v10005_v48 }
 0x3d9   : > { %12248 = vmatprep.subr.bf16.mxu0 (!%p11042_p9), %v13203_v37 }
 0x3dc   : > { %12250 = vmatpush3.bf16.msra.mxu0 (!%p11042_p9), %v12249_v45 }
 0x3dd   : > { %12251 = vmatprep.subr.bf16.mxu0 (!%p11042_p9), %v13203_v37 }
 0x3e0   : > { %12253 = vmatpush3.bf16.msra.mxu0 (!%p11042_p9), %v12252_v52 }
 0x3f2   : > { %v12076_v56 = vpop.f32.mrb[92].mxu0 }
 0x3f3   : > { %v12077_v57 = vpop.f32.mrb[93].mxu0 }
 0x3f4   : > { %v12078_v58 = vadd.f32 %v12077_v57, %v12076_v56  ;;  %v12079_v59 = vpop.f32.mrb[94].mxu0  ;;  %v12098_v60 = vpop.f32.mrb[92].mxu1 }
 0x3f5   : > { %v12080_v51 = vpop.f32.mrb[95].mxu0  ;;  %v12099_v61 = vpop.f32.mrb[93].mxu1 }
 0x3f6   : > { %v9737_v62 = vadd.f32 %v12078_v58, %v9697_v55  ;;  %v12100_v63 = vadd.f32 %v12099_v61, %v12098_v60  ;;  %v12101_v0 = vpop.f32.mrb[94].mxu1 }
 0x3f7   : > { %v12102_v1 = vpop.f32.mrb[95].mxu1 }
 0x3f8   : > { %v9777_v2 = vadd.f32 %v12100_v63, %v9737_v62 }
 0x412   : > { %v12120_v3 = vpop.f32.mrb[96].mxu0 }
 0x413   : > { %v12121_v4 = vpop.f32.mrb[97].mxu0 }
 0x414   : > { %v12122_v5 = vadd.f32 %v12121_v4, %v12120_v3  ;;  %v12123_v6 = vpop.f32.mrb[98].mxu0  ;;  %v12142_v7 = vpop.f32.mrb[96].mxu1 }
 0x415   : > { %v12124_v8 = vpop.f32.mrb[99].mxu0  ;;  %v12143_v9 = vpop.f32.mrb[97].mxu1 }
 0x416   : > { %v9817_v10 = vadd.f32 %v12122_v5, %v9777_v2  ;;  %v12144_v11 = vadd.f32 %v12143_v9, %v12142_v7  ;;  %v12145_v12 = vpop.f32.mrb[98].mxu1 }
 0x417   : > { %v12146_v13 = vpop.f32.mrb[99].mxu1 }
 0x418   : > { %v9857_v14 = vadd.f32 %v12144_v11, %v9817_v10 }
 0x432   : > { %v12164_v15 = vpop.f32.mrb[100].mxu0 }
 0x433   : > { %v12165_v16 = vpop.f32.mrb[101].mxu0 }
 0x434   : > { %v12166_v17 = vadd.f32 %v12165_v16, %v12164_v15  ;;  %v12167_v18 = vpop.f32.mrb[102].mxu0  ;;  %v12186_v19 = vpop.f32.mrb[100].mxu1 }
 0x435   : > { %v12168_v20 = vpop.f32.mrb[103].mxu0  ;;  %v12187_v21 = vpop.f32.mrb[101].mxu1 }
 0x436   : > { %v9897_v22 = vadd.f32 %v12166_v17, %v9857_v14  ;;  %v12188_v23 = vadd.f32 %v12187_v21, %v12186_v19  ;;  %v12189_v24 = vpop.f32.mrb[102].mxu1 }
 0x437   : > { %v12190_v25 = vpop.f32.mrb[103].mxu1 }
 0x438   : > { %v9937_v26 = vadd.f32 %v12188_v23, %v9897_v22 }
 0x452   : > { %v12208_v27 = vpop.f32.mrb[104].mxu0 }
 0x453   : > { %v12209_v28 = vpop.f32.mrb[105].mxu0 }
 0x454   : > { %v12210_v29 = vadd.f32 %v12209_v28, %v12208_v27  ;;  %v12211_v31 = vpop.f32.mrb[106].mxu0  ;;  %9988 = sbr.rel (%p11042_p9) target bundleno = 1339 (0x53b), region = 44 }
 0x455   : > { %v12212_v33 = vpop.f32.mrb[107].mxu0 }
 0x456   : > { %v9977_v34 = vadd.f32 %v12210_v29, %v9937_v26 }
 0x458   : > { %v9982_v35 = vadd.f32 %v9977_v34, %v284_v32 }
 0x45a   : > { %9984 = vst.msk [vmem:[#allocation2] sm:$0x3] %vm9983_vm1, %v9982_v35 }
 0x461   : > { %v9989_v46 = vld [vmem:[#allocation2] sm:$0x3] }
 0x462   : > { %v9997_v50 = vadd.f32 %v11043_v47, %v9989_v46 }
 0x464   : > { %v9998_v53 = vmax.f32 %v9997_v50, 0.0 }
 0x466   : > { %12240 = vmatmul.mubr.msk.f32.vlgmr.msra.gmra.mrb[0].mxu0 %vm10007_vm3, %v9998_v53 }
 0x539   : > { %v10077_v54 = vpop.f32.mrb[0].mxu0 }
 0x53a   : > { %10082 = vst.msk [vmem:[%s13287_s14] sm:$0x3] %vm10081_vm4, %v10077_v54  ;;  %v12241_v55 = vpop.f32.mrb[1].mxu0 }
 0x53b PF: > { %s14_s19 = sadd.s32 1, %s13199_s19   ;;  %s14393_s15 = smov %s13191_s17 }
 0x53c   : > { %p11_p10 = scmp.ge.s32.totalorder %s14_s19, 6   ;;  %s14394_s16 = smov %s13195_s18 }
 0x53d   : > { %s14395_s17 = smov %s14398_s20  ;;  %s14396_s18 = smov %s14402_s21 }
 0x53e   :  { %13 = sbr.rel (!%p11_p10) target bundleno = 3 (0x3), region = 83 }

</bundles_post_ra>
